<compile_context>
chip_gen: v6e
topology: v6e:2x2x1
jax: 0.10.0
libtpu: 0.0.40
codegen_flags: <defaults>
</compile_context>

<pallas_src>
import numpy as np
import jax
import jax.numpy as jnp
from jax.experimental import pallas as pl
from jax.experimental.pallas import tpu as pltpu


# ------------------------------ Pallas kernel --------------------------------

def _baseline_net_kernel(x_ref, w1_ref, b1_ref, w2_ref, b2_ref, g_ref,
                         fb1_ref, fw2_ref, fb2_ref, fw3_ref, fb3_ref,
                         o_ref, f1pad_ref):
    hp, wp, cin = x_ref.shape          # spatially padded input tile (h+2, w+2, cin)
    h, w = hp - 2, wp - 2
    c1 = w1_ref.shape[-1]
    c2 = w2_ref.shape[-1]
    hid = fb1_ref.shape[-1]
    s = h * w

    # ---- conv1: 3x3, stride 1, pad 1 (input arrives spatially pre-padded) ----
    acc1 = jnp.zeros((s, c1), jnp.float32)
    for tap in range(9):
        dh, dw = tap // 3, tap % 3
        xs = x_ref[dh:dh + h, dw:dw + w, :].reshape(s, cin)
        acc1 = acc1 + jnp.dot(xs, w1_ref[tap],
                              preferred_element_type=jnp.float32)
    f1 = jnp.maximum(acc1 + b1_ref[...], 0.0)                     # (s, c1)

    # stash f1 into a zero-padded VMEM scratch so conv2 can read 3x3 windows
    f1pad_ref[...] = jnp.zeros(f1pad_ref.shape, jnp.float32)
    f1pad_ref[1:1 + h, 1:1 + w, :] = f1.reshape(h, w, c1)

    # ---- conv2: 3x3, stride 1, pad 1 ----
    acc2 = jnp.zeros((s, c2), jnp.float32)
    for tap in range(9):
        dh, dw = tap // 3, tap % 3
        fs = f1pad_ref[dh:dh + h, dw:dw + w, :].reshape(s, c1)
        acc2 = acc2 + jnp.dot(fs, w2_ref[tap],
                              preferred_element_type=jnp.float32)
    f2 = jnp.maximum(acc2 + b2_ref[...], 0.0)                     # (s, c2)

    # ---- AdaptiveAvgPool2d((7,7)) + NCHW flatten + fc1, folded into g_ref ----
    #   h1[j] = sum_{s,c} f2[s,c] * G[c,s,j]
    part = jnp.zeros((s, hid), jnp.float32)
    for c in range(c2):
        part = part + f2[:, c:c + 1] * g_ref[c]                   # (s, hid)
    h1 = jnp.maximum(jnp.sum(part, axis=0, keepdims=True) + fb1_ref[...], 0.0)

    # ---- fc2 -> fc3 -> softmax over the (lane-padded) class dim ----
    h2 = jnp.maximum(
        jnp.dot(h1, fw2_ref[...], preferred_element_type=jnp.float32)
        + fb2_ref[...], 0.0)
    logits = (jnp.dot(h2, fw3_ref[...], preferred_element_type=jnp.float32)
              + fb3_ref[...])                                     # padded lanes = -1e30
    m = jnp.max(logits, axis=-1, keepdims=True)
    e = jnp.exp(logits - m)
    o_ref[...] = e * pl.reciprocal(jnp.sum(e, axis=-1, keepdims=True), approx=True)


# ------------------------------- JAX wrapper ----------------------------------

def _pool_matrix(h, w, out=7):
    """Matrix form of nn.AdaptiveAvgPool2d((7,7)) — PyTorch bin semantics."""
    p = np.zeros((out * out, h * w), dtype=np.float32)

    def bins(size):
        return [(int(np.floor(i * size / out)), int(np.ceil((i + 1) * size / out)))
                for i in range(out)]

    for i, (hs, he) in enumerate(bins(h)):
        for j, (ws, we) in enumerate(bins(w)):
            cnt = float((he - hs) * (we - ws))
            for hh in range(hs, he):
                for ww in range(ws, we):
                    p[i * out + j, hh * w + ww] = 1.0 / cnt
    return jnp.asarray(p)


@jax.jit
def baseline_net_forward(params, x_nchw):
    """BaselineNet.forward, fused into one Pallas kernel (grid over batch)."""
    n, cin, h, w = x_nchw.shape
    c1 = params["conv1_b"].shape[0]
    c2 = params["conv2_b"].shape[0]
    hid = params["fc1_b"].shape[0]
    nc = params["fc3_b"].shape[0]
    nc_pad = ((nc + 127) // 128) * 128            # lane-dense final output

    x = jnp.transpose(x_nchw, (0, 2, 3, 1))                        # NCHW -> NHWC
    xpad = jnp.pad(x, ((0, 0), (1, 1), (1, 1), (0, 0)))            # 3x3 halo

    w1 = params["conv1_w"].reshape(9, cin, c1)
    b1 = params["conv1_b"].reshape(1, c1)
    w2 = params["conv2_w"].reshape(9, c1, c2)
    b2 = params["conv2_b"].reshape(1, c2)

    # Fold AdaptiveAvgPool2d((7,7)) + PyTorch flatten (c*49 + p order) into fc1:
    #   G[c, s, j] = sum_p pool[p, s] * fc1_w[c*49 + p, j]
    pool = _pool_matrix(h, w)                                      # (49, h*w)
    g = jnp.einsum("ps,cpj->csj", pool,
                   params["fc1_w"].reshape(c2, 49, hid))           # (c2, h*w, hid)

    fb1 = params["fc1_b"].reshape(1, hid)
    fw2 = params["fc2_w"]
    fb2 = params["fc2_b"].reshape(1, hid)
    # pad classes to 128 lanes; padded logits get -1e30 so softmax ignores them
    fw3 = jnp.zeros((hid, nc_pad), jnp.float32).at[:, :nc].set(params["fc3_w"])
    fb3 = jnp.full((1, nc_pad), -1e30, jnp.float32).at[0, :nc].set(params["fc3_b"])

    out = pl.pallas_call(
        _baseline_net_kernel,
        out_shape=jax.ShapeDtypeStruct((n, 1, nc_pad), jnp.float32),
        grid=(n,),
        in_specs=[
            pl.BlockSpec((None, h + 2, w + 2, cin), lambda b: (b, 0, 0, 0)),
            pl.BlockSpec((9, cin, c1), lambda b: (0, 0, 0)),
            pl.BlockSpec((1, c1), lambda b: (0, 0)),
            pl.BlockSpec((9, c1, c2), lambda b: (0, 0, 0)),
            pl.BlockSpec((1, c2), lambda b: (0, 0)),
            pl.BlockSpec((c2, h * w, hid), lambda b: (0, 0, 0)),
            pl.BlockSpec((1, hid), lambda b: (0, 0)),
            pl.BlockSpec((hid, hid), lambda b: (0, 0)),
            pl.BlockSpec((1, hid), lambda b: (0, 0)),
            pl.BlockSpec((hid, nc_pad), lambda b: (0, 0)),
            pl.BlockSpec((1, nc_pad), lambda b: (0, 0)),
        ],
        out_specs=pl.BlockSpec((None, 1, nc_pad), lambda b: (b, 0, 0)),
        scratch_shapes=[pltpu.VMEM((h + 2, w + 2, c1), jnp.float32)],
        compiler_params=pltpu.CompilerParams(
            dimension_semantics=("parallel",)),
    )(xpad, w1, b1, w2, b2, g, fb1, fw2, fb2, fw3, fb3)

    return out.reshape(n, nc_pad)[:, :nc]


# --------------------------- pure-JAX reference -------------------------------

def _im2col_3x3(x_nhwc):
    n, h, w, c = x_nhwc.shape
    xp = jnp.pad(x_nhwc, ((0, 0), (1, 1), (1, 1), (0, 0)))
    cols = jnp.concatenate(
        [xp[:, dh:dh + h, dw:dw + w, :] for dh in range(3) for dw in range(3)],
        axis=-1)
    return cols.reshape(n * h * w, 9 * c)


def baseline_net_reference(params, x_nchw):
    prec = jax.lax.Precision.HIGHEST
    n, cin, h, w = x_nchw.shape
    x = jnp.transpose(x_nchw, (0, 2, 3, 1))
    c1 = params["conv1_w"].shape[-1]
    c2 = params["conv2_w"].shape[-1]
    f1 = jnp.maximum(
        jnp.dot(_im2col_3x3(x), params["conv1_w"].reshape(9 * cin, c1),
                precision=prec) + params["conv1_b"], 0.0).reshape(n, h, w, c1)
    f2 = jnp.maximum(
        jnp.dot(_im2col_3x3(f1), params["conv2_w"].reshape(9 * c1, c2),
                precision=prec) + params["conv2_b"], 0.0).reshape(n, h, w, c2)
    pool = _pool_matrix(h, w)
    pooled = jnp.einsum("ps,nsc->npc", pool, f2.reshape(n, h * w, c2),
                        precision=prec)
    flat = jnp.transpose(pooled, (0, 2, 1)).reshape(n, c2 * 49)    # NCHW flatten
    h1 = jnp.maximum(jnp.dot(flat, params["fc1_w"], precision=prec)
                     + params["fc1_b"], 0.0)
    h2 = jnp.maximum(jnp.dot(h1, params["fc2_w"], precision=prec)
                     + params["fc2_b"], 0.0)
    logits = jnp.dot(h2, params["fc3_w"], precision=prec) + params["fc3_b"]
    return jax.nn.softmax(logits, axis=1)      # nn.Softmax() on 2-D -> dim=1


# --------------------------------- params -------------------------------------

def init_params(key, in_ch=4, c1=8, c2=16, hidden=32, num_classes=10):
    ks = jax.random.split(key, 10)

    def dense(k, fan_in, fan_out):
        return jax.random.normal(k, (fan_in, fan_out), jnp.float32) / np.sqrt(fan_in)

    return {
        "conv1_w": jax.random.normal(ks[0], (3, 3, in_ch, c1), jnp.float32) / np.sqrt(9 * in_ch),
        "conv1_b": 0.1 * jax.random.normal(ks[1], (c1,), jnp.float32),
        "conv2_w": jax.random.normal(ks[2], (3, 3, c1, c2), jnp.float32) / np.sqrt(9 * c1),
        "conv2_b": 0.1 * jax.random.normal(ks[3], (c2,), jnp.float32),
        "fc1_w": dense(ks[4], c2 * 49, hidden),
        "fc1_b": 0.1 * jax.random.normal(ks[5], (hidden,), jnp.float32),
        "fc2_w": dense(ks[6], hidden, hidden),
        "fc2_b": 0.1 * jax.random.normal(ks[7], (hidden,), jnp.float32),
        "fc3_w": dense(ks[8], hidden, num_classes),
        "fc3_b": 0.1 * jax.random.normal(ks[9], (num_classes,), jnp.float32),
    }


if __name__ == "__main__":
    key = jax.random.PRNGKey(0)
    k_params, k_x = jax.random.split(key)

    batch, in_ch, spatial, num_classes = 2, 4, 16, 10
    params = init_params(k_params, in_ch=in_ch, c1=8, c2=16, hidden=32,
                         num_classes=num_classes)
    x = jax.random.normal(k_x, (batch, in_ch, spatial, spatial), jnp.float32)

    probs = jax.block_until_ready(baseline_net_forward(params, x))

    assert probs.shape == (batch, num_classes)
    assert bool(jnp.all(jnp.isfinite(probs)))
    # approx reciprocal in the softmax -> allow a small slack on the row sums
    assert bool(jnp.allclose(jnp.sum(probs, axis=-1), 1.0, atol=5e-3))

    ref = baseline_net_reference(params, x)
    assert bool(jnp.allclose(probs, ref, atol=2e-2, rtol=2e-2))

    print("KERNEL_OK")
</pallas_src>

<mosaic_0001>
module attributes {stable_mosaic.version = 11 : i64} {
  func.func @_baseline_net_kernel(%arg0: i32, %arg1: memref<1x18x18x4xf32, #tpu.memory_space<vmem>>, %arg2: memref<9x4x8xf32, #tpu.memory_space<vmem>>, %arg3: memref<1x8xf32, #tpu.memory_space<vmem>>, %arg4: memref<9x8x16xf32, #tpu.memory_space<vmem>>, %arg5: memref<1x16xf32, #tpu.memory_space<vmem>>, %arg6: memref<16x256x32xf32, #tpu.memory_space<vmem>>, %arg7: memref<1x32xf32, #tpu.memory_space<vmem>>, %arg8: memref<32x32xf32, #tpu.memory_space<vmem>>, %arg9: memref<1x32xf32, #tpu.memory_space<vmem>>, %arg10: memref<32x128xf32, #tpu.memory_space<vmem>>, %arg11: memref<1x128xf32, #tpu.memory_space<vmem>>, %arg12: memref<1x1x128xf32, #tpu.memory_space<vmem>>, %arg13: memref<18x18x8xf32, #tpu.memory_space<vmem>>) attributes {dimension_semantics = [#tpu.dimension_semantics<parallel>], iteration_bounds = array<i64: 2>, scalar_prefetch = 0 : i64, scratch_operands = 1 : i64, tpu.core_type = #tpu.core_type<tc>, window_params = [{transform_indices = @transform_0, window_bounds = array<i64: 1, 18, 18, 4>}, {pipeline_mode = #tpu.pipeline_mode<synchronous>, transform_indices = @transform_1, window_bounds = array<i64: 9, 4, 8>}, {pipeline_mode = #tpu.pipeline_mode<synchronous>, transform_indices = @transform_2, window_bounds = array<i64: 1, 8>}, {pipeline_mode = #tpu.pipeline_mode<synchronous>, transform_indices = @transform_3, window_bounds = array<i64: 9, 8, 16>}, {pipeline_mode = #tpu.pipeline_mode<synchronous>, transform_indices = @transform_4, window_bounds = array<i64: 1, 16>}, {pipeline_mode = #tpu.pipeline_mode<synchronous>, transform_indices = @transform_5, window_bounds = array<i64: 16, 256, 32>}, {pipeline_mode = #tpu.pipeline_mode<synchronous>, transform_indices = @transform_6, window_bounds = array<i64: 1, 32>}, {pipeline_mode = #tpu.pipeline_mode<synchronous>, transform_indices = @transform_7, window_bounds = array<i64: 32, 32>}, {pipeline_mode = #tpu.pipeline_mode<synchronous>, transform_indices = @transform_8, window_bounds = array<i64: 1, 32>}, {pipeline_mode = #tpu.pipeline_mode<synchronous>, transform_indices = @transform_9, window_bounds = array<i64: 32, 128>}, {pipeline_mode = #tpu.pipeline_mode<synchronous>, transform_indices = @transform_10, window_bounds = array<i64: 1, 128>}, {transform_indices = @transform_11, window_bounds = array<i64: 1, 1, 128>}]} {
    %cst = arith.constant 0.000000e+00 : f32
    %0 = vector.broadcast %cst : f32 to vector<256x8xf32>
    %c0 = arith.constant 0 : index
    %c0_0 = arith.constant 0 : index
    %c0_1 = arith.constant 0 : index
    %c0_2 = arith.constant 0 : index
    %1 = vector.load %arg1[%c0, %c0_0, %c0_1, %c0_2] : memref<1x18x18x4xf32, #tpu.memory_space<vmem>>, vector<1x16x16x4xf32>
    %2 = vector.shape_cast %1 : vector<1x16x16x4xf32> to vector<16x16x4xf32>
    %3 = vector.shape_cast %2 : vector<16x16x4xf32> to vector<256x4xf32>
    %c0_3 = arith.constant 0 : index
    %c0_4 = arith.constant 0 : index
    %c0_5 = arith.constant 0 : index
    %4 = vector.load %arg2[%c0_3, %c0_4, %c0_5] : memref<9x4x8xf32, #tpu.memory_space<vmem>>, vector<1x4x8xf32>
    %5 = vector.shape_cast %4 : vector<1x4x8xf32> to vector<4x8xf32>
    %cst_6 = arith.constant dense<0.000000e+00> : vector<256x8xf32>
    %6 = tpu.matmul %3, %5, %cst_6 {dimension_numbers = #tpu.dot_dimension_numbers<[1], [0], [0], [1], [0, 0, 1, 1], [], []>} : vector<256x4xf32>, vector<4x8xf32>, vector<256x8xf32> -> vector<256x8xf32>
    %7 = arith.addf %0, %6 : vector<256x8xf32>
    %c0_7 = arith.constant 0 : index
    %c0_8 = arith.constant 0 : index
    %c1 = arith.constant 1 : index
    %c0_9 = arith.constant 0 : index
    %8 = vector.load %arg1[%c0_7, %c0_8, %c1, %c0_9] : memref<1x18x18x4xf32, #tpu.memory_space<vmem>>, vector<1x16x16x4xf32>
    %9 = vector.shape_cast %8 : vector<1x16x16x4xf32> to vector<16x16x4xf32>
    %10 = vector.shape_cast %9 : vector<16x16x4xf32> to vector<256x4xf32>
    %c1_10 = arith.constant 1 : index
    %c0_11 = arith.constant 0 : index
    %c0_12 = arith.constant 0 : index
    %11 = vector.load %arg2[%c1_10, %c0_11, %c0_12] : memref<9x4x8xf32, #tpu.memory_space<vmem>>, vector<1x4x8xf32>
    %12 = vector.shape_cast %11 : vector<1x4x8xf32> to vector<4x8xf32>
    %cst_13 = arith.constant dense<0.000000e+00> : vector<256x8xf32>
    %13 = tpu.matmul %10, %12, %cst_13 {dimension_numbers = #tpu.dot_dimension_numbers<[1], [0], [0], [1], [0, 0, 1, 1], [], []>} : vector<256x4xf32>, vector<4x8xf32>, vector<256x8xf32> -> vector<256x8xf32>
    %14 = arith.addf %7, %13 : vector<256x8xf32>
    %c0_14 = arith.constant 0 : index
    %c0_15 = arith.constant 0 : index
    %c2 = arith.constant 2 : index
    %c0_16 = arith.constant 0 : index
    %15 = vector.load %arg1[%c0_14, %c0_15, %c2, %c0_16] : memref<1x18x18x4xf32, #tpu.memory_space<vmem>>, vector<1x16x16x4xf32>
    %16 = vector.shape_cast %15 : vector<1x16x16x4xf32> to vector<16x16x4xf32>
    %17 = vector.shape_cast %16 : vector<16x16x4xf32> to vector<256x4xf32>
    %c2_17 = arith.constant 2 : index
    %c0_18 = arith.constant 0 : index
    %c0_19 = arith.constant 0 : index
    %18 = vector.load %arg2[%c2_17, %c0_18, %c0_19] : memref<9x4x8xf32, #tpu.memory_space<vmem>>, vector<1x4x8xf32>
    %19 = vector.shape_cast %18 : vector<1x4x8xf32> to vector<4x8xf32>
    %cst_20 = arith.constant dense<0.000000e+00> : vector<256x8xf32>
    %20 = tpu.matmul %17, %19, %cst_20 {dimension_numbers = #tpu.dot_dimension_numbers<[1], [0], [0], [1], [0, 0, 1, 1], [], []>} : vector<256x4xf32>, vector<4x8xf32>, vector<256x8xf32> -> vector<256x8xf32>
    %21 = arith.addf %14, %20 : vector<256x8xf32>
    %c0_21 = arith.constant 0 : index
    %c1_22 = arith.constant 1 : index
    %c0_23 = arith.constant 0 : index
    %c0_24 = arith.constant 0 : index
    %22 = vector.load %arg1[%c0_21, %c1_22, %c0_23, %c0_24] : memref<1x18x18x4xf32, #tpu.memory_space<vmem>>, vector<1x16x16x4xf32>
    %23 = vector.shape_cast %22 : vector<1x16x16x4xf32> to vector<16x16x4xf32>
    %24 = vector.shape_cast %23 : vector<16x16x4xf32> to vector<256x4xf32>
    %c3 = arith.constant 3 : index
    %c0_25 = arith.constant 0 : index
    %c0_26 = arith.constant 0 : index
    %25 = vector.load %arg2[%c3, %c0_25, %c0_26] : memref<9x4x8xf32, #tpu.memory_space<vmem>>, vector<1x4x8xf32>
    %26 = vector.shape_cast %25 : vector<1x4x8xf32> to vector<4x8xf32>
    %cst_27 = arith.constant dense<0.000000e+00> : vector<256x8xf32>
    %27 = tpu.matmul %24, %26, %cst_27 {dimension_numbers = #tpu.dot_dimension_numbers<[1], [0], [0], [1], [0, 0, 1, 1], [], []>} : vector<256x4xf32>, vector<4x8xf32>, vector<256x8xf32> -> vector<256x8xf32>
    %28 = arith.addf %21, %27 : vector<256x8xf32>
    %c0_28 = arith.constant 0 : index
    %c1_29 = arith.constant 1 : index
    %c1_30 = arith.constant 1 : index
    %c0_31 = arith.constant 0 : index
    %29 = vector.load %arg1[%c0_28, %c1_29, %c1_30, %c0_31] : memref<1x18x18x4xf32, #tpu.memory_space<vmem>>, vector<1x16x16x4xf32>
    %30 = vector.shape_cast %29 : vector<1x16x16x4xf32> to vector<16x16x4xf32>
    %31 = vector.shape_cast %30 : vector<16x16x4xf32> to vector<256x4xf32>
    %c4 = arith.constant 4 : index
    %c0_32 = arith.constant 0 : index
    %c0_33 = arith.constant 0 : index
    %32 = vector.load %arg2[%c4, %c0_32, %c0_33] : memref<9x4x8xf32, #tpu.memory_space<vmem>>, vector<1x4x8xf32>
    %33 = vector.shape_cast %32 : vector<1x4x8xf32> to vector<4x8xf32>
    %cst_34 = arith.constant dense<0.000000e+00> : vector<256x8xf32>
    %34 = tpu.matmul %31, %33, %cst_34 {dimension_numbers = #tpu.dot_dimension_numbers<[1], [0], [0], [1], [0, 0, 1, 1], [], []>} : vector<256x4xf32>, vector<4x8xf32>, vector<256x8xf32> -> vector<256x8xf32>
    %35 = arith.addf %28, %34 : vector<256x8xf32>
    %c0_35 = arith.constant 0 : index
    %c1_36 = arith.constant 1 : index
    %c2_37 = arith.constant 2 : index
    %c0_38 = arith.constant 0 : index
    %36 = vector.load %arg1[%c0_35, %c1_36, %c2_37, %c0_38] : memref<1x18x18x4xf32, #tpu.memory_space<vmem>>, vector<1x16x16x4xf32>
    %37 = vector.shape_cast %36 : vector<1x16x16x4xf32> to vector<16x16x4xf32>
    %38 = vector.shape_cast %37 : vector<16x16x4xf32> to vector<256x4xf32>
    %c5 = arith.constant 5 : index
    %c0_39 = arith.constant 0 : index
    %c0_40 = arith.constant 0 : index
    %39 = vector.load %arg2[%c5, %c0_39, %c0_40] : memref<9x4x8xf32, #tpu.memory_space<vmem>>, vector<1x4x8xf32>
    %40 = vector.shape_cast %39 : vector<1x4x8xf32> to vector<4x8xf32>
    %cst_41 = arith.constant dense<0.000000e+00> : vector<256x8xf32>
    %41 = tpu.matmul %38, %40, %cst_41 {dimension_numbers = #tpu.dot_dimension_numbers<[1], [0], [0], [1], [0, 0, 1, 1], [], []>} : vector<256x4xf32>, vector<4x8xf32>, vector<256x8xf32> -> vector<256x8xf32>
    %42 = arith.addf %35, %41 : vector<256x8xf32>
    %c0_42 = arith.constant 0 : index
    %c2_43 = arith.constant 2 : index
    %c0_44 = arith.constant 0 : index
    %c0_45 = arith.constant 0 : index
    %43 = vector.load %arg1[%c0_42, %c2_43, %c0_44, %c0_45] : memref<1x18x18x4xf32, #tpu.memory_space<vmem>>, vector<1x16x16x4xf32>
    %44 = vector.shape_cast %43 : vector<1x16x16x4xf32> to vector<16x16x4xf32>
    %45 = vector.shape_cast %44 : vector<16x16x4xf32> to vector<256x4xf32>
    %c6 = arith.constant 6 : index
    %c0_46 = arith.constant 0 : index
    %c0_47 = arith.constant 0 : index
    %46 = vector.load %arg2[%c6, %c0_46, %c0_47] : memref<9x4x8xf32, #tpu.memory_space<vmem>>, vector<1x4x8xf32>
    %47 = vector.shape_cast %46 : vector<1x4x8xf32> to vector<4x8xf32>
    %cst_48 = arith.constant dense<0.000000e+00> : vector<256x8xf32>
    %48 = tpu.matmul %45, %47, %cst_48 {dimension_numbers = #tpu.dot_dimension_numbers<[1], [0], [0], [1], [0, 0, 1, 1], [], []>} : vector<256x4xf32>, vector<4x8xf32>, vector<256x8xf32> -> vector<256x8xf32>
    %49 = arith.addf %42, %48 : vector<256x8xf32>
    %c0_49 = arith.constant 0 : index
    %c2_50 = arith.constant 2 : index
    %c1_51 = arith.constant 1 : index
    %c0_52 = arith.constant 0 : index
    %50 = vector.load %arg1[%c0_49, %c2_50, %c1_51, %c0_52] : memref<1x18x18x4xf32, #tpu.memory_space<vmem>>, vector<1x16x16x4xf32>
    %51 = vector.shape_cast %50 : vector<1x16x16x4xf32> to vector<16x16x4xf32>
    %52 = vector.shape_cast %51 : vector<16x16x4xf32> to vector<256x4xf32>
    %c7 = arith.constant 7 : index
    %c0_53 = arith.constant 0 : index
    %c0_54 = arith.constant 0 : index
    %53 = vector.load %arg2[%c7, %c0_53, %c0_54] : memref<9x4x8xf32, #tpu.memory_space<vmem>>, vector<1x4x8xf32>
    %54 = vector.shape_cast %53 : vector<1x4x8xf32> to vector<4x8xf32>
    %cst_55 = arith.constant dense<0.000000e+00> : vector<256x8xf32>
    %55 = tpu.matmul %52, %54, %cst_55 {dimension_numbers = #tpu.dot_dimension_numbers<[1], [0], [0], [1], [0, 0, 1, 1], [], []>} : vector<256x4xf32>, vector<4x8xf32>, vector<256x8xf32> -> vector<256x8xf32>
    %56 = arith.addf %49, %55 : vector<256x8xf32>
    %c0_56 = arith.constant 0 : index
    %c2_57 = arith.constant 2 : index
    %c2_58 = arith.constant 2 : index
    %c0_59 = arith.constant 0 : index
    %57 = vector.load %arg1[%c0_56, %c2_57, %c2_58, %c0_59] : memref<1x18x18x4xf32, #tpu.memory_space<vmem>>, vector<1x16x16x4xf32>
    %58 = vector.shape_cast %57 : vector<1x16x16x4xf32> to vector<16x16x4xf32>
    %59 = vector.shape_cast %58 : vector<16x16x4xf32> to vector<256x4xf32>
    %c8 = arith.constant 8 : index
    %c0_60 = arith.constant 0 : index
    %c0_61 = arith.constant 0 : index
    %60 = vector.load %arg2[%c8, %c0_60, %c0_61] : memref<9x4x8xf32, #tpu.memory_space<vmem>>, vector<1x4x8xf32>
    %61 = vector.shape_cast %60 : vector<1x4x8xf32> to vector<4x8xf32>
    %cst_62 = arith.constant dense<0.000000e+00> : vector<256x8xf32>
    %62 = tpu.matmul %59, %61, %cst_62 {dimension_numbers = #tpu.dot_dimension_numbers<[1], [0], [0], [1], [0, 0, 1, 1], [], []>} : vector<256x4xf32>, vector<4x8xf32>, vector<256x8xf32> -> vector<256x8xf32>
    %63 = arith.addf %56, %62 : vector<256x8xf32>
    %c0_63 = arith.constant 0 : index
    %c0_64 = arith.constant 0 : index
    %64 = vector.load %arg3[%c0_63, %c0_64] : memref<1x8xf32, #tpu.memory_space<vmem>>, vector<1x8xf32>
    %65 = vector.broadcast %64 : vector<1x8xf32> to vector<256x8xf32>
    %66 = arith.addf %63, %65 : vector<256x8xf32>
    %cst_65 = arith.constant 0.000000e+00 : f32
    %67 = vector.broadcast %cst_65 : f32 to vector<256x8xf32>
    %68 = arith.maximumf %66, %67 : vector<256x8xf32>
    %cst_66 = arith.constant 0.000000e+00 : f32
    %69 = vector.broadcast %cst_66 : f32 to vector<18x18x8xf32>
    %c0_67 = arith.constant 0 : index
    %c0_68 = arith.constant 0 : index
    %c0_69 = arith.constant 0 : index
    %70 = vector.load %arg13[%c0_67, %c0_68, %c0_69] : memref<18x18x8xf32, #tpu.memory_space<vmem>>, vector<18x18x8xf32>
    tpu.vector_store %arg13[%c0_67, %c0_68, %c0_69], %69 {strides = array<i32>} : memref<18x18x8xf32, #tpu.memory_space<vmem>>, vector<18x18x8xf32>,
    %71 = vector.shape_cast %68 : vector<256x8xf32> to vector<16x16x8xf32>
    %c1_70 = arith.constant 1 : index
    %c1_71 = arith.constant 1 : index
    %c0_72 = arith.constant 0 : index
    %72 = vector.load %arg13[%c1_70, %c1_71, %c0_72] : memref<18x18x8xf32, #tpu.memory_space<vmem>>, vector<16x16x8xf32>
    tpu.vector_store %arg13[%c1_70, %c1_71, %c0_72], %71 {strides = array<i32>} : memref<18x18x8xf32, #tpu.memory_space<vmem>>, vector<16x16x8xf32>,
    %cst_73 = arith.constant 0.000000e+00 : f32
    %73 = vector.broadcast %cst_73 : f32 to vector<256x16xf32>
    %c0_74 = arith.constant 0 : index
    %c0_75 = arith.constant 0 : index
    %c0_76 = arith.constant 0 : index
    %74 = vector.load %arg13[%c0_74, %c0_75, %c0_76] : memref<18x18x8xf32, #tpu.memory_space<vmem>>, vector<16x16x8xf32>
    %75 = vector.shape_cast %74 : vector<16x16x8xf32> to vector<256x8xf32>
    %c0_77 = arith.constant 0 : index
    %c0_78 = arith.constant 0 : index
    %c0_79 = arith.constant 0 : index
    %76 = vector.load %arg4[%c0_77, %c0_78, %c0_79] : memref<9x8x16xf32, #tpu.memory_space<vmem>>, vector<1x8x16xf32>
    %77 = vector.shape_cast %76 : vector<1x8x16xf32> to vector<8x16xf32>
    %cst_80 = arith.constant dense<0.000000e+00> : vector<256x16xf32>
    %78 = tpu.matmul %75, %77, %cst_80 {dimension_numbers = #tpu.dot_dimension_numbers<[1], [0], [0], [1], [0, 0, 1, 1], [], []>} : vector<256x8xf32>, vector<8x16xf32>, vector<256x16xf32> -> vector<256x16xf32>
    %79 = arith.addf %73, %78 : vector<256x16xf32>
    %c0_81 = arith.constant 0 : index
    %c1_82 = arith.constant 1 : index
    %c0_83 = arith.constant 0 : index
    %80 = vector.load %arg13[%c0_81, %c1_82, %c0_83] : memref<18x18x8xf32, #tpu.memory_space<vmem>>, vector<16x16x8xf32>
    %81 = vector.shape_cast %80 : vector<16x16x8xf32> to vector<256x8xf32>
    %c1_84 = arith.constant 1 : index
    %c0_85 = arith.constant 0 : index
    %c0_86 = arith.constant 0 : index
    %82 = vector.load %arg4[%c1_84, %c0_85, %c0_86] : memref<9x8x16xf32, #tpu.memory_space<vmem>>, vector<1x8x16xf32>
    %83 = vector.shape_cast %82 : vector<1x8x16xf32> to vector<8x16xf32>
    %cst_87 = arith.constant dense<0.000000e+00> : vector<256x16xf32>
    %84 = tpu.matmul %81, %83, %cst_87 {dimension_numbers = #tpu.dot_dimension_numbers<[1], [0], [0], [1], [0, 0, 1, 1], [], []>} : vector<256x8xf32>, vector<8x16xf32>, vector<256x16xf32> -> vector<256x16xf32>
    %85 = arith.addf %79, %84 : vector<256x16xf32>
    %c0_88 = arith.constant 0 : index
    %c2_89 = arith.constant 2 : index
    %c0_90 = arith.constant 0 : index
    %86 = vector.load %arg13[%c0_88, %c2_89, %c0_90] : memref<18x18x8xf32, #tpu.memory_space<vmem>>, vector<16x16x8xf32>
    %87 = vector.shape_cast %86 : vector<16x16x8xf32> to vector<256x8xf32>
    %c2_91 = arith.constant 2 : index
    %c0_92 = arith.constant 0 : index
    %c0_93 = arith.constant 0 : index
    %88 = vector.load %arg4[%c2_91, %c0_92, %c0_93] : memref<9x8x16xf32, #tpu.memory_space<vmem>>, vector<1x8x16xf32>
    %89 = vector.shape_cast %88 : vector<1x8x16xf32> to vector<8x16xf32>
    %cst_94 = arith.constant dense<0.000000e+00> : vector<256x16xf32>
    %90 = tpu.matmul %87, %89, %cst_94 {dimension_numbers = #tpu.dot_dimension_numbers<[1], [0], [0], [1], [0, 0, 1, 1], [], []>} : vector<256x8xf32>, vector<8x16xf32>, vector<256x16xf32> -> vector<256x16xf32>
    %91 = arith.addf %85, %90 : vector<256x16xf32>
    %c1_95 = arith.constant 1 : index
    %c0_96 = arith.constant 0 : index
    %c0_97 = arith.constant 0 : index
    %92 = vector.load %arg13[%c1_95, %c0_96, %c0_97] : memref<18x18x8xf32, #tpu.memory_space<vmem>>, vector<16x16x8xf32>
    %93 = vector.shape_cast %92 : vector<16x16x8xf32> to vector<256x8xf32>
    %c3_98 = arith.constant 3 : index
    %c0_99 = arith.constant 0 : index
    %c0_100 = arith.constant 0 : index
    %94 = vector.load %arg4[%c3_98, %c0_99, %c0_100] : memref<9x8x16xf32, #tpu.memory_space<vmem>>, vector<1x8x16xf32>
    %95 = vector.shape_cast %94 : vector<1x8x16xf32> to vector<8x16xf32>
    %cst_101 = arith.constant dense<0.000000e+00> : vector<256x16xf32>
    %96 = tpu.matmul %93, %95, %cst_101 {dimension_numbers = #tpu.dot_dimension_numbers<[1], [0], [0], [1], [0, 0, 1, 1], [], []>} : vector<256x8xf32>, vector<8x16xf32>, vector<256x16xf32> -> vector<256x16xf32>
    %97 = arith.addf %91, %96 : vector<256x16xf32>
    %c1_102 = arith.constant 1 : index
    %c1_103 = arith.constant 1 : index
    %c0_104 = arith.constant 0 : index
    %98 = vector.load %arg13[%c1_102, %c1_103, %c0_104] : memref<18x18x8xf32, #tpu.memory_space<vmem>>, vector<16x16x8xf32>
    %99 = vector.shape_cast %98 : vector<16x16x8xf32> to vector<256x8xf32>
    %c4_105 = arith.constant 4 : index
    %c0_106 = arith.constant 0 : index
    %c0_107 = arith.constant 0 : index
    %100 = vector.load %arg4[%c4_105, %c0_106, %c0_107] : memref<9x8x16xf32, #tpu.memory_space<vmem>>, vector<1x8x16xf32>
    %101 = vector.shape_cast %100 : vector<1x8x16xf32> to vector<8x16xf32>
    %cst_108 = arith.constant dense<0.000000e+00> : vector<256x16xf32>
    %102 = tpu.matmul %99, %101, %cst_108 {dimension_numbers = #tpu.dot_dimension_numbers<[1], [0], [0], [1], [0, 0, 1, 1], [], []>} : vector<256x8xf32>, vector<8x16xf32>, vector<256x16xf32> -> vector<256x16xf32>
    %103 = arith.addf %97, %102 : vector<256x16xf32>
    %c1_109 = arith.constant 1 : index
    %c2_110 = arith.constant 2 : index
    %c0_111 = arith.constant 0 : index
    %104 = vector.load %arg13[%c1_109, %c2_110, %c0_111] : memref<18x18x8xf32, #tpu.memory_space<vmem>>, vector<16x16x8xf32>
    %105 = vector.shape_cast %104 : vector<16x16x8xf32> to vector<256x8xf32>
    %c5_112 = arith.constant 5 : index
    %c0_113 = arith.constant 0 : index
    %c0_114 = arith.constant 0 : index
    %106 = vector.load %arg4[%c5_112, %c0_113, %c0_114] : memref<9x8x16xf32, #tpu.memory_space<vmem>>, vector<1x8x16xf32>
    %107 = vector.shape_cast %106 : vector<1x8x16xf32> to vector<8x16xf32>
    %cst_115 = arith.constant dense<0.000000e+00> : vector<256x16xf32>
    %108 = tpu.matmul %105, %107, %cst_115 {dimension_numbers = #tpu.dot_dimension_numbers<[1], [0], [0], [1], [0, 0, 1, 1], [], []>} : vector<256x8xf32>, vector<8x16xf32>, vector<256x16xf32> -> vector<256x16xf32>
    %109 = arith.addf %103, %108 : vector<256x16xf32>
    %c2_116 = arith.constant 2 : index
    %c0_117 = arith.constant 0 : index
    %c0_118 = arith.constant 0 : index
    %110 = vector.load %arg13[%c2_116, %c0_117, %c0_118] : memref<18x18x8xf32, #tpu.memory_space<vmem>>, vector<16x16x8xf32>
    %111 = vector.shape_cast %110 : vector<16x16x8xf32> to vector<256x8xf32>
    %c6_119 = arith.constant 6 : index
    %c0_120 = arith.constant 0 : index
    %c0_121 = arith.constant 0 : index
    %112 = vector.load %arg4[%c6_119, %c0_120, %c0_121] : memref<9x8x16xf32, #tpu.memory_space<vmem>>, vector<1x8x16xf32>
    %113 = vector.shape_cast %112 : vector<1x8x16xf32> to vector<8x16xf32>
    %cst_122 = arith.constant dense<0.000000e+00> : vector<256x16xf32>
    %114 = tpu.matmul %111, %113, %cst_122 {dimension_numbers = #tpu.dot_dimension_numbers<[1], [0], [0], [1], [0, 0, 1, 1], [], []>} : vector<256x8xf32>, vector<8x16xf32>, vector<256x16xf32> -> vector<256x16xf32>
    %115 = arith.addf %109, %114 : vector<256x16xf32>
    %c2_123 = arith.constant 2 : index
    %c1_124 = arith.constant 1 : index
    %c0_125 = arith.constant 0 : index
    %116 = vector.load %arg13[%c2_123, %c1_124, %c0_125] : memref<18x18x8xf32, #tpu.memory_space<vmem>>, vector<16x16x8xf32>
    %117 = vector.shape_cast %116 : vector<16x16x8xf32> to vector<256x8xf32>
    %c7_126 = arith.constant 7 : index
    %c0_127 = arith.constant 0 : index
    %c0_128 = arith.constant 0 : index
    %118 = vector.load %arg4[%c7_126, %c0_127, %c0_128] : memref<9x8x16xf32, #tpu.memory_space<vmem>>, vector<1x8x16xf32>
    %119 = vector.shape_cast %118 : vector<1x8x16xf32> to vector<8x16xf32>
    %cst_129 = arith.constant dense<0.000000e+00> : vector<256x16xf32>
    %120 = tpu.matmul %117, %119, %cst_129 {dimension_numbers = #tpu.dot_dimension_numbers<[1], [0], [0], [1], [0, 0, 1, 1], [], []>} : vector<256x8xf32>, vector<8x16xf32>, vector<256x16xf32> -> vector<256x16xf32>
    %121 = arith.addf %115, %120 : vector<256x16xf32>
    %c2_130 = arith.constant 2 : index
    %c2_131 = arith.constant 2 : index
    %c0_132 = arith.constant 0 : index
    %122 = vector.load %arg13[%c2_130, %c2_131, %c0_132] : memref<18x18x8xf32, #tpu.memory_space<vmem>>, vector<16x16x8xf32>
    %123 = vector.shape_cast %122 : vector<16x16x8xf32> to vector<256x8xf32>
    %c8_133 = arith.constant 8 : index
    %c0_134 = arith.constant 0 : index
    %c0_135 = arith.constant 0 : index
    %124 = vector.load %arg4[%c8_133, %c0_134, %c0_135] : memref<9x8x16xf32, #tpu.memory_space<vmem>>, vector<1x8x16xf32>
    %125 = vector.shape_cast %124 : vector<1x8x16xf32> to vector<8x16xf32>
    %cst_136 = arith.constant dense<0.000000e+00> : vector<256x16xf32>
    %126 = tpu.matmul %123, %125, %cst_136 {dimension_numbers = #tpu.dot_dimension_numbers<[1], [0], [0], [1], [0, 0, 1, 1], [], []>} : vector<256x8xf32>, vector<8x16xf32>, vector<256x16xf32> -> vector<256x16xf32>
    %127 = arith.addf %121, %126 : vector<256x16xf32>
    %c0_137 = arith.constant 0 : index
    %c0_138 = arith.constant 0 : index
    %128 = vector.load %arg5[%c0_137, %c0_138] : memref<1x16xf32, #tpu.memory_space<vmem>>, vector<1x16xf32>
    %129 = vector.broadcast %128 : vector<1x16xf32> to vector<256x16xf32>
    %130 = arith.addf %127, %129 : vector<256x16xf32>
    %cst_139 = arith.constant 0.000000e+00 : f32
    %131 = vector.broadcast %cst_139 : f32 to vector<256x16xf32>
    %132 = arith.maximumf %130, %131 : vector<256x16xf32>
    %cst_140 = arith.constant 0.000000e+00 : f32
    %133 = vector.broadcast %cst_140 : f32 to vector<256x32xf32>
    %134 = vector.extract_strided_slice %132 {offsets = [0, 0], sizes = [256, 1], strides = [1, 1]} : vector<256x16xf32> to vector<256x1xf32>
    %c0_141 = arith.constant 0 : index
    %c0_142 = arith.constant 0 : index
    %c0_143 = arith.constant 0 : index
    %135 = vector.load %arg6[%c0_141, %c0_142, %c0_143] : memref<16x256x32xf32, #tpu.memory_space<vmem>>, vector<1x256x32xf32>
    %136 = vector.shape_cast %135 : vector<1x256x32xf32> to vector<256x32xf32>
    %137 = vector.broadcast %134 : vector<256x1xf32> to vector<256x32xf32>
    %138 = arith.mulf %137, %136 : vector<256x32xf32>
    %139 = arith.addf %133, %138 : vector<256x32xf32>
    %140 = vector.extract_strided_slice %132 {offsets = [0, 1], sizes = [256, 1], strides = [1, 1]} : vector<256x16xf32> to vector<256x1xf32>
    %c1_144 = arith.constant 1 : index
    %c0_145 = arith.constant 0 : index
    %c0_146 = arith.constant 0 : index
    %141 = vector.load %arg6[%c1_144, %c0_145, %c0_146] : memref<16x256x32xf32, #tpu.memory_space<vmem>>, vector<1x256x32xf32>
    %142 = vector.shape_cast %141 : vector<1x256x32xf32> to vector<256x32xf32>
    %143 = vector.broadcast %140 : vector<256x1xf32> to vector<256x32xf32>
    %144 = arith.mulf %143, %142 : vector<256x32xf32>
    %145 = arith.addf %139, %144 : vector<256x32xf32>
    %146 = vector.extract_strided_slice %132 {offsets = [0, 2], sizes = [256, 1], strides = [1, 1]} : vector<256x16xf32> to vector<256x1xf32>
    %c2_147 = arith.constant 2 : index
    %c0_148 = arith.constant 0 : index
    %c0_149 = arith.constant 0 : index
    %147 = vector.load %arg6[%c2_147, %c0_148, %c0_149] : memref<16x256x32xf32, #tpu.memory_space<vmem>>, vector<1x256x32xf32>
    %148 = vector.shape_cast %147 : vector<1x256x32xf32> to vector<256x32xf32>
    %149 = vector.broadcast %146 : vector<256x1xf32> to vector<256x32xf32>
    %150 = arith.mulf %149, %148 : vector<256x32xf32>
    %151 = arith.addf %145, %150 : vector<256x32xf32>
    %152 = vector.extract_strided_slice %132 {offsets = [0, 3], sizes = [256, 1], strides = [1, 1]} : vector<256x16xf32> to vector<256x1xf32>
    %c3_150 = arith.constant 3 : index
    %c0_151 = arith.constant 0 : index
    %c0_152 = arith.constant 0 : index
    %153 = vector.load %arg6[%c3_150, %c0_151, %c0_152] : memref<16x256x32xf32, #tpu.memory_space<vmem>>, vector<1x256x32xf32>
    %154 = vector.shape_cast %153 : vector<1x256x32xf32> to vector<256x32xf32>
    %155 = vector.broadcast %152 : vector<256x1xf32> to vector<256x32xf32>
    %156 = arith.mulf %155, %154 : vector<256x32xf32>
    %157 = arith.addf %151, %156 : vector<256x32xf32>
    %158 = vector.extract_strided_slice %132 {offsets = [0, 4], sizes = [256, 1], strides = [1, 1]} : vector<256x16xf32> to vector<256x1xf32>
    %c4_153 = arith.constant 4 : index
    %c0_154 = arith.constant 0 : index
    %c0_155 = arith.constant 0 : index
    %159 = vector.load %arg6[%c4_153, %c0_154, %c0_155] : memref<16x256x32xf32, #tpu.memory_space<vmem>>, vector<1x256x32xf32>
    %160 = vector.shape_cast %159 : vector<1x256x32xf32> to vector<256x32xf32>
    %161 = vector.broadcast %158 : vector<256x1xf32> to vector<256x32xf32>
    %162 = arith.mulf %161, %160 : vector<256x32xf32>
    %163 = arith.addf %157, %162 : vector<256x32xf32>
    %164 = vector.extract_strided_slice %132 {offsets = [0, 5], sizes = [256, 1], strides = [1, 1]} : vector<256x16xf32> to vector<256x1xf32>
    %c5_156 = arith.constant 5 : index
    %c0_157 = arith.constant 0 : index
    %c0_158 = arith.constant 0 : index
    %165 = vector.load %arg6[%c5_156, %c0_157, %c0_158] : memref<16x256x32xf32, #tpu.memory_space<vmem>>, vector<1x256x32xf32>
    %166 = vector.shape_cast %165 : vector<1x256x32xf32> to vector<256x32xf32>
    %167 = vector.broadcast %164 : vector<256x1xf32> to vector<256x32xf32>
    %168 = arith.mulf %167, %166 : vector<256x32xf32>
    %169 = arith.addf %163, %168 : vector<256x32xf32>
    %170 = vector.extract_strided_slice %132 {offsets = [0, 6], sizes = [256, 1], strides = [1, 1]} : vector<256x16xf32> to vector<256x1xf32>
    %c6_159 = arith.constant 6 : index
    %c0_160 = arith.constant 0 : index
    %c0_161 = arith.constant 0 : index
    %171 = vector.load %arg6[%c6_159, %c0_160, %c0_161] : memref<16x256x32xf32, #tpu.memory_space<vmem>>, vector<1x256x32xf32>
    %172 = vector.shape_cast %171 : vector<1x256x32xf32> to vector<256x32xf32>
    %173 = vector.broadcast %170 : vector<256x1xf32> to vector<256x32xf32>
    %174 = arith.mulf %173, %172 : vector<256x32xf32>
    %175 = arith.addf %169, %174 : vector<256x32xf32>
    %176 = vector.extract_strided_slice %132 {offsets = [0, 7], sizes = [256, 1], strides = [1, 1]} : vector<256x16xf32> to vector<256x1xf32>
    %c7_162 = arith.constant 7 : index
    %c0_163 = arith.constant 0 : index
    %c0_164 = arith.constant 0 : index
    %177 = vector.load %arg6[%c7_162, %c0_163, %c0_164] : memref<16x256x32xf32, #tpu.memory_space<vmem>>, vector<1x256x32xf32>
    %178 = vector.shape_cast %177 : vector<1x256x32xf32> to vector<256x32xf32>
    %179 = vector.broadcast %176 : vector<256x1xf32> to vector<256x32xf32>
    %180 = arith.mulf %179, %178 : vector<256x32xf32>
    %181 = arith.addf %175, %180 : vector<256x32xf32>
    %182 = vector.extract_strided_slice %132 {offsets = [0, 8], sizes = [256, 1], strides = [1, 1]} : vector<256x16xf32> to vector<256x1xf32>
    %c8_165 = arith.constant 8 : index
    %c0_166 = arith.constant 0 : index
    %c0_167 = arith.constant 0 : index
    %183 = vector.load %arg6[%c8_165, %c0_166, %c0_167] : memref<16x256x32xf32, #tpu.memory_space<vmem>>, vector<1x256x32xf32>
    %184 = vector.shape_cast %183 : vector<1x256x32xf32> to vector<256x32xf32>
    %185 = vector.broadcast %182 : vector<256x1xf32> to vector<256x32xf32>
    %186 = arith.mulf %185, %184 : vector<256x32xf32>
    %187 = arith.addf %181, %186 : vector<256x32xf32>
    %188 = vector.extract_strided_slice %132 {offsets = [0, 9], sizes = [256, 1], strides = [1, 1]} : vector<256x16xf32> to vector<256x1xf32>
    %c9 = arith.constant 9 : index
    %c0_168 = arith.constant 0 : index
    %c0_169 = arith.constant 0 : index
    %189 = vector.load %arg6[%c9, %c0_168, %c0_169] : memref<16x256x32xf32, #tpu.memory_space<vmem>>, vector<1x256x32xf32>
    %190 = vector.shape_cast %189 : vector<1x256x32xf32> to vector<256x32xf32>
    %191 = vector.broadcast %188 : vector<256x1xf32> to vector<256x32xf32>
    %192 = arith.mulf %191, %190 : vector<256x32xf32>
    %193 = arith.addf %187, %192 : vector<256x32xf32>
    %194 = vector.extract_strided_slice %132 {offsets = [0, 10], sizes = [256, 1], strides = [1, 1]} : vector<256x16xf32> to vector<256x1xf32>
    %c10 = arith.constant 10 : index
    %c0_170 = arith.constant 0 : index
    %c0_171 = arith.constant 0 : index
    %195 = vector.load %arg6[%c10, %c0_170, %c0_171] : memref<16x256x32xf32, #tpu.memory_space<vmem>>, vector<1x256x32xf32>
    %196 = vector.shape_cast %195 : vector<1x256x32xf32> to vector<256x32xf32>
    %197 = vector.broadcast %194 : vector<256x1xf32> to vector<256x32xf32>
    %198 = arith.mulf %197, %196 : vector<256x32xf32>
    %199 = arith.addf %193, %198 : vector<256x32xf32>
    %200 = vector.extract_strided_slice %132 {offsets = [0, 11], sizes = [256, 1], strides = [1, 1]} : vector<256x16xf32> to vector<256x1xf32>
    %c11 = arith.constant 11 : index
    %c0_172 = arith.constant 0 : index
    %c0_173 = arith.constant 0 : index
    %201 = vector.load %arg6[%c11, %c0_172, %c0_173] : memref<16x256x32xf32, #tpu.memory_space<vmem>>, vector<1x256x32xf32>
    %202 = vector.shape_cast %201 : vector<1x256x32xf32> to vector<256x32xf32>
    %203 = vector.broadcast %200 : vector<256x1xf32> to vector<256x32xf32>
    %204 = arith.mulf %203, %202 : vector<256x32xf32>
    %205 = arith.addf %199, %204 : vector<256x32xf32>
    %206 = vector.extract_strided_slice %132 {offsets = [0, 12], sizes = [256, 1], strides = [1, 1]} : vector<256x16xf32> to vector<256x1xf32>
    %c12 = arith.constant 12 : index
    %c0_174 = arith.constant 0 : index
    %c0_175 = arith.constant 0 : index
    %207 = vector.load %arg6[%c12, %c0_174, %c0_175] : memref<16x256x32xf32, #tpu.memory_space<vmem>>, vector<1x256x32xf32>
    %208 = vector.shape_cast %207 : vector<1x256x32xf32> to vector<256x32xf32>
    %209 = vector.broadcast %206 : vector<256x1xf32> to vector<256x32xf32>
    %210 = arith.mulf %209, %208 : vector<256x32xf32>
    %211 = arith.addf %205, %210 : vector<256x32xf32>
    %212 = vector.extract_strided_slice %132 {offsets = [0, 13], sizes = [256, 1], strides = [1, 1]} : vector<256x16xf32> to vector<256x1xf32>
    %c13 = arith.constant 13 : index
    %c0_176 = arith.constant 0 : index
    %c0_177 = arith.constant 0 : index
    %213 = vector.load %arg6[%c13, %c0_176, %c0_177] : memref<16x256x32xf32, #tpu.memory_space<vmem>>, vector<1x256x32xf32>
    %214 = vector.shape_cast %213 : vector<1x256x32xf32> to vector<256x32xf32>
    %215 = vector.broadcast %212 : vector<256x1xf32> to vector<256x32xf32>
    %216 = arith.mulf %215, %214 : vector<256x32xf32>
    %217 = arith.addf %211, %216 : vector<256x32xf32>
    %218 = vector.extract_strided_slice %132 {offsets = [0, 14], sizes = [256, 1], strides = [1, 1]} : vector<256x16xf32> to vector<256x1xf32>
    %c14 = arith.constant 14 : index
    %c0_178 = arith.constant 0 : index
    %c0_179 = arith.constant 0 : index
    %219 = vector.load %arg6[%c14, %c0_178, %c0_179] : memref<16x256x32xf32, #tpu.memory_space<vmem>>, vector<1x256x32xf32>
    %220 = vector.shape_cast %219 : vector<1x256x32xf32> to vector<256x32xf32>
    %221 = vector.broadcast %218 : vector<256x1xf32> to vector<256x32xf32>
    %222 = arith.mulf %221, %220 : vector<256x32xf32>
    %223 = arith.addf %217, %222 : vector<256x32xf32>
    %224 = vector.extract_strided_slice %132 {offsets = [0, 15], sizes = [256, 1], strides = [1, 1]} : vector<256x16xf32> to vector<256x1xf32>
    %c15 = arith.constant 15 : index
    %c0_180 = arith.constant 0 : index
    %c0_181 = arith.constant 0 : index
    %225 = vector.load %arg6[%c15, %c0_180, %c0_181] : memref<16x256x32xf32, #tpu.memory_space<vmem>>, vector<1x256x32xf32>
    %226 = vector.shape_cast %225 : vector<1x256x32xf32> to vector<256x32xf32>
    %227 = vector.broadcast %224 : vector<256x1xf32> to vector<256x32xf32>
    %228 = arith.mulf %227, %226 : vector<256x32xf32>
    %229 = arith.addf %223, %228 : vector<256x32xf32>
    %cst_182 = arith.constant dense<0.000000e+00> : vector<32xf32>
    %230 = vector.multi_reduction <add>, %229, %cst_182 [0] : vector<256x32xf32> to vector<32xf32>
    %231 = vector.shape_cast %230 : vector<32xf32> to vector<1x32xf32>
    %c0_183 = arith.constant 0 : index
    %c0_184 = arith.constant 0 : index
    %232 = vector.load %arg7[%c0_183, %c0_184] : memref<1x32xf32, #tpu.memory_space<vmem>>, vector<1x32xf32>
    %233 = arith.addf %231, %232 : vector<1x32xf32>
    %cst_185 = arith.constant 0.000000e+00 : f32
    %234 = vector.broadcast %cst_185 : f32 to vector<1x32xf32>
    %235 = arith.maximumf %233, %234 : vector<1x32xf32>
    %c0_186 = arith.constant 0 : index
    %c0_187 = arith.constant 0 : index
    %236 = vector.load %arg8[%c0_186, %c0_187] : memref<32x32xf32, #tpu.memory_space<vmem>>, vector<32x32xf32>
    %cst_188 = arith.constant dense<0.000000e+00> : vector<1x32xf32>
    %237 = tpu.matmul %235, %236, %cst_188 {dimension_numbers = #tpu.dot_dimension_numbers<[1], [0], [0], [1], [0, 0, 1, 1], [], []>} : vector<1x32xf32>, vector<32x32xf32>, vector<1x32xf32> -> vector<1x32xf32>
    %c0_189 = arith.constant 0 : index
    %c0_190 = arith.constant 0 : index
    %238 = vector.load %arg9[%c0_189, %c0_190] : memref<1x32xf32, #tpu.memory_space<vmem>>, vector<1x32xf32>
    %239 = arith.addf %237, %238 : vector<1x32xf32>
    %cst_191 = arith.constant 0.000000e+00 : f32
    %240 = vector.broadcast %cst_191 : f32 to vector<1x32xf32>
    %241 = arith.maximumf %239, %240 : vector<1x32xf32>
    %c0_192 = arith.constant 0 : index
    %c0_193 = arith.constant 0 : index
    %242 = vector.load %arg10[%c0_192, %c0_193] : memref<32x128xf32, #tpu.memory_space<vmem>>, vector<32x128xf32>
    %cst_194 = arith.constant dense<0.000000e+00> : vector<1x128xf32>
    %243 = tpu.matmul %241, %242, %cst_194 {dimension_numbers = #tpu.dot_dimension_numbers<[1], [0], [0], [1], [0, 0, 1, 1], [], []>} : vector<1x32xf32>, vector<32x128xf32>, vector<1x128xf32> -> vector<1x128xf32>
    %c0_195 = arith.constant 0 : index
    %c0_196 = arith.constant 0 : index
    %244 = vector.load %arg11[%c0_195, %c0_196] : memref<1x128xf32, #tpu.memory_space<vmem>>, vector<1x128xf32>
    %245 = arith.addf %243, %244 : vector<1x128xf32>
    %cst_197 = arith.constant dense<0xFF800000> : vector<1xf32>
    %246 = vector.multi_reduction <maximumf>, %245, %cst_197 [1] : vector<1x128xf32> to vector<1xf32>
    %247 = vector.shape_cast %246 : vector<1xf32> to vector<1x1xf32>
    %248 = vector.broadcast %247 : vector<1x1xf32> to vector<1x128xf32>
    %249 = arith.subf %245, %248 : vector<1x128xf32>
    %250 = math.exp %249 : vector<1x128xf32>
    %cst_198 = arith.constant dense<0.000000e+00> : vector<1xf32>
    %251 = vector.multi_reduction <add>, %250, %cst_198 [1] : vector<1x128xf32> to vector<1xf32>
    %252 = vector.shape_cast %251 : vector<1xf32> to vector<1x1xf32>
    %253 = tpu.reciprocal %252 {approx = true} : vector<1x1xf32> -> vector<1x1xf32>
    %254 = vector.broadcast %253 : vector<1x1xf32> to vector<1x128xf32>
    %255 = arith.mulf %250, %254 : vector<1x128xf32>
    %c0_199 = arith.constant 0 : index
    %c0_200 = arith.constant 0 : index
    %c0_201 = arith.constant 0 : index
    %256 = vector.load %arg12[%c0_199, %c0_200, %c0_201] : memref<1x1x128xf32, #tpu.memory_space<vmem>>, vector<1x1x128xf32>
    %257 = vector.shape_cast %256 : vector<1x1x128xf32> to vector<1x128xf32>
    %258 = vector.shape_cast %255 : vector<1x128xf32> to vector<1x1x128xf32>
    tpu.vector_store %arg12[%c0_199, %c0_200, %c0_201], %258 {strides = array<i32>} : memref<1x1x128xf32, #tpu.memory_space<vmem>>, vector<1x1x128xf32>,
    return
  }
  func.func @transform_0(%arg0: i32) -> (i32, i32, i32, i32) {
    %c0_i32 = arith.constant 0 : i32
    %c0_i32_0 = arith.constant 0 : i32
    %c0_i32_1 = arith.constant 0 : i32
    %c0_i32_2 = arith.constant 0 : i32
    return %arg0, %c0_i32, %c0_i32_0, %c0_i32_1 : i32, i32, i32, i32
  }
  func.func @transform_1(%arg0: i32) -> (i32, i32, i32) {
    %c0_i32 = arith.constant 0 : i32
    %c0_i32_0 = arith.constant 0 : i32
    %c0_i32_1 = arith.constant 0 : i32
    %c0_i32_2 = arith.constant 0 : i32
    return %c0_i32, %c0_i32_0, %c0_i32_1 : i32, i32, i32
  }
  func.func @transform_2(%arg0: i32) -> (i32, i32) {
    %c0_i32 = arith.constant 0 : i32
    %c0_i32_0 = arith.constant 0 : i32
    %c0_i32_1 = arith.constant 0 : i32
    return %c0_i32, %c0_i32_0 : i32, i32
  }
  func.func @transform_3(%arg0: i32) -> (i32, i32, i32) {
    %c0_i32 = arith.constant 0 : i32
    %c0_i32_0 = arith.constant 0 : i32
    %c0_i32_1 = arith.constant 0 : i32
    %c0_i32_2 = arith.constant 0 : i32
    return %c0_i32, %c0_i32_0, %c0_i32_1 : i32, i32, i32
  }
  func.func @transform_4(%arg0: i32) -> (i32, i32) {
    %c0_i32 = arith.constant 0 : i32
    %c0_i32_0 = arith.constant 0 : i32
    %c0_i32_1 = arith.constant 0 : i32
    return %c0_i32, %c0_i32_0 : i32, i32
  }
  func.func @transform_5(%arg0: i32) -> (i32, i32, i32) {
    %c0_i32 = arith.constant 0 : i32
    %c0_i32_0 = arith.constant 0 : i32
    %c0_i32_1 = arith.constant 0 : i32
    %c0_i32_2 = arith.constant 0 : i32
    return %c0_i32, %c0_i32_0, %c0_i32_1 : i32, i32, i32
  }
  func.func @transform_6(%arg0: i32) -> (i32, i32) {
    %c0_i32 = arith.constant 0 : i32
    %c0_i32_0 = arith.constant 0 : i32
    %c0_i32_1 = arith.constant 0 : i32
    return %c0_i32, %c0_i32_0 : i32, i32
  }
  func.func @transform_7(%arg0: i32) -> (i32, i32) {
    %c0_i32 = arith.constant 0 : i32
    %c0_i32_0 = arith.constant 0 : i32
    %c0_i32_1 = arith.constant 0 : i32
    return %c0_i32, %c0_i32_0 : i32, i32
  }
  func.func @transform_8(%arg0: i32) -> (i32, i32) {
    %c0_i32 = arith.constant 0 : i32
    %c0_i32_0 = arith.constant 0 : i32
    %c0_i32_1 = arith.constant 0 : i32
    return %c0_i32, %c0_i32_0 : i32, i32
  }
  func.func @transform_9(%arg0: i32) -> (i32, i32) {
    %c0_i32 = arith.constant 0 : i32
    %c0_i32_0 = arith.constant 0 : i32
    %c0_i32_1 = arith.constant 0 : i32
    return %c0_i32, %c0_i32_0 : i32, i32
  }
  func.func @transform_10(%arg0: i32) -> (i32, i32) {
    %c0_i32 = arith.constant 0 : i32
    %c0_i32_0 = arith.constant 0 : i32
    %c0_i32_1 = arith.constant 0 : i32
    return %c0_i32, %c0_i32_0 : i32, i32
  }
  func.func @transform_11(%arg0: i32) -> (i32, i32, i32) {
    %c0_i32 = arith.constant 0 : i32
    %c0_i32_0 = arith.constant 0 : i32
    %c0_i32_1 = arith.constant 0 : i32
    return %arg0, %c0_i32, %c0_i32_0 : i32, i32, i32
  }
}

</mosaic_0001>

<bundles_post_ra>
// kernel: baseline_net_forward.1
= control target key start
LH: loop header
LB: loop body
LE: loop exit
PB: predicated region body
PF: predicated region fallthrough
CT: control target
= control target key end

     0   :  { %s22394_s0 = inlined_call_operand.vmem [shape: f32[2,18,18,4], index: 0, kind: input, shape index: {}]   ;;  %s22395_s1 = inlined_call_operand.vmem [shape: f32[9,4,8], index: 1, kind: input, shape index: {}]   ;;  %s22396_s2 = inlined_call_operand.vmem [shape: f32[1,8], index: 2, kind: input, shape index: {}]   ;;  %s22397_s3 = inlined_call_operand.vmem [shape: f32[9,8,16], index: 3, kind: input, shape index: {}]   ;;  %s22398_s4 = inlined_call_operand.vmem [shape: f32[1,16], index: 4, kind: input, shape index: {}]   ;;  %s22399_s5 = inlined_call_operand.vmem [shape: f32[16,256,32], index: 5, kind: input, shape index: {}]   ;;  %s22400_s6 = inlined_call_operand.vmem [shape: f32[1,32], index: 6, kind: input, shape index: {}]   ;;  %s22401_s7 = inlined_call_operand.vmem [shape: f32[32,32], index: 7, kind: input, shape index: {}]   ;;  %s22402_s8 = inlined_call_operand.vmem [shape: f32[1,32], index: 8, kind: input, shape index: {}]   ;;  %s22403_s9 = inlined_call_operand.vmem [shape: f32[32,128], index: 9, kind: input, shape index: {}]   ;;  %s22404_s10 = inlined_call_operand.vmem [shape: f32[1,128], index: 10, kind: input, shape index: {}]   ;;  %s22405_s11 = inlined_call_operand.hbm [shape: f32[2,1,128], index: 11, kind: output, shape index: {}]  }
   0x1   :  { %22542 = sst [smem:[#allocation342_spill]] %s22394_s0 }
   0x2   :  { %22543 = sst [smem:[#allocation343_spill]] %s22395_s1 }
   0x3   :  { %16 = vsyncpa [#allocation4], 0 }
   0x4   :  { %18 = vsyncpa [#allocation4 + $0x1], 0  ;;  %s14906_s17 = smov 0   ;;  %s14908_s18 = smov 0  }
   0x5   :  { %s14910_s19 = smov 0   ;;  %s14912_s20 = smov 0  }
   0x6 LB: > { %s14927_s21 = sadd.s32 4294967295, %s14825_s20   ;;  %s11425_s22 = sadd.s32 4294967294, %s14825_s20   ;;  %s14825_s20 = sphi %s14912_s20, %s23747_s20   ;;  %s14821_s19 = sphi %s14910_s19, %s23746_s19   ;;  %s14817_s18 = sphi %s14908_s18, %s23745_s18   ;;  %s14813_s17 = sphi %s14906_s17, %s23744_s17  }
   0x7   : > { %s14931_s23 = sadd.s32 1, %s14825_s20   ;;  %s267_s24 = sadd.s32 1, %s14821_s19 }
   0x8   : > { %s264_s25 = ssub.s32 %s14825_s20, %s14931_s23  ;;  %p277_p0 = scmp.ne.s32.totalorder %s14821_s19, %s14817_s18 }
   0x9   : > { %p265_p1 = scmp.eq.s32.totalorder %s264_s25, 0  ;;  %p278_p2 = scmp.eq.s32.totalorder %s14927_s21, 1 }
   0xa   : > { %p283_p3 = scmp.ne.s32.totalorder %s14817_s18, %s14813_s17  ;;  %p284_p4 = scmp.eq.s32.totalorder %s11425_s22, 1 }
   0xb   : > { %s14942_s26 = scalar_select %p265_p1, %s14821_s19, %s267_s24  }
   0xc   : > { %p14944_p5 = por %p278_p2, %p277_p0  ;;  %p14948_p6 = por %p284_p4, %p283_p3 }
   0xd   : > { %p11428_p7 = scmp.ge.s32.totalorder %s14825_s20, 1  ;;  %p340_p8 = scmp.lt.s32.totalorder %s14825_s20, 3 }
   0xf   : > { %p341_p9 = pnand %p11428_p7, %p340_p8 }
  0x11   : > { %344 = sbr.rel (%p341_p9) target bundleno = 3313 (0xcf1), region = 64 }
  0x16   : > { %s22546_s1 = sld [smem:[#allocation343_spill]]  ;;  %vm548_vm0 = vcmask 1043456   ;;  %p379_p10 = scmp.lt.s32.totalorder %s14927_s21, 1  ;;  %vm451_vm1 = vcmask 31744   ;;  %vm3904_vm2 = vcmask 64512   ;;  %vm3907_vm3 = vcmask 58368  }
  0x17   : > { %s22547_s0 = sld [smem:[#allocation342_spill]]  ;;  %vm11114_vm4 = vcmask 261120   ;;  %vm14844_vm5 = vmmov 0   ;;  %vm11344_vm6 = vcmask 1040384   ;;  %s377_s30 = sand.u32 1, %s14817_s18  }
  0x18   : > { %s380_s24 = scalar_select %p379_p10, %s14927_s21, 1 }
  0x19   : > { %s12707_s13 = sshll.u32 %s14927_s21, 4  ;;  %s378_s14 = scalar_lea.vmem [#allocation3], %s377_s30 }
  0x1a   : > { %s14236_s25 = smul.u32 432, %s380_s24  ;;  %s11370_s15 = sshll.u32 %s378_s14, 4  ;;  %s11371_s15 = int_to_ptr.vmem [resolvable:$true] %s11370_s15 }
  0x1b   : > { %s11368_s22 = scalar_lea.hbm %s22405_s11, %s12707_s13  ;;  %s11358_s24 = scalar_lea.sflag [#allocation4], %s377_s30 }
  0x1c   : > { %v11430_v0 = vld [vmem:[%s22546_s1 + $0x4] sm:$0xf]  ;;  %v416_v1 = vld [vmem:[%s22546_s1] sm:$0xf]  ;;  %v11497_v2 = vld [vmem:[%s22546_s1 + $0x8] sm:$0xf] }
  0x1d   : > { %13314 = vmatprep.subr.msk.mxu0 %vm548_vm0, %v11430_v0  ;;  %13364 = vmatprep.subr.msk.mxu1 %vm548_vm0, %v416_v1  ;;  %v11563_v3 = vld [vmem:[%s22546_s1 + $0xc] sm:$0xf]  ;;  %s14977_s12 = scalar_lea.vmem %s22547_s0, %s14236_s25  ;;  %v14996_v10 = vld [vmem:[%s22546_s1 + $0x10] sm:$0xf]  ;;  %v15001_v11 = vld [vmem:[%s22546_s1 + $0x14] sm:$0xf] }
  0x1e   : > { %13315 = vmatpush3.msk.msra.mxu0 %vm548_vm0, %v11430_v0  ;;  %13365 = vmatpush3.msk.msra.mxu1 %vm548_vm0, %v416_v1  ;;  %v417_v4 = vld [vmem:[%s14977_s12 + $0x1] sm:$0xff]  ;;  %v418_v6 = vld [vmem:[%s14977_s12 + $0x9] sm:$0xff]  ;;  %v14986_v8 = vld [vmem:[%s14977_s12 + $0x19] sm:$0xff]  ;;  %s14765_s25 = scalar_lea.vmem %s11371_s15, 16  ;;  %s14845_s29 = smov [#allocation3]  }
  0x1f   : > { %13414 = vmatprep.subr.msk.mxu0 %vm548_vm0, %v11497_v2  ;;  %13464 = vmatprep.subr.msk.mxu1 %vm548_vm0, %v11563_v3  ;;  %v384_v5 = vld [vmem:[%s14977_s12] sm:$0xff]  ;;  %v385_v7 = vld [vmem:[%s14977_s12 + $0x8] sm:$0xff]  ;;  %v14989_v9 = vld [vmem:[%s14977_s12 + $0x18] sm:$0xff]  ;;  %p14766_p11 = scmp.ne.s32.totalorder %s11371_s15, %s14765_s25  ;;  %s14769_s0 = sshll.u32 %s14845_s29, 4  ;;  %s14770_s0 = int_to_ptr.vmem [resolvable:$false] %s14769_s0 }
  0x20   : > { %13316 = vmatprep.mubr.msk.f32.mxu0 %vm451_vm1, %v417_v4  ;;  %13366 = vmatprep.mubr.msk.f32.mxu1 %vm451_vm1, %v384_v5  ;;  %v15007_v12 = vld [vmem:[%s14977_s12 + $0x21] sm:$0xff]  ;;  %v15015_v14 = vld [vmem:[%s14977_s12 + $0x31] sm:$0xff]  ;;  %v15034_v16 = vld [vmem:[%s14977_s12 + $0x39] sm:$0xff]  ;;  %s14771_s21 = scalar_lea.vmem %s14770_s0, 32  ;;  %p14772_p0 = scmp.lt.s32.totalorder %s11371_s15, %s14770_s0 }
  0x21   : > { %13317 = vmatmul.mubr.msk.f32.vlgmr.msra.gmra.mxu0 %vm451_vm1, %v418_v6  ;;  %13367 = vmatmul.mubr.msk.f32.vlgmr.msra.gmra.mxu1 %vm451_vm1, %v385_v7  ;;  %v15010_v13 = vld [vmem:[%s14977_s12 + $0x20] sm:$0xff]  ;;  %v15018_v15 = vld [vmem:[%s14977_s12 + $0x30] sm:$0xff]  ;;  %v15037_v17 = vld [vmem:[%s14977_s12 + $0x38] sm:$0xff]  ;;  %p14767_p12 = pnand %p14766_p11, %p14944_p5  ;;  %p14773_p1 = scmp.lt.s32.totalorder %s14771_s21, %s14765_s25 }
  0x22   : > { %13415 = vmatpush3.msk.msra.mxu0 %vm548_vm0, %v11497_v2  ;;  %13319 = vmatprep.mubr.msk.f32.mxu0 %vm451_vm1, %v14986_v8  ;;  %22548 = vst [vmem:[#allocation6_spill] sm:$0xff] %v15018_v15  ;;  %22549 = vst [vmem:[#allocation7_spill] sm:$0xff] %v15037_v17  ;;  %v15040_v18 = vld [vmem:[%s14977_s12 + $0x49] sm:$0xff]  ;;  %v15054_v20 = vld [vmem:[%s14977_s12 + $0x51] sm:$0xff] }
  0x23   : > { %13369 = vmatprep.mubr.msk.f32.mxu1 %vm451_vm1, %v14989_v9  ;;  %13465 = vmatpush3.msk.msra.mxu1 %vm548_vm0, %v11563_v3  ;;  %v15043_v19 = vld [vmem:[%s14977_s12 + $0x48] sm:$0xff]  ;;  %v15057_v21 = vld [vmem:[%s14977_s12 + $0x50] sm:$0xff]  ;;  %v15063_v23 = vld [vmem:[%s14977_s12 + $0x60] sm:$0xff]  ;;  %p14768_p13 = pneg %p14767_p12  ;;  %p14774_p2 = por %p14773_p1, %p14772_p0 }
  0x24   : > { %13514 = vmatprep.subr.msk.mxu0 %vm548_vm0, %v14996_v10  ;;  %13564 = vmatprep.subr.msk.mxu1 %vm548_vm0, %v15001_v11  ;;  %22550 = vst [vmem:[#allocation8_spill] sm:$0xff] %v15043_v19  ;;  %22551 = vst [vmem:[#allocation9_spill] sm:$0xff] %v15057_v21  ;;  %v15060_v22 = vld [vmem:[%s14977_s12 + $0x61] sm:$0xff]  ;;  %v15074_v24 = vld [vmem:[%s14977_s12 + $0x69] sm:$0xff] }
  0x25   : > { %13320 = vmatmul.mubr.msk.f32.gmra.mxu0 %vm451_vm1, %v15007_v12  ;;  %13370 = vmatmul.mubr.msk.f32.gmra.mxu1 %vm451_vm1, %v15010_v13  ;;  %22552 = vst [vmem:[#allocation10_spill] sm:$0xff] %v15063_v23  ;;  %v15077_v25 = vld [vmem:[%s14977_s12 + $0x68] sm:$0xff]  ;;  %v15080_v26 = vld [vmem:[%s14977_s12 + $0x79] sm:$0xff]  ;;  %v15100_v30 = vld [vmem:[%s14977_s12 + $0x91] sm:$0xff]  ;;  %p14775_p3 = pnand %p14774_p2, %p14768_p13 }
  0x26   : > { %13322 = vmatprep.mubr.msk.f32.mxu0 %vm451_vm1, %v15015_v14  ;;  %13372 = vmatprep.mubr.msk.f32.mxu1 %vm451_vm1, %v15018_v15  ;;  %22553 = vst [vmem:[#allocation11_spill] sm:$0xff] %v15077_v25  ;;  %v15083_v27 = vld [vmem:[%s14977_s12 + $0x78] sm:$0xff]  ;;  %v15094_v28 = vld [vmem:[%s14977_s12 + $0x81] sm:$0xff]  ;;  %v15103_v31 = vld [vmem:[%s14977_s12 + $0x90] sm:$0xff] }
  0x27   : > { %22554 = vst [vmem:[#allocation12_spill] sm:$0xff] %v15083_v27  ;;  %v15097_v29 = vld [vmem:[%s14977_s12 + $0x80] sm:$0xff]  ;;  %22556 = vst [vmem:[#allocation14_spill] sm:$0xff] %v15103_v31  ;;  %v15117_v33 = vld [vmem:[%s14977_s12 + $0x98] sm:$0xff] }
  0x28   : > { %22555 = vst [vmem:[#allocation13_spill] sm:$0xff] %v15097_v29  ;;  %v15114_v32 = vld [vmem:[%s14977_s12 + $0x99] sm:$0xff]  ;;  %22557 = vst [vmem:[#allocation15_spill] sm:$0xff] %v15117_v33  ;;  %v15120_v34 = vld [vmem:[%s14977_s12 + $0xa9] sm:$0xff] }
  0x29   : > { %13323 = vmatmul.mubr.msk.f32.gmra.mxu0 %vm451_vm1, %v15034_v16  ;;  %13373 = vmatmul.mubr.msk.f32.gmra.mxu1 %vm451_vm1, %v15037_v17  ;;  %v15123_v35 = vld [vmem:[%s14977_s12 + $0xa8] sm:$0xff]  ;;  %v15134_v36 = vld [vmem:[%s14977_s12 + $0xb1] sm:$0xff]  ;;  %v15143_v39 = vld [vmem:[%s14977_s12 + $0xc0] sm:$0xff] }
  0x2a   : > { %13325 = vmatprep.mubr.msk.f32.mxu0 %vm451_vm1, %v15040_v18  ;;  %13375 = vmatprep.mubr.msk.f32.mxu1 %vm451_vm1, %v15043_v19  ;;  %22558 = vst [vmem:[#allocation16_spill] sm:$0xff] %v15123_v35  ;;  %v15137_v37 = vld [vmem:[%s14977_s12 + $0xb0] sm:$0xff]  ;;  %v15140_v38 = vld [vmem:[%s14977_s12 + $0xc1] sm:$0xff]  ;;  %22560 = vst [vmem:[#allocation18_spill] sm:$0xff] %v15143_v39 }
  0x2b   : > { %22559 = vst [vmem:[#allocation17_spill] sm:$0xff] %v15137_v37  ;;  %v15154_v40 = vld [vmem:[%s14977_s12 + $0xc9] sm:$0xff]  ;;  %v15160_v42 = vld [vmem:[%s14977_s12 + $0xd9] sm:$0xff]  ;;  %v15174_v44 = vld [vmem:[%s14977_s12 + $0xe1] sm:$0xff] }
  0x2c   : > { %v15157_v41 = vld [vmem:[%s14977_s12 + $0xc8] sm:$0xff]  ;;  %v15163_v43 = vld [vmem:[%s14977_s12 + $0xd8] sm:$0xff]  ;;  %v15177_v45 = vld [vmem:[%s14977_s12 + $0xe0] sm:$0xff] }
  0x2d   : > { %13326 = vmatmul.mubr.msk.f32.gmra.mxu0 %vm451_vm1, %v15054_v20  ;;  %13376 = vmatmul.mubr.msk.f32.gmra.mxu1 %vm451_vm1, %v15057_v21  ;;  %22561 = vst [vmem:[#allocation19_spill] sm:$0xff] %v15157_v41  ;;  %22562 = vst [vmem:[#allocation20_spill] sm:$0xff] %v15163_v43  ;;  %v15180_v46 = vld [vmem:[%s14977_s12 + $0xf1] sm:$0xff]  ;;  %v15194_v48 = vld [vmem:[%s14977_s12 + $0xf9] sm:$0xff] }
  0x2e   : > { %13328 = vmatprep.mubr.msk.f32.mxu0 %vm451_vm1, %v15060_v22  ;;  %13378 = vmatprep.mubr.msk.f32.mxu1 %vm451_vm1, %v15063_v23  ;;  %22563 = vst [vmem:[#allocation21_spill] sm:$0xff] %v15177_v45  ;;  %v15183_v47 = vld [vmem:[%s14977_s12 + $0xf0] sm:$0xff]  ;;  %v15197_v49 = vld [vmem:[%s14977_s12 + $0xf8] sm:$0xff]  ;;  %v15203_v51 = vld [vmem:[%s14977_s12 + $0x108] sm:$0xff] }
  0x2f   : > { %22564 = vst [vmem:[#allocation22_spill] sm:$0xff] %v15183_v47  ;;  %22565 = vst [vmem:[#allocation23_spill] sm:$0xff] %v15197_v49  ;;  %v15200_v50 = vld [vmem:[%s14977_s12 + $0x109] sm:$0xff]  ;;  %v15214_v52 = vld [vmem:[%s14977_s12 + $0x111] sm:$0xff] }
  0x30   : > { %22566 = vst [vmem:[#allocation24_spill] sm:$0xff] %v15203_v51  ;;  %v15217_v53 = vld [vmem:[%s14977_s12 + $0x110] sm:$0xff]  ;;  %v15220_v54 = vld [vmem:[%s14977_s12 + $0x121] sm:$0xff]  ;;  %v15240_v58 = vld [vmem:[%s14977_s12 + $0x139] sm:$0xff] }
  0x31   : > { %13329 = vmatmul.mubr.msk.f32.gmra.mxu0 %vm451_vm1, %v15074_v24  ;;  %13379 = vmatmul.mubr.msk.f32.gmra.mxu1 %vm451_vm1, %v15077_v25  ;;  %22567 = vst [vmem:[#allocation25_spill] sm:$0xff] %v15217_v53  ;;  %v15223_v55 = vld [vmem:[%s14977_s12 + $0x120] sm:$0xff]  ;;  %v15234_v56 = vld [vmem:[%s14977_s12 + $0x129] sm:$0xff]  ;;  %v15243_v59 = vld [vmem:[%s14977_s12 + $0x138] sm:$0xff] }
  0x32   : > { %13331 = vmatprep.mubr.msk.f32.mxu0 %vm451_vm1, %v15080_v26  ;;  %13381 = vmatprep.mubr.msk.f32.mxu1 %vm451_vm1, %v15083_v27  ;;  %22568 = vst [vmem:[#allocation26_spill] sm:$0xff] %v15223_v55  ;;  %v15237_v57 = vld [vmem:[%s14977_s12 + $0x128] sm:$0xff]  ;;  %22570 = vst [vmem:[#allocation28_spill] sm:$0xff] %v15243_v59  ;;  %v15257_v61 = vld [vmem:[%s14977_s12 + $0x140] sm:$0xff] }
  0x33   : > { %22569 = vst [vmem:[#allocation27_spill] sm:$0xff] %v15237_v57  ;;  %v15254_v60 = vld [vmem:[%s14977_s12 + $0x141] sm:$0xff]  ;;  %22571 = vst [vmem:[#allocation29_spill] sm:$0xff] %v15257_v61  ;;  %v15260_v62 = vld [vmem:[%s14977_s12 + $0x151] sm:$0xff] }
  0x34   : > { %v15263_v63 = vld [vmem:[%s14977_s12 + $0x150] sm:$0xff]  ;;  %v15274_v0 = vld [vmem:[%s14977_s12 + $0x159] sm:$0xff]  ;;  %v15283_v3 = vld [vmem:[%s14977_s12 + $0x168] sm:$0xff] }
  0x35   : > { %13332 = vmatmul.mubr.msk.f32.gmra.mxu0 %vm451_vm1, %v15094_v28  ;;  %13382 = vmatmul.mubr.msk.f32.gmra.mxu1 %vm451_vm1, %v15097_v29  ;;  %22572 = vst [vmem:[#allocation30_spill] sm:$0xff] %v15263_v63  ;;  %v15277_v1 = vld [vmem:[%s14977_s12 + $0x158] sm:$0xff]  ;;  %v15280_v2 = vld [vmem:[%s14977_s12 + $0x169] sm:$0xff] }
  0x36   : > { %13334 = vmatprep.mubr.msk.f32.mxu0 %vm451_vm1, %v15100_v30  ;;  %13384 = vmatprep.mubr.msk.f32.mxu1 %vm451_vm1, %v15103_v31  ;;  %22573 = vst [vmem:[#allocation31_spill] sm:$0xff] %v15277_v1  ;;  %22574 = vst [vmem:[#allocation32_spill] sm:$0xff] %v15280_v2  ;;  %v15294_v4 = vld [vmem:[%s14977_s12 + $0x171] sm:$0xff]  ;;  %v1101_v6 = vld [vmem:[%s14977_s12 + $0x2] sm:$0xff] }
  0x37   : > { %22575 = vst [vmem:[#allocation33_spill] sm:$0xff] %v15294_v4  ;;  %v15297_v5 = vld [vmem:[%s14977_s12 + $0x170] sm:$0xff] }
  0x38   : > { %v1102_v7 = vld [vmem:[%s14977_s12 + $0xa] sm:$0xff] }
  0x39   : > { %13335 = vmatmul.mubr.msk.f32.gmra.mxu0 %vm451_vm1, %v15114_v32  ;;  %13385 = vmatmul.mubr.msk.f32.gmra.mxu1 %vm451_vm1, %v15117_v33 }
  0x3a   : > { %13337 = vmatprep.mubr.msk.f32.mxu0 %vm451_vm1, %v15120_v34  ;;  %13387 = vmatprep.mubr.msk.f32.mxu1 %vm451_vm1, %v15123_v35 }
  0x3d   : > { %13338 = vmatmul.mubr.msk.f32.gmra.mxu0 %vm451_vm1, %v15134_v36  ;;  %13388 = vmatmul.mubr.msk.f32.gmra.mxu1 %vm451_vm1, %v15137_v37 }
  0x3e   : > { %13340 = vmatprep.mubr.msk.f32.mxu0 %vm451_vm1, %v15140_v38  ;;  %13390 = vmatprep.mubr.msk.f32.mxu1 %vm451_vm1, %v15143_v39 }
  0x41   : > { %13341 = vmatmul.mubr.msk.f32.gmra.mxu0 %vm451_vm1, %v15154_v40  ;;  %13391 = vmatmul.mubr.msk.f32.gmra.mxu1 %vm451_vm1, %v15157_v41 }
  0x42   : > { %13343 = vmatprep.mubr.msk.f32.mxu0 %vm451_vm1, %v15160_v42  ;;  %13393 = vmatprep.mubr.msk.f32.mxu1 %vm451_vm1, %v15163_v43 }
  0x45   : > { %13344 = vmatmul.mubr.msk.f32.gmra.mxu0 %vm451_vm1, %v15174_v44  ;;  %13394 = vmatmul.mubr.msk.f32.gmra.mxu1 %vm451_vm1, %v15177_v45 }
  0x46   : > { %13346 = vmatprep.mubr.msk.f32.mxu0 %vm451_vm1, %v15180_v46  ;;  %13396 = vmatprep.mubr.msk.f32.mxu1 %vm451_vm1, %v15183_v47 }
  0x49   : > { %13347 = vmatmul.mubr.msk.f32.gmra.mxu0 %vm451_vm1, %v15194_v48  ;;  %13397 = vmatmul.mubr.msk.f32.gmra.mxu1 %vm451_vm1, %v15197_v49 }
  0x4a   : > { %13349 = vmatprep.mubr.msk.f32.mxu0 %vm451_vm1, %v15200_v50  ;;  %13399 = vmatprep.mubr.msk.f32.mxu1 %vm451_vm1, %v15203_v51 }
  0x4d   : > { %13350 = vmatmul.mubr.msk.f32.gmra.mxu0 %vm451_vm1, %v15214_v52  ;;  %13400 = vmatmul.mubr.msk.f32.gmra.mxu1 %vm451_vm1, %v15217_v53 }
  0x4e   : > { %13352 = vmatprep.mubr.msk.f32.mxu0 %vm451_vm1, %v15220_v54  ;;  %13402 = vmatprep.mubr.msk.f32.mxu1 %vm451_vm1, %v15223_v55 }
  0x51   : > { %13353 = vmatmul.mubr.msk.f32.gmra.mxu0 %vm451_vm1, %v15234_v56  ;;  %13403 = vmatmul.mubr.msk.f32.gmra.mxu1 %vm451_vm1, %v15237_v57 }
  0x52   : > { %13355 = vmatprep.mubr.msk.f32.mxu0 %vm451_vm1, %v15240_v58  ;;  %13405 = vmatprep.mubr.msk.f32.mxu1 %vm451_vm1, %v15243_v59 }
  0x55   : > { %13356 = vmatmul.mubr.msk.f32.gmra.mxu0 %vm451_vm1, %v15254_v60  ;;  %13406 = vmatmul.mubr.msk.f32.gmra.mxu1 %vm451_vm1, %v15257_v61 }
  0x56   : > { %13358 = vmatprep.mubr.msk.f32.mxu0 %vm451_vm1, %v15260_v62  ;;  %13408 = vmatprep.mubr.msk.f32.mxu1 %vm451_vm1, %v15263_v63 }
  0x59   : > { %13359 = vmatmul.mubr.msk.f32.gmra.mxu0 %vm451_vm1, %v15274_v0  ;;  %13409 = vmatmul.mubr.msk.f32.gmra.mxu1 %vm451_vm1, %v15277_v1 }
  0x5a   : > { %13361 = vmatprep.mubr.msk.f32.mxu0 %vm451_vm1, %v15280_v2  ;;  %13411 = vmatprep.mubr.msk.f32.mxu1 %vm451_vm1, %v15283_v3  ;;  %v15309_v2 = vld [vmem:[%s14977_s12 + $0x1a] sm:$0xff] }
  0x5d   : > { %13362 = vmatmul.mubr.msk.f32.gmra.mxu0 %vm451_vm1, %v15294_v4  ;;  %13412 = vmatmul.mubr.msk.f32.gmra.mxu1 %vm451_vm1, %v15297_v5  ;;  %v15317_v4 = vld [vmem:[%s22546_s1 + $0x18] sm:$0xf] }
  0x5e   : > { %13416 = vmatprep.mubr.msk.f32.mxu0 %vm451_vm1, %v1101_v6  ;;  %13466 = vmatprep.mubr.msk.f32.mxu1 %vm451_vm1, %v14989_v9  ;;  %v15322_v6 = vld [vmem:[%s22546_s1 + $0x1c] sm:$0xf]  ;;  %v15329_v9 = vld [vmem:[%s14977_s12 + $0x22] sm:$0xff] }
  0x61   : > { %13417 = vmatmul.mubr.msk.f32.vlgmr.msra.gmra.mxu0 %vm451_vm1, %v1102_v7  ;;  %13467 = vmatmul.mubr.msk.f32.vlgmr.msra.gmra.mxu1 %vm451_vm1, %v15010_v13  ;;  %v15334_v13 = vld [vmem:[%s14977_s12 + $0x32] sm:$0xff] }
  0x62   : > { %13515 = vmatpush3.msk.msra.mxu0 %vm548_vm0, %v14996_v10  ;;  %13419 = vmatprep.mubr.msk.f32.mxu0 %vm451_vm1, %v15309_v2  ;;  %v15349_v10 = vld [vmem:[%s14977_s12 + $0x3a] sm:$0xff]  ;;  %v15363_v7 = vld [vmem:[%s14977_s12 + $0x52] sm:$0xff] }
  0x63   : > { %13469 = vmatprep.mubr.msk.f32.mxu1 %vm451_vm1, %v15018_v15  ;;  %13565 = vmatpush3.msk.msra.mxu1 %vm548_vm0, %v15001_v11  ;;  %v15354_v11 = vld [vmem:[%s14977_s12 + $0x4a] sm:$0xff]  ;;  %v15525_v15 = vld [vmem:[%s14977_s12 + $0x180] sm:$0xff] }
  0x64   : > { %13614 = vmatprep.subr.msk.mxu0 %vm548_vm0, %v15317_v4  ;;  %13664 = vmatprep.subr.msk.mxu1 %vm548_vm0, %v15322_v6  ;;  %22576 = vst [vmem:[#allocation34_spill] sm:$0xff] %v15525_v15 }
  0x65   : > { %13420 = vmatmul.mubr.msk.f32.gmra.mxu0 %vm451_vm1, %v15329_v9  ;;  %13470 = vmatmul.mubr.msk.f32.gmra.mxu1 %vm451_vm1, %v15037_v17  ;;  %v15368_v17 = vld [vmem:[%s14977_s12 + $0x62] sm:$0xff] }
  0x66   : > { %13422 = vmatprep.mubr.msk.f32.mxu0 %vm451_vm1, %v15334_v13  ;;  %13472 = vmatprep.mubr.msk.f32.mxu1 %vm451_vm1, %v15043_v19  ;;  %v15382_v19 = vld [vmem:[%s14977_s12 + $0x7a] sm:$0xff] }
  0x69   : > { %13423 = vmatmul.mubr.msk.f32.gmra.mxu0 %vm451_vm1, %v15349_v10  ;;  %13473 = vmatmul.mubr.msk.f32.gmra.mxu1 %vm451_vm1, %v15057_v21  ;;  %v15377_v21 = vld [vmem:[%s14977_s12 + $0x6a] sm:$0xff] }
  0x6a   : > { %13425 = vmatprep.mubr.msk.f32.mxu0 %vm451_vm1, %v15354_v11  ;;  %13475 = vmatprep.mubr.msk.f32.mxu1 %vm451_vm1, %v15063_v23  ;;  %v15396_v23 = vld [vmem:[%s14977_s12 + $0x92] sm:$0xff] }
  0x6d   : > { %13426 = vmatmul.mubr.msk.f32.gmra.mxu0 %vm451_vm1, %v15363_v7  ;;  %13476 = vmatmul.mubr.msk.f32.gmra.mxu1 %vm451_vm1, %v15077_v25  ;;  %v15391_v25 = vld [vmem:[%s14977_s12 + $0x82] sm:$0xff] }
  0x6e   : > { %13428 = vmatprep.mubr.msk.f32.mxu0 %vm451_vm1, %v15368_v17  ;;  %13478 = vmatprep.mubr.msk.f32.mxu1 %vm451_vm1, %v15083_v27  ;;  %v15410_v27 = vld [vmem:[%s14977_s12 + $0xaa] sm:$0xff] }
  0x71   : > { %13429 = vmatmul.mubr.msk.f32.gmra.mxu0 %vm451_vm1, %v15377_v21  ;;  %13479 = vmatmul.mubr.msk.f32.gmra.mxu1 %vm451_vm1, %v15097_v29  ;;  %v15405_v29 = vld [vmem:[%s14977_s12 + $0x9a] sm:$0xff] }
  0x72   : > { %13431 = vmatprep.mubr.msk.f32.mxu0 %vm451_vm1, %v15382_v19  ;;  %13481 = vmatprep.mubr.msk.f32.mxu1 %vm451_vm1, %v15103_v31  ;;  %v15424_v31 = vld [vmem:[%s14977_s12 + $0xc2] sm:$0xff] }
  0x75   : > { %13432 = vmatmul.mubr.msk.f32.gmra.mxu0 %vm451_vm1, %v15391_v25  ;;  %13482 = vmatmul.mubr.msk.f32.gmra.mxu1 %vm451_vm1, %v15117_v33  ;;  %v15419_v33 = vld [vmem:[%s14977_s12 + $0xb2] sm:$0xff] }
  0x76   : > { %13434 = vmatprep.mubr.msk.f32.mxu0 %vm451_vm1, %v15396_v23  ;;  %13484 = vmatprep.mubr.msk.f32.mxu1 %vm451_vm1, %v15123_v35  ;;  %v15438_v35 = vld [vmem:[%s14977_s12 + $0xda] sm:$0xff] }
  0x79   : > { %13435 = vmatmul.mubr.msk.f32.gmra.mxu0 %vm451_vm1, %v15405_v29  ;;  %13485 = vmatmul.mubr.msk.f32.gmra.mxu1 %vm451_vm1, %v15137_v37  ;;  %v15433_v37 = vld [vmem:[%s14977_s12 + $0xca] sm:$0xff] }
  0x7a   : > { %13437 = vmatprep.mubr.msk.f32.mxu0 %vm451_vm1, %v15410_v27  ;;  %13487 = vmatprep.mubr.msk.f32.mxu1 %vm451_vm1, %v15143_v39  ;;  %v15452_v39 = vld [vmem:[%s14977_s12 + $0xf2] sm:$0xff] }
  0x7d   : > { %13438 = vmatmul.mubr.msk.f32.gmra.mxu0 %vm451_vm1, %v15419_v33  ;;  %13488 = vmatmul.mubr.msk.f32.gmra.mxu1 %vm451_vm1, %v15157_v41  ;;  %v15447_v41 = vld [vmem:[%s14977_s12 + $0xe2] sm:$0xff] }
  0x7e   : > { %13440 = vmatprep.mubr.msk.f32.mxu0 %vm451_vm1, %v15424_v31  ;;  %13490 = vmatprep.mubr.msk.f32.mxu1 %vm451_vm1, %v15163_v43  ;;  %v15466_v43 = vld [vmem:[%s14977_s12 + $0x10a] sm:$0xff] }
  0x81   : > { %13441 = vmatmul.mubr.msk.f32.gmra.mxu0 %vm451_vm1, %v15433_v37  ;;  %13491 = vmatmul.mubr.msk.f32.gmra.mxu1 %vm451_vm1, %v15177_v45  ;;  %v15461_v45 = vld [vmem:[%s14977_s12 + $0xfa] sm:$0xff] }
  0x82   : > { %13443 = vmatprep.mubr.msk.f32.mxu0 %vm451_vm1, %v15438_v35  ;;  %13493 = vmatprep.mubr.msk.f32.mxu1 %vm451_vm1, %v15183_v47  ;;  %v15480_v47 = vld [vmem:[%s14977_s12 + $0x122] sm:$0xff] }
  0x85   : > { %13444 = vmatmul.mubr.msk.f32.gmra.mxu0 %vm451_vm1, %v15447_v41  ;;  %13494 = vmatmul.mubr.msk.f32.gmra.mxu1 %vm451_vm1, %v15197_v49  ;;  %v15475_v49 = vld [vmem:[%s14977_s12 + $0x112] sm:$0xff] }
  0x86   : > { %13446 = vmatprep.mubr.msk.f32.mxu0 %vm451_vm1, %v15452_v39  ;;  %13496 = vmatprep.mubr.msk.f32.mxu1 %vm451_vm1, %v15203_v51  ;;  %v15508_v51 = vld [vmem:[%s14977_s12 + $0x152] sm:$0xff] }
  0x89   : > { %13447 = vmatmul.mubr.msk.f32.gmra.mxu0 %vm451_vm1, %v15461_v45  ;;  %13497 = vmatmul.mubr.msk.f32.gmra.mxu1 %vm451_vm1, %v15217_v53  ;;  %v15489_v53 = vld [vmem:[%s14977_s12 + $0x12a] sm:$0xff] }
  0x8a   : > { %13449 = vmatprep.mubr.msk.f32.mxu0 %vm451_vm1, %v15466_v43  ;;  %13499 = vmatprep.mubr.msk.f32.mxu1 %vm451_vm1, %v15223_v55  ;;  %v15494_v55 = vld [vmem:[%s14977_s12 + $0x13a] sm:$0xff] }
  0x8d   : > { %13450 = vmatmul.mubr.msk.f32.gmra.mxu0 %vm451_vm1, %v15475_v49  ;;  %13500 = vmatmul.mubr.msk.f32.gmra.mxu1 %vm451_vm1, %v15237_v57  ;;  %v15503_v57 = vld [vmem:[%s14977_s12 + $0x142] sm:$0xff] }
  0x8e   : > { %13452 = vmatprep.mubr.msk.f32.mxu0 %vm451_vm1, %v15480_v47  ;;  %13502 = vmatprep.mubr.msk.f32.mxu1 %vm451_vm1, %v15243_v59  ;;  %v15522_v59 = vld [vmem:[%s14977_s12 + $0x16a] sm:$0xff] }
  0x91   : > { %13453 = vmatmul.mubr.msk.f32.gmra.mxu0 %vm451_vm1, %v15489_v53  ;;  %13503 = vmatmul.mubr.msk.f32.gmra.mxu1 %vm451_vm1, %v15257_v61  ;;  %v15517_v61 = vld [vmem:[%s14977_s12 + $0x15a] sm:$0xff] }
  0x92   : > { %13455 = vmatprep.mubr.msk.f32.mxu0 %vm451_vm1, %v15494_v55  ;;  %13505 = vmatprep.mubr.msk.f32.mxu1 %vm451_vm1, %v15263_v63  ;;  %v15539_v63 = vld [vmem:[%s14977_s12 + $0x188] sm:$0xff] }
  0x95   : > { %13456 = vmatmul.mubr.msk.f32.gmra.mxu0 %vm451_vm1, %v15503_v57  ;;  %13506 = vmatmul.mubr.msk.f32.gmra.mxu1 %vm451_vm1, %v15277_v1  ;;  %v15534_v1 = vld [vmem:[%s14977_s12 + $0x172] sm:$0xff] }
  0x96   : > { %13458 = vmatprep.mubr.msk.f32.mxu0 %vm451_vm1, %v15508_v51  ;;  %13508 = vmatprep.mubr.msk.f32.mxu1 %vm451_vm1, %v15283_v3 }
  0x99   : > { %13459 = vmatmul.mubr.msk.f32.gmra.mxu0 %vm451_vm1, %v15517_v61  ;;  %13509 = vmatmul.mubr.msk.f32.gmra.mxu1 %vm451_vm1, %v15297_v5 }
  0x9a   : > { %13461 = vmatprep.mubr.msk.f32.mxu0 %vm451_vm1, %v15522_v59  ;;  %13511 = vmatprep.mubr.msk.f32.mxu1 %vm451_vm1, %v15525_v15  ;;  %v15556_v15 = vld [vmem:[%s22546_s1 + $0x20] sm:$0xf] }
  0x9d   : > { %13462 = vmatmul.mubr.msk.f32.gmra.mxu0 %vm451_vm1, %v15534_v1  ;;  %13512 = vmatmul.mubr.msk.f32.gmra.mxu1 %vm451_vm1, %v15539_v63 }
  0x9e   : > { %13516 = vmatprep.mubr.msk.f32.mxu0 %vm451_vm1, %v14986_v8  ;;  %13566 = vmatprep.mubr.msk.f32.mxu1 %vm451_vm1, %v15309_v2  ;;  %v22577_v8 = vld [vmem:[#allocation32_spill] sm:$0xff] }
  0x9f   : > { %v22581_v2 = vld [vmem:[#allocation8_spill] sm:$0xff] }
  0xa1   : > { %13517 = vmatmul.mubr.msk.f32.vlgmr.msra.gmra.mxu0 %vm451_vm1, %v15007_v12  ;;  %13567 = vmatmul.mubr.msk.f32.vlgmr.msra.gmra.mxu1 %vm451_vm1, %v15329_v9  ;;  %v15673_v12 = vld [vmem:[%s14977_s12 + $0x181] sm:$0xff] }
  0xa2   : > { %13615 = vmatpush3.msk.msra.mxu0 %vm548_vm0, %v15317_v4  ;;  %13519 = vmatprep.mubr.msk.f32.mxu0 %vm451_vm1, %v15015_v14 }
  0xa3   : > { %13569 = vmatprep.mubr.msk.f32.mxu1 %vm451_vm1, %v15334_v13  ;;  %13665 = vmatpush3.msk.msra.mxu1 %vm548_vm0, %v15322_v6 }
  0xa4   : > { %13714 = vmatprep.subr.msk.mxu0 %vm548_vm0, %v15556_v15 }
  0xa5   : > { %13520 = vmatmul.mubr.msk.f32.gmra.mxu0 %vm451_vm1, %v15034_v16  ;;  %13570 = vmatmul.mubr.msk.f32.gmra.mxu1 %vm451_vm1, %v15349_v10 }
  0xa6   : > { %13522 = vmatprep.mubr.msk.f32.mxu0 %vm451_vm1, %v15040_v18  ;;  %13572 = vmatprep.mubr.msk.f32.mxu1 %vm451_vm1, %v15354_v11 }
  0xa9   : > { %13523 = vmatmul.mubr.msk.f32.gmra.mxu0 %vm451_vm1, %v15054_v20  ;;  %13573 = vmatmul.mubr.msk.f32.gmra.mxu1 %vm451_vm1, %v15363_v7 }
  0xaa   : > { %13525 = vmatprep.mubr.msk.f32.mxu0 %vm451_vm1, %v15060_v22  ;;  %13575 = vmatprep.mubr.msk.f32.mxu1 %vm451_vm1, %v15368_v17 }
  0xad   : > { %13526 = vmatmul.mubr.msk.f32.gmra.mxu0 %vm451_vm1, %v15074_v24  ;;  %13576 = vmatmul.mubr.msk.f32.gmra.mxu1 %vm451_vm1, %v15377_v21 }
  0xae   : > { %13528 = vmatprep.mubr.msk.f32.mxu0 %vm451_vm1, %v15080_v26  ;;  %13578 = vmatprep.mubr.msk.f32.mxu1 %vm451_vm1, %v15382_v19 }
  0xb1   : > { %13529 = vmatmul.mubr.msk.f32.gmra.mxu0 %vm451_vm1, %v15094_v28  ;;  %13579 = vmatmul.mubr.msk.f32.gmra.mxu1 %vm451_vm1, %v15391_v25 }
  0xb2   : > { %13531 = vmatprep.mubr.msk.f32.mxu0 %vm451_vm1, %v15100_v30  ;;  %13581 = vmatprep.mubr.msk.f32.mxu1 %vm451_vm1, %v15396_v23 }
  0xb5   : > { %13532 = vmatmul.mubr.msk.f32.gmra.mxu0 %vm451_vm1, %v15114_v32  ;;  %13582 = vmatmul.mubr.msk.f32.gmra.mxu1 %vm451_vm1, %v15405_v29 }
  0xb6   : > { %13534 = vmatprep.mubr.msk.f32.mxu0 %vm451_vm1, %v15120_v34  ;;  %13584 = vmatprep.mubr.msk.f32.mxu1 %vm451_vm1, %v15410_v27 }
  0xb9   : > { %13535 = vmatmul.mubr.msk.f32.gmra.mxu0 %vm451_vm1, %v15134_v36  ;;  %13585 = vmatmul.mubr.msk.f32.gmra.mxu1 %vm451_vm1, %v15419_v33 }
  0xba   : > { %13537 = vmatprep.mubr.msk.f32.mxu0 %vm451_vm1, %v15140_v38  ;;  %13587 = vmatprep.mubr.msk.f32.mxu1 %vm451_vm1, %v15424_v31 }
  0xbd   : > { %13538 = vmatmul.mubr.msk.f32.gmra.mxu0 %vm451_vm1, %v15154_v40  ;;  %13588 = vmatmul.mubr.msk.f32.gmra.mxu1 %vm451_vm1, %v15433_v37 }
  0xbe   : > { %13540 = vmatprep.mubr.msk.f32.mxu0 %vm451_vm1, %v15160_v42  ;;  %13590 = vmatprep.mubr.msk.f32.mxu1 %vm451_vm1, %v15438_v35 }
  0xc1   : > { %13541 = vmatmul.mubr.msk.f32.gmra.mxu0 %vm451_vm1, %v15174_v44  ;;  %13591 = vmatmul.mubr.msk.f32.gmra.mxu1 %vm451_vm1, %v15447_v41 }
  0xc2   : > { %13543 = vmatprep.mubr.msk.f32.mxu0 %vm451_vm1, %v15180_v46  ;;  %13593 = vmatprep.mubr.msk.f32.mxu1 %vm451_vm1, %v15452_v39 }
  0xc5   : > { %13544 = vmatmul.mubr.msk.f32.gmra.mxu0 %vm451_vm1, %v15194_v48  ;;  %13594 = vmatmul.mubr.msk.f32.gmra.mxu1 %vm451_vm1, %v15461_v45 }
  0xc6   : > { %13546 = vmatprep.mubr.msk.f32.mxu0 %vm451_vm1, %v15200_v50  ;;  %13596 = vmatprep.mubr.msk.f32.mxu1 %vm451_vm1, %v15466_v43 }
  0xc9   : > { %13547 = vmatmul.mubr.msk.f32.gmra.mxu0 %vm451_vm1, %v15214_v52  ;;  %13597 = vmatmul.mubr.msk.f32.gmra.mxu1 %vm451_vm1, %v15475_v49  ;;  %v22578_v49 = vld [vmem:[#allocation33_spill] sm:$0xff] }
  0xca   : > { %13549 = vmatprep.mubr.msk.f32.mxu0 %vm451_vm1, %v15220_v54  ;;  %13599 = vmatprep.mubr.msk.f32.mxu1 %vm451_vm1, %v15480_v47  ;;  %v15676_v47 = vld [vmem:[%s14977_s12 + $0x182] sm:$0xff] }
  0xcd   : > { %13550 = vmatmul.mubr.msk.f32.gmra.mxu0 %vm451_vm1, %v15234_v56  ;;  %13600 = vmatmul.mubr.msk.f32.gmra.mxu1 %vm451_vm1, %v15489_v53  ;;  %v15690_v53 = vld [vmem:[%s14977_s12 + $0x18a] sm:$0xff] }
  0xce   : > { %13552 = vmatprep.mubr.msk.f32.mxu0 %vm451_vm1, %v15240_v58  ;;  %13602 = vmatprep.mubr.msk.f32.mxu1 %vm451_vm1, %v15494_v55  ;;  %v22579_v55 = vld [vmem:[#allocation6_spill] sm:$0xff] }
  0xd1   : > { %13553 = vmatmul.mubr.msk.f32.gmra.mxu0 %vm451_vm1, %v15254_v60  ;;  %13603 = vmatmul.mubr.msk.f32.gmra.mxu1 %vm451_vm1, %v15503_v57 }
  0xd2   : > { %13555 = vmatprep.mubr.msk.f32.mxu0 %vm451_vm1, %v15260_v62  ;;  %13605 = vmatprep.mubr.msk.f32.mxu1 %vm451_vm1, %v15508_v51  ;;  %v15685_v51 = vld [vmem:[%s14977_s12 + $0x189] sm:$0xff] }
  0xd5   : > { %13556 = vmatmul.mubr.msk.f32.gmra.mxu0 %vm451_vm1, %v15274_v0  ;;  %13606 = vmatmul.mubr.msk.f32.gmra.mxu1 %vm451_vm1, %v15517_v61  ;;  %v22580_v61 = vld [vmem:[#allocation7_spill] sm:$0xff] }
  0xd6   : > { %13558 = vmatprep.mubr.msk.f32.mxu0 %vm451_vm1, %v22577_v8  ;;  %13608 = vmatprep.mubr.msk.f32.mxu1 %vm451_vm1, %v15522_v59 }
  0xd9   : > { %13559 = vmatmul.mubr.msk.f32.gmra.mxu0 %vm451_vm1, %v22578_v49  ;;  %13609 = vmatmul.mubr.msk.f32.gmra.mxu1 %vm451_vm1, %v15534_v1 }
  0xda   : > { %13561 = vmatprep.mubr.msk.f32.mxu0 %vm451_vm1, %v15673_v12  ;;  %13611 = vmatprep.mubr.msk.f32.mxu1 %vm451_vm1, %v15676_v47 }
  0xdd   : > { %13562 = vmatmul.mubr.msk.f32.gmra.mxu0 %vm451_vm1, %v15685_v51  ;;  %13612 = vmatmul.mubr.msk.f32.gmra.mxu1 %vm451_vm1, %v15690_v53 }
  0xde   : > { %13616 = vmatprep.mubr.msk.f32.mxu0 %vm451_vm1, %v22579_v55  ;;  %13666 = vmatprep.mubr.msk.f32.mxu1 %vm451_vm1, %v15015_v14 }
  0xe1   : > { %v13318_v57 = vpop.f32.mrf.mxu0  ;;  %v13368_v59 = vpop.f32.mrf.mxu1  ;;  %13617 = vmatmul.mubr.msk.f32.vlgmr.msra.gmra.mxu0 %vm451_vm1, %v22580_v61  ;;  %13667 = vmatmul.mubr.msk.f32.vlgmr.msra.gmra.mxu1 %vm451_vm1, %v15034_v16  ;;  %v22582_v61 = vld [vmem:[#allocation9_spill] sm:$0xff] }
  0xe2   : > { %v15704_v1 = vadd.f32 %v13368_v59, %v13318_v57  ;;  %13715 = vmatpush3.msk.msra.mxu0 %vm548_vm0, %v15556_v15  ;;  %13619 = vmatprep.mubr.msk.f32.mxu0 %vm451_vm1, %v22581_v2  ;;  %v22583_v15 = vld [vmem:[#allocation10_spill] sm:$0xff] }
  0xe3   : > { %v618_v4 = vpop.f32.mrf.mxu0  ;;  %v942_v6 = vpop.f32.mrf.mxu1  ;;  %13669 = vmatprep.mubr.msk.f32.mxu1 %vm451_vm1, %v15040_v18 }
  0xe4   : > { %v15712_v14 = vadd.f32 %v942_v6, %v618_v4  ;;  %v22584_v6 = vld [vmem:[#allocation11_spill] sm:$0xff] }
  0xe5   : > { %v13321_v9 = vpop.f32.mrf.mxu0  ;;  %v13371_v55 = vpop.f32.mrf.mxu1  ;;  %13620 = vmatmul.mubr.msk.f32.gmra.mxu0 %vm451_vm1, %v22582_v61  ;;  %13670 = vmatmul.mubr.msk.f32.gmra.mxu1 %vm451_vm1, %v15054_v20 }
  0xe6   : > { %v15718_v16 = vadd.f32 %v13371_v55, %v13321_v9  ;;  %13622 = vmatprep.mubr.msk.f32.mxu0 %vm451_vm1, %v22583_v15  ;;  %13672 = vmatprep.mubr.msk.f32.mxu1 %vm451_vm1, %v15060_v22  ;;  %v22585_v9 = vld [vmem:[#allocation12_spill] sm:$0xff] }
  0xe7   : > { %v628_v57 = vpop.f32.mrf.mxu0  ;;  %v952_v18 = vpop.f32.mrf.mxu1 }
  0xe8   : > { %v15724_v59 = vadd.f32 %v952_v18, %v628_v57  ;;  %v22586_v18 = vld [vmem:[#allocation13_spill] sm:$0xff] }
  0xe9   : > { %v13324_v2 = vpop.f32.mrf.mxu0  ;;  %v13374_v4 = vpop.f32.mrf.mxu1  ;;  %13623 = vmatmul.mubr.msk.f32.gmra.mxu0 %vm451_vm1, %v22584_v6  ;;  %13673 = vmatmul.mubr.msk.f32.gmra.mxu1 %vm451_vm1, %v15074_v24 }
  0xea   : > { %v15730_v20 = vadd.f32 %v13374_v4, %v13324_v2  ;;  %13625 = vmatprep.mubr.msk.f32.mxu0 %vm451_vm1, %v22585_v9  ;;  %13675 = vmatprep.mubr.msk.f32.mxu1 %vm451_vm1, %v15080_v26  ;;  %v22587_v2 = vld [vmem:[#allocation14_spill] sm:$0xff] }
  0xeb   : > { %v638_v22 = vpop.f32.mrf.mxu0  ;;  %v962_v55 = vpop.f32.mrf.mxu1 }
  0xec   : > { %v15736_v61 = vadd.f32 %v962_v55, %v638_v22  ;;  %v22588_v55 = vld [vmem:[#allocation15_spill] sm:$0xff] }
  0xed   : > { %v13327_v15 = vpop.f32.mrf.mxu0  ;;  %v13377_v57 = vpop.f32.mrf.mxu1  ;;  %13626 = vmatmul.mubr.msk.f32.gmra.mxu0 %vm451_vm1, %v22586_v18  ;;  %13676 = vmatmul.mubr.msk.f32.gmra.mxu1 %vm451_vm1, %v15094_v28 }
  0xee   : > { %v15742_v24 = vadd.f32 %v13377_v57, %v13327_v15  ;;  %13628 = vmatprep.mubr.msk.f32.mxu0 %vm451_vm1, %v22587_v2  ;;  %13678 = vmatprep.mubr.msk.f32.mxu1 %vm451_vm1, %v15100_v30  ;;  %v22589_v15 = vld [vmem:[#allocation16_spill] sm:$0xff] }
  0xef   : > { %v648_v26 = vpop.f32.mrf.mxu0  ;;  %v972_v4 = vpop.f32.mrf.mxu1 }
  0xf0   : > { %v15748_v6 = vadd.f32 %v972_v4, %v648_v26  ;;  %v22590_v4 = vld [vmem:[#allocation17_spill] sm:$0xff] }
  0xf1   : > { %v13330_v9 = vpop.f32.mrf.mxu0  ;;  %v13380_v22 = vpop.f32.mrf.mxu1  ;;  %13629 = vmatmul.mubr.msk.f32.gmra.mxu0 %vm451_vm1, %v22588_v55  ;;  %13679 = vmatmul.mubr.msk.f32.gmra.mxu1 %vm451_vm1, %v15114_v32 }
  0xf2   : > { %v15754_v28 = vadd.f32 %v13380_v22, %v13330_v9  ;;  %13631 = vmatprep.mubr.msk.f32.mxu0 %vm451_vm1, %v22589_v15  ;;  %13681 = vmatprep.mubr.msk.f32.mxu1 %vm451_vm1, %v15120_v34  ;;  %v22591_v9 = vld [vmem:[#allocation18_spill] sm:$0xff] }
  0xf3   : > { %v658_v30 = vpop.f32.mrf.mxu0  ;;  %v982_v57 = vpop.f32.mrf.mxu1 }
  0xf4   : > { %v15760_v18 = vadd.f32 %v982_v57, %v658_v30  ;;  %v22592_v57 = vld [vmem:[#allocation19_spill] sm:$0xff] }
  0xf5   : > { %v13333_v2 = vpop.f32.mrf.mxu0  ;;  %v13383_v26 = vpop.f32.mrf.mxu1  ;;  %13632 = vmatmul.mubr.msk.f32.gmra.mxu0 %vm451_vm1, %v22590_v4  ;;  %13682 = vmatmul.mubr.msk.f32.gmra.mxu1 %vm451_vm1, %v15134_v36 }
  0xf6   : > { %v15766_v32 = vadd.f32 %v13383_v26, %v13333_v2  ;;  %13634 = vmatprep.mubr.msk.f32.mxu0 %vm451_vm1, %v22591_v9  ;;  %13684 = vmatprep.mubr.msk.f32.mxu1 %vm451_vm1, %v15140_v38  ;;  %v22593_v2 = vld [vmem:[#allocation20_spill] sm:$0xff] }
  0xf7   : > { %v668_v34 = vpop.f32.mrf.mxu0  ;;  %v992_v22 = vpop.f32.mrf.mxu1 }
  0xf8   : > { %v15772_v55 = vadd.f32 %v992_v22, %v668_v34  ;;  %v22594_v22 = vld [vmem:[#allocation21_spill] sm:$0xff] }
  0xf9   : > { %v13336_v15 = vpop.f32.mrf.mxu0  ;;  %v13386_v30 = vpop.f32.mrf.mxu1  ;;  %13635 = vmatmul.mubr.msk.f32.gmra.mxu0 %vm451_vm1, %v22592_v57  ;;  %13685 = vmatmul.mubr.msk.f32.gmra.mxu1 %vm451_vm1, %v15154_v40 }
  0xfa   : > { %v15778_v36 = vadd.f32 %v13386_v30, %v13336_v15  ;;  %13637 = vmatprep.mubr.msk.f32.mxu0 %vm451_vm1, %v22593_v2  ;;  %13687 = vmatprep.mubr.msk.f32.mxu1 %vm451_vm1, %v15160_v42  ;;  %v22595_v15 = vld [vmem:[#allocation22_spill] sm:$0xff] }
  0xfb   : > { %v678_v38 = vpop.f32.mrf.mxu0  ;;  %v1002_v26 = vpop.f32.mrf.mxu1 }
  0xfc   : > { %v15784_v4 = vadd.f32 %v1002_v26, %v678_v38  ;;  %v22596_v26 = vld [vmem:[#allocation23_spill] sm:$0xff] }
  0xfd   : > { %v13339_v9 = vpop.f32.mrf.mxu0  ;;  %v13389_v34 = vpop.f32.mrf.mxu1  ;;  %13638 = vmatmul.mubr.msk.f32.gmra.mxu0 %vm451_vm1, %v22594_v22  ;;  %13688 = vmatmul.mubr.msk.f32.gmra.mxu1 %vm451_vm1, %v15174_v44 }
  0xfe   : > { %v15790_v40 = vadd.f32 %v13389_v34, %v13339_v9  ;;  %13640 = vmatprep.mubr.msk.f32.mxu0 %vm451_vm1, %v22595_v15  ;;  %13690 = vmatprep.mubr.msk.f32.mxu1 %vm451_vm1, %v15180_v46  ;;  %v22597_v9 = vld [vmem:[#allocation24_spill] sm:$0xff] }
  0xff   : > { %v688_v42 = vpop.f32.mrf.mxu0  ;;  %v1012_v30 = vpop.f32.mrf.mxu1 }
 0x100   : > { %v15796_v57 = vadd.f32 %v1012_v30, %v688_v42  ;;  %v22598_v42 = vld [vmem:[#allocation25_spill] sm:$0xff]  ;;  %v22599_v30 = vld [vmem:[#allocation26_spill] sm:$0xff] }
 0x101   : > { %v13342_v2 = vpop.f32.mrf.mxu0  ;;  %v13392_v38 = vpop.f32.mrf.mxu1  ;;  %13641 = vmatmul.mubr.msk.f32.gmra.mxu0 %vm451_vm1, %v22596_v26  ;;  %13691 = vmatmul.mubr.msk.f32.gmra.mxu1 %vm451_vm1, %v15194_v48 }
 0x102   : > { %v15802_v44 = vadd.f32 %v13392_v38, %v13342_v2  ;;  %13643 = vmatprep.mubr.msk.f32.mxu0 %vm451_vm1, %v22597_v9  ;;  %13693 = vmatprep.mubr.msk.f32.mxu1 %vm451_vm1, %v15200_v50  ;;  %v22601_v9 = vld [vmem:[#allocation27_spill] sm:$0xff] }
 0x103   : > { %v15808_v46 = vpop.f32.mrf.mxu0  ;;  %v15810_v34 = vpop.f32.mrf.mxu1 }
 0x105   : > { %v13345_v22 = vpop.f32.mrf.mxu0  ;;  %v13395_v15 = vpop.f32.mrf.mxu1  ;;  %13644 = vmatmul.mubr.msk.f32.gmra.mxu0 %vm451_vm1, %v22598_v42  ;;  %13694 = vmatmul.mubr.msk.f32.gmra.mxu1 %vm451_vm1, %v15214_v52 }
 0x106   : > { %v15816_v48 = vadd.f32 %v13395_v15, %v13345_v22  ;;  %13646 = vmatprep.mubr.msk.f32.mxu0 %vm451_vm1, %v22599_v30  ;;  %13696 = vmatprep.mubr.msk.f32.mxu1 %vm451_vm1, %v15220_v54  ;;  %v22602_v22 = vld [vmem:[#allocation28_spill] sm:$0xff] }
 0x107   : > { %v15822_v50 = vpop.f32.mrf.mxu0  ;;  %v15824_v2 = vpop.f32.mrf.mxu1 }
 0x108   : > { %22600 = vst [vmem:[#allocation32_spill] sm:$0xff] %v15824_v2  ;;  %v22604_v2 = vld [vmem:[#allocation29_spill] sm:$0xff] }
 0x109   : > { %v13348_v38 = vpop.f32.mrf.mxu0  ;;  %v13398_v26 = vpop.f32.mrf.mxu1  ;;  %13647 = vmatmul.mubr.msk.f32.gmra.mxu0 %vm451_vm1, %v22601_v9  ;;  %13697 = vmatmul.mubr.msk.f32.gmra.mxu1 %vm451_vm1, %v15234_v56 }
 0x10a   : > { %v15830_v52 = vadd.f32 %v13398_v26, %v13348_v38  ;;  %13649 = vmatprep.mubr.msk.f32.mxu0 %vm451_vm1, %v22602_v22  ;;  %13699 = vmatprep.mubr.msk.f32.mxu1 %vm451_vm1, %v15240_v58  ;;  %v22605_v38 = vld [vmem:[#allocation30_spill] sm:$0xff] }
 0x10b   : > { %v15836_v54 = vpop.f32.mrf.mxu0  ;;  %v15838_v15 = vpop.f32.mrf.mxu1 }
 0x10c   : > { %22603 = vst [vmem:[#allocation33_spill] sm:$0xff] %v15838_v15  ;;  %v22606_v15 = vld [vmem:[#allocation31_spill] sm:$0xff] }
 0x10d   : > { %v13351_v42 = vpop.f32.mrf.mxu0  ;;  %v13401_v30 = vpop.f32.mrf.mxu1  ;;  %13650 = vmatmul.mubr.msk.f32.gmra.mxu0 %vm451_vm1, %v22604_v2  ;;  %13700 = vmatmul.mubr.msk.f32.gmra.mxu1 %vm451_vm1, %v15254_v60 }
 0x10e   : > { %v15844_v56 = vadd.f32 %v13401_v30, %v13351_v42  ;;  %13652 = vmatprep.mubr.msk.f32.mxu0 %vm451_vm1, %v22605_v38  ;;  %13702 = vmatprep.mubr.msk.f32.mxu1 %vm451_vm1, %v15260_v62  ;;  %v11759_v38 = vld [vmem:[%s14977_s12 + $0x198] sm:$0xff] }
 0x10f   : > { %v15850_v58 = vpop.f32.mrf.mxu0  ;;  %v15852_v26 = vpop.f32.mrf.mxu1 }
 0x111   : > { %v13354_v9 = vpop.f32.mrf.mxu0  ;;  %v13404_v22 = vpop.f32.mrf.mxu1  ;;  %13653 = vmatmul.mubr.msk.f32.gmra.mxu0 %vm451_vm1, %v22606_v15  ;;  %13703 = vmatmul.mubr.msk.f32.gmra.mxu1 %vm451_vm1, %v15274_v0 }
 0x112   : > { %v15858_v60 = vadd.f32 %v13404_v22, %v13354_v9  ;;  %13655 = vmatprep.mubr.msk.f32.mxu0 %vm451_vm1, %v15283_v3  ;;  %13705 = vmatprep.mubr.msk.f32.mxu1 %vm451_vm1, %v22577_v8  ;;  %v22607_v3 = vld [vmem:[#allocation34_spill] sm:$0xff] }
 0x113   : > { %v15864_v62 = vpop.f32.mrf.mxu0  ;;  %v15866_v2 = vpop.f32.mrf.mxu1  ;;  %v11825_v9 = vld [vmem:[%s14977_s12 + $0x199] sm:$0xff] }
 0x115   : > { %v13357_v42 = vpop.f32.mrf.mxu0  ;;  %v13407_v30 = vpop.f32.mrf.mxu1  ;;  %13656 = vmatmul.mubr.msk.f32.gmra.mxu0 %vm451_vm1, %v15297_v5  ;;  %13706 = vmatmul.mubr.msk.f32.gmra.mxu1 %vm451_vm1, %v22578_v49 }
 0x116   : > { %v15872_v0 = vadd.f32 %v13407_v30, %v13357_v42  ;;  %13658 = vmatprep.mubr.msk.f32.mxu0 %vm451_vm1, %v22607_v3  ;;  %13708 = vmatprep.mubr.msk.f32.mxu1 %vm451_vm1, %v15673_v12  ;;  %v11760_v42 = vld [vmem:[%s14977_s12 + $0x1a0] sm:$0xff] }
 0x117   : > { %v15878_v8 = vpop.f32.mrf.mxu0  ;;  %v15880_v15 = vpop.f32.mrf.mxu1  ;;  %v11826_v12 = vld [vmem:[%s14977_s12 + $0x1a1] sm:$0xff] }
 0x118   : > { %22608 = vst [vmem:[#allocation6_spill] sm:$0xff] %v15878_v8  ;;  %22609 = vst [vmem:[#allocation7_spill] sm:$0xff] %v15880_v15 }
 0x119   : > { %v13360_v22 = vpop.f32.mrf.mxu0  ;;  %v13410_v5 = vpop.f32.mrf.mxu1  ;;  %13659 = vmatmul.mubr.msk.f32.gmra.mxu0 %vm451_vm1, %v15539_v63  ;;  %13709 = vmatmul.mubr.msk.f32.gmra.mxu1 %vm451_vm1, %v15685_v51 }
 0x11a   : > { %v15888_v49 = vadd.f32 %v13410_v5, %v13360_v22  ;;  %13661 = vmatprep.mubr.msk.f32.mxu0 %vm451_vm1, %v11759_v38  ;;  %13711 = vmatprep.mubr.msk.f32.mxu1 %vm451_vm1, %v11825_v9 }
 0x11b   : > { %v15894_v30 = vpop.f32.mrf.mxu0  ;;  %v15896_v3 = vpop.f32.mrf.mxu1 }
 0x11c   : > { %22610 = vst [vmem:[#allocation8_spill] sm:$0xff] %v15894_v30  ;;  %22611 = vst [vmem:[#allocation9_spill] sm:$0xff] %v15896_v3 }
 0x11d   : > { %v13363_v15 = vpop.f32.mrf.mxu0  ;;  %v13413_v8 = vpop.f32.mrf.mxu1  ;;  %13662 = vmatmul.mubr.msk.f32.gmra.mxu0 %vm451_vm1, %v11760_v42  ;;  %13712 = vmatmul.mubr.msk.f32.gmra.mxu1 %vm451_vm1, %v11826_v12 }
 0x11e   : > { %v15900_v63 = vadd.f32 %v13413_v8, %v13363_v15  ;;  %13716 = vmatprep.mubr.msk.f32.mxu0 %vm451_vm1, %v15334_v13 }
 0x11f   : > { %v15904_v51 = vpop.f32.mrf.mxu0  ;;  %v15906_v38 = vpop.f32.mrf.mxu1 }
 0x120   : > { %22612 = vst [vmem:[#allocation10_spill] sm:$0xff] %v15904_v51  ;;  %22613 = vst [vmem:[#allocation11_spill] sm:$0xff] %v15906_v38 }
 0x121   : > { %v13418_v9 = vpop.f32.mrf.mxu0  ;;  %13717 = vmatmul.mubr.msk.f32.vlgmr.msra.gmra.mxu0 %vm451_vm1, %v15349_v10  ;;  %v13468_v22 = vpop.f32.mrf.mxu1 }
 0x122   : > { %v1460_v5 = vadd.f32 %v13418_v9, %v15704_v1  ;;  %13719 = vmatprep.mubr.msk.f32.mxu0 %vm451_vm1, %v15354_v11 }
 0x123   : > { %v1300_v42 = vpop.f32.mrf.mxu0  ;;  %v15913_v8 = vpop.f32.mrf.mxu1 }
 0x124   : > { %v15916_v15 = vadd.f32 %v1300_v42, %v15712_v14  ;;  %v15918_v13 = vadd.f32 %v13468_v22, %v1460_v5 }
 0x125   : > { %v13421_v12 = vpop.f32.mrf.mxu0  ;;  %13720 = vmatmul.mubr.msk.f32.gmra.mxu0 %vm451_vm1, %v15363_v7  ;;  %v13471_v38 = vpop.f32.mrf.mxu1 }
 0x126   : > { %v1462_v10 = vadd.f32 %v13421_v12, %v15718_v16  ;;  %13722 = vmatprep.mubr.msk.f32.mxu0 %vm451_vm1, %v15368_v17 }
 0x127   : > { %v1310_v1 = vpop.f32.mrf.mxu0  ;;  %v15925_v11 = vpop.f32.mrf.mxu1 }
 0x128   : > { %v15928_v9 = vadd.f32 %v1310_v1, %v15724_v59  ;;  %v15930_v14 = vadd.f32 %v13471_v38, %v1462_v10 }
 0x129   : > { %v13424_v22 = vpop.f32.mrf.mxu0  ;;  %13723 = vmatmul.mubr.msk.f32.gmra.mxu0 %vm451_vm1, %v15377_v21  ;;  %v13474_v5 = vpop.f32.mrf.mxu1 }
 0x12a   : > { %v1464_v7 = vadd.f32 %v13424_v22, %v15730_v20  ;;  %13725 = vmatprep.mubr.msk.f32.mxu0 %vm451_vm1, %v15382_v19  ;;  %v11928_v19 = vld [vmem:[%s22397_s3 + $0x8] sm:$0xff] }
 0x12b   : > { %v1320_v16 = vpop.f32.mrf.mxu0  ;;  %v15937_v17 = vpop.f32.mrf.mxu1  ;;  %13764 = vmatprep.subr.mxu1 %v11928_v19 }
 0x12c   : > { %v15940_v42 = vadd.f32 %v1320_v16, %v15736_v61  ;;  %v15942_v59 = vadd.f32 %v13474_v5, %v1464_v7  ;;  %13765 = vmatpush3.msra.mxu1 %v11928_v19 }
 0x12d   : > { %v13427_v38 = vpop.f32.mrf.mxu0  ;;  %13726 = vmatmul.mubr.msk.f32.gmra.mxu0 %vm451_vm1, %v15391_v25  ;;  %v13477_v12 = vpop.f32.mrf.mxu1 }
 0x12e   : > { %v1466_v21 = vadd.f32 %v13427_v38, %v15742_v24  ;;  %13728 = vmatprep.mubr.msk.f32.mxu0 %vm451_vm1, %v15396_v23 }
 0x12f   : > { %v1330_v20 = vpop.f32.mrf.mxu0  ;;  %v15952_v10 = vpop.f32.mrf.mxu1 }
 0x130   : > { %v15955_v61 = vadd.f32 %v1330_v20, %v15748_v6  ;;  %v15957_v1 = vadd.f32 %v13477_v12, %v1466_v21 }
 0x131   : > { %v13430_v25 = vpop.f32.mrf.mxu0  ;;  %13729 = vmatmul.mubr.msk.f32.gmra.mxu0 %vm451_vm1, %v15405_v29  ;;  %v13480_v24 = vpop.f32.mrf.mxu1 }
 0x132   : > { %v1468_v23 = vadd.f32 %v13430_v25, %v15754_v28  ;;  %13731 = vmatprep.mubr.msk.f32.mxu0 %vm451_vm1, %v15410_v27 }
 0x133   : > { %v1340_v22 = vpop.f32.mrf.mxu0  ;;  %v15964_v5 = vpop.f32.mrf.mxu1 }
 0x134   : > { %v15967_v7 = vadd.f32 %v1340_v22, %v15760_v18  ;;  %v15969_v6 = vadd.f32 %v13480_v24, %v1468_v23 }
 0x135   : > { %v13433_v16 = vpop.f32.mrf.mxu0  ;;  %13732 = vmatmul.mubr.msk.f32.gmra.mxu0 %vm451_vm1, %v15419_v33  ;;  %v13483_v38 = vpop.f32.mrf.mxu1 }
 0x136   : > { %v1470_v29 = vadd.f32 %v13433_v16, %v15766_v32  ;;  %13734 = vmatprep.mubr.msk.f32.mxu0 %vm451_vm1, %v15424_v31 }
 0x137   : > { %v1350_v28 = vpop.f32.mrf.mxu0  ;;  %v15976_v27 = vpop.f32.mrf.mxu1 }
 0x138   : > { %v15979_v12 = vadd.f32 %v1350_v28, %v15772_v55  ;;  %v15981_v18 = vadd.f32 %v13483_v38, %v1470_v29  ;;  %v11881_v29 = vld [vmem:[%s14977_s12 + $0x122] sm:$0xff] }
 0x139   : > { %v13436_v21 = vpop.f32.mrf.mxu0  ;;  %13735 = vmatmul.mubr.msk.f32.gmra.mxu0 %vm451_vm1, %v15433_v37  ;;  %v13486_v19 = vpop.f32.mrf.mxu1 }
 0x13a   : > { %v1472_v33 = vadd.f32 %v13436_v21, %v15778_v36  ;;  %13737 = vmatprep.mubr.msk.f32.mxu0 %vm451_vm1, %v15438_v35 }
 0x13b   : > { %v1360_v32 = vpop.f32.mrf.mxu0  ;;  %v15988_v31 = vpop.f32.mrf.mxu1 }
 0x13c   : > { %22614 = vst [vmem:[#allocation12_spill] sm:$0xff] %v15988_v31  ;;  %v15991_v20 = vadd.f32 %v1360_v32, %v15784_v4  ;;  %v15993_v55 = vadd.f32 %v13486_v19, %v1472_v33  ;;  %v11883_v33 = vld [vmem:[%s14977_s12 + $0x13a] sm:$0xff] }
 0x13d   : > { %v13439_v25 = vpop.f32.mrf.mxu0  ;;  %13738 = vmatmul.mubr.msk.f32.gmra.mxu0 %vm451_vm1, %v15447_v41  ;;  %v13489_v37 = vpop.f32.mrf.mxu1 }
 0x13e   : > { %22615 = vst [vmem:[#allocation13_spill] sm:$0xff] %v15991_v20  ;;  %v1474_v36 = vadd.f32 %v13439_v25, %v15790_v40  ;;  %13740 = vmatprep.mubr.msk.f32.mxu0 %vm451_vm1, %v15452_v39  ;;  %v1023_v40 = vadd.f32 %v15810_v34, %v15808_v46  ;;  %v11880_v39 = vld [vmem:[%s14977_s12 + $0x112] sm:$0xff] }
 0x13f   : > { %v1370_v35 = vpop.f32.mrf.mxu0  ;;  %v16000_v24 = vpop.f32.mrf.mxu1 }
 0x140   : > { %22616 = vst [vmem:[#allocation14_spill] sm:$0xff] %v16000_v24  ;;  %v16003_v4 = vadd.f32 %v1370_v35, %v15796_v57  ;;  %v16005_v23 = vadd.f32 %v13489_v37, %v1474_v36 }
 0x141   : > { %v13442_v22 = vpop.f32.mrf.mxu0  ;;  %13741 = vmatmul.mubr.msk.f32.gmra.mxu0 %vm451_vm1, %v15461_v45  ;;  %v13492_v41 = vpop.f32.mrf.mxu1 }
 0x142   : > { %22617 = vst [vmem:[#allocation15_spill] sm:$0xff] %v16003_v4  ;;  %v1476_v16 = vadd.f32 %v13442_v22, %v15802_v44  ;;  %13743 = vmatprep.mubr.msk.f32.mxu0 %vm451_vm1, %v15466_v43  ;;  %v11882_v43 = vld [vmem:[%s14977_s12 + $0x12a] sm:$0xff] }
 0x143   : > { %v1380_v57 = vpop.f32.mrf.mxu0  ;;  %v16015_v38 = vpop.f32.mrf.mxu1 }
 0x144   : > { %22618 = vst [vmem:[#allocation16_spill] sm:$0xff] %v16015_v38  ;;  %v16018_v28 = vadd.f32 %v1380_v57, %v1023_v40  ;;  %v16020_v21 = vadd.f32 %v13492_v41, %v1476_v16  ;;  %v11885_v41 = vld [vmem:[%s14977_s12 + $0x152] sm:$0xff] }
 0x145   : > { %v13445_v45 = vpop.f32.mrf.mxu0  ;;  %13744 = vmatmul.mubr.msk.f32.gmra.mxu0 %vm451_vm1, %v11880_v39  ;;  %v13495_v46 = vpop.f32.mrf.mxu1 }
 0x146   : > { %22619 = vst [vmem:[#allocation17_spill] sm:$0xff] %v16018_v28  ;;  %v1478_v44 = vadd.f32 %v13445_v45, %v15816_v48  ;;  %13746 = vmatprep.mubr.msk.f32.mxu0 %vm451_vm1, %v11881_v29  ;;  %v11884_v48 = vld [vmem:[%s14977_s12 + $0x142] sm:$0xff] }
 0x147   : > { %v16026_v34 = vpop.f32.mrf.mxu0  ;;  %v16028_v19 = vpop.f32.mrf.mxu1 }
 0x148   : > { %22620 = vst [vmem:[#allocation18_spill] sm:$0xff] %v16026_v34  ;;  %22621 = vst [vmem:[#allocation19_spill] sm:$0xff] %v16028_v19  ;;  %v16031_v32 = vadd.f32 %v13495_v46, %v1478_v44  ;;  %v11887_v46 = vld [vmem:[%s14977_s12 + $0x16a] sm:$0xff] }
 0x149   : > { %v13448_v25 = vpop.f32.mrf.mxu0  ;;  %13747 = vmatmul.mubr.msk.f32.gmra.mxu0 %vm451_vm1, %v11882_v43  ;;  %v13498_v37 = vpop.f32.mrf.mxu1 }
 0x14a   : > { %v1480_v36 = vadd.f32 %v13448_v25, %v15830_v52  ;;  %13749 = vmatprep.mubr.msk.f32.mxu0 %vm451_vm1, %v11883_v33  ;;  %v11886_v52 = vld [vmem:[%s14977_s12 + $0x15a] sm:$0xff] }
 0x14b   : > { %v16037_v35 = vpop.f32.mrf.mxu0  ;;  %v16039_v22 = vpop.f32.mrf.mxu1 }
 0x14c   : > { %22622 = vst [vmem:[#allocation20_spill] sm:$0xff] %v16037_v35  ;;  %22623 = vst [vmem:[#allocation21_spill] sm:$0xff] %v16039_v22  ;;  %v16042_v40 = vadd.f32 %v13498_v37, %v1480_v36 }
 0x14d   : > { %v13451_v16 = vpop.f32.mrf.mxu0  ;;  %13750 = vmatmul.mubr.msk.f32.gmra.mxu0 %vm451_vm1, %v11884_v48  ;;  %v13501_v39 = vpop.f32.mrf.mxu1 }
 0x14e   : > { %v1482_v57 = vadd.f32 %v13451_v16, %v15844_v56  ;;  %13752 = vmatprep.mubr.msk.f32.mxu0 %vm451_vm1, %v11885_v41  ;;  %v11888_v56 = vld [vmem:[%s14977_s12 + $0x172] sm:$0xff] }
 0x14f   : > { %v16048_v29 = vpop.f32.mrf.mxu0  ;;  %v16050_v45 = vpop.f32.mrf.mxu1 }
 0x150   : > { %22624 = vst [vmem:[#allocation22_spill] sm:$0xff] %v16048_v29  ;;  %22625 = vst [vmem:[#allocation23_spill] sm:$0xff] %v16050_v45  ;;  %v16053_v44 = vadd.f32 %v13501_v39, %v1482_v57 }
 0x151   : > { %v13454_v43 = vpop.f32.mrf.mxu0  ;;  %13753 = vmatmul.mubr.msk.f32.gmra.mxu0 %vm451_vm1, %v11886_v52  ;;  %v13504_v33 = vpop.f32.mrf.mxu1  ;;  %v11891_v52 = vld [vmem:[%s14977_s12 + $0x19a] sm:$0xff] }
 0x152   : > { %v1484_v25 = vadd.f32 %v13454_v43, %v15858_v60  ;;  %13755 = vmatprep.mubr.msk.f32.mxu0 %vm451_vm1, %v11887_v46 }
 0x153   : > { %v16059_v37 = vpop.f32.mrf.mxu0  ;;  %v16061_v36 = vpop.f32.mrf.mxu1 }
 0x154   : > { %22626 = vst [vmem:[#allocation24_spill] sm:$0xff] %v16059_v37  ;;  %22627 = vst [vmem:[#allocation25_spill] sm:$0xff] %v16061_v36  ;;  %v16063_v48 = vadd.f32 %v13504_v33, %v1484_v25 }
 0x155   : > { %v13457_v41 = vpop.f32.mrf.mxu0  ;;  %13756 = vmatmul.mubr.msk.f32.gmra.mxu0 %vm451_vm1, %v11888_v56  ;;  %v13507_v16 = vpop.f32.mrf.mxu1 }
 0x156   : > { %v1486_v39 = vadd.f32 %v13457_v41, %v15872_v0  ;;  %13758 = vmatprep.mubr.msk.f32.mxu0 %vm451_vm1, %v15676_v47  ;;  %v11892_v0 = vld [vmem:[%s14977_s12 + $0x1a2] sm:$0xff] }
 0x157   : > { %v16069_v60 = vpop.f32.mrf.mxu0  ;;  %v16071_v57 = vpop.f32.mrf.mxu1 }
 0x158   : > { %22628 = vst [vmem:[#allocation26_spill] sm:$0xff] %v16069_v60  ;;  %22629 = vst [vmem:[#allocation27_spill] sm:$0xff] %v16071_v57  ;;  %v16074_v46 = vadd.f32 %v13507_v16, %v1486_v39 }
 0x159   : > { %v13460_v43 = vpop.f32.mrf.mxu0  ;;  %13759 = vmatmul.mubr.msk.f32.gmra.mxu0 %vm451_vm1, %v15690_v53  ;;  %v13510_v33 = vpop.f32.mrf.mxu1 }
 0x15a   : > { %v1488_v25 = vadd.f32 %v13460_v43, %v15888_v49  ;;  %13761 = vmatprep.mubr.msk.f32.mxu0 %vm451_vm1, %v11891_v52 }
 0x15b   : > { %v16081_v56 = vpop.f32.mrf.mxu0  ;;  %v16083_v47 = vpop.f32.mrf.mxu1 }
 0x15c   : > { %22630 = vst [vmem:[#allocation28_spill] sm:$0xff] %v16081_v56  ;;  %22631 = vst [vmem:[#allocation29_spill] sm:$0xff] %v16083_v47  ;;  %v16085_v41 = vadd.f32 %v13510_v33, %v1488_v25  ;;  %v4025_v47 = vld [vmem:[%s22397_s3] sm:$0xff] }
 0x15d   : > { %v13463_v57 = vpop.f32.mrf.mxu0  ;;  %13762 = vmatmul.mubr.msk.f32.gmra.mxu0 %vm451_vm1, %v11892_v0  ;;  %v13513_v16 = vpop.f32.mrf.mxu1  ;;  %v22437_v0 = vmov 0.0   ;;  %13814 = vmatprep.subr.mxu0 %v4025_v47 }
 0x15e   : > { %v1490_v39 = vadd.f32 %v13463_v57, %v15900_v63  ;;  %3910 = vst.msk [vmem:[#allocation2 + $0x20] sm:$0xff] %vm3904_vm2, %v22437_v0  ;;  %3905 = vst.msk [vmem:[#allocation2] sm:$0xff] %vm3904_vm2, %v22437_v0  ;;  %13815 = vmatpush3.msra.mxu0 %v4025_v47 }
 0x15f   : > { %v16089_v60 = vpop.f32.mrf.mxu0  ;;  %v16091_v53 = vpop.f32.mrf.mxu1  ;;  %3906 = vst.msk [vmem:[#allocation2 + $0x8] sm:$0xff] %vm3904_vm2, %v22437_v0  ;;  %3909 = vst.msk [vmem:[#allocation2 + $0x18] sm:$0xff] %vm3904_vm2, %v22437_v0 }
 0x160   : > { %22632 = vst [vmem:[#allocation30_spill] sm:$0xff] %v16089_v60  ;;  %22633 = vst [vmem:[#allocation31_spill] sm:$0xff] %v16091_v53  ;;  %v16093_v49 = vadd.f32 %v13513_v16, %v1490_v39 }
 0x161   : > { %v13518_v52 = vpop.f32.mrf.mxu0  ;;  %v16095_v43 = vpop.f32.mrf.mxu1  ;;  %3912 = vst.msk [vmem:[#allocation2 + $0x30] sm:$0xff] %vm3904_vm2, %v22437_v0  ;;  %3913 = vst.msk [vmem:[#allocation2 + $0x38] sm:$0xff] %vm3904_vm2, %v22437_v0 }
 0x162   : > { %v16098_v56 = vadd.f32 %v13518_v52, %v15918_v13  ;;  %3915 = vst.msk [vmem:[#allocation2 + $0x48] sm:$0xff] %vm3904_vm2, %v22437_v0  ;;  %3916 = vst.msk [vmem:[#allocation2 + $0x50] sm:$0xff] %vm3904_vm2, %v22437_v0 }
 0x163   : > { %v16100_v33 = vpop.f32.mrf.mxu0  ;;  %v16102_v25 = vpop.f32.mrf.mxu1  ;;  %3918 = vst.msk [vmem:[#allocation2 + $0x60] sm:$0xff] %vm3904_vm2, %v22437_v0  ;;  %3919 = vst.msk [vmem:[#allocation2 + $0x68] sm:$0xff] %vm3904_vm2, %v22437_v0 }
 0x164   : > { %3921 = vst.msk [vmem:[#allocation2 + $0x78] sm:$0xff] %vm3904_vm2, %v22437_v0  ;;  %3922 = vst.msk [vmem:[#allocation2 + $0x80] sm:$0xff] %vm3904_vm2, %v22437_v0 }
 0x165   : > { %3924 = vst.msk [vmem:[#allocation2 + $0x90] sm:$0xff] %vm3904_vm2, %v22437_v0  ;;  %3925 = vst.msk [vmem:[#allocation2 + $0x98] sm:$0xff] %vm3904_vm2, %v22437_v0  ;;  %v13521_v63 = vpop.f32.mrf.mxu0  ;;  %v16176_v13 = vpop.f32.mrf.mxu1 }
 0x166   : > { %3927 = vst.msk [vmem:[#allocation2 + $0xa8] sm:$0xff] %vm3904_vm2, %v22437_v0  ;;  %3928 = vst.msk [vmem:[#allocation2 + $0xb0] sm:$0xff] %vm3904_vm2, %v22437_v0  ;;  %v16215_v57 = vadd.f32 %v13521_v63, %v15930_v14  ;;  %v4026_v14 = vld [vmem:[#allocation2 + $0x1] sm:$0xff] }
 0x167   : > { %3930 = vst.msk [vmem:[#allocation2 + $0xc0] sm:$0xff] %vm3904_vm2, %v22437_v0  ;;  %3931 = vst.msk [vmem:[#allocation2 + $0xc8] sm:$0xff] %vm3904_vm2, %v22437_v0  ;;  %v16217_v16 = vpop.f32.mrf.mxu0  ;;  %v16219_v39 = vpop.f32.mrf.mxu1  ;;  %v3993_v63 = vld [vmem:[#allocation2] sm:$0xff]  ;;  %13766 = vmatprep.mubr.msk.f32.mxu1 %vm3904_vm2, %v4026_v14  ;;  %v3994_v45 = vld [vmem:[#allocation2 + $0x8] sm:$0xff] }
 0x168   : > { %3933 = vst.msk [vmem:[#allocation2 + $0xd8] sm:$0xff] %vm3904_vm2, %v22437_v0  ;;  %3934 = vst.msk [vmem:[#allocation2 + $0xe0] sm:$0xff] %vm3904_vm2, %v22437_v0  ;;  %13816 = vmatprep.mubr.msk.f32.mxu0 %vm3904_vm2, %v3993_v63 }
 0x169   : > { %3936 = vst.msk [vmem:[#allocation2 + $0xf0] sm:$0xff] %vm3904_vm2, %v22437_v0  ;;  %3937 = vst.msk [vmem:[#allocation2 + $0xf8] sm:$0xff] %vm3904_vm2, %v22437_v0  ;;  %v13524_v52 = vpop.f32.mrf.mxu0  ;;  %v16221_v53 = vpop.f32.mrf.mxu1  ;;  %13817 = vmatmul.mubr.msk.f32.vlgmr.msra.gmra.mxu0 %vm3904_vm2, %v3994_v45 }
 0x16a   : > { %3939 = vst.msk [vmem:[#allocation2 + $0x108] sm:$0xff] %vm3904_vm2, %v22437_v0  ;;  %3940 = vst.msk [vmem:[#allocation2 + $0x110] sm:$0xff] %vm3904_vm2, %v22437_v0  ;;  %v16224_v60 = vadd.f32 %v13524_v52, %v15942_v59 }
 0x16b   : > { %3942 = vst.msk [vmem:[#allocation2 + $0x120] sm:$0xff] %vm3904_vm2, %v22437_v0  ;;  %3943 = vst.msk [vmem:[#allocation2 + $0x128] sm:$0xff] %vm3904_vm2, %v22437_v0  ;;  %v16229_v36 = vpop.f32.mrf.mxu0 }
 0x16c   : > { %3945 = vst.msk [vmem:[#allocation2 + $0x138] sm:$0xff] %vm3904_vm2, %v22437_v0  ;;  %3946 = vst.msk [vmem:[#allocation2 + $0x140] sm:$0xff] %vm3904_vm2, %v22437_v0 }
 0x16d   : > { %3948 = vst.msk [vmem:[#allocation2 + $0x150] sm:$0xff] %vm3904_vm2, %v22437_v0  ;;  %3949 = vst.msk [vmem:[#allocation2 + $0x158] sm:$0xff] %vm3904_vm2, %v22437_v0  ;;  %v13527_v29 = vpop.f32.mrf.mxu0 }
 0x16e   : > { %3951 = vst.msk [vmem:[#allocation2 + $0x168] sm:$0xff] %vm3904_vm2, %v22437_v0  ;;  %3952 = vst.msk [vmem:[#allocation2 + $0x170] sm:$0xff] %vm3904_vm2, %v22437_v0  ;;  %v16239_v59 = vadd.f32 %v13527_v29, %v15957_v1  ;;  %v11993_v1 = vld [vmem:[%s22397_s3 + $0x10] sm:$0xff] }
 0x16f   : > { %3954 = vst.msk [vmem:[#allocation2 + $0x180] sm:$0xff] %vm3904_vm2, %v22437_v0  ;;  %3955 = vst.msk [vmem:[#allocation2 + $0x188] sm:$0xff] %vm3904_vm2, %v22437_v0  ;;  %v16242_v52 = vpop.f32.mrf.mxu0  ;;  %13864 = vmatprep.subr.mxu1 %v11993_v1 }
 0x170   : > { %3957 = vst.msk [vmem:[#allocation2 + $0x198] sm:$0xff] %vm3904_vm2, %v22437_v0  ;;  %3958 = vst.msk [vmem:[#allocation2 + $0x1a0] sm:$0xff] %vm3904_vm2, %v22437_v0 }
 0x171   : > { %3911 = vst.msk [vmem:[#allocation2 + $0x28] sm:$0x3] %vm3907_vm3, %v22437_v0  ;;  %3908 = vst.msk [vmem:[#allocation2 + $0x10] sm:$0x3] %vm3907_vm3, %v22437_v0  ;;  %v13530_v14 = vpop.f32.mrf.mxu0 }
 0x172   : > { %3914 = vst.msk [vmem:[#allocation2 + $0x40] sm:$0x3] %vm3907_vm3, %v22437_v0  ;;  %3917 = vst.msk [vmem:[#allocation2 + $0x58] sm:$0x3] %vm3907_vm3, %v22437_v0  ;;  %v16249_v19 = vadd.f32 %v13530_v14, %v15969_v6 }
 0x173   : > { %3920 = vst.msk [vmem:[#allocation2 + $0x70] sm:$0x3] %vm3907_vm3, %v22437_v0  ;;  %3923 = vst.msk [vmem:[#allocation2 + $0x88] sm:$0x3] %vm3907_vm3, %v22437_v0  ;;  %v16251_v34 = vpop.f32.mrf.mxu0 }
 0x174   : > { %3926 = vst.msk [vmem:[#allocation2 + $0xa0] sm:$0x3] %vm3907_vm3, %v22437_v0  ;;  %3929 = vst.msk [vmem:[#allocation2 + $0xb8] sm:$0x3] %vm3907_vm3, %v22437_v0 }
 0x175   : > { %3932 = vst.msk [vmem:[#allocation2 + $0xd0] sm:$0x3] %vm3907_vm3, %v22437_v0  ;;  %3935 = vst.msk [vmem:[#allocation2 + $0xe8] sm:$0x3] %vm3907_vm3, %v22437_v0  ;;  %v13533_v29 = vpop.f32.mrf.mxu0 }
 0x176   : > { %3938 = vst.msk [vmem:[#allocation2 + $0x100] sm:$0x3] %vm3907_vm3, %v22437_v0  ;;  %3941 = vst.msk [vmem:[#allocation2 + $0x118] sm:$0x3] %vm3907_vm3, %v22437_v0 }
 0x177   : > { %3944 = vst.msk [vmem:[#allocation2 + $0x130] sm:$0x3] %vm3907_vm3, %v22437_v0  ;;  %3947 = vst.msk [vmem:[#allocation2 + $0x148] sm:$0x3] %vm3907_vm3, %v22437_v0  ;;  %v16263_v38 = vpop.f32.mrf.mxu0 }
 0x178   : > { %3950 = vst.msk [vmem:[#allocation2 + $0x160] sm:$0x3] %vm3907_vm3, %v22437_v0  ;;  %3953 = vst.msk [vmem:[#allocation2 + $0x178] sm:$0x3] %vm3907_vm3, %v22437_v0  ;;  %v4027_v37 = vld [vmem:[#allocation2 + $0x9] sm:$0xff] }
 0x179   : > { %3956 = vst.msk [vmem:[#allocation2 + $0x190] sm:$0x3] %vm3907_vm3, %v22437_v0  ;;  %3959 = vst.msk [vmem:[#allocation2 + $0x1a8] sm:$0x3] %vm3907_vm3, %v22437_v0  ;;  %v16231_v0 = vpop.f32.mrf.mxu1  ;;  %13767 = vmatmul.mubr.msk.f32.vlgmr.msra.gmra.mxu1 %vm3904_vm2, %v4027_v37  ;;  %v16261_v37 = vadd.f32 %v13533_v29, %v15981_v18  ;;  %v13536_v14 = vpop.f32.mrf.mxu0 }
 0x17a   : > { %13865 = vmatpush3.msra.mxu1 %v11993_v1  ;;  %v16270_v24 = vadd.f32 %v13536_v14, %v15993_v55 }
 0x17b   : > { %v16234_v22 = vpop.f32.mrf.mxu1  ;;  %22635 = vst [vmem:[#allocation35_spill] sm:$0xff] %v16261_v37  ;;  %v16272_v4 = vpop.f32.mrf.mxu0 }
 0x17c   : > { %22638 = vst [vmem:[#allocation38_spill] sm:$0xff] %v16270_v24  ;;  %22639 = vst [vmem:[#allocation39_spill] sm:$0xff] %v16272_v4 }
 0x17d   : > { %v16244_v35 = vpop.f32.mrf.mxu1  ;;  %v13539_v3 = vpop.f32.mrf.mxu0 }
 0x17e   : > { %v16279_v18 = vadd.f32 %v13539_v3, %v16005_v23 }
 0x17f   : > { %v16246_v47 = vpop.f32.mrf.mxu1  ;;  %v16281_v1 = vpop.f32.mrf.mxu0 }
 0x180   : > { %22642 = vst [vmem:[#allocation42_spill] sm:$0xff] %v16279_v18  ;;  %22643 = vst [vmem:[#allocation43_spill] sm:$0xff] %v16281_v1 }
 0x181   : > { %v16253_v63 = vpop.f32.mrf.mxu1 }
 0x183   : > { %v16258_v45 = vpop.f32.mrf.mxu1 }
 0x184   : > { %22634 = vst [vmem:[#allocation34_spill] sm:$0xff] %v16258_v45 }
 0x185   : > { %v16265_v6 = vpop.f32.mrf.mxu1 }
 0x186   : > { %22636 = vst [vmem:[#allocation36_spill] sm:$0xff] %v16265_v6  ;;  %v13542_v6 = vpop.f32.mrf.mxu0 }
 0x187   : > { %v16267_v28 = vpop.f32.mrf.mxu1  ;;  %v16288_v55 = vadd.f32 %v13542_v6, %v16020_v21 }
 0x188   : > { %22637 = vst [vmem:[#allocation37_spill] sm:$0xff] %v16267_v28  ;;  %v16290_v14 = vpop.f32.mrf.mxu0 }
 0x189   : > { %v16274_v51 = vpop.f32.mrf.mxu1  ;;  %22646 = vst [vmem:[#allocation46_spill] sm:$0xff] %v16288_v55  ;;  %22647 = vst [vmem:[#allocation47_spill] sm:$0xff] %v16290_v14 }
 0x18a   : > { %22640 = vst [vmem:[#allocation40_spill] sm:$0xff] %v16274_v51  ;;  %v13545_v51 = vpop.f32.mrf.mxu0 }
 0x18b   : > { %v16276_v30 = vpop.f32.mrf.mxu1  ;;  %v16297_v3 = vadd.f32 %v13545_v51, %v16031_v32 }
 0x18c   : > { %22641 = vst [vmem:[#allocation41_spill] sm:$0xff] %v16276_v30  ;;  %v16299_v23 = vpop.f32.mrf.mxu0 }
 0x18d   : > { %v16283_v29 = vpop.f32.mrf.mxu1  ;;  %22650 = vst [vmem:[#allocation50_spill] sm:$0xff] %v16297_v3  ;;  %22651 = vst [vmem:[#allocation51_spill] sm:$0xff] %v16299_v23 }
 0x18e   : > { %22644 = vst [vmem:[#allocation44_spill] sm:$0xff] %v16283_v29  ;;  %v13548_v29 = vpop.f32.mrf.mxu0 }
 0x18f   : > { %v16285_v45 = vpop.f32.mrf.mxu1  ;;  %v16306_v21 = vadd.f32 %v13548_v29, %v16042_v40 }
 0x190   : > { %22645 = vst [vmem:[#allocation45_spill] sm:$0xff] %v16285_v45  ;;  %v16308_v6 = vpop.f32.mrf.mxu0 }
 0x191   : > { %v16292_v28 = vpop.f32.mrf.mxu1  ;;  %22654 = vst [vmem:[#allocation54_spill] sm:$0xff] %v16306_v21  ;;  %22655 = vst [vmem:[#allocation55_spill] sm:$0xff] %v16308_v6 }
 0x192   : > { %22648 = vst [vmem:[#allocation48_spill] sm:$0xff] %v16292_v28  ;;  %v13551_v28 = vpop.f32.mrf.mxu0 }
 0x193   : > { %v16294_v24 = vpop.f32.mrf.mxu1  ;;  %v16315_v51 = vadd.f32 %v13551_v28, %v16053_v44 }
 0x194   : > { %22649 = vst [vmem:[#allocation49_spill] sm:$0xff] %v16294_v24  ;;  %v16317_v32 = vpop.f32.mrf.mxu0 }
 0x195   : > { %v16301_v30 = vpop.f32.mrf.mxu1  ;;  %22658 = vst [vmem:[#allocation58_spill] sm:$0xff] %v16315_v51  ;;  %22659 = vst [vmem:[#allocation59_spill] sm:$0xff] %v16317_v32 }
 0x196   : > { %22652 = vst [vmem:[#allocation52_spill] sm:$0xff] %v16301_v30  ;;  %v13554_v30 = vpop.f32.mrf.mxu0 }
 0x197   : > { %v16303_v18 = vpop.f32.mrf.mxu1  ;;  %v16324_v40 = vadd.f32 %v13554_v30, %v16063_v48 }
 0x198   : > { %22653 = vst [vmem:[#allocation53_spill] sm:$0xff] %v16303_v18  ;;  %v16326_v29 = vpop.f32.mrf.mxu0 }
 0x199   : > { %v16310_v45 = vpop.f32.mrf.mxu1  ;;  %22662 = vst [vmem:[#allocation62_spill] sm:$0xff] %v16324_v40  ;;  %22663 = vst [vmem:[#allocation63_spill] sm:$0xff] %v16326_v29 }
 0x19a   : > { %22656 = vst [vmem:[#allocation56_spill] sm:$0xff] %v16310_v45  ;;  %v13557_v45 = vpop.f32.mrf.mxu0 }
 0x19b   : > { %v16312_v55 = vpop.f32.mrf.mxu1  ;;  %v16333_v28 = vadd.f32 %v13557_v45, %v16074_v46 }
 0x19c   : > { %22657 = vst [vmem:[#allocation57_spill] sm:$0xff] %v16312_v55  ;;  %v16335_v44 = vpop.f32.mrf.mxu0 }
 0x19d   : > { %v16319_v24 = vpop.f32.mrf.mxu1  ;;  %22666 = vst [vmem:[#allocation66_spill] sm:$0xff] %v16333_v28  ;;  %22667 = vst [vmem:[#allocation67_spill] sm:$0xff] %v16335_v44 }
 0x19e   : > { %22660 = vst [vmem:[#allocation60_spill] sm:$0xff] %v16319_v24  ;;  %v13560_v24 = vpop.f32.mrf.mxu0 }
 0x19f   : > { %v16321_v3 = vpop.f32.mrf.mxu1  ;;  %v16342_v30 = vadd.f32 %v13560_v24, %v16085_v41 }
 0x1a0   : > { %22661 = vst [vmem:[#allocation61_spill] sm:$0xff] %v16321_v3  ;;  %v16344_v48 = vpop.f32.mrf.mxu0 }
 0x1a1   : > { %v16328_v18 = vpop.f32.mrf.mxu1  ;;  %22670 = vst [vmem:[#allocation70_spill] sm:$0xff] %v16342_v30  ;;  %22671 = vst [vmem:[#allocation71_spill] sm:$0xff] %v16344_v48 }
 0x1a2   : > { %22664 = vst [vmem:[#allocation64_spill] sm:$0xff] %v16328_v18  ;;  %v13563_v18 = vpop.f32.mrf.mxu0 }
 0x1a3   : > { %v16330_v21 = vpop.f32.mrf.mxu1  ;;  %v16351_v46 = vadd.f32 %v13563_v18, %v16093_v49 }
 0x1a4   : > { %22665 = vst [vmem:[#allocation65_spill] sm:$0xff] %v16330_v21  ;;  %v16353_v45 = vpop.f32.mrf.mxu0 }
 0x1a5   : > { %v16337_v55 = vpop.f32.mrf.mxu1  ;;  %22674 = vst [vmem:[#allocation74_spill] sm:$0xff] %v16351_v46  ;;  %22675 = vst [vmem:[#allocation75_spill] sm:$0xff] %v16353_v45  ;;  %v16379_v46 = vld [vmem:[%s22397_s3 + $0x20] sm:$0xff] }
 0x1a6   : > { %22668 = vst [vmem:[#allocation68_spill] sm:$0xff] %v16337_v55  ;;  %v13618_v55 = vpop.f32.mrf.mxu0  ;;  %22677 = vst [vmem:[#allocation77_spill] sm:$0xff] %v16379_v46  ;;  %13964 = vmatprep.subr.mxu1 %v16379_v46 }
 0x1a7   : > { %v16339_v51 = vpop.f32.mrf.mxu1 }
 0x1a8   : > { %22669 = vst [vmem:[#allocation69_spill] sm:$0xff] %v16339_v51  ;;  %v2862_v51 = vpop.f32.mrf.mxu0 }
 0x1a9   : > { %v16346_v3 = vpop.f32.mrf.mxu1 }
 0x1aa   : > { %22672 = vst [vmem:[#allocation72_spill] sm:$0xff] %v16346_v3  ;;  %v16361_v41 = vpop.f32.mrf.mxu0 }
 0x1ab   : > { %v16348_v40 = vpop.f32.mrf.mxu1 }
 0x1ac   : > { %22673 = vst [vmem:[#allocation73_spill] sm:$0xff] %v16348_v40  ;;  %v16363_v30 = vpop.f32.mrf.mxu0 }
 0x1ad   : > { %v16355_v21 = vpop.f32.mrf.mxu1 }
 0x1ae   : > { %22676 = vst [vmem:[#allocation76_spill] sm:$0xff] %v16355_v21  ;;  %v16367_v40 = vpop.f32.mrf.mxu0  ;;  %v12026_v21 = vld [vmem:[%s22397_s3 + $0x18] sm:$0xff] }
 0x1af   : > { %v16357_v28 = vpop.f32.mrf.mxu1  ;;  %13914 = vmatprep.subr.mxu0 %v12026_v21 }
 0x1b0   : > { %v16371_v18 = vpop.f32.mrf.mxu0  ;;  %13915 = vmatpush3.msra.mxu0 %v12026_v21 }
 0x1b1   : > { %v16359_v24 = vpop.f32.mrf.mxu1 }
 0x1b2   : > { %v16381_v45 = vpop.f32.mrf.mxu0 }
 0x1b3   : > { %v16365_v3 = vpop.f32.mrf.mxu1 }
 0x1b4   : > { %v16386_v44 = vpop.f32.mrf.mxu0 }
 0x1b5   : > { %v16369_v49 = vpop.f32.mrf.mxu1 }
 0x1b6   : > { %v16388_v29 = vpop.f32.mrf.mxu0 }
 0x1b7   : > { %v16384_v48 = vpop.f32.mrf.mxu1  ;;  %22678 = vst [vmem:[#allocation78_spill] sm:$0xff] %v16388_v29 }
 0x1b8   : > { %v16392_v6 = vpop.f32.mrf.mxu0 }
 0x1b9   : > { %v16390_v32 = vpop.f32.mrf.mxu1  ;;  %22679 = vst [vmem:[#allocation79_spill] sm:$0xff] %v16392_v6 }
 0x1ba   : > { %v16394_v23 = vpop.f32.mrf.mxu0 }
 0x1bb   : > { %22680 = vst [vmem:[#allocation80_spill] sm:$0xff] %v16394_v23  ;;  %v16396_v14 = vpop.f32.mrf.mxu1 }
 0x1bc   : > { %22681 = vst [vmem:[#allocation81_spill] sm:$0xff] %v16396_v14  ;;  %v16398_v1 = vpop.f32.mrf.mxu0 }
 0x1bd   : > { %22682 = vst [vmem:[#allocation82_spill] sm:$0xff] %v16398_v1  ;;  %v16402_v21 = vpop.f32.mrf.mxu1 }
 0x1be   : > { %v16400_v4 = vpop.f32.mrf.mxu0  ;;  %22684 = vst [vmem:[#allocation84_spill] sm:$0xff] %v16402_v21 }
 0x1bf   : > { %22683 = vst [vmem:[#allocation83_spill] sm:$0xff] %v16400_v4  ;;  %v16408_v31 = vpop.f32.mrf.mxu1 }
 0x1c0   : > { %v16404_v46 = vpop.f32.mrf.mxu0  ;;  %22687 = vst [vmem:[#allocation87_spill] sm:$0xff] %v16408_v31 }
 0x1c1   : > { %22685 = vst [vmem:[#allocation85_spill] sm:$0xff] %v16404_v46  ;;  %v16414_v6 = vpop.f32.mrf.mxu1 }
 0x1c2   : > { %v16406_v37 = vpop.f32.mrf.mxu0  ;;  %22690 = vst [vmem:[#allocation90_spill] sm:$0xff] %v16414_v6 }
 0x1c3   : > { %22686 = vst [vmem:[#allocation86_spill] sm:$0xff] %v16406_v37  ;;  %v16420_v1 = vpop.f32.mrf.mxu1 }
 0x1c4   : > { %v16410_v20 = vpop.f32.mrf.mxu0  ;;  %22693 = vst [vmem:[#allocation93_spill] sm:$0xff] %v16420_v1 }
 0x1c5   : > { %22688 = vst [vmem:[#allocation88_spill] sm:$0xff] %v16410_v20  ;;  %v16426_v46 = vpop.f32.mrf.mxu1 }
 0x1c6   : > { %v16412_v29 = vpop.f32.mrf.mxu0 }
 0x1c7   : > { %22689 = vst [vmem:[#allocation89_spill] sm:$0xff] %v16412_v29  ;;  %v16432_v20 = vpop.f32.mrf.mxu1 }
 0x1c8   : > { %v16416_v23 = vpop.f32.mrf.mxu0  ;;  %22698 = vst [vmem:[#allocation98_spill] sm:$0xff] %v16432_v20 }
 0x1c9   : > { %22691 = vst [vmem:[#allocation91_spill] sm:$0xff] %v16416_v23  ;;  %v16438_v23 = vpop.f32.mrf.mxu1 }
 0x1ca   : > { %v16418_v14 = vpop.f32.mrf.mxu0 }
 0x1cb   : > { %22692 = vst [vmem:[#allocation92_spill] sm:$0xff] %v16418_v14 }
 0x1cc   : > { %v16422_v4 = vpop.f32.mrf.mxu0 }
 0x1cd   : > { %22694 = vst [vmem:[#allocation94_spill] sm:$0xff] %v16422_v4  ;;  %v16446_v4 = vpop.f32.mrf.mxu1 }
 0x1ce   : > { %v16424_v21 = vpop.f32.mrf.mxu0  ;;  %22703 = vst [vmem:[#allocation103_spill] sm:$0xff] %v16446_v4 }
 0x1cf   : > { %22695 = vst [vmem:[#allocation95_spill] sm:$0xff] %v16424_v21  ;;  %v1850_v21 = vadd.f32 %v15913_v8, %v15916_v15 }
 0x1d0   : > { %v16428_v37 = vpop.f32.mrf.mxu0 }
 0x1d1   : > { %22696 = vst [vmem:[#allocation96_spill] sm:$0xff] %v16428_v37 }
 0x1d2   : > { %v16430_v31 = vpop.f32.mrf.mxu0 }
 0x1d3   : > { %22697 = vst [vmem:[#allocation97_spill] sm:$0xff] %v16430_v31  ;;  %v2240_v31 = vadd.f32 %v16100_v33, %v1850_v21  ;;  %v1854_v33 = vadd.f32 %v15937_v17, %v15940_v42  ;;  %v1856_v17 = vadd.f32 %v15952_v10, %v15955_v61  ;;  %v2635_v42 = vadd.f32 %v16221_v53, %v16224_v60 }
 0x1d4   : > { %v16434_v29 = vpop.f32.mrf.mxu0 }
 0x1d5   : > { %22699 = vst [vmem:[#allocation99_spill] sm:$0xff] %v16434_v29  ;;  %v2631_v29 = vadd.f32 %v16095_v43, %v16098_v56  ;;  %v2630_v8 = vadd.f32 %v16102_v25, %v2240_v31  ;;  %v2244_v56 = vadd.f32 %v16229_v36, %v1854_v33  ;;  %v16484_v36 = vld [vmem:[%s22396_s2] ss:$0 sm:$0xff]  ;;  %v3026_v10 = vadd.f32 %v16367_v40, %v2635_v42  ;;  %v22706_v33 = vld [vmem:[#allocation33_spill] sm:$0xff] }
 0x1d6   : > { %v16436_v6 = vpop.f32.mrf.mxu0 }
 0x1d7   : > { %22700 = vst [vmem:[#allocation100_spill] sm:$0xff] %v16436_v6  ;;  %v1852_v6 = vadd.f32 %v15925_v11, %v15928_v9  ;;  %v3022_v4 = vadd.f32 %v13618_v55, %v2631_v29  ;;  %v2633_v11 = vadd.f32 %v16176_v13, %v16215_v57  ;;  %v3021_v9 = vadd.f32 %v2862_v51, %v2630_v8 }
 0x1d8   : > { %v16440_v14 = vpop.f32.mrf.mxu0 }
 0x1d9   : > { %22701 = vst [vmem:[#allocation101_spill] sm:$0xff] %v16440_v14  ;;  %v16457_v14 = vpop.f32.mrf.mxu1  ;;  %v2242_v15 = vadd.f32 %v16217_v16, %v1852_v6  ;;  %v3412_v25 = vadd.f32 %v16357_v28, %v3022_v4  ;;  %v3024_v16 = vadd.f32 %v16361_v41, %v2633_v11  ;;  %v3411_v57 = vadd.f32 %v16359_v24, %v3021_v9  ;;  %v22705_v28 = vld [vmem:[#allocation32_spill] sm:$0xff] }
 0x1da   : > { %v16442_v1 = vpop.f32.mrf.mxu0  ;;  %v2634_v4 = vadd.f32 %v16231_v0, %v2244_v56  ;;  %v2246_v6 = vadd.f32 %v16242_v52, %v1856_v17  ;;  %v16497_v24 = vadd.f32 %v22705_v28, %v15822_v50  ;;  %v2637_v0 = vadd.f32 %v16234_v22, %v16239_v59 }
 0x1db   : > { %22702 = vst [vmem:[#allocation102_spill] sm:$0xff] %v16442_v1  ;;  %v16470_v43 = vpop.f32.mrf.mxu1  ;;  %v2632_v31 = vadd.f32 %v16219_v39, %v2242_v15  ;;  %v3414_v53 = vadd.f32 %v16365_v3, %v3024_v16  ;;  %v16508_v11 = vadd.f32 %v22706_v33, %v15836_v54  ;;  %v16520_v54 = vadd.f32 %v15852_v26, %v15850_v58  ;;  %v22719_v33 = vld [vmem:[#allocation36_spill] sm:$0xff] }
 0x1dc   : > { %v16448_v37 = vpop.f32.mrf.mxu0  ;;  %v3025_v52 = vadd.f32 %v16371_v18, %v2634_v4  ;;  %v2636_v50 = vadd.f32 %v16244_v35, %v2246_v6  ;;  %v3028_v18 = vadd.f32 %v16381_v45, %v2637_v0  ;;  %v2639_v35 = vadd.f32 %v16246_v47, %v16249_v19  ;;  %v22712_v4 = vld [vmem:[#allocation12_spill] sm:$0xff] }
 0x1dd   : > { %v3023_v39 = vadd.f32 %v16363_v30, %v2632_v31  ;;  %v16491_v61 = vpop.f32.mrf.mxu1  ;;  %v1858_v30 = vadd.f32 %v15964_v5, %v15967_v7  ;;  %v3416_v7 = vadd.f32 %v16384_v48, %v3026_v10  ;;  %v16532_v58 = vadd.f32 %v15866_v2, %v15864_v62  ;;  %v16545_v62 = vld [vmem:[%s22397_s3 + $0x28] sm:$0xff]  ;;  %v22709_v2 = vld [vmem:[#allocation6_spill] sm:$0xff]  ;;  %v22713_v10 = vld [vmem:[#allocation35_spill] sm:$0xff] }
 0x1de   : > { %v16451_v20 = vpop.f32.mrf.mxu0  ;;  %v3415_v48 = vadd.f32 %v16390_v32, %v3025_v52  ;;  %v3027_v45 = vadd.f32 %v16386_v44, %v2636_v50  ;;  %v22708_v44 = vld [vmem:[#allocation81_spill] sm:$0xff]  ;;  %14014 = vmatprep.subr.mxu0 %v16545_v62 }
 0x1df   : > { %22704 = vst [vmem:[#allocation104_spill] sm:$0xff] %v16451_v20  ;;  %v3413_v41 = vadd.f32 %v16369_v49, %v3023_v39  ;;  %v2248_v5 = vadd.f32 %v16251_v34, %v1858_v30  ;;  %v16513_v22 = vpop.f32.mrf.mxu1  ;;  %v1860_v34 = vadd.f32 %v15976_v27, %v15979_v12  ;;  %v22707_v12 = vld [vmem:[#allocation78_spill] sm:$0xff]  ;;  %v3418_v42 = vadd.f32 %v22708_v44, %v3028_v18  ;;  %v22716_v30 = vld [vmem:[#allocation84_spill] sm:$0xff] }
 0x1e0   : > { %v16459_v1 = vpop.f32.mrf.mxu0  ;;  %v3030_v19 = vadd.f32 %v22707_v12, %v2639_v35  ;;  %v3417_v0 = vadd.f32 %v22716_v30, %v3027_v45  ;;  %v22723_v45 = vld [vmem:[#allocation10_spill] sm:$0xff]  ;;  %v22733_v30 = vld [vmem:[#allocation83_spill] sm:$0xff] }
 0x1e1   : > { %v2638_v26 = vadd.f32 %v16253_v63, %v2248_v5  ;;  %v2250_v27 = vadd.f32 %v16263_v38, %v1860_v34  ;;  %v16537_v47 = vpop.f32.mrf.mxu1  ;;  %v22710_v38 = vld [vmem:[#allocation7_spill] sm:$0xff]  ;;  %v22727_v12 = vld [vmem:[#allocation38_spill] sm:$0xff] }
 0x1e2   : > { %v16465_v21 = vpop.f32.mrf.mxu0  ;;  %v16549_v63 = vadd.f32 %v22710_v38, %v22709_v2  ;;  %v22720_v5 = vld [vmem:[#allocation39_spill] sm:$0xff]  ;;  %v22729_v44 = vld [vmem:[#allocation90_spill] sm:$0xff] }
 0x1e3   : > { %v2640_v50 = vadd.f32 %v22719_v33, %v2250_v27  ;;  %v22730_v38 = vld [vmem:[#allocation82_spill] sm:$0xff] }
 0x1e4   : > { %v16472_v20 = vpop.f32.mrf.mxu0 }
 0x1e6   : > { %v13718_v13 = vpop.f32.mrf.mxu0 }
 0x1e7   : > { %v3802_v55 = vadd.f32 %v13718_v13, %v3412_v25 }
 0x1e8   : > { %v3642_v60 = vpop.f32.mrf.mxu0 }
 0x1e9   : > { %v3841_v51 = vadd.f32 %v16484_v36, %v3802_v55  ;;  %v3801_v29 = vadd.f32 %v3642_v60, %v3411_v57  ;;  %v22711_v55 = vld [vmem:[#allocation13_spill] sm:$0xff]  ;;  %v22714_v60 = vld [vmem:[#allocation34_spill] sm:$0xff] }
 0x1ea   : > { %v13721_v40 = vpop.f32.mrf.mxu0  ;;  %v1862_v6 = vadd.f32 %v22712_v4, %v22711_v55  ;;  %v3031_v55 = vadd.f32 %v22730_v38, %v2640_v50 }
 0x1eb   : > { %v3873_v8 = vmax.f32 %v3841_v51, 0.0  ;;  %v3840_v3 = vadd.f32 %v16484_v36, %v3801_v29  ;;  %v3804_v15 = vadd.f32 %v13721_v40, %v3414_v53  ;;  %v2641_v53 = vadd.f32 %v22714_v60, %v22713_v10  ;;  %v22715_v51 = vld [vmem:[#allocation79_spill] sm:$0xff] }
 0x1ec   : > { %v3652_v59 = vpop.f32.mrf.mxu0  ;;  %v3029_v29 = vadd.f32 %v22715_v51, %v2638_v26  ;;  %v22726_v26 = vld [vmem:[#allocation14_spill] sm:$0xff] }
 0x1ed   : > { %3962 = vst.msk [vmem:[#allocation2 + $0x21] sm:$0xff] %vm3904_vm2, %v3873_v8  ;;  %v3872_v49 = vmax.f32 %v3840_v3, 0.0  ;;  %v3843_v9 = vadd.f32 %v16484_v36, %v3804_v15  ;;  %v3803_v56 = vadd.f32 %v3652_v59, %v3413_v41  ;;  %v22717_v8 = vld [vmem:[#allocation8_spill] sm:$0xff]  ;;  %v22718_v3 = vld [vmem:[#allocation9_spill] sm:$0xff]  ;;  %v22721_v59 = vld [vmem:[#allocation87_spill] sm:$0xff] }
 0x1ee   : > { %v13724_v31 = vpop.f32.mrf.mxu0  ;;  %v16562_v15 = vadd.f32 %v22718_v3, %v22717_v8  ;;  %v3420_v18 = vadd.f32 %v22721_v59, %v3030_v19  ;;  %v22728_v19 = vld [vmem:[#allocation37_spill] sm:$0xff] }
 0x1ef   : > { %3961 = vst.msk [vmem:[#allocation2 + $0x19] sm:$0xff] %vm3904_vm2, %v3872_v49  ;;  %v3875_v25 = vmax.f32 %v3843_v9, 0.0  ;;  %v3842_v16 = vadd.f32 %v16484_v36, %v3803_v56  ;;  %v3806_v17 = vadd.f32 %v13724_v31, %v3416_v7  ;;  %v2252_v7 = vadd.f32 %v22720_v5, %v1862_v6  ;;  %v16567_v49 = vpop.f32.mrf.mxu1  ;;  %v22722_v56 = vld [vmem:[#allocation80_spill] sm:$0xff]  ;;  %v22735_v5 = vld [vmem:[#allocation17_spill] sm:$0xff] }
 0x1f0   : > { %v3662_v32 = vpop.f32.mrf.mxu0  ;;  %v3032_v34 = vadd.f32 %v22722_v56, %v2641_v53  ;;  %v22731_v53 = vld [vmem:[#allocation40_spill] sm:$0xff]  ;;  %v22738_v56 = vld [vmem:[#allocation42_spill] sm:$0xff] }
 0x1f1   : > { %3964 = vst.msk [vmem:[#allocation2 + $0x39] sm:$0xff] %vm3904_vm2, %v3875_v25  ;;  %v3874_v13 = vmax.f32 %v3842_v16, 0.0  ;;  %v3845_v57 = vadd.f32 %v16484_v36, %v3806_v17  ;;  %v3805_v39 = vadd.f32 %v3662_v32, %v3415_v48  ;;  %v22724_v25 = vld [vmem:[#allocation11_spill] sm:$0xff]  ;;  %v2643_v32 = vadd.f32 %v22728_v19, %v22727_v12 }
 0x1f2   : > { %v13727_v28 = vpop.f32.mrf.mxu0  ;;  %v16574_v16 = vadd.f32 %v22724_v25, %v22723_v45  ;;  %v22725_v17 = vld [vmem:[#allocation15_spill] sm:$0xff]  ;;  %v2642_v51 = vadd.f32 %v22731_v53, %v2252_v7  ;;  %v22736_v7 = vld [vmem:[#allocation16_spill] sm:$0xff] }
 0x1f3   : > { %3963 = vst.msk [vmem:[#allocation2 + $0x31] sm:$0xff] %vm3904_vm2, %v3874_v13  ;;  %v3877_v52 = vmax.f32 %v3845_v57, 0.0  ;;  %v3844_v40 = vadd.f32 %v16484_v36, %v3805_v39  ;;  %v3808_v41 = vadd.f32 %v13727_v28, %v3418_v42  ;;  %v1864_v27 = vadd.f32 %v22726_v26, %v22725_v17 }
 0x1f4   : > { %v3672_v9 = vpop.f32.mrf.mxu0  ;;  %v3419_v42 = vadd.f32 %v22729_v44, %v3029_v29  ;;  %v16594_v60 = vld [vmem:[#allocation2 + $0x21] sm:$0xff]  ;;  %v1866_v59 = vadd.f32 %v22736_v7, %v22735_v5 }
 0x1f5   : > { %3966 = vst.msk [vmem:[#allocation2 + $0x51] sm:$0xff] %vm3904_vm2, %v3877_v52  ;;  %v3876_v35 = vmax.f32 %v3844_v40, 0.0  ;;  %v3847_v48 = vadd.f32 %v16484_v36, %v3808_v41  ;;  %v3807_v31 = vadd.f32 %v3672_v9, %v3417_v0  ;;  %v22732_v29 = vld [vmem:[#allocation43_spill] sm:$0xff]  ;;  %v3034_v0 = vadd.f32 %v22733_v30, %v2643_v32  ;;  %v16599_v52 = vpop.f32.mrf.mxu1  ;;  %v22734_v41 = vld [vmem:[#allocation93_spill] sm:$0xff]  ;;  %v22741_v44 = vld [vmem:[#allocation44_spill] sm:$0xff] }
 0x1f6   : > { %v13730_v13 = vpop.f32.mrf.mxu0  ;;  %v16581_v57 = vld [vmem:[#allocation2 + $0x19] sm:$0xff]  ;;  %v2254_v28 = vadd.f32 %v22732_v29, %v1864_v27  ;;  %v3422_v8 = vadd.f32 %v22734_v41, %v3032_v34  ;;  %v3421_v27 = vadd.f32 %v16426_v46, %v3031_v55 }
 0x1f7   : > { %v16583_v39 = vld [vmem:[#allocation2 + $0x18] sm:$0xff]  ;;  %v16585_v2 = vld [vmem:[#allocation2 + $0x20] sm:$0xff]  ;;  %3965 = vst.msk [vmem:[#allocation2 + $0x49] sm:$0xff] %vm3904_vm2, %v3876_v35  ;;  %v3879_v4 = vmax.f32 %v3847_v48, 0.0  ;;  %v3846_v6 = vadd.f32 %v16484_v36, %v3807_v31  ;;  %v3810_v10 = vadd.f32 %v13730_v13, %v3420_v18  ;;  %13769 = vmatprep.mubr.msk.f32.mxu1 %vm3904_vm2, %v16581_v57  ;;  %v22739_v35 = vld [vmem:[#allocation41_spill] sm:$0xff]  ;;  %v16633_v55 = vpop.f32.mrf.mxu1 }
 0x1f8   : > { %13819 = vmatprep.mubr.msk.f32.mxu0 %vm3904_vm2, %v16583_v39  ;;  %v3682_v40 = vpop.f32.mrf.mxu0  ;;  %13770 = vmatmul.mubr.msk.f32.gmra.mxu1 %vm3904_vm2, %v16594_v60  ;;  %v22737_v18 = vld [vmem:[#allocation18_spill] sm:$0xff]  ;;  %v2645_v48 = vadd.f32 %v22739_v35, %v22738_v56  ;;  %v22740_v31 = vld [vmem:[#allocation85_spill] sm:$0xff]  ;;  %v22742_v13 = vld [vmem:[#allocation47_spill] sm:$0xff] }
 0x1f9   : > { %13820 = vmatmul.mubr.msk.f32.gmra.mxu0 %vm3904_vm2, %v16585_v2  ;;  %3968 = vst.msk [vmem:[#allocation2 + $0x69] sm:$0xff] %vm3904_vm2, %v3879_v4  ;;  %v3878_v3 = vmax.f32 %v3846_v6, 0.0  ;;  %v3849_v33 = vadd.f32 %v16484_v36, %v3810_v10  ;;  %v3809_v50 = vadd.f32 %v3682_v40, %v3419_v42  ;;  %v1477_v9 = vadd.f32 %v22737_v18, %v16497_v24  ;;  %v16628_v32 = vld [vmem:[#allocation2 + $0x39] sm:$0xff]  ;;  %v22750_v56 = vld [vmem:[#allocation88_spill] sm:$0xff] }
 0x1fa   : > { %v3033_v45 = vadd.f32 %v22740_v31, %v2642_v51  ;;  %v13733_v25 = vpop.f32.mrf.mxu0  ;;  %v16615_v17 = vld [vmem:[#allocation2 + $0x31] sm:$0xff]  ;;  %v2644_v42 = vadd.f32 %v22741_v44, %v2254_v28  ;;  %v2256_v38 = vadd.f32 %v22742_v13, %v1866_v59  ;;  %v22745_v30 = vld [vmem:[#allocation19_spill] sm:$0xff]  ;;  %v22751_v31 = vld [vmem:[#allocation48_spill] sm:$0xff] }
 0x1fb   : > { %v16617_v34 = vld [vmem:[#allocation2 + $0x30] sm:$0xff]  ;;  %v16619_v26 = vld [vmem:[#allocation2 + $0x38] sm:$0xff]  ;;  %3967 = vst.msk [vmem:[#allocation2 + $0x61] sm:$0xff] %vm3904_vm2, %v3878_v3  ;;  %v3881_v12 = vmax.f32 %v3849_v33, 0.0  ;;  %v3848_v19 = vadd.f32 %v16484_v36, %v3809_v50  ;;  %v3812_v24 = vadd.f32 %v13733_v25, %v3422_v8  ;;  %13772 = vmatprep.mubr.msk.f32.mxu1 %vm3904_vm2, %v16615_v17  ;;  %v1868_v40 = vadd.f32 %v22745_v30, %v1477_v9 }
 0x1fc   : > { %13822 = vmatprep.mubr.msk.f32.mxu0 %vm3904_vm2, %v16617_v34  ;;  %v22743_v4 = vld [vmem:[#allocation98_spill] sm:$0xff]  ;;  %v3692_v6 = vpop.f32.mrf.mxu0  ;;  %13773 = vmatmul.mubr.msk.f32.gmra.mxu1 %vm3904_vm2, %v16628_v32  ;;  %v22748_v3 = vld [vmem:[#allocation45_spill] sm:$0xff]  ;;  %v3423_v50 = vadd.f32 %v16438_v23, %v3033_v45  ;;  %v3035_v35 = vadd.f32 %v22750_v56, %v2644_v42  ;;  %v2646_v45 = vadd.f32 %v22751_v31, %v2256_v38  ;;  %v22752_v25 = vld [vmem:[#allocation51_spill] sm:$0xff] }
 0x1fd   : > { %v3424_v46 = vadd.f32 %v22743_v4, %v3034_v0  ;;  %13823 = vmatmul.mubr.msk.f32.gmra.mxu0 %vm3904_vm2, %v16619_v26  ;;  %v22744_v10 = vld [vmem:[#allocation86_spill] sm:$0xff]  ;;  %3970 = vst.msk [vmem:[#allocation2 + $0x81] sm:$0xff] %vm3904_vm2, %v3881_v12  ;;  %v3880_v51 = vmax.f32 %v3848_v19, 0.0  ;;  %v3851_v29 = vadd.f32 %v16484_v36, %v3812_v24  ;;  %v3811_v28 = vadd.f32 %v3692_v6, %v3421_v27  ;;  %v22746_v0 = vld [vmem:[#allocation20_spill] sm:$0xff]  ;;  %v22753_v12 = vld [vmem:[#allocation89_spill] sm:$0xff]  ;;  %v16666_v24 = vpop.f32.mrf.mxu1 }
 0x1fe   : > { %v3036_v53 = vadd.f32 %v22744_v10, %v2645_v48  ;;  %v1479_v41 = vadd.f32 %v22746_v0, %v16508_v11  ;;  %v22747_v8 = vld [vmem:[#allocation46_spill] sm:$0xff]  ;;  %v13736_v5 = vpop.f32.mrf.mxu0  ;;  %v16648_v7 = vld [vmem:[#allocation2 + $0x49] sm:$0xff]  ;;  %v2258_v27 = vadd.f32 %v22752_v25, %v1868_v40  ;;  %v22754_v42 = vld [vmem:[#allocation103_spill] sm:$0xff]  ;;  %v3425_v56 = vadd.f32 %v16457_v14, %v3035_v35 }
 0x1ff   : > { %v2647_v33 = vadd.f32 %v22748_v3, %v22747_v8  ;;  %v16650_v59 = vld [vmem:[#allocation2 + $0x48] sm:$0xff]  ;;  %v16652_v18 = vld [vmem:[#allocation2 + $0x50] sm:$0xff]  ;;  %3969 = vst.msk [vmem:[#allocation2 + $0x79] sm:$0xff] %vm3904_vm2, %v3880_v51  ;;  %v3883_v9 = vmax.f32 %v3851_v29, 0.0  ;;  %v3850_v48 = vadd.f32 %v16484_v36, %v3811_v28  ;;  %v3814_v11 = vadd.f32 %v13736_v5, %v3424_v46  ;;  %13775 = vmatprep.mubr.msk.f32.mxu1 %vm3904_vm2, %v16648_v7  ;;  %v22759_v0 = vld [vmem:[#allocation91_spill] sm:$0xff]  ;;  %v16699_v35 = vpop.f32.mrf.mxu1 }
 0x200   : > { %22749 = vst [vmem:[#allocation32_spill] sm:$0xff] %v16652_v18  ;;  %13825 = vmatprep.mubr.msk.f32.mxu0 %vm3904_vm2, %v16650_v59  ;;  %v16661_v23 = vld [vmem:[#allocation2 + $0x51] sm:$0xff]  ;;  %v3702_v44 = vpop.f32.mrf.mxu0  ;;  %v3426_v13 = vadd.f32 %v22754_v42, %v3036_v53  ;;  %v3037_v8 = vadd.f32 %v22759_v0, %v2646_v45  ;;  %v22763_v31 = vld [vmem:[#allocation55_spill] sm:$0xff] }
 0x201   : > { %v3038_v19 = vadd.f32 %v22753_v12, %v2647_v33  ;;  %13776 = vmatmul.mubr.msk.f32.gmra.mxu1 %vm3904_vm2, %v16661_v23  ;;  %13826 = vmatmul.mubr.msk.f32.gmra.mxu0 %vm3904_vm2, %v16652_v18  ;;  %3972 = vst.msk [vmem:[#allocation2 + $0x99] sm:$0xff] %vm3904_vm2, %v3883_v9  ;;  %v3882_v4 = vmax.f32 %v3850_v48, 0.0  ;;  %v3853_v38 = vadd.f32 %v16484_v36, %v3814_v11  ;;  %v22755_v6 = vld [vmem:[#allocation21_spill] sm:$0xff]  ;;  %v22756_v51 = vld [vmem:[#allocation22_spill] sm:$0xff]  ;;  %v22762_v48 = vld [vmem:[#allocation52_spill] sm:$0xff] }
 0x202   : > { %v3813_v46 = vadd.f32 %v3702_v44, %v3423_v50  ;;  %v1870_v10 = vadd.f32 %v22755_v6, %v1479_v41  ;;  %v1481_v29 = vadd.f32 %v22756_v51, %v16520_v54  ;;  %v22757_v28 = vld [vmem:[#allocation50_spill] sm:$0xff]  ;;  %v22758_v30 = vld [vmem:[#allocation49_spill] sm:$0xff]  ;;  %v13739_v3 = vpop.f32.mrf.mxu0  ;;  %v16681_v33 = vld [vmem:[#allocation2 + $0x61] sm:$0xff]  ;;  %v2648_v11 = vadd.f32 %v22762_v48, %v2258_v27 }
 0x203   : > { %v2649_v40 = vadd.f32 %v22758_v30, %v22757_v28  ;;  %v16683_v53 = vld [vmem:[#allocation2 + $0x60] sm:$0xff]  ;;  %v16685_v5 = vld [vmem:[#allocation2 + $0x68] sm:$0xff]  ;;  %3971 = vst.msk [vmem:[#allocation2 + $0x91] sm:$0xff] %vm3904_vm2, %v3882_v4  ;;  %v3885_v41 = vmax.f32 %v3853_v38, 0.0  ;;  %v3816_v54 = vadd.f32 %v13739_v3, %v3426_v13  ;;  %13778 = vmatprep.mubr.msk.f32.mxu1 %vm3904_vm2, %v16681_v33  ;;  %v3428_v14 = vadd.f32 %v16470_v43, %v3038_v19  ;;  %v22771_v3 = vld [vmem:[#allocation94_spill] sm:$0xff] }
 0x204   : > { %22760 = vst [vmem:[#allocation33_spill] sm:$0xff] %v16683_v53  ;;  %22761 = vst [vmem:[#allocation78_spill] sm:$0xff] %v16685_v5  ;;  %v3852_v50 = vadd.f32 %v16484_v36, %v3813_v46  ;;  %13828 = vmatprep.mubr.msk.f32.mxu0 %vm3904_vm2, %v16683_v53  ;;  %v16694_v9 = vld [vmem:[#allocation2 + $0x69] sm:$0xff]  ;;  %v2260_v45 = vadd.f32 %v22763_v31, %v1870_v10  ;;  %v3712_v25 = vpop.f32.mrf.mxu0  ;;  %v22765_v4 = vld [vmem:[#allocation23_spill] sm:$0xff]  ;;  %v3427_v51 = vadd.f32 %v16491_v61, %v3037_v8 }
 0x205   : > { %13779 = vmatmul.mubr.msk.f32.gmra.mxu1 %vm3904_vm2, %v16694_v9  ;;  %13829 = vmatmul.mubr.msk.f32.gmra.mxu0 %vm3904_vm2, %v16685_v5  ;;  %v22764_v12 = vld [vmem:[#allocation92_spill] sm:$0xff]  ;;  %3974 = vst.msk [vmem:[#allocation2 + $0xb1] sm:$0xff] %vm3904_vm2, %v3885_v41  ;;  %v3855_v27 = vadd.f32 %v16484_v36, %v3816_v54  ;;  %v3815_v13 = vadd.f32 %v3712_v25, %v3425_v56  ;;  %v22767_v46 = vld [vmem:[#allocation54_spill] sm:$0xff]  ;;  %v22768_v6 = vld [vmem:[#allocation53_spill] sm:$0xff]  ;;  %v16732_v25 = vpop.f32.mrf.mxu1 }
 0x206   : > { %v3040_v44 = vadd.f32 %v22764_v12, %v2649_v40  ;;  %v3884_v42 = vmax.f32 %v3852_v50, 0.0  ;;  %v1872_v38 = vadd.f32 %v22765_v4, %v1481_v29  ;;  %v22766_v43 = vld [vmem:[#allocation24_spill] sm:$0xff]  ;;  %v2651_v10 = vadd.f32 %v22768_v6, %v22767_v46  ;;  %v13742_v28 = vpop.f32.mrf.mxu0  ;;  %v16714_v30 = vld [vmem:[#allocation2 + $0x79] sm:$0xff]  ;;  %v22778_v6 = vld [vmem:[#allocation57_spill] sm:$0xff] }
 0x207   : > { %v1483_v19 = vadd.f32 %v22766_v43, %v16532_v58  ;;  %v16716_v40 = vld [vmem:[#allocation2 + $0x78] sm:$0xff]  ;;  %v16718_v0 = vld [vmem:[#allocation2 + $0x80] sm:$0xff]  ;;  %v3039_v41 = vadd.f32 %v22771_v3, %v2648_v11  ;;  %v3887_v29 = vmax.f32 %v3855_v27, 0.0  ;;  %v3854_v56 = vadd.f32 %v16484_v36, %v3815_v13  ;;  %13781 = vmatprep.mubr.msk.f32.mxu1 %vm3904_vm2, %v16714_v30  ;;  %v22775_v13 = vld [vmem:[#allocation25_spill] sm:$0xff] }
 0x208   : > { %22769 = vst [vmem:[#allocation81_spill] sm:$0xff] %v16716_v40  ;;  %22770 = vst [vmem:[#allocation6_spill] sm:$0xff] %v16718_v0  ;;  %v3818_v58 = vadd.f32 %v13742_v28, %v3428_v14  ;;  %13831 = vmatprep.mubr.msk.f32.mxu0 %vm3904_vm2, %v16716_v40  ;;  %v16727_v61 = vld [vmem:[#allocation2 + $0x81] sm:$0xff]  ;;  %v3722_v12 = vpop.f32.mrf.mxu0  ;;  %v3430_v14 = vadd.f32 %v16513_v22, %v3040_v44  ;;  %v22777_v46 = vld [vmem:[#allocation58_spill] sm:$0xff] }
 0x209   : > { %3973 = vst.msk [vmem:[#allocation2 + $0xa9] sm:$0xff] %vm3904_vm2, %v3884_v42  ;;  %v22772_v8 = vld [vmem:[#allocation56_spill] sm:$0xff]  ;;  %v22773_v54 = vld [vmem:[#allocation59_spill] sm:$0xff]  ;;  %13782 = vmatmul.mubr.msk.f32.gmra.mxu1 %vm3904_vm2, %v16727_v61  ;;  %13832 = vmatmul.mubr.msk.f32.gmra.mxu0 %vm3904_vm2, %v16718_v0  ;;  %3976 = vst.msk [vmem:[#allocation2 + $0xc9] sm:$0xff] %vm3904_vm2, %v3887_v29  ;;  %v3886_v42 = vmax.f32 %v3854_v56, 0.0  ;;  %v3817_v27 = vadd.f32 %v3722_v12, %v3427_v51  ;;  %v1874_v4 = vadd.f32 %v22775_v13, %v1483_v19 }
 0x20a   : > { %v2650_v50 = vadd.f32 %v22772_v8, %v2260_v45  ;;  %v2262_v48 = vadd.f32 %v22773_v54, %v1872_v38  ;;  %v22774_v31 = vld [vmem:[#allocation95_spill] sm:$0xff]  ;;  %v3857_v45 = vadd.f32 %v16484_v36, %v3818_v58  ;;  %v22776_v38 = vld [vmem:[#allocation26_spill] sm:$0xff]  ;;  %v22779_v28 = vld [vmem:[#allocation96_spill] sm:$0xff]  ;;  %v13745_v8 = vpop.f32.mrf.mxu0  ;;  %v3429_v29 = vadd.f32 %v16537_v47, %v3039_v41  ;;  %v16765_v41 = vpop.f32.mrf.mxu1 }
 0x20b   : > { %v3042_v11 = vadd.f32 %v22774_v31, %v2651_v10  ;;  %v1485_v43 = vadd.f32 %v22776_v38, %v16549_v63  ;;  %v2653_v10 = vadd.f32 %v22778_v6, %v22777_v46  ;;  %v16747_v54 = vld [vmem:[#allocation2 + $0x91] sm:$0xff]  ;;  %3975 = vst.msk [vmem:[#allocation2 + $0xc1] sm:$0xff] %vm3904_vm2, %v3886_v42  ;;  %v3856_v51 = vadd.f32 %v16484_v36, %v3817_v27  ;;  %v16760_v56 = vld [vmem:[#allocation2 + $0x99] sm:$0xff]  ;;  %v22783_v58 = vld [vmem:[#allocation60_spill] sm:$0xff] }
 0x20c   : > { %v3041_v3 = vadd.f32 %v22779_v28, %v2650_v50  ;;  %v16749_v22 = vld [vmem:[#allocation2 + $0x90] sm:$0xff]  ;;  %v16751_v44 = vld [vmem:[#allocation2 + $0x98] sm:$0xff]  ;;  %v3889_v19 = vmax.f32 %v3857_v45, 0.0  ;;  %v3820_v63 = vadd.f32 %v13745_v8, %v3430_v14  ;;  %13784 = vmatprep.mubr.msk.f32.mxu1 %vm3904_vm2, %v16747_v54  ;;  %22782 = vst [vmem:[#allocation12_spill] sm:$0xff] %v16760_v56  ;;  %v2652_v50 = vadd.f32 %v22783_v58, %v2262_v48  ;;  %v3732_v42 = vpop.f32.mrf.mxu0 }
 0x20d   : > { %22780 = vst [vmem:[#allocation7_spill] sm:$0xff] %v16749_v22  ;;  %22781 = vst [vmem:[#allocation13_spill] sm:$0xff] %v16751_v44  ;;  %13834 = vmatprep.mubr.msk.f32.mxu0 %vm3904_vm2, %v16749_v22  ;;  %v22784_v31 = vld [vmem:[#allocation63_spill] sm:$0xff]  ;;  %v3432_v47 = vadd.f32 %v16567_v49, %v3042_v11  ;;  %13785 = vmatmul.mubr.msk.f32.gmra.mxu1 %vm3904_vm2, %v16760_v56  ;;  %v22785_v14 = vld [vmem:[#allocation97_spill] sm:$0xff]  ;;  %v3888_v27 = vmax.f32 %v3856_v51, 0.0  ;;  %v3819_v13 = vadd.f32 %v3732_v42, %v3429_v29 }
 0x20e   : > { %v2264_v12 = vadd.f32 %v22784_v31, %v1874_v4  ;;  %13835 = vmatmul.mubr.msk.f32.gmra.mxu0 %vm3904_vm2, %v16751_v44  ;;  %v3044_v45 = vadd.f32 %v22785_v14, %v2653_v10  ;;  %3978 = vst.msk [vmem:[#allocation2 + $0xe1] sm:$0xff] %vm3904_vm2, %v3889_v19  ;;  %v3859_v48 = vadd.f32 %v16484_v36, %v3820_v63  ;;  %v22786_v4 = vld [vmem:[#allocation27_spill] sm:$0xff]  ;;  %v22787_v49 = vld [vmem:[#allocation28_spill] sm:$0xff]  ;;  %v22788_v46 = vld [vmem:[#allocation62_spill] sm:$0xff]  ;;  %v13748_v58 = vpop.f32.mrf.mxu0 }
 0x20f   : > { %v1876_v38 = vadd.f32 %v22786_v4, %v1485_v43  ;;  %v1487_v11 = vadd.f32 %v22787_v49, %v16562_v15  ;;  %v22789_v6 = vld [vmem:[#allocation61_spill] sm:$0xff]  ;;  %v3431_v8 = vadd.f32 %v16599_v52, %v3041_v3  ;;  %v22793_v51 = vld [vmem:[#allocation99_spill] sm:$0xff]  ;;  %3977 = vst.msk [vmem:[#allocation2 + $0xd9] sm:$0xff] %vm3904_vm2, %v3888_v27  ;;  %v3858_v29 = vadd.f32 %v16484_v36, %v3819_v13  ;;  %v22795_v3 = vld [vmem:[#allocation64_spill] sm:$0xff] }
 0x210   : > { %v2655_v28 = vadd.f32 %v22789_v6, %v22788_v46  ;;  %v16780_v31 = vld [vmem:[#allocation2 + $0xa9] sm:$0xff]  ;;  %v3043_v63 = vadd.f32 %v22793_v51, %v2652_v50  ;;  %v3891_v43 = vmax.f32 %v3859_v48, 0.0  ;;  %v3822_v15 = vadd.f32 %v13748_v58, %v3432_v47  ;;  %v16793_v52 = vld [vmem:[#allocation2 + $0xb1] sm:$0xff]  ;;  %v22796_v14 = vld [vmem:[#allocation67_spill] sm:$0xff]  ;;  %v16798_v46 = vpop.f32.mrf.mxu1  ;;  %v3742_v27 = vpop.f32.mrf.mxu0 }
 0x211   : > { %22790 = vst [vmem:[#allocation35_spill] sm:$0xff] %v16780_v31  ;;  %v16782_v10 = vld [vmem:[#allocation2 + $0xa8] sm:$0xff]  ;;  %v16784_v19 = vld [vmem:[#allocation2 + $0xb0] sm:$0xff]  ;;  %13787 = vmatprep.mubr.msk.f32.mxu1 %vm3904_vm2, %v16780_v31  ;;  %22794 = vst [vmem:[#allocation84_spill] sm:$0xff] %v16793_v52  ;;  %v2654_v42 = vadd.f32 %v22795_v3, %v2264_v12  ;;  %v2266_v4 = vadd.f32 %v22796_v14, %v1876_v38  ;;  %v3434_v47 = vadd.f32 %v16633_v55, %v3044_v45 }
 0x212   : > { %22791 = vst [vmem:[#allocation34_spill] sm:$0xff] %v16782_v10  ;;  %22792 = vst [vmem:[#allocation79_spill] sm:$0xff] %v16784_v19  ;;  %13837 = vmatprep.mubr.msk.f32.mxu0 %vm3904_vm2, %v16782_v10  ;;  %v22797_v49 = vld [vmem:[#allocation100_spill] sm:$0xff]  ;;  %13788 = vmatmul.mubr.msk.f32.gmra.mxu1 %vm3904_vm2, %v16793_v52  ;;  %v3890_v48 = vmax.f32 %v3858_v29, 0.0  ;;  %v3861_v12 = vadd.f32 %v16484_v36, %v3822_v15  ;;  %v3821_v13 = vadd.f32 %v3742_v27, %v3431_v8  ;;  %v22798_v38 = vld [vmem:[#allocation29_spill] sm:$0xff]  ;;  %v13751_v31 = vpop.f32.mrf.mxu0 }
 0x213   : > { %v3046_v50 = vadd.f32 %v22797_v49, %v2655_v28  ;;  %13838 = vmatmul.mubr.msk.f32.gmra.mxu0 %vm3904_vm2, %v16784_v19  ;;  %3980 = vst.msk [vmem:[#allocation2 + $0xf9] sm:$0xff] %vm3904_vm2, %v3891_v43  ;;  %v1878_v6 = vadd.f32 %v22798_v38, %v1487_v11  ;;  %v22799_v28 = vld [vmem:[#allocation30_spill] sm:$0xff]  ;;  %v22801_v3 = vld [vmem:[#allocation65_spill] sm:$0xff]  ;;  %v16813_v56 = vld [vmem:[#allocation2 + $0xc1] sm:$0xff]  ;;  %v3433_v43 = vadd.f32 %v16666_v24, %v3043_v63  ;;  %v13710_v63 = vpop.f32.mrf.mxu1 }
 0x214   : > { %v1489_v58 = vadd.f32 %v22799_v28, %v16574_v16  ;;  %v22800_v51 = vld [vmem:[#allocation66_spill] sm:$0xff]  ;;  %v22802_v49 = vld [vmem:[#allocation101_spill] sm:$0xff]  ;;  %v16815_v55 = vld [vmem:[#allocation2 + $0xc0] sm:$0xff]  ;;  %3979 = vst.msk [vmem:[#allocation2 + $0xf1] sm:$0xff] %vm3904_vm2, %v3890_v48  ;;  %v3893_v11 = vmax.f32 %v3861_v12, 0.0  ;;  %v3860_v8 = vadd.f32 %v16484_v36, %v3821_v13  ;;  %v3824_v16 = vadd.f32 %v13751_v31, %v3434_v47  ;;  %13790 = vmatprep.mubr.msk.f32.mxu1 %vm3904_vm2, %v16813_v56  ;;  %v3752_v48 = vpop.f32.mrf.mxu0 }
 0x215   : > { %v2657_v14 = vadd.f32 %v22801_v3, %v22800_v51  ;;  %v3045_v52 = vadd.f32 %v22802_v49, %v2654_v42  ;;  %22803 = vst [vmem:[#allocation8_spill] sm:$0xff] %v16815_v55  ;;  %v16817_v45 = vld [vmem:[#allocation2 + $0xc8] sm:$0xff]  ;;  %13840 = vmatprep.mubr.msk.f32.mxu0 %vm3904_vm2, %v16815_v55  ;;  %v22807_v27 = vld [vmem:[#allocation71_spill] sm:$0xff]  ;;  %v3436_v24 = vadd.f32 %v16699_v35, %v3046_v50  ;;  %v22808_v31 = vld [vmem:[#allocation102_spill] sm:$0xff] }
 0x216   : > { %22804 = vst [vmem:[#allocation9_spill] sm:$0xff] %v16817_v45  ;;  %v16826_v29 = vld [vmem:[#allocation2 + $0xc9] sm:$0xff]  ;;  %v2268_v38 = vadd.f32 %v22807_v27, %v1878_v6  ;;  %3982 = vst.msk [vmem:[#allocation2 + $0x111] sm:$0xff] %vm3904_vm2, %v3893_v11  ;;  %v3892_v12 = vmax.f32 %v3860_v8, 0.0  ;;  %v3863_v13 = vadd.f32 %v16484_v36, %v3824_v16  ;;  %v22809_v28 = vld [vmem:[#allocation31_spill] sm:$0xff]  ;;  %v13754_v49 = vpop.f32.mrf.mxu0 }
 0x217   : > { %22805 = vst [vmem:[#allocation36_spill] sm:$0xff] %v16826_v29  ;;  %v22806_v15 = vld [vmem:[#allocation68_spill] sm:$0xff]  ;;  %13791 = vmatmul.mubr.msk.f32.gmra.mxu1 %vm3904_vm2, %v16826_v29  ;;  %13841 = vmatmul.mubr.msk.f32.gmra.mxu0 %vm3904_vm2, %v16817_v45  ;;  %v3048_v47 = vadd.f32 %v22808_v31, %v2657_v14  ;;  %v1880_v6 = vadd.f32 %v22809_v28, %v1489_v58  ;;  %v22810_v51 = vld [vmem:[#allocation70_spill] sm:$0xff]  ;;  %v22811_v35 = vld [vmem:[#allocation69_spill] sm:$0xff] }
 0x218   : > { %v2656_v42 = vadd.f32 %v22806_v15, %v2266_v4  ;;  %v3823_v4 = vadd.f32 %v3752_v48, %v3433_v43  ;;  %v2659_v50 = vadd.f32 %v22811_v35, %v22810_v51  ;;  %v3435_v3 = vadd.f32 %v16732_v25, %v3045_v52  ;;  %v16842_v15 = vld [vmem:[#allocation2 + $0xd9] sm:$0xff]  ;;  %3981 = vst.msk [vmem:[#allocation2 + $0x109] sm:$0xff] %vm3904_vm2, %v3892_v12  ;;  %v16855_v25 = vld [vmem:[#allocation2 + $0xe1] sm:$0xff]  ;;  %v3762_v12 = vpop.f32.mrf.mxu0 }
 0x219   : > { %v16844_v27 = vld [vmem:[#allocation2 + $0xd8] sm:$0xff]  ;;  %v16846_v29 = vld [vmem:[#allocation2 + $0xe0] sm:$0xff]  ;;  %v3895_v11 = vmax.f32 %v3863_v13, 0.0  ;;  %v3826_v58 = vadd.f32 %v13754_v49, %v3436_v24  ;;  %13793 = vmatprep.mubr.msk.f32.mxu1 %vm3904_vm2, %v16842_v15  ;;  %v3438_v24 = vadd.f32 %v16765_v41, %v3048_v47 }
 0x21a   : > { %22812 = vst [vmem:[#allocation39_spill] sm:$0xff] %v16844_v27  ;;  %22813 = vst [vmem:[#allocation87_spill] sm:$0xff] %v16846_v29  ;;  %v3047_v14 = vadd.f32 %v16448_v37, %v2656_v42  ;;  %v3862_v43 = vadd.f32 %v16484_v36, %v3823_v4  ;;  %13843 = vmatprep.mubr.msk.f32.mxu0 %vm3904_vm2, %v16844_v27  ;;  %v22814_v52 = vld [vmem:[#allocation72_spill] sm:$0xff]  ;;  %v22815_v16 = vld [vmem:[#allocation75_spill] sm:$0xff]  ;;  %v3392_v42 = vpop.f32.mrf.mxu1 }
 0x21b   : > { %v2658_v8 = vadd.f32 %v22814_v52, %v2268_v38  ;;  %v2270_v48 = vadd.f32 %v22815_v16, %v1880_v6  ;;  %v22816_v31 = vld [vmem:[#allocation104_spill] sm:$0xff]  ;;  %13794 = vmatmul.mubr.msk.f32.gmra.mxu1 %vm3904_vm2, %v16855_v25  ;;  %13844 = vmatmul.mubr.msk.f32.gmra.mxu0 %vm3904_vm2, %v16846_v29  ;;  %3984 = vst.msk [vmem:[#allocation2 + $0x129] sm:$0xff] %vm3904_vm2, %v3895_v11  ;;  %v22817_v28 = vld [vmem:[#allocation74_spill] sm:$0xff]  ;;  %v22818_v6 = vld [vmem:[#allocation73_spill] sm:$0xff] }
 0x21c   : > { %v3050_v37 = vadd.f32 %v22816_v31, %v2659_v50  ;;  %v3894_v13 = vmax.f32 %v3862_v43, 0.0  ;;  %v3865_v4 = vadd.f32 %v16484_v36, %v3826_v58  ;;  %v3825_v38 = vadd.f32 %v3762_v12, %v3435_v3  ;;  %v13757_v50 = vpop.f32.mrf.mxu0  ;;  %v16870_v49 = vld [vmem:[#allocation2 + $0xf1] sm:$0xff]  ;;  %v22821_v43 = vld [vmem:[#allocation76_spill] sm:$0xff]  ;;  %v13713_v31 = vpop.f32.mrf.mxu1 }
 0x21d   : > { %v2661_v51 = vadd.f32 %v22818_v6, %v22817_v28  ;;  %v3049_v35 = vadd.f32 %v16459_v1, %v2658_v8  ;;  %v16872_v52 = vld [vmem:[#allocation2 + $0xf0] sm:$0xff]  ;;  %v16874_v16 = vld [vmem:[#allocation2 + $0xf8] sm:$0xff]  ;;  %v3437_v41 = vadd.f32 %v16798_v46, %v3047_v14  ;;  %v3828_v3 = vadd.f32 %v13757_v50, %v3438_v24  ;;  %13796 = vmatprep.mubr.msk.f32.mxu1 %vm3904_vm2, %v16870_v49 }
 0x21e   : > { %22819 = vst [vmem:[#allocation80_spill] sm:$0xff] %v16872_v52  ;;  %22820 = vst [vmem:[#allocation10_spill] sm:$0xff] %v16874_v16  ;;  %v3897_v47 = vmax.f32 %v3865_v4, 0.0  ;;  %v3864_v11 = vadd.f32 %v16484_v36, %v3825_v38  ;;  %13846 = vmatprep.mubr.msk.f32.mxu0 %vm3904_vm2, %v16872_v52  ;;  %v16883_v1 = vld [vmem:[#allocation2 + $0xf9] sm:$0xff]  ;;  %v2660_v58 = vadd.f32 %v22821_v43, %v2270_v48  ;;  %v3772_v12 = vpop.f32.mrf.mxu0 }
 0x21f   : > { %3983 = vst.msk [vmem:[#allocation2 + $0x121] sm:$0xff] %vm3904_vm2, %v3894_v13  ;;  %v3440_v8 = vadd.f32 %v13710_v63, %v3050_v37  ;;  %13797 = vmatmul.mubr.msk.f32.gmra.mxu1 %vm3904_vm2, %v16883_v1  ;;  %13847 = vmatmul.mubr.msk.f32.gmra.mxu0 %vm3904_vm2, %v16874_v16  ;;  %v3052_v46 = vadd.f32 %v16465_v21, %v2661_v51  ;;  %v16893_v48 = vld [vmem:[#allocation2 + $0x109] sm:$0xff] }
 0x220   : > { %3986 = vst.msk [vmem:[#allocation2 + $0x141] sm:$0xff] %vm3904_vm2, %v3897_v47  ;;  %v3896_v14 = vmax.f32 %v3864_v11, 0.0  ;;  %v3867_v24 = vadd.f32 %v16484_v36, %v3828_v3  ;;  %v3827_v13 = vadd.f32 %v3772_v12, %v3437_v41  ;;  %v3439_v4 = vadd.f32 %v3392_v42, %v3049_v35  ;;  %v13760_v38 = vpop.f32.mrf.mxu0  ;;  %v16895_v63 = vld [vmem:[#allocation2 + $0x108] sm:$0xff]  ;;  %v16897_v37 = vld [vmem:[#allocation2 + $0x110] sm:$0xff]  ;;  %13799 = vmatprep.mubr.msk.f32.mxu1 %vm3904_vm2, %v16893_v48  ;;  %v3402_v35 = vpop.f32.mrf.mxu1 }
 0x221   : > { %22822 = vst [vmem:[#allocation11_spill] sm:$0xff] %v16895_v63  ;;  %22823 = vst [vmem:[#allocation15_spill] sm:$0xff] %v16897_v37  ;;  %v3051_v28 = vadd.f32 %v16472_v20, %v2660_v58  ;;  %v3830_v51 = vadd.f32 %v13760_v38, %v3440_v8  ;;  %13849 = vmatprep.mubr.msk.f32.mxu0 %vm3904_vm2, %v16895_v63  ;;  %v16906_v42 = vld [vmem:[#allocation2 + $0x111] sm:$0xff]  ;;  %v3442_v20 = vadd.f32 %v13713_v31, %v3052_v46 }
 0x222   : > { %3985 = vst.msk [vmem:[#allocation2 + $0x139] sm:$0xff] %vm3904_vm2, %v3896_v14  ;;  %v3899_v6 = vmax.f32 %v3867_v24, 0.0  ;;  %v3866_v21 = vadd.f32 %v16484_v36, %v3827_v13  ;;  %v3782_v50 = vpop.f32.mrf.mxu0  ;;  %v16926_v46 = vld [vmem:[#allocation2 + $0x129] sm:$0xff] }
 0x223   : > { %13800 = vmatmul.mubr.msk.f32.gmra.mxu1 %vm3904_vm2, %v16906_v42  ;;  %13850 = vmatmul.mubr.msk.f32.gmra.mxu0 %vm3904_vm2, %v16897_v37  ;;  %v3869_v47 = vadd.f32 %v16484_v36, %v3830_v51  ;;  %v3829_v11 = vadd.f32 %v3782_v50, %v3439_v4  ;;  %v3441_v12 = vadd.f32 %v3402_v35, %v3051_v28 }
 0x224   : > { %3988 = vst.msk [vmem:[#allocation2 + $0x159] sm:$0xff] %vm3904_vm2, %v3899_v6  ;;  %v3898_v41 = vmax.f32 %v3866_v21, 0.0  ;;  %v13763_v3 = vpop.f32.mrf.mxu0 }
 0x225   : > { %v3901_v14 = vmax.f32 %v3869_v47, 0.0  ;;  %v3868_v24 = vadd.f32 %v16484_v36, %v3829_v11  ;;  %v3832_v31 = vadd.f32 %v13763_v3, %v3442_v20 }
 0x226   : > { %v16914_v43 = vld [vmem:[#allocation2 + $0x121] sm:$0xff]  ;;  %3987 = vst.msk [vmem:[#allocation2 + $0x151] sm:$0xff] %vm3904_vm2, %v3898_v41  ;;  %v3792_v13 = vpop.f32.mrf.mxu0 }
 0x227   : > { %v16916_v58 = vld [vmem:[#allocation2 + $0x120] sm:$0xff]  ;;  %v16918_v8 = vld [vmem:[#allocation2 + $0x128] sm:$0xff]  ;;  %13802 = vmatprep.mubr.msk.f32.mxu1 %vm3904_vm2, %v16914_v43  ;;  %3990 = vst.msk [vmem:[#allocation2 + $0x171] sm:$0xff] %vm3904_vm2, %v3901_v14  ;;  %v3900_v4 = vmax.f32 %v3868_v24, 0.0  ;;  %v3871_v38 = vadd.f32 %v16484_v36, %v3832_v31  ;;  %v3831_v28 = vadd.f32 %v3792_v13, %v3441_v12 }
 0x228   : > { %22824 = vst [vmem:[#allocation14_spill] sm:$0xff] %v16916_v58  ;;  %22825 = vst [vmem:[#allocation38_spill] sm:$0xff] %v16918_v8  ;;  %13852 = vmatprep.mubr.msk.f32.mxu0 %vm3904_vm2, %v16916_v58  ;;  %13803 = vmatmul.mubr.msk.f32.gmra.mxu1 %vm3904_vm2, %v16926_v46  ;;  %v16946_v20 = vld [vmem:[#allocation2 + $0x141] sm:$0xff] }
 0x229   : > { %13853 = vmatmul.mubr.msk.f32.gmra.mxu0 %vm3904_vm2, %v16918_v8  ;;  %v16934_v6 = vld [vmem:[#allocation2 + $0x139] sm:$0xff]  ;;  %3989 = vst.msk [vmem:[#allocation2 + $0x169] sm:$0xff] %vm3904_vm2, %v3900_v4  ;;  %v3903_v35 = vmax.f32 %v3871_v38, 0.0  ;;  %v3870_v50 = vadd.f32 %v16484_v36, %v3831_v28  ;;  %v4702_v12 = vld [vmem:[#allocation2 + $0x2] sm:$0xff]  ;;  %v4703_v4 = vld [vmem:[#allocation2 + $0xa] sm:$0xff]  ;;  %v13818_v28 = vpop.f32.mrf.mxu0 }
 0x22a   : > { %v16936_v21 = vld [vmem:[#allocation2 + $0x138] sm:$0xff]  ;;  %v16938_v51 = vld [vmem:[#allocation2 + $0x140] sm:$0xff]  ;;  %13805 = vmatprep.mubr.msk.f32.mxu1 %vm3904_vm2, %v16934_v6 }
 0x22b   : > { %22826 = vst [vmem:[#allocation37_spill] sm:$0xff] %v16936_v21  ;;  %22827 = vst [vmem:[#allocation90_spill] sm:$0xff] %v16938_v51  ;;  %13855 = vmatprep.mubr.msk.f32.mxu0 %vm3904_vm2, %v16936_v21  ;;  %v3902_v41 = vmax.f32 %v3870_v50, 0.0  ;;  %v16964_v3 = vld [vmem:[#allocation2 + $0x159] sm:$0xff]  ;;  %v16997_v50 = vld [vmem:[%s22397_s3 + $0x30] sm:$0xff] }
 0x22c   : > { %13806 = vmatmul.mubr.msk.f32.gmra.mxu1 %vm3904_vm2, %v16946_v20  ;;  %3992 = vst.msk [vmem:[#allocation2 + $0x189] sm:$0xff] %vm3904_vm2, %v3903_v35  ;;  %v16992_v35 = vld [vmem:[#allocation2 + $0x1a] sm:$0xff] }
 0x22d   : > { %13856 = vmatmul.mubr.msk.f32.gmra.mxu0 %vm3904_vm2, %v16938_v51  ;;  %v16953_v47 = vld [vmem:[#allocation2 + $0x151] sm:$0xff]  ;;  %3991 = vst.msk [vmem:[#allocation2 + $0x181] sm:$0xff] %vm3904_vm2, %v3902_v41 }
 0x22e   : > { %v16955_v36 = vld [vmem:[#allocation2 + $0x150] sm:$0xff]  ;;  %v16957_v11 = vld [vmem:[#allocation2 + $0x158] sm:$0xff]  ;;  %13808 = vmatprep.mubr.msk.f32.mxu1 %vm3904_vm2, %v16953_v47 }
 0x22f   : > { %22828 = vst [vmem:[#allocation82_spill] sm:$0xff] %v16955_v36  ;;  %22829 = vst [vmem:[#allocation40_spill] sm:$0xff] %v16957_v11  ;;  %13858 = vmatprep.mubr.msk.f32.mxu0 %vm3904_vm2, %v16955_v36  ;;  %v16980_v13 = vld [vmem:[#allocation2 + $0x171] sm:$0xff] }
 0x230   : > { %13809 = vmatmul.mubr.msk.f32.gmra.mxu1 %vm3904_vm2, %v16964_v3  ;;  %v16970_v14 = vld [vmem:[#allocation2 + $0x169] sm:$0xff] }
 0x231   : > { %13859 = vmatmul.mubr.msk.f32.gmra.mxu0 %vm3904_vm2, %v16957_v11  ;;  %v16972_v24 = vld [vmem:[#allocation2 + $0x168] sm:$0xff]  ;;  %v16974_v31 = vld [vmem:[#allocation2 + $0x170] sm:$0xff]  ;;  %13811 = vmatprep.mubr.msk.f32.mxu1 %vm3904_vm2, %v16970_v14 }
 0x232   : > { %22830 = vst [vmem:[#allocation43_spill] sm:$0xff] %v16972_v24  ;;  %13861 = vmatprep.mubr.msk.f32.mxu0 %vm3904_vm2, %v16972_v24 }
 0x234   : > { %13812 = vmatmul.mubr.msk.f32.gmra.mxu1 %vm3904_vm2, %v16980_v13 }
 0x235   : > { %13862 = vmatmul.mubr.msk.f32.gmra.mxu0 %vm3904_vm2, %v16974_v31  ;;  %13866 = vmatprep.mubr.msk.f32.mxu1 %vm3904_vm2, %v4702_v12  ;;  %v22832_v12 = vld [vmem:[#allocation77_spill] sm:$0xff] }
 0x236   : > { %13916 = vmatprep.mubr.msk.f32.mxu0 %vm3904_vm2, %v16583_v39  ;;  %v17002_v39 = vld [vmem:[%s22397_s3 + $0x38] sm:$0xff] }
 0x238   : > { %13867 = vmatmul.mubr.msk.f32.vlgmr.msra.gmra.mxu1 %vm3904_vm2, %v4703_v4  ;;  %v17020_v4 = vld [vmem:[#allocation2 + $0x32] sm:$0xff] }
 0x239   : > { %v13768_v38 = vpop.f32.mrf.mxu1  ;;  %13917 = vmatmul.mubr.msk.f32.vlgmr.msra.gmra.mxu0 %vm3904_vm2, %v16585_v2  ;;  %13965 = vmatpush3.msra.mxu1 %v22832_v12  ;;  %v17012_v2 = vld [vmem:[#allocation2 + $0x22] sm:$0xff] }
 0x23a   : > { %v17004_v41 = vadd.f32 %v13818_v28, %v13768_v38  ;;  %13869 = vmatprep.mubr.msk.f32.mxu1 %vm3904_vm2, %v16992_v35  ;;  %13919 = vmatprep.mubr.msk.f32.mxu0 %vm3904_vm2, %v16617_v34  ;;  %v17032_v38 = vld [vmem:[#allocation2 + $0x4a] sm:$0xff]  ;;  %v17038_v28 = vld [vmem:[#allocation2 + $0x52] sm:$0xff]  ;;  %v17044_v12 = vld [vmem:[#allocation2 + $0x62] sm:$0xff] }
 0x23b   : > { %14015 = vmatpush3.msra.mxu0 %v16545_v62  ;;  %14064 = vmatprep.subr.mxu1 %v16997_v50  ;;  %v17026_v62 = vld [vmem:[#allocation2 + $0x3a] sm:$0xff] }
 0x23c   : > { %22831 = vst [vmem:[#allocation83_spill] sm:$0xff] %v17004_v41  ;;  %14114 = vmatprep.subr.mxu0 %v17002_v39  ;;  %13870 = vmatmul.mubr.msk.f32.gmra.mxu1 %vm3904_vm2, %v17012_v2  ;;  %v17050_v41 = vld [vmem:[#allocation2 + $0x6a] sm:$0xff] }
 0x23d   : > { %13920 = vmatmul.mubr.msk.f32.gmra.mxu0 %vm3904_vm2, %v16619_v26  ;;  %13872 = vmatprep.mubr.msk.f32.mxu1 %vm3904_vm2, %v17020_v4 }
 0x23e   : > { %13922 = vmatprep.mubr.msk.f32.mxu0 %vm3904_vm2, %v16650_v59 }
 0x240   : > { %13873 = vmatmul.mubr.msk.f32.gmra.mxu1 %vm3904_vm2, %v17026_v62 }
 0x241   : > { %13923 = vmatmul.mubr.msk.f32.gmra.mxu0 %vm3904_vm2, %v16652_v18  ;;  %13875 = vmatprep.mubr.msk.f32.mxu1 %vm3904_vm2, %v17032_v38  ;;  %v17178_v18 = vld [vmem:[#allocation2 + $0x180] sm:$0xff] }
 0x242   : > { %13925 = vmatprep.mubr.msk.f32.mxu0 %vm3904_vm2, %v16683_v53  ;;  %v17056_v53 = vld [vmem:[#allocation2 + $0x7a] sm:$0xff]  ;;  %22833 = vst [vmem:[#allocation93_spill] sm:$0xff] %v17178_v18 }
 0x244   : > { %13876 = vmatmul.mubr.msk.f32.gmra.mxu1 %vm3904_vm2, %v17038_v28 }
 0x245   : > { %13926 = vmatmul.mubr.msk.f32.gmra.mxu0 %vm3904_vm2, %v16685_v5  ;;  %13878 = vmatprep.mubr.msk.f32.mxu1 %vm3904_vm2, %v17044_v12  ;;  %v17062_v5 = vld [vmem:[#allocation2 + $0x82] sm:$0xff] }
 0x246   : > { %13928 = vmatprep.mubr.msk.f32.mxu0 %vm3904_vm2, %v16716_v40  ;;  %v17068_v40 = vld [vmem:[#allocation2 + $0x92] sm:$0xff] }
 0x248   : > { %13879 = vmatmul.mubr.msk.f32.gmra.mxu1 %vm3904_vm2, %v17050_v41 }
 0x249   : > { %13929 = vmatmul.mubr.msk.f32.gmra.mxu0 %vm3904_vm2, %v16718_v0  ;;  %13881 = vmatprep.mubr.msk.f32.mxu1 %vm3904_vm2, %v17056_v53  ;;  %v17074_v0 = vld [vmem:[#allocation2 + $0x9a] sm:$0xff] }
 0x24a   : > { %13931 = vmatprep.mubr.msk.f32.mxu0 %vm3904_vm2, %v16749_v22  ;;  %v17080_v22 = vld [vmem:[#allocation2 + $0xaa] sm:$0xff] }
 0x24c   : > { %13882 = vmatmul.mubr.msk.f32.gmra.mxu1 %vm3904_vm2, %v17062_v5 }
 0x24d   : > { %13932 = vmatmul.mubr.msk.f32.gmra.mxu0 %vm3904_vm2, %v16751_v44  ;;  %13884 = vmatprep.mubr.msk.f32.mxu1 %vm3904_vm2, %v17068_v40  ;;  %v17086_v44 = vld [vmem:[#allocation2 + $0xb2] sm:$0xff] }
 0x24e   : > { %13934 = vmatprep.mubr.msk.f32.mxu0 %vm3904_vm2, %v16782_v10  ;;  %v17092_v10 = vld [vmem:[#allocation2 + $0xc2] sm:$0xff] }
 0x250   : > { %13885 = vmatmul.mubr.msk.f32.gmra.mxu1 %vm3904_vm2, %v17074_v0 }
 0x251   : > { %13935 = vmatmul.mubr.msk.f32.gmra.mxu0 %vm3904_vm2, %v16784_v19  ;;  %13887 = vmatprep.mubr.msk.f32.mxu1 %vm3904_vm2, %v17080_v22  ;;  %v17098_v19 = vld [vmem:[#allocation2 + $0xca] sm:$0xff] }
 0x252   : > { %13937 = vmatprep.mubr.msk.f32.mxu0 %vm3904_vm2, %v16815_v55  ;;  %v17104_v55 = vld [vmem:[#allocation2 + $0xda] sm:$0xff] }
 0x254   : > { %13888 = vmatmul.mubr.msk.f32.gmra.mxu1 %vm3904_vm2, %v17086_v44 }
 0x255   : > { %13938 = vmatmul.mubr.msk.f32.gmra.mxu0 %vm3904_vm2, %v16817_v45  ;;  %13890 = vmatprep.mubr.msk.f32.mxu1 %vm3904_vm2, %v17092_v10  ;;  %v17110_v45 = vld [vmem:[#allocation2 + $0xe2] sm:$0xff] }
 0x256   : > { %13940 = vmatprep.mubr.msk.f32.mxu0 %vm3904_vm2, %v16844_v27  ;;  %v17116_v27 = vld [vmem:[#allocation2 + $0xf2] sm:$0xff] }
 0x258   : > { %13891 = vmatmul.mubr.msk.f32.gmra.mxu1 %vm3904_vm2, %v17098_v19 }
 0x259   : > { %13941 = vmatmul.mubr.msk.f32.gmra.mxu0 %vm3904_vm2, %v16846_v29  ;;  %13893 = vmatprep.mubr.msk.f32.mxu1 %vm3904_vm2, %v17104_v55  ;;  %v17122_v29 = vld [vmem:[#allocation2 + $0xfa] sm:$0xff] }
 0x25a   : > { %13943 = vmatprep.mubr.msk.f32.mxu0 %vm3904_vm2, %v16872_v52  ;;  %v17128_v52 = vld [vmem:[#allocation2 + $0x10a] sm:$0xff] }
 0x25c   : > { %13894 = vmatmul.mubr.msk.f32.gmra.mxu1 %vm3904_vm2, %v17110_v45 }
 0x25d   : > { %13944 = vmatmul.mubr.msk.f32.gmra.mxu0 %vm3904_vm2, %v16874_v16  ;;  %13896 = vmatprep.mubr.msk.f32.mxu1 %vm3904_vm2, %v17116_v27  ;;  %v17134_v16 = vld [vmem:[#allocation2 + $0x112] sm:$0xff] }
 0x25e   : > { %13946 = vmatprep.mubr.msk.f32.mxu0 %vm3904_vm2, %v16895_v63  ;;  %v17140_v63 = vld [vmem:[#allocation2 + $0x122] sm:$0xff] }
 0x260   : > { %13897 = vmatmul.mubr.msk.f32.gmra.mxu1 %vm3904_vm2, %v17122_v29 }
 0x261   : > { %13947 = vmatmul.mubr.msk.f32.gmra.mxu0 %vm3904_vm2, %v16897_v37  ;;  %13899 = vmatprep.mubr.msk.f32.mxu1 %vm3904_vm2, %v17128_v52  ;;  %v17146_v37 = vld [vmem:[#allocation2 + $0x12a] sm:$0xff] }
 0x262   : > { %13949 = vmatprep.mubr.msk.f32.mxu0 %vm3904_vm2, %v16916_v58  ;;  %v17152_v58 = vld [vmem:[#allocation2 + $0x13a] sm:$0xff] }
 0x264   : > { %13900 = vmatmul.mubr.msk.f32.gmra.mxu1 %vm3904_vm2, %v17134_v16 }
 0x265   : > { %13950 = vmatmul.mubr.msk.f32.gmra.mxu0 %vm3904_vm2, %v16918_v8  ;;  %13902 = vmatprep.mubr.msk.f32.mxu1 %vm3904_vm2, %v17140_v63  ;;  %v17158_v8 = vld [vmem:[#allocation2 + $0x142] sm:$0xff] }
 0x266   : > { %13952 = vmatprep.mubr.msk.f32.mxu0 %vm3904_vm2, %v16936_v21  ;;  %v17164_v21 = vld [vmem:[#allocation2 + $0x152] sm:$0xff] }
 0x268   : > { %13903 = vmatmul.mubr.msk.f32.gmra.mxu1 %vm3904_vm2, %v17146_v37 }
 0x269   : > { %13953 = vmatmul.mubr.msk.f32.gmra.mxu0 %vm3904_vm2, %v16938_v51  ;;  %13905 = vmatprep.mubr.msk.f32.mxu1 %vm3904_vm2, %v17152_v58  ;;  %v17170_v51 = vld [vmem:[#allocation2 + $0x15a] sm:$0xff] }
 0x26a   : > { %13955 = vmatprep.mubr.msk.f32.mxu0 %vm3904_vm2, %v16955_v36  ;;  %v17176_v36 = vld [vmem:[#allocation2 + $0x16a] sm:$0xff] }
 0x26c   : > { %13906 = vmatmul.mubr.msk.f32.gmra.mxu1 %vm3904_vm2, %v17158_v8 }
 0x26d   : > { %13956 = vmatmul.mubr.msk.f32.gmra.mxu0 %vm3904_vm2, %v16957_v11  ;;  %13908 = vmatprep.mubr.msk.f32.mxu1 %vm3904_vm2, %v17164_v21  ;;  %v17184_v11 = vld [vmem:[#allocation2 + $0x172] sm:$0xff] }
 0x26e   : > { %13958 = vmatprep.mubr.msk.f32.mxu0 %vm3904_vm2, %v16972_v24  ;;  %v17186_v24 = vld [vmem:[#allocation2 + $0x188] sm:$0xff] }
 0x270   : > { %13909 = vmatmul.mubr.msk.f32.gmra.mxu1 %vm3904_vm2, %v17170_v51 }
 0x271   : > { %13959 = vmatmul.mubr.msk.f32.gmra.mxu0 %vm3904_vm2, %v16974_v31  ;;  %13911 = vmatprep.mubr.msk.f32.mxu1 %vm3904_vm2, %v17176_v36 }
 0x272   : > { %13961 = vmatprep.mubr.msk.f32.mxu0 %vm3904_vm2, %v17178_v18  ;;  %v17203_v18 = vld [vmem:[%s22397_s3 + $0x40] sm:$0xff] }
 0x274   : > { %13912 = vmatmul.mubr.msk.f32.gmra.mxu1 %vm3904_vm2, %v17184_v11 }
 0x275   : > { %13962 = vmatmul.mubr.msk.f32.gmra.mxu0 %vm3904_vm2, %v17186_v24  ;;  %13966 = vmatprep.mubr.msk.f32.mxu1 %vm3904_vm2, %v16581_v57  ;;  %v22834_v57 = vmov 0.0  }
 0x276   : > { %14016 = vmatprep.mubr.msk.f32.mxu0 %vm3904_vm2, %v16992_v35  ;;  %v22836_v35 = vld [vmem:[#allocation35_spill] sm:$0xff] }
 0x278   : > { %13967 = vmatmul.mubr.msk.f32.vlgmr.msra.gmra.mxu1 %vm3904_vm2, %v16594_v60  ;;  %v22835_v60 = vld [vmem:[#allocation12_spill] sm:$0xff] }
 0x279   : > { %14017 = vmatmul.mubr.msk.f32.vlgmr.msra.gmra.mxu0 %vm3904_vm2, %v17012_v2  ;;  %14065 = vmatpush3.msra.mxu1 %v16997_v50  ;;  %v22837_v50 = vld [vmem:[#allocation84_spill] sm:$0xff] }
 0x27a   : > { %13969 = vmatprep.mubr.msk.f32.mxu1 %vm3904_vm2, %v16615_v17  ;;  %14019 = vmatprep.mubr.msk.f32.mxu0 %vm3904_vm2, %v17020_v4 }
 0x27b   : > { %14115 = vmatpush3.msra.mxu0 %v17002_v39  ;;  %14164 = vmatprep.subr.mxu1 %v17203_v18  ;;  %v22838_v39 = vld [vmem:[#allocation36_spill] sm:$0xff] }
 0x27c   : > { %14214 = vmatprep.subr.mxu0 %v22834_v57  ;;  %13970 = vmatmul.mubr.msk.f32.gmra.mxu1 %vm3904_vm2, %v16628_v32 }
 0x27d   : > { %14020 = vmatmul.mubr.msk.f32.gmra.mxu0 %vm3904_vm2, %v17026_v62  ;;  %13972 = vmatprep.mubr.msk.f32.mxu1 %vm3904_vm2, %v16648_v7 }
 0x27e   : > { %14022 = vmatprep.mubr.msk.f32.mxu0 %vm3904_vm2, %v17032_v38 }
 0x280   : > { %13973 = vmatmul.mubr.msk.f32.gmra.mxu1 %vm3904_vm2, %v16661_v23 }
 0x281   : > { %14023 = vmatmul.mubr.msk.f32.gmra.mxu0 %vm3904_vm2, %v17038_v28  ;;  %13975 = vmatprep.mubr.msk.f32.mxu1 %vm3904_vm2, %v16681_v33 }
 0x282   : > { %14025 = vmatprep.mubr.msk.f32.mxu0 %vm3904_vm2, %v17044_v12 }
 0x284   : > { %13976 = vmatmul.mubr.msk.f32.gmra.mxu1 %vm3904_vm2, %v16694_v9 }
 0x285   : > { %14026 = vmatmul.mubr.msk.f32.gmra.mxu0 %vm3904_vm2, %v17050_v41  ;;  %13978 = vmatprep.mubr.msk.f32.mxu1 %vm3904_vm2, %v16714_v30 }
 0x286   : > { %14028 = vmatprep.mubr.msk.f32.mxu0 %vm3904_vm2, %v17056_v53 }
 0x288   : > { %13979 = vmatmul.mubr.msk.f32.gmra.mxu1 %vm3904_vm2, %v16727_v61 }
 0x289   : > { %14029 = vmatmul.mubr.msk.f32.gmra.mxu0 %vm3904_vm2, %v17062_v5  ;;  %13981 = vmatprep.mubr.msk.f32.mxu1 %vm3904_vm2, %v16747_v54 }
 0x28a   : > { %14031 = vmatprep.mubr.msk.f32.mxu0 %vm3904_vm2, %v17068_v40 }
 0x28c   : > { %13982 = vmatmul.mubr.msk.f32.gmra.mxu1 %vm3904_vm2, %v22835_v60 }
 0x28d   : > { %14032 = vmatmul.mubr.msk.f32.gmra.mxu0 %vm3904_vm2, %v17074_v0  ;;  %13984 = vmatprep.mubr.msk.f32.mxu1 %vm3904_vm2, %v22836_v35 }
 0x28e   : > { %14034 = vmatprep.mubr.msk.f32.mxu0 %vm3904_vm2, %v17080_v22 }
 0x290   : > { %13985 = vmatmul.mubr.msk.f32.gmra.mxu1 %vm3904_vm2, %v22837_v50 }
 0x291   : > { %14035 = vmatmul.mubr.msk.f32.gmra.mxu0 %vm3904_vm2, %v17086_v44  ;;  %13987 = vmatprep.mubr.msk.f32.mxu1 %vm3904_vm2, %v16813_v56 }
 0x292   : > { %14037 = vmatprep.mubr.msk.f32.mxu0 %vm3904_vm2, %v17092_v10 }
 0x294   : > { %13988 = vmatmul.mubr.msk.f32.gmra.mxu1 %vm3904_vm2, %v22838_v39 }
 0x295   : > { %14038 = vmatmul.mubr.msk.f32.gmra.mxu0 %vm3904_vm2, %v17098_v19  ;;  %13990 = vmatprep.mubr.msk.f32.mxu1 %vm3904_vm2, %v16842_v15 }
 0x296   : > { %14040 = vmatprep.mubr.msk.f32.mxu0 %vm3904_vm2, %v17104_v55 }
 0x298   : > { %13991 = vmatmul.mubr.msk.f32.gmra.mxu1 %vm3904_vm2, %v16855_v25 }
 0x299   : > { %14041 = vmatmul.mubr.msk.f32.gmra.mxu0 %vm3904_vm2, %v17110_v45  ;;  %13993 = vmatprep.mubr.msk.f32.mxu1 %vm3904_vm2, %v16870_v49 }
 0x29a   : > { %14043 = vmatprep.mubr.msk.f32.mxu0 %vm3904_vm2, %v17116_v27 }
 0x29c   : > { %13994 = vmatmul.mubr.msk.f32.gmra.mxu1 %vm3904_vm2, %v16883_v1 }
 0x29d   : > { %14044 = vmatmul.mubr.msk.f32.gmra.mxu0 %vm3904_vm2, %v17122_v29  ;;  %13996 = vmatprep.mubr.msk.f32.mxu1 %vm3904_vm2, %v16893_v48 }
 0x29e   : > { %14046 = vmatprep.mubr.msk.f32.mxu0 %vm3904_vm2, %v17128_v52 }
 0x2a0   : > { %13997 = vmatmul.mubr.msk.f32.gmra.mxu1 %vm3904_vm2, %v16906_v42 }
 0x2a1   : > { %14047 = vmatmul.mubr.msk.f32.gmra.mxu0 %vm3904_vm2, %v17134_v16  ;;  %13999 = vmatprep.mubr.msk.f32.mxu1 %vm3904_vm2, %v16914_v43  ;;  %v17321_v16 = vld [vmem:[#allocation2 + $0x181] sm:$0xff] }
 0x2a2   : > { %14049 = vmatprep.mubr.msk.f32.mxu0 %vm3904_vm2, %v17140_v63 }
 0x2a4   : > { %14000 = vmatmul.mubr.msk.f32.gmra.mxu1 %vm3904_vm2, %v16926_v46 }
 0x2a5   : > { %14050 = vmatmul.mubr.msk.f32.gmra.mxu0 %vm3904_vm2, %v17146_v37  ;;  %14002 = vmatprep.mubr.msk.f32.mxu1 %vm3904_vm2, %v16934_v6  ;;  %v17323_v37 = vld [vmem:[#allocation2 + $0x182] sm:$0xff] }
 0x2a6   : > { %14052 = vmatprep.mubr.msk.f32.mxu0 %vm3904_vm2, %v17152_v58  ;;  %v17329_v58 = vld [vmem:[#allocation2 + $0x189] sm:$0xff] }
 0x2a8   : > { %14003 = vmatmul.mubr.msk.f32.gmra.mxu1 %vm3904_vm2, %v16946_v20 }
 0x2a9   : > { %14053 = vmatmul.mubr.msk.f32.gmra.mxu0 %vm3904_vm2, %v17158_v8  ;;  %14005 = vmatprep.mubr.msk.f32.mxu1 %vm3904_vm2, %v16953_v47  ;;  %v17331_v8 = vld [vmem:[#allocation2 + $0x18a] sm:$0xff] }
 0x2aa   : > { %14055 = vmatprep.mubr.msk.f32.mxu0 %vm3904_vm2, %v17164_v21  ;;  %22839 = vst [vmem:[#allocation17_spill] sm:$0xff] %v17331_v8  ;;  %v17348_v21 = vpop.f32.mrf.mxu1 }
 0x2ac   : > { %14006 = vmatmul.mubr.msk.f32.gmra.mxu1 %vm3904_vm2, %v16964_v3 }
 0x2ad   : > { %14056 = vmatmul.mubr.msk.f32.gmra.mxu0 %vm3904_vm2, %v17170_v51  ;;  %14008 = vmatprep.mubr.msk.f32.mxu1 %vm3904_vm2, %v16970_v14  ;;  %v17350_v51 = vpop.f32.mrf.mxu0 }
 0x2ae   : > { %14058 = vmatprep.mubr.msk.f32.mxu0 %vm3904_vm2, %v17176_v36 }
 0x2b0   : > { %14009 = vmatmul.mubr.msk.f32.gmra.mxu1 %vm3904_vm2, %v16980_v13 }
 0x2b1   : > { %14059 = vmatmul.mubr.msk.f32.gmra.mxu0 %vm3904_vm2, %v17184_v11  ;;  %14011 = vmatprep.mubr.msk.f32.mxu1 %vm3904_vm2, %v17321_v16 }
 0x2b2   : > { %14061 = vmatprep.mubr.msk.f32.mxu0 %vm3904_vm2, %v17323_v37 }
 0x2b4   : > { %14012 = vmatmul.mubr.msk.f32.gmra.mxu1 %vm3904_vm2, %v17329_v58 }
 0x2b5   : > { %14062 = vmatmul.mubr.msk.f32.gmra.mxu0 %vm3904_vm2, %v17331_v8  ;;  %14066 = vmatprep.mubr.msk.f32.mxu1 %vm3904_vm2, %v16617_v34  ;;  %v22858_v8 = vld [vmem:[#allocation38_spill] sm:$0xff] }
 0x2b6   : > { %14116 = vmatprep.mubr.msk.f32.mxu0 %vm3904_vm2, %v16615_v17 }
 0x2b8   : > { %14067 = vmatmul.mubr.msk.f32.vlgmr.msra.gmra.mxu1 %vm3904_vm2, %v16619_v26  ;;  %v13771_v17 = vpop.f32.mrf.mxu1  ;;  %v22840_v26 = vld [vmem:[#allocation32_spill] sm:$0xff] }
 0x2b9   : > { %14117 = vmatmul.mubr.msk.f32.vlgmr.msra.gmra.mxu0 %vm3904_vm2, %v16628_v32  ;;  %14165 = vmatpush3.msra.mxu1 %v17203_v18  ;;  %v13821_v34 = vpop.f32.mrf.mxu0 }
 0x2ba   : > { %14069 = vmatprep.mubr.msk.f32.mxu1 %vm3904_vm2, %v16650_v59  ;;  %14119 = vmatprep.mubr.msk.f32.mxu0 %vm3904_vm2, %v16648_v7  ;;  %v17359_v32 = vadd.f32 %v13821_v34, %v13771_v17  ;;  %v22841_v59 = vld [vmem:[#allocation33_spill] sm:$0xff]  ;;  %v4232_v18 = vpop.f32.mrf.mxu1 }
 0x2bb   : > { %14225 = vmatprep.subr.mxu1 %v22834_v57  ;;  %v4553_v7 = vpop.f32.mrf.mxu0  ;;  %v22842_v57 = vld [vmem:[#allocation78_spill] sm:$0xff]  ;;  %v22843_v17 = vld [vmem:[#allocation81_spill] sm:$0xff] }
 0x2bc   : > { %14070 = vmatmul.mubr.msk.f32.gmra.mxu1 %vm3904_vm2, %v22840_v26  ;;  %v17365_v36 = vadd.f32 %v4553_v7, %v4232_v18  ;;  %v13774_v11 = vpop.f32.mrf.mxu1  ;;  %v22844_v7 = vld [vmem:[#allocation6_spill] sm:$0xff] }
 0x2bd   : > { %14120 = vmatmul.mubr.msk.f32.gmra.mxu0 %vm3904_vm2, %v16661_v23  ;;  %14072 = vmatprep.mubr.msk.f32.mxu1 %vm3904_vm2, %v22841_v59  ;;  %v13824_v2 = vpop.f32.mrf.mxu0 }
 0x2be   : > { %14122 = vmatprep.mubr.msk.f32.mxu0 %vm3904_vm2, %v16681_v33  ;;  %v17371_v23 = vadd.f32 %v13824_v2, %v13774_v11  ;;  %v4242_v33 = vpop.f32.mrf.mxu1 }
 0x2bf   : > { %v4563_v34 = vpop.f32.mrf.mxu0 }
 0x2c0   : > { %14073 = vmatmul.mubr.msk.f32.gmra.mxu1 %vm3904_vm2, %v22842_v57  ;;  %v17377_v26 = vadd.f32 %v4563_v34, %v4242_v33  ;;  %v22845_v57 = vld [vmem:[#allocation7_spill] sm:$0xff]  ;;  %v22846_v34 = vld [vmem:[#allocation13_spill] sm:$0xff] }
 0x2c1   : > { %14123 = vmatmul.mubr.msk.f32.gmra.mxu0 %vm3904_vm2, %v16694_v9  ;;  %14075 = vmatprep.mubr.msk.f32.mxu1 %vm3904_vm2, %v22843_v17  ;;  %v13777_v59 = vpop.f32.mrf.mxu1  ;;  %v13827_v18 = vpop.f32.mrf.mxu0 }
 0x2c2   : > { %14125 = vmatprep.mubr.msk.f32.mxu0 %vm3904_vm2, %v16714_v30  ;;  %v17383_v9 = vadd.f32 %v13827_v18, %v13777_v59  ;;  %v22847_v59 = vld [vmem:[#allocation34_spill] sm:$0xff] }
 0x2c3   : > { %v4252_v30 = vpop.f32.mrf.mxu1  ;;  %v4573_v11 = vpop.f32.mrf.mxu0 }
 0x2c4   : > { %14076 = vmatmul.mubr.msk.f32.gmra.mxu1 %vm3904_vm2, %v22844_v7  ;;  %v17389_v2 = vadd.f32 %v4573_v11, %v4252_v30  ;;  %v22848_v11 = vld [vmem:[#allocation79_spill] sm:$0xff] }
 0x2c5   : > { %14126 = vmatmul.mubr.msk.f32.gmra.mxu0 %vm3904_vm2, %v16727_v61  ;;  %14078 = vmatprep.mubr.msk.f32.mxu1 %vm3904_vm2, %v22845_v57  ;;  %v13780_v17 = vpop.f32.mrf.mxu1  ;;  %v13830_v33 = vpop.f32.mrf.mxu0 }
 0x2c6   : > { %14128 = vmatprep.mubr.msk.f32.mxu0 %vm3904_vm2, %v16747_v54  ;;  %v17395_v61 = vadd.f32 %v13830_v33, %v13780_v17  ;;  %v22849_v17 = vld [vmem:[#allocation8_spill] sm:$0xff] }
 0x2c7   : > { %v4262_v54 = vpop.f32.mrf.mxu1  ;;  %v4583_v18 = vpop.f32.mrf.mxu0 }
 0x2c8   : > { %14079 = vmatmul.mubr.msk.f32.gmra.mxu1 %vm3904_vm2, %v22846_v34  ;;  %v17401_v7 = vadd.f32 %v4583_v18, %v4262_v54  ;;  %v22850_v18 = vld [vmem:[#allocation9_spill] sm:$0xff] }
 0x2c9   : > { %14129 = vmatmul.mubr.msk.f32.gmra.mxu0 %vm3904_vm2, %v22835_v60  ;;  %14081 = vmatprep.mubr.msk.f32.mxu1 %vm3904_vm2, %v22847_v59  ;;  %v13783_v57 = vpop.f32.mrf.mxu1  ;;  %v13833_v30 = vpop.f32.mrf.mxu0 }
 0x2ca   : > { %14131 = vmatprep.mubr.msk.f32.mxu0 %vm3904_vm2, %v22836_v35  ;;  %v17407_v60 = vadd.f32 %v13833_v30, %v13783_v57  ;;  %v22851_v57 = vld [vmem:[#allocation39_spill] sm:$0xff] }
 0x2cb   : > { %v4272_v35 = vpop.f32.mrf.mxu1  ;;  %v4593_v33 = vpop.f32.mrf.mxu0 }
 0x2cc   : > { %14082 = vmatmul.mubr.msk.f32.gmra.mxu1 %vm3904_vm2, %v22848_v11  ;;  %v17413_v34 = vadd.f32 %v4593_v33, %v4272_v35  ;;  %v22852_v33 = vld [vmem:[#allocation87_spill] sm:$0xff] }
 0x2cd   : > { %14132 = vmatmul.mubr.msk.f32.gmra.mxu0 %vm3904_vm2, %v22837_v50  ;;  %14084 = vmatprep.mubr.msk.f32.mxu1 %vm3904_vm2, %v22849_v17  ;;  %v13786_v59 = vpop.f32.mrf.mxu1 }
 0x2ce   : > { %14134 = vmatprep.mubr.msk.f32.mxu0 %vm3904_vm2, %v16813_v56  ;;  %v13836_v54 = vpop.f32.mrf.mxu0 }
 0x2cf   : > { %v17419_v50 = vadd.f32 %v13836_v54, %v13786_v59  ;;  %v4282_v56 = vpop.f32.mrf.mxu1  ;;  %v22853_v59 = vld [vmem:[#allocation80_spill] sm:$0xff] }
 0x2d0   : > { %14085 = vmatmul.mubr.msk.f32.gmra.mxu1 %vm3904_vm2, %v22850_v18  ;;  %v4603_v30 = vpop.f32.mrf.mxu0 }
 0x2d1   : > { %14135 = vmatmul.mubr.msk.f32.gmra.mxu0 %vm3904_vm2, %v22838_v39  ;;  %14087 = vmatprep.mubr.msk.f32.mxu1 %vm3904_vm2, %v22851_v57  ;;  %v17425_v11 = vadd.f32 %v4603_v30, %v4282_v56  ;;  %v22854_v30 = vld [vmem:[#allocation10_spill] sm:$0xff] }
 0x2d2   : > { %14137 = vmatprep.mubr.msk.f32.mxu0 %vm3904_vm2, %v16842_v15  ;;  %v13789_v17 = vpop.f32.mrf.mxu1 }
 0x2d3   : > { %v13839_v35 = vpop.f32.mrf.mxu0 }
 0x2d4   : > { %14088 = vmatmul.mubr.msk.f32.gmra.mxu1 %vm3904_vm2, %v22852_v33  ;;  %v17431_v39 = vadd.f32 %v13839_v35, %v13789_v17  ;;  %v4292_v15 = vpop.f32.mrf.mxu1  ;;  %v22855_v17 = vld [vmem:[#allocation11_spill] sm:$0xff] }
 0x2d5   : > { %14138 = vmatmul.mubr.msk.f32.gmra.mxu0 %vm3904_vm2, %v16855_v25  ;;  %14090 = vmatprep.mubr.msk.f32.mxu1 %vm3904_vm2, %v22853_v59  ;;  %v4613_v54 = vpop.f32.mrf.mxu0 }
 0x2d6   : > { %14140 = vmatprep.mubr.msk.f32.mxu0 %vm3904_vm2, %v16870_v49  ;;  %v17437_v18 = vadd.f32 %v4613_v54, %v4292_v15  ;;  %v22856_v15 = vld [vmem:[#allocation15_spill] sm:$0xff]  ;;  %v22857_v54 = vld [vmem:[#allocation14_spill] sm:$0xff] }
 0x2d7   : > { %v13792_v57 = vpop.f32.mrf.mxu1  ;;  %v13842_v56 = vpop.f32.mrf.mxu0 }
 0x2d8   : > { %14091 = vmatmul.mubr.msk.f32.gmra.mxu1 %vm3904_vm2, %v22854_v30  ;;  %v17443_v25 = vadd.f32 %v13842_v56, %v13792_v57 }
 0x2d9   : > { %14141 = vmatmul.mubr.msk.f32.gmra.mxu0 %vm3904_vm2, %v16883_v1  ;;  %14093 = vmatprep.mubr.msk.f32.mxu1 %vm3904_vm2, %v22855_v17  ;;  %v17449_v49 = vpop.f32.mrf.mxu1  ;;  %v17451_v35 = vpop.f32.mrf.mxu0 }
 0x2da   : > { %14143 = vmatprep.mubr.msk.f32.mxu0 %vm3904_vm2, %v16893_v48 }
 0x2db   : > { %v13795_v33 = vpop.f32.mrf.mxu1  ;;  %v13845_v59 = vpop.f32.mrf.mxu0 }
 0x2dc   : > { %14094 = vmatmul.mubr.msk.f32.gmra.mxu1 %vm3904_vm2, %v22856_v15  ;;  %v17457_v1 = vadd.f32 %v13845_v59, %v13795_v33  ;;  %v22859_v33 = vld [vmem:[#allocation37_spill] sm:$0xff] }
 0x2dd   : > { %14144 = vmatmul.mubr.msk.f32.gmra.mxu0 %vm3904_vm2, %v16906_v42  ;;  %14096 = vmatprep.mubr.msk.f32.mxu1 %vm3904_vm2, %v22857_v54  ;;  %v4312_v48 = vpop.f32.mrf.mxu1  ;;  %v4633_v57 = vpop.f32.mrf.mxu0 }
 0x2de   : > { %14146 = vmatprep.mubr.msk.f32.mxu0 %vm3904_vm2, %v16914_v43  ;;  %v17463_v56 = vadd.f32 %v4633_v57, %v4312_v48  ;;  %v22860_v57 = vld [vmem:[#allocation90_spill] sm:$0xff] }
 0x2df   : > { %v13798_v30 = vpop.f32.mrf.mxu1  ;;  %v13848_v17 = vpop.f32.mrf.mxu0 }
 0x2e0   : > { %14097 = vmatmul.mubr.msk.f32.gmra.mxu1 %vm3904_vm2, %v22858_v8  ;;  %v17469_v42 = vadd.f32 %v13848_v17, %v13798_v30  ;;  %v22861_v8 = vld [vmem:[#allocation82_spill] sm:$0xff] }
 0x2e1   : > { %14147 = vmatmul.mubr.msk.f32.gmra.mxu0 %vm3904_vm2, %v16926_v46  ;;  %14099 = vmatprep.mubr.msk.f32.mxu1 %vm3904_vm2, %v22859_v33  ;;  %v4322_v43 = vpop.f32.mrf.mxu1  ;;  %v4643_v59 = vpop.f32.mrf.mxu0 }
 0x2e2   : > { %14149 = vmatprep.mubr.msk.f32.mxu0 %vm3904_vm2, %v16934_v6  ;;  %v17475_v15 = vadd.f32 %v4643_v59, %v4322_v43  ;;  %v22862_v59 = vld [vmem:[#allocation40_spill] sm:$0xff] }
 0x2e3   : > { %v13801_v54 = vpop.f32.mrf.mxu1  ;;  %v13851_v48 = vpop.f32.mrf.mxu0 }
 0x2e4   : > { %14100 = vmatmul.mubr.msk.f32.gmra.mxu1 %vm3904_vm2, %v22860_v57  ;;  %v17481_v46 = vadd.f32 %v13851_v48, %v13801_v54  ;;  %v22863_v54 = vld [vmem:[#allocation43_spill] sm:$0xff] }
 0x2e5   : > { %14150 = vmatmul.mubr.msk.f32.gmra.mxu0 %vm3904_vm2, %v16946_v20  ;;  %14102 = vmatprep.mubr.msk.f32.mxu1 %vm3904_vm2, %v22861_v8  ;;  %v4332_v6 = vpop.f32.mrf.mxu1  ;;  %v4653_v30 = vpop.f32.mrf.mxu0 }
 0x2e6   : > { %14152 = vmatprep.mubr.msk.f32.mxu0 %vm3904_vm2, %v16953_v47  ;;  %v17487_v17 = vadd.f32 %v4653_v30, %v4332_v6  ;;  %v22864_v30 = vld [vmem:[#allocation93_spill] sm:$0xff] }
 0x2e8   : > { %v13804_v33 = vpop.f32.mrf.mxu1  ;;  %14103 = vmatmul.mubr.msk.f32.gmra.mxu1 %vm3904_vm2, %v22862_v59  ;;  %v6668_v59 = vld [vmem:[#allocation2 + $0x199] sm:$0xff] }
 0x2e9   : > { %v13854_v43 = vpop.f32.mrf.mxu0  ;;  %14153 = vmatmul.mubr.msk.f32.gmra.mxu0 %vm3904_vm2, %v16964_v3  ;;  %14105 = vmatprep.mubr.msk.f32.mxu1 %vm3904_vm2, %v22863_v54 }
 0x2ea   : > { %v17493_v20 = vadd.f32 %v13854_v43, %v13804_v33  ;;  %14155 = vmatprep.mubr.msk.f32.mxu0 %vm3904_vm2, %v16970_v14  ;;  %v4342_v47 = vpop.f32.mrf.mxu1  ;;  %v6281_v43 = vld [vmem:[#allocation2 + $0x198] sm:$0xff] }
 0x2eb   : > { %v4663_v48 = vpop.f32.mrf.mxu0 }
 0x2ec   : > { %v17499_v57 = vadd.f32 %v4663_v48, %v4342_v47  ;;  %v13807_v8 = vpop.f32.mrf.mxu1  ;;  %14106 = vmatmul.mubr.msk.f32.gmra.mxu1 %vm3904_vm2, %v16974_v31 }
 0x2ed   : > { %v13857_v6 = vpop.f32.mrf.mxu0  ;;  %14156 = vmatmul.mubr.msk.f32.gmra.mxu0 %vm3904_vm2, %v16980_v13  ;;  %14108 = vmatprep.mubr.msk.f32.mxu1 %vm3904_vm2, %v22864_v30  ;;  %v6282_v13 = vld [vmem:[#allocation2 + $0x1a0] sm:$0xff] }
 0x2ee   : > { %v17505_v3 = vadd.f32 %v13857_v6, %v13807_v8  ;;  %14158 = vmatprep.mubr.msk.f32.mxu0 %vm3904_vm2, %v17321_v16  ;;  %v4352_v14 = vpop.f32.mrf.mxu1  ;;  %v6669_v16 = vld [vmem:[#allocation2 + $0x1a1] sm:$0xff] }
 0x2ef   : > { %v4673_v33 = vpop.f32.mrf.mxu0 }
 0x2f0   : > { %v17511_v54 = vadd.f32 %v4673_v33, %v4352_v14  ;;  %v13810_v47 = vpop.f32.mrf.mxu1  ;;  %14109 = vmatmul.mubr.msk.f32.gmra.mxu1 %vm3904_vm2, %v17186_v24 }
 0x2f1   : > { %v13860_v48 = vpop.f32.mrf.mxu0  ;;  %14159 = vmatmul.mubr.msk.f32.gmra.mxu0 %vm3904_vm2, %v17329_v58  ;;  %14111 = vmatprep.mubr.msk.f32.mxu1 %vm3904_vm2, %v6281_v43 }
 0x2f2   : > { %v17517_v31 = vadd.f32 %v13860_v48, %v13810_v47  ;;  %14161 = vmatprep.mubr.msk.f32.mxu0 %vm3904_vm2, %v6668_v59  ;;  %v4362_v8 = vpop.f32.mrf.mxu1 }
 0x2f3   : > { %v4683_v6 = vpop.f32.mrf.mxu0 }
 0x2f4   : > { %v17521_v30 = vadd.f32 %v4683_v6, %v4362_v8  ;;  %v13813_v14 = vpop.f32.mrf.mxu1  ;;  %14112 = vmatmul.mubr.msk.f32.gmra.mxu1 %vm3904_vm2, %v6282_v13  ;;  %v4544_v8 = vadd.f32 %v17350_v51, %v17348_v21  ;;  %v22866_v13 = vld [vmem:[#allocation83_spill] sm:$0xff] }
 0x2f5   : > { %v13863_v33 = vpop.f32.mrf.mxu0  ;;  %14162 = vmatmul.mubr.msk.f32.gmra.mxu0 %vm3904_vm2, %v6669_v16  ;;  %14166 = vmatprep.mubr.msk.f32.mxu1 %vm3904_vm2, %v17020_v4 }
 0x2f6   : > { %v17525_v24 = vadd.f32 %v13863_v33, %v13813_v14  ;;  %v4372_v58 = vpop.f32.mrf.mxu1 }
 0x2f7   : > { %v4693_v43 = vpop.f32.mrf.mxu0 }
 0x2f8   : > { %v17529_v47 = vadd.f32 %v4693_v43, %v4372_v58  ;;  %v13868_v59 = vpop.f32.mrf.mxu1  ;;  %14167 = vmatmul.mubr.msk.f32.vlgmr.msra.gmra.mxu1 %vm3904_vm2, %v17026_v62 }
 0x2f9   : > { %v13918_v48 = vpop.f32.mrf.mxu0  ;;  %v5058_v6 = vadd.f32 %v13868_v59, %v22866_v13  ;;  %14169 = vmatprep.mubr.msk.f32.mxu1 %vm3904_vm2, %v17032_v38 }
 0x2fa   : > { %22865 = vst [vmem:[#allocation16_spill] sm:$0xff] %v17529_v47  ;;  %v4898_v16 = vpop.f32.mrf.mxu1 }
 0x2fb   : > { %v5285_v14 = vpop.f32.mrf.mxu0  ;;  %v17538_v4 = vadd.f32 %v13918_v48, %v5058_v6  ;;  %v5057_v33 = vadd.f32 %v4898_v16, %v4544_v8 }
 0x2fc   : > { %v13871_v58 = vpop.f32.mrf.mxu1  ;;  %14170 = vmatmul.mubr.msk.f32.gmra.mxu1 %vm3904_vm2, %v17038_v28 }
 0x2fd   : > { %v13921_v43 = vpop.f32.mrf.mxu0  ;;  %v17542_v47 = vadd.f32 %v5285_v14, %v5057_v33  ;;  %v5060_v62 = vadd.f32 %v13871_v58, %v17359_v32  ;;  %14172 = vmatprep.mubr.msk.f32.mxu1 %vm3904_vm2, %v17044_v12 }
 0x2fe   : > { %v4908_v21 = vpop.f32.mrf.mxu1 }
 0x2ff   : > { %v5295_v51 = vpop.f32.mrf.mxu0  ;;  %v17547_v38 = vadd.f32 %v13921_v43, %v5060_v62  ;;  %v5059_v59 = vadd.f32 %v4908_v21, %v17365_v36 }
 0x300   : > { %v13874_v48 = vpop.f32.mrf.mxu1  ;;  %14173 = vmatmul.mubr.msk.f32.gmra.mxu1 %vm3904_vm2, %v17050_v41 }
 0x301   : > { %v13924_v8 = vpop.f32.mrf.mxu0  ;;  %v17552_v13 = vadd.f32 %v5295_v51, %v5059_v59  ;;  %v5062_v28 = vadd.f32 %v13874_v48, %v17371_v23  ;;  %14175 = vmatprep.mubr.msk.f32.mxu1 %vm3904_vm2, %v17056_v53 }
 0x302   : > { %v4918_v32 = vpop.f32.mrf.mxu1 }
 0x303   : > { %v5305_v12 = vpop.f32.mrf.mxu0  ;;  %v17557_v6 = vadd.f32 %v13924_v8, %v5062_v28  ;;  %v5061_v16 = vadd.f32 %v4918_v32, %v17377_v26 }
 0x304   : > { %v13877_v14 = vpop.f32.mrf.mxu1  ;;  %14176 = vmatmul.mubr.msk.f32.gmra.mxu1 %vm3904_vm2, %v17062_v5 }
 0x305   : > { %v13927_v36 = vpop.f32.mrf.mxu0  ;;  %v17562_v33 = vadd.f32 %v5305_v12, %v5061_v16  ;;  %v5064_v41 = vadd.f32 %v13877_v14, %v17383_v9  ;;  %14178 = vmatprep.mubr.msk.f32.mxu1 %vm3904_vm2, %v17068_v40 }
 0x306   : > { %v4928_v23 = vpop.f32.mrf.mxu1 }
 0x307   : > { %v5315_v53 = vpop.f32.mrf.mxu0  ;;  %v17567_v58 = vadd.f32 %v13927_v36, %v5064_v41  ;;  %v5063_v43 = vadd.f32 %v4928_v23, %v17389_v2 }
 0x308   : > { %v13880_v62 = vpop.f32.mrf.mxu1  ;;  %14179 = vmatmul.mubr.msk.f32.gmra.mxu1 %vm3904_vm2, %v17074_v0 }
 0x309   : > { %v13930_v26 = vpop.f32.mrf.mxu0  ;;  %v17572_v21 = vadd.f32 %v5315_v53, %v5063_v43  ;;  %v5066_v5 = vadd.f32 %v13880_v62, %v17395_v61  ;;  %14181 = vmatprep.mubr.msk.f32.mxu1 %vm3904_vm2, %v17080_v22 }
 0x30a   : > { %v4938_v9 = vpop.f32.mrf.mxu1 }
 0x30b   : > { %v5325_v40 = vpop.f32.mrf.mxu0  ;;  %v17577_v51 = vadd.f32 %v13930_v26, %v5066_v5  ;;  %v5065_v59 = vadd.f32 %v4938_v9, %v17401_v7 }
 0x30c   : > { %v13883_v48 = vpop.f32.mrf.mxu1  ;;  %14182 = vmatmul.mubr.msk.f32.gmra.mxu1 %vm3904_vm2, %v17086_v44 }
 0x30d   : > { %v13933_v2 = vpop.f32.mrf.mxu0  ;;  %v17582_v8 = vadd.f32 %v5325_v40, %v5065_v59  ;;  %v5068_v0 = vadd.f32 %v13883_v48, %v17407_v60  ;;  %14184 = vmatprep.mubr.msk.f32.mxu1 %vm3904_vm2, %v17092_v10  ;;  %v7044_v40 = vld [vmem:[#allocation2 + $0x112] sm:$0xff] }
 0x30e   : > { %v4948_v61 = vpop.f32.mrf.mxu1 }
 0x30f   : > { %v5335_v22 = vpop.f32.mrf.mxu0  ;;  %v17587_v28 = vadd.f32 %v13933_v2, %v5068_v0  ;;  %v5067_v32 = vadd.f32 %v4948_v61, %v17413_v34  ;;  %v7046_v0 = vld [vmem:[#allocation2 + $0x12a] sm:$0xff] }
 0x310   : > { %v13886_v12 = vpop.f32.mrf.mxu1  ;;  %14185 = vmatmul.mubr.msk.f32.gmra.mxu1 %vm3904_vm2, %v17098_v19 }
 0x311   : > { %v13936_v7 = vpop.f32.mrf.mxu0  ;;  %v17592_v16 = vadd.f32 %v5335_v22, %v5067_v32  ;;  %v5070_v44 = vadd.f32 %v13886_v12, %v17419_v50  ;;  %14187 = vmatprep.mubr.msk.f32.mxu1 %vm3904_vm2, %v17104_v55  ;;  %v7047_v32 = vld [vmem:[#allocation2 + $0x13a] sm:$0xff] }
 0x312   : > { %v4958_v60 = vpop.f32.mrf.mxu1 }
 0x313   : > { %v5345_v10 = vpop.f32.mrf.mxu0  ;;  %v17597_v14 = vadd.f32 %v13936_v7, %v5070_v44  ;;  %v5069_v36 = vadd.f32 %v4958_v60, %v17425_v11 }
 0x314   : > { %v13889_v41 = vpop.f32.mrf.mxu1  ;;  %14188 = vmatmul.mubr.msk.f32.gmra.mxu1 %vm3904_vm2, %v17110_v45  ;;  %v4624_v45 = vadd.f32 %v17451_v35, %v17449_v49 }
 0x315   : > { %v13939_v34 = vpop.f32.mrf.mxu0  ;;  %v17602_v23 = vadd.f32 %v5345_v10, %v5069_v36  ;;  %v5072_v19 = vadd.f32 %v13889_v41, %v17431_v39  ;;  %14190 = vmatprep.mubr.msk.f32.mxu1 %vm3904_vm2, %v17116_v27  ;;  %v7048_v10 = vld [vmem:[#allocation2 + $0x142] sm:$0xff]  ;;  %v7049_v41 = vld [vmem:[#allocation2 + $0x152] sm:$0xff] }
 0x316   : > { %v4968_v50 = vpop.f32.mrf.mxu1 }
 0x317   : > { %v5355_v55 = vpop.f32.mrf.mxu0  ;;  %v17607_v53 = vadd.f32 %v13939_v34, %v5072_v19  ;;  %v5071_v43 = vadd.f32 %v4968_v50, %v17437_v18 }
 0x318   : > { %v13892_v62 = vpop.f32.mrf.mxu1  ;;  %14191 = vmatmul.mubr.msk.f32.gmra.mxu1 %vm3904_vm2, %v17122_v29 }
 0x319   : > { %v13942_v11 = vpop.f32.mrf.mxu0  ;;  %v17614_v26 = vadd.f32 %v5355_v55, %v5071_v43  ;;  %v5074_v39 = vadd.f32 %v13892_v62, %v17443_v25  ;;  %14193 = vmatprep.mubr.msk.f32.mxu1 %vm3904_vm2, %v17128_v52  ;;  %v7050_v62 = vld [vmem:[#allocation2 + $0x15a] sm:$0xff] }
 0x31a   : > { %v4978_v27 = vpop.f32.mrf.mxu1 }
 0x31b   : > { %v5365_v5 = vpop.f32.mrf.mxu0  ;;  %v17619_v9 = vadd.f32 %v13942_v11, %v5074_v39  ;;  %v5073_v18 = vadd.f32 %v4978_v27, %v4624_v45  ;;  %v7051_v45 = vld [vmem:[#allocation2 + $0x16a] sm:$0xff] }
 0x31c   : > { %v13895_v59 = vpop.f32.mrf.mxu1  ;;  %14194 = vmatmul.mubr.msk.f32.gmra.mxu1 %vm3904_vm2, %v7044_v40 }
 0x31d   : > { %v13945_v48 = vpop.f32.mrf.mxu0  ;;  %v17622_v29 = vadd.f32 %v5365_v5, %v5073_v18  ;;  %v5076_v49 = vadd.f32 %v13895_v59, %v17457_v1  ;;  %14196 = vmatprep.mubr.msk.f32.mxu1 %vm3904_vm2, %v17140_v63  ;;  %v7052_v59 = vld [vmem:[#allocation2 + $0x172] sm:$0xff] }
 0x31e   : > { %v4988_v25 = vpop.f32.mrf.mxu1 }
 0x31f   : > { %v5375_v35 = vpop.f32.mrf.mxu0  ;;  %v17627_v52 = vadd.f32 %v13945_v48, %v5076_v49  ;;  %v5075_v2 = vadd.f32 %v4988_v25, %v17463_v56 }
 0x320   : > { %v13898_v61 = vpop.f32.mrf.mxu1  ;;  %14197 = vmatmul.mubr.msk.f32.gmra.mxu1 %vm3904_vm2, %v7046_v0 }
 0x321   : > { %v13948_v22 = vpop.f32.mrf.mxu0  ;;  %v17631_v12 = vadd.f32 %v5375_v35, %v5075_v2  ;;  %v5078_v7 = vadd.f32 %v13898_v61, %v17469_v42  ;;  %14199 = vmatprep.mubr.msk.f32.mxu1 %vm3904_vm2, %v7047_v32  ;;  %v7055_v2 = vld [vmem:[#allocation2 + $0x19a] sm:$0xff]  ;;  %v22867_v32 = vld [vmem:[#allocation17_spill] sm:$0xff] }
 0x322   : > { %v4998_v1 = vpop.f32.mrf.mxu1 }
 0x323   : > { %v5385_v63 = vpop.f32.mrf.mxu0  ;;  %v17635_v44 = vadd.f32 %v13948_v22, %v5078_v7  ;;  %v5077_v60 = vadd.f32 %v4998_v1, %v17475_v15 }
 0x324   : > { %v13901_v56 = vpop.f32.mrf.mxu1  ;;  %14200 = vmatmul.mubr.msk.f32.gmra.mxu1 %vm3904_vm2, %v7048_v10 }
 0x325   : > { %v13951_v36 = vpop.f32.mrf.mxu0  ;;  %v17639_v34 = vadd.f32 %v5385_v63, %v5077_v60  ;;  %v5080_v19 = vadd.f32 %v13901_v56, %v17481_v46  ;;  %14202 = vmatprep.mubr.msk.f32.mxu1 %vm3904_vm2, %v7049_v41 }
 0x326   : > { %v5008_v42 = vpop.f32.mrf.mxu1 }
 0x327   : > { %v5395_v50 = vpop.f32.mrf.mxu0  ;;  %v17643_v55 = vadd.f32 %v13951_v36, %v5080_v19  ;;  %v5079_v43 = vadd.f32 %v5008_v42, %v17487_v17 }
 0x328   : > { %v13904_v15 = vpop.f32.mrf.mxu1  ;;  %14203 = vmatmul.mubr.msk.f32.gmra.mxu1 %vm3904_vm2, %v7050_v62 }
 0x329   : > { %v13954_v11 = vpop.f32.mrf.mxu0  ;;  %v17647_v39 = vadd.f32 %v5395_v50, %v5079_v43  ;;  %v5082_v27 = vadd.f32 %v13904_v15, %v17493_v20  ;;  %14205 = vmatprep.mubr.msk.f32.mxu1 %vm3904_vm2, %v7051_v45  ;;  %v22868_v50 = vld [vmem:[#allocation16_spill] sm:$0xff] }
 0x32a   : > { %v5018_v46 = vpop.f32.mrf.mxu1 }
 0x32b   : > { %v5405_v5 = vpop.f32.mrf.mxu0  ;;  %v17651_v18 = vadd.f32 %v13954_v11, %v5082_v27  ;;  %v5081_v40 = vadd.f32 %v5018_v46, %v17499_v57 }
 0x32c   : > { %v13907_v17 = vpop.f32.mrf.mxu1  ;;  %14206 = vmatmul.mubr.msk.f32.gmra.mxu1 %vm3904_vm2, %v7052_v59 }
 0x32d   : > { %v13957_v48 = vpop.f32.mrf.mxu0  ;;  %v17655_v49 = vadd.f32 %v5405_v5, %v5081_v40  ;;  %v5084_v25 = vadd.f32 %v13907_v17, %v17505_v3  ;;  %14208 = vmatprep.mubr.msk.f32.mxu1 %vm3904_vm2, %v17323_v37  ;;  %v7056_v3 = vld [vmem:[#allocation2 + $0x1a2] sm:$0xff] }
 0x32e   : > { %v5028_v20 = vpop.f32.mrf.mxu1 }
 0x32f   : > { %v5415_v35 = vpop.f32.mrf.mxu0  ;;  %v17660_v0 = vadd.f32 %v13957_v48, %v5084_v25  ;;  %v5083_v61 = vadd.f32 %v5028_v20, %v17511_v54 }
 0x330   : > { %v13910_v57 = vpop.f32.mrf.mxu1  ;;  %14209 = vmatmul.mubr.msk.f32.gmra.mxu1 %vm3904_vm2, %v22867_v32 }
 0x331   : > { %v13960_v22 = vpop.f32.mrf.mxu0  ;;  %v17665_v7 = vadd.f32 %v5415_v35, %v5083_v61  ;;  %v5086_v1 = vadd.f32 %v13910_v57, %v17517_v31  ;;  %14211 = vmatprep.mubr.msk.f32.mxu1 %vm3904_vm2, %v7055_v2  ;;  %v22493_v35 = vmov 1  }
 0x332   : > { %v5038_v37 = vpop.f32.mrf.mxu1  ;;  %14295 = vset.pattern.permute.xlu1 %v22493_v35 }
 0x333   : > { %v5425_v63 = vpop.f32.mrf.mxu0  ;;  %v17669_v60 = vadd.f32 %v13960_v22, %v5086_v1  ;;  %v5085_v10 = vadd.f32 %v5038_v37, %v17521_v30 }
 0x334   : > { %v13913_v56 = vpop.f32.mrf.mxu1  ;;  %14212 = vmatmul.mubr.msk.f32.gmra.mxu1 %vm3904_vm2, %v7056_v3 }
 0x335   : > { %v13963_v54 = vpop.f32.mrf.mxu0  ;;  %v17673_v36 = vadd.f32 %v5425_v63, %v5085_v10  ;;  %v5088_v41 = vadd.f32 %v13913_v56, %v17525_v24 }
 0x336   : > { %v5048_v19 = vpop.f32.mrf.mxu1 }
 0x337   : > { %v5435_v42 = vpop.f32.mrf.mxu0  ;;  %v17676_v31 = vadd.f32 %v13963_v54, %v5088_v41  ;;  %v5087_v43 = vadd.f32 %v5048_v19, %v22868_v50 }
 0x338   : > { %v13968_v62 = vpop.f32.mrf.mxu1 }
 0x339   : > { %v17679_v15 = vpop.f32.mrf.mxu0  ;;  %v17681_v11 = vadd.f32 %v5435_v42, %v5087_v43  ;;  %v17684_v30 = vadd.f32 %v13968_v62, %v17538_v4  ;;  %v22489_v4 = vmov 0  }
 0x33a   : > { %v5672_v45 = vpop.f32.mrf.mxu1  ;;  %14294 = vset.pattern.permute.xlu0 %v22489_v4 }
 0x33b   : > { %v6059_v27 = vpop.f32.mrf.mxu0  ;;  %v5831_v46 = vadd.f32 %v5672_v45, %v17542_v47 }
 0x33c   : > { %v13971_v5 = vpop.f32.mrf.mxu1 }
 0x33d   : > { %v14021_v24 = vpop.f32.mrf.mxu0  ;;  %v17687_v40 = vadd.f32 %v6059_v27, %v5831_v46  ;;  %v5834_v59 = vadd.f32 %v13971_v5, %v17547_v38 }
 0x33e   : > { %v5682_v17 = vpop.f32.mrf.mxu1 }
 0x33f   : > { %v6069_v48 = vpop.f32.mrf.mxu0  ;;  %v17690_v25 = vadd.f32 %v14021_v24, %v5834_v59  ;;  %v5833_v20 = vadd.f32 %v5682_v17, %v17552_v13 }
 0x340   : > { %v13974_v2 = vpop.f32.mrf.mxu1 }
 0x341   : > { %v14024_v47 = vpop.f32.mrf.mxu0  ;;  %v17695_v61 = vadd.f32 %v6069_v48, %v5833_v20  ;;  %v5836_v57 = vadd.f32 %v13974_v2, %v17557_v6 }
 0x342   : > { %v5692_v22 = vpop.f32.mrf.mxu1 }
 0x343   : > { %v6079_v38 = vpop.f32.mrf.mxu0  ;;  %v17698_v32 = vadd.f32 %v14024_v47, %v5836_v57  ;;  %v5835_v1 = vadd.f32 %v5692_v22, %v17562_v33 }
 0x344   : > { %v13977_v3 = vpop.f32.mrf.mxu1 }
 0x345   : > { %v14027_v13 = vpop.f32.mrf.mxu0  ;;  %v17701_v37 = vadd.f32 %v6079_v38, %v5835_v1  ;;  %v5838_v63 = vadd.f32 %v13977_v3, %v17567_v58 }
 0x346   : > { %v5702_v10 = vpop.f32.mrf.mxu1 }
 0x347   : > { %v6089_v56 = vpop.f32.mrf.mxu0  ;;  %v17704_v54 = vadd.f32 %v14027_v13, %v5838_v63  ;;  %v5837_v41 = vadd.f32 %v5702_v10, %v17572_v21 }
 0x348   : > { %v13980_v19 = vpop.f32.mrf.mxu1 }
 0x349   : > { %v14030_v6 = vpop.f32.mrf.mxu0  ;;  %v17707_v42 = vadd.f32 %v6089_v56, %v5837_v41  ;;  %v5840_v50 = vadd.f32 %v13980_v19, %v17577_v51 }
 0x34a   : > { %v5712_v43 = vpop.f32.mrf.mxu1 }
 0x34b   : > { %v6099_v33 = vpop.f32.mrf.mxu0  ;;  %v17710_v62 = vadd.f32 %v14030_v6, %v5840_v50  ;;  %v5839_v45 = vadd.f32 %v5712_v43, %v17582_v8 }
 0x34c   : > { %v13983_v27 = vpop.f32.mrf.mxu1 }
 0x34d   : > { %v14033_v58 = vpop.f32.mrf.mxu0  ;;  %v17713_v46 = vadd.f32 %v6099_v33, %v5839_v45  ;;  %v5842_v5 = vadd.f32 %v13983_v27, %v17587_v28 }
 0x34e   : > { %v5722_v24 = vpop.f32.mrf.mxu1 }
 0x34f   : > { %v6109_v21 = vpop.f32.mrf.mxu0  ;;  %v17716_v59 = vadd.f32 %v14033_v58, %v5842_v5  ;;  %v5841_v17 = vadd.f32 %v5722_v24, %v17592_v16 }
 0x350   : > { %v13986_v48 = vpop.f32.mrf.mxu1 }
 0x351   : > { %v14036_v51 = vpop.f32.mrf.mxu0  ;;  %v17719_v20 = vadd.f32 %v6109_v21, %v5841_v17  ;;  %v5844_v2 = vadd.f32 %v13986_v48, %v17597_v14 }
 0x352   : > { %v5732_v47 = vpop.f32.mrf.mxu1 }
 0x353   : > { %v6119_v8 = vpop.f32.mrf.mxu0  ;;  %v17722_v57 = vadd.f32 %v14036_v51, %v5844_v2  ;;  %v5843_v22 = vadd.f32 %v5732_v47, %v17602_v23 }
 0x354   : > { %v13989_v38 = vpop.f32.mrf.mxu1 }
 0x355   : > { %v14039_v28 = vpop.f32.mrf.mxu0  ;;  %v17725_v1 = vadd.f32 %v6119_v8, %v5843_v22  ;;  %v5846_v3 = vadd.f32 %v13989_v38, %v17607_v53 }
 0x356   : > { %v5742_v13 = vpop.f32.mrf.mxu1 }
 0x357   : > { %v6129_v16 = vpop.f32.mrf.mxu0  ;;  %v17728_v63 = vadd.f32 %v14039_v28, %v5846_v3  ;;  %v5845_v10 = vadd.f32 %v5742_v13, %v17614_v26 }
 0x358   : > { %v13992_v56 = vpop.f32.mrf.mxu1 }
 0x359   : > { %v14042_v14 = vpop.f32.mrf.mxu0  ;;  %v17731_v41 = vadd.f32 %v6129_v16, %v5845_v10  ;;  %v5848_v19 = vadd.f32 %v13992_v56, %v17619_v9 }
 0x35a   : > { %v5752_v6 = vpop.f32.mrf.mxu1 }
 0x35b   : > { %v6139_v23 = vpop.f32.mrf.mxu0  ;;  %v17734_v50 = vadd.f32 %v14042_v14, %v5848_v19  ;;  %v5847_v43 = vadd.f32 %v5752_v6, %v17622_v29 }
 0x35c   : > { %v13995_v33 = vpop.f32.mrf.mxu1 }
 0x35d   : > { %v14045_v53 = vpop.f32.mrf.mxu0  ;;  %v17737_v45 = vadd.f32 %v6139_v23, %v5847_v43  ;;  %v5850_v27 = vadd.f32 %v13995_v33, %v17627_v52 }
 0x35e   : > { %v5762_v58 = vpop.f32.mrf.mxu1 }
 0x35f   : > { %v6149_v26 = vpop.f32.mrf.mxu0  ;;  %v17740_v5 = vadd.f32 %v14045_v53, %v5850_v27  ;;  %v5849_v24 = vadd.f32 %v5762_v58, %v17631_v12 }
 0x360   : > { %v13998_v21 = vpop.f32.mrf.mxu1 }
 0x361   : > { %v14048_v9 = vpop.f32.mrf.mxu0  ;;  %v17743_v17 = vadd.f32 %v6149_v26, %v5849_v24  ;;  %v5852_v48 = vadd.f32 %v13998_v21, %v17635_v44 }
 0x362   : > { %v5772_v51 = vpop.f32.mrf.mxu1 }
 0x363   : > { %v6159_v29 = vpop.f32.mrf.mxu0  ;;  %v17746_v2 = vadd.f32 %v14048_v9, %v5852_v48  ;;  %v5851_v47 = vadd.f32 %v5772_v51, %v17639_v34 }
 0x364   : > { %v14001_v8 = vpop.f32.mrf.mxu1 }
 0x365   : > { %v14051_v52 = vpop.f32.mrf.mxu0  ;;  %v17749_v22 = vadd.f32 %v6159_v29, %v5851_v47  ;;  %v5854_v38 = vadd.f32 %v14001_v8, %v17643_v55 }
 0x366   : > { %v5782_v28 = vpop.f32.mrf.mxu1 }
 0x367   : > { %v6169_v12 = vpop.f32.mrf.mxu0  ;;  %v17752_v3 = vadd.f32 %v14051_v52, %v5854_v38  ;;  %v5853_v13 = vadd.f32 %v5782_v28, %v17647_v39 }
 0x368   : > { %v14004_v16 = vpop.f32.mrf.mxu1 }
 0x369   : > { %v14054_v44 = vpop.f32.mrf.mxu0  ;;  %v17755_v10 = vadd.f32 %v6169_v12, %v5853_v13  ;;  %v5856_v56 = vadd.f32 %v14004_v16, %v17651_v18 }
 0x36a   : > { %v5792_v14 = vpop.f32.mrf.mxu1 }
 0x36b   : > { %v6179_v34 = vpop.f32.mrf.mxu0  ;;  %v17758_v19 = vadd.f32 %v14054_v44, %v5856_v56  ;;  %v5855_v6 = vadd.f32 %v5792_v14, %v17655_v49 }
 0x36c   : > { %v14007_v23 = vpop.f32.mrf.mxu1 }
 0x36d   : > { %v14057_v55 = vpop.f32.mrf.mxu0  ;;  %v17761_v43 = vadd.f32 %v6179_v34, %v5855_v6  ;;  %v5858_v33 = vadd.f32 %v14007_v23, %v17660_v0 }
 0x36e   : > { %v5802_v53 = vpop.f32.mrf.mxu1 }
 0x36f   : > { %v6189_v39 = vpop.f32.mrf.mxu0  ;;  %v17764_v27 = vadd.f32 %v14057_v55, %v5858_v33  ;;  %v5857_v58 = vadd.f32 %v5802_v53, %v17665_v7 }
 0x370   : > { %v14010_v26 = vpop.f32.mrf.mxu1 }
 0x371   : > { %v14060_v18 = vpop.f32.mrf.mxu0  ;;  %v17767_v24 = vadd.f32 %v6189_v39, %v5857_v58  ;;  %v5860_v21 = vadd.f32 %v14010_v26, %v17669_v60 }
 0x372   : > { %v5812_v9 = vpop.f32.mrf.mxu1 }
 0x373   : > { %v6199_v49 = vpop.f32.mrf.mxu0  ;;  %v17770_v48 = vadd.f32 %v14060_v18, %v5860_v21  ;;  %v5859_v51 = vadd.f32 %v5812_v9, %v17673_v36 }
 0x374   : > { %v14013_v29 = vpop.f32.mrf.mxu1 }
 0x375   : > { %v14063_v0 = vpop.f32.mrf.mxu0  ;;  %v17773_v47 = vadd.f32 %v6199_v49, %v5859_v51  ;;  %v5862_v8 = vadd.f32 %v14013_v29, %v17676_v31 }
 0x376   : > { %v5822_v52 = vpop.f32.mrf.mxu1 }
 0x377   : > { %v6209_v7 = vpop.f32.mrf.mxu0  ;;  %v17776_v38 = vadd.f32 %v14063_v0, %v5862_v8  ;;  %v5861_v28 = vadd.f32 %v5822_v52, %v17681_v11 }
 0x378   : > { %v17779_v12 = vpop.f32.mrf.mxu1 }
 0x379   : > { %v17781_v60 = vpop.f32.mrf.mxu0  ;;  %v17783_v13 = vadd.f32 %v6209_v7, %v5861_v28 }
 0x37a   : > { %v6447_v16 = vpop.f32.mrf.mxu1 }
 0x37b   : > { %v17786_v36 = vadd.f32 %v6447_v16, %v17687_v40  ;;  %v17788_v44 = vpop.f32.mrf.mxu0 }
 0x37c   : > { %v14071_v56 = vpop.f32.mrf.mxu1 }
 0x37d   : > { %v17791_v31 = vadd.f32 %v14071_v56, %v17690_v25  ;;  %v17796_v11 = vpop.f32.mrf.mxu0 }
 0x37e   : > { %v6457_v14 = vpop.f32.mrf.mxu1 }
 0x37f   : > { %v17794_v34 = vadd.f32 %v6457_v14, %v17695_v61  ;;  %v17804_v33 = vpop.f32.mrf.mxu0 }
 0x380   : > { %v14074_v6 = vpop.f32.mrf.mxu1 }
 0x381   : > { %v17799_v23 = vadd.f32 %v14074_v6, %v17698_v32  ;;  %v17812_v58 = vpop.f32.mrf.mxu0 }
 0x382   : > { %v6467_v55 = vpop.f32.mrf.mxu1 }
 0x383   : > { %v17802_v40 = vadd.f32 %v6467_v55, %v17701_v37  ;;  %v17820_v21 = vpop.f32.mrf.mxu0 }
 0x384   : > { %v14077_v53 = vpop.f32.mrf.mxu1 }
 0x385   : > { %v17807_v25 = vadd.f32 %v14077_v53, %v17704_v54  ;;  %v17828_v51 = vpop.f32.mrf.mxu0 }
 0x386   : > { %v6477_v39 = vpop.f32.mrf.mxu1 }
 0x387   : > { %v17810_v61 = vadd.f32 %v6477_v39, %v17707_v42  ;;  %v17836_v8 = vpop.f32.mrf.mxu0 }
 0x388   : > { %v14080_v26 = vpop.f32.mrf.mxu1 }
 0x389   : > { %v17815_v32 = vadd.f32 %v14080_v26, %v17710_v62  ;;  %v17844_v28 = vpop.f32.mrf.mxu0 }
 0x38a   : > { %v6487_v18 = vpop.f32.mrf.mxu1 }
 0x38b   : > { %v17818_v37 = vadd.f32 %v6487_v18, %v17713_v46  ;;  %v17852_v14 = vpop.f32.mrf.mxu0 }
 0x38c   : > { %v14083_v9 = vpop.f32.mrf.mxu1 }
 0x38d   : > { %v17823_v54 = vadd.f32 %v14083_v9, %v17716_v59  ;;  %v17860_v53 = vpop.f32.mrf.mxu0 }
 0x38e   : > { %v6497_v49 = vpop.f32.mrf.mxu1 }
 0x38f   : > { %v17826_v42 = vadd.f32 %v6497_v49, %v17719_v20  ;;  %v17868_v18 = vpop.f32.mrf.mxu0 }
 0x390   : > { %v14086_v29 = vpop.f32.mrf.mxu1 }
 0x391   : > { %v17831_v62 = vadd.f32 %v14086_v29, %v17722_v57  ;;  %v17876_v29 = vpop.f32.mrf.mxu0 }
 0x392   : > { %v6507_v0 = vpop.f32.mrf.mxu1 }
 0x393   : > { %v17834_v46 = vadd.f32 %v6507_v0, %v17725_v1 }
 0x394   : > { %v14089_v52 = vpop.f32.mrf.mxu1 }
 0x395   : > { %v17839_v59 = vadd.f32 %v14089_v52, %v17728_v63 }
 0x396   : > { %v6517_v7 = vpop.f32.mrf.mxu1 }
 0x397   : > { %v17842_v20 = vadd.f32 %v6517_v7, %v17731_v41  ;;  %v17884_v7 = vpop.f32.mrf.mxu0 }
 0x398   : > { %v14092_v16 = vpop.f32.mrf.mxu1 }
 0x399   : > { %v17847_v57 = vadd.f32 %v14092_v16, %v17734_v50 }
 0x39a   : > { %v6527_v56 = vpop.f32.mrf.mxu1 }
 0x39b   : > { %v17850_v1 = vadd.f32 %v6527_v56, %v17737_v45 }
 0x39c   : > { %v14095_v6 = vpop.f32.mrf.mxu1 }
 0x39d   : > { %v17855_v63 = vadd.f32 %v14095_v6, %v17740_v5  ;;  %v17892_v6 = vpop.f32.mrf.mxu0 }
 0x39e   : > { %v6537_v55 = vpop.f32.mrf.mxu1 }
 0x39f   : > { %v17858_v41 = vadd.f32 %v6537_v55, %v17743_v17 }
 0x3a0   : > { %v14098_v39 = vpop.f32.mrf.mxu1 }
 0x3a1   : > { %v17863_v50 = vadd.f32 %v14098_v39, %v17746_v2 }
 0x3a2   : > { %v6547_v26 = vpop.f32.mrf.mxu1 }
 0x3a3   : > { %v17866_v45 = vadd.f32 %v6547_v26, %v17749_v22 }
 0x3a4   : > { %v14101_v9 = vpop.f32.mrf.mxu1 }
 0x3a5   : > { %v17871_v5 = vadd.f32 %v14101_v9, %v17752_v3 }
 0x3a6   : > { %v6557_v49 = vpop.f32.mrf.mxu1 }
 0x3a7   : > { %v17874_v17 = vadd.f32 %v6557_v49, %v17755_v10 }
 0x3a8   : > { %v14104_v0 = vpop.f32.mrf.mxu1 }
 0x3a9   : > { %v17879_v2 = vadd.f32 %v14104_v0, %v17758_v19  ;;  %v6219_v19 = vadd.f32 %v17679_v15, %v17684_v30 }
 0x3aa   : > { %v6567_v52 = vpop.f32.mrf.mxu1 }
 0x3ab   : > { %v17882_v22 = vadd.f32 %v6567_v52, %v17761_v43  ;;  %v6607_v26 = vadd.f32 %v17779_v12, %v6219_v19 }
 0x3ac   : > { %v14107_v16 = vpop.f32.mrf.mxu1 }
 0x3ad   : > { %v17887_v3 = vadd.f32 %v14107_v16, %v17764_v27  ;;  %v17903_v27 = vpop.f32.mrf.mxu0  ;;  %v6994_v52 = vadd.f32 %v17781_v60, %v6607_v26 }
 0x3ae   : > { %v6577_v56 = vpop.f32.mrf.mxu1 }
 0x3af   : > { %v17890_v10 = vadd.f32 %v6577_v56, %v17767_v24  ;;  %v17912_v30 = vpop.f32.mrf.mxu0 }
 0x3b0   : > { %v14110_v55 = vpop.f32.mrf.mxu1 }
 0x3b1   : > { %v17897_v39 = vadd.f32 %v14110_v55, %v17770_v48  ;;  %v17924_v60 = vpop.f32.mrf.mxu0  ;;  %v6995_v55 = vadd.f32 %v17804_v33, %v17794_v34  ;;  %v6997_v34 = vadd.f32 %v17820_v21, %v17802_v40 }
 0x3b2   : > { %v6587_v43 = vpop.f32.mrf.mxu1 }
 0x3b3   : > { %v17901_v9 = vadd.f32 %v6587_v43, %v17773_v47  ;;  %v17917_v47 = vld [vmem:[%s22398_s4] ss:$0 sm:$0xff] }
 0x3b4   : > { %v14113_v49 = vpop.f32.mrf.mxu1 }
 0x3b5   : > { %v17906_v24 = vadd.f32 %v14113_v49, %v17776_v38  ;;  %v6996_v38 = vadd.f32 %v17796_v11, %v17791_v31  ;;  %v6998_v49 = vadd.f32 %v17812_v58, %v17799_v23  ;;  %v17937_v31 = vpop.f32.mrf.mxu0  ;;  %v7000_v23 = vadd.f32 %v17828_v51, %v17807_v25 }
 0x3b6   : > { %v6597_v0 = vpop.f32.mrf.mxu1  ;;  %v6999_v25 = vadd.f32 %v17836_v8, %v17810_v61  ;;  %v7001_v61 = vadd.f32 %v17852_v14, %v17818_v37  ;;  %v7003_v37 = vadd.f32 %v17868_v18, %v17826_v42 }
 0x3b7   : > { %v17910_v15 = vadd.f32 %v6597_v0, %v17783_v13 }
 0x3b8   : > { %v14168_v48 = vpop.f32.mrf.mxu1 }
 0x3b9   : > { %v7381_v12 = vadd.f32 %v14168_v48, %v6994_v52 }
 0x3ba   : > { %v17919_v16 = vpop.f32.mrf.mxu1 }
 0x3bb   : > { %v7420_v56 = vadd.f32 %v17917_v47, %v7381_v12 }
 0x3bc   : > { %v14171_v13 = vpop.f32.mrf.mxu1 }
 0x3bd   : > { %v17928_v19 = vmax.f32 %v7420_v56, 0.0  ;;  %v7383_v43 = vadd.f32 %v14171_v13, %v6996_v38  ;;  %v22497_v56 = vmov 3   ;;  %v22485_v13 = vmov 2  }
 0x3be   : > { %v7231_v26 = vpop.f32.mrf.mxu1 }
 0x3bf   : > { %22869 = vst [vmem:[#allocation18_spill] sm:$0xff] %v17928_v19  ;;  %v17933_v0 = vadd.f32 %v17917_v47, %v7383_v43  ;;  %v7382_v52 = vadd.f32 %v7231_v26, %v6995_v55  ;;  %7777 = vperm.xlu1 %14295, %v17928_v19   ;;  %7522 = vperm.xlu0 %14294, %v17928_v19   ;;  %v17951_v55 = vpop.f32.mrf.mxu0 }
 0x3c0   : > { %v14174_v11 = vpop.f32.mrf.mxu1  ;;  %v7002_v26 = vadd.f32 %v17844_v28, %v17815_v32 }
 0x3c1   : > { %v17942_v33 = vadd.f32 %v17917_v47, %v7382_v52  ;;  %v7385_v48 = vadd.f32 %v14174_v11, %v6998_v49  ;;  %v17965_v11 = vpop.f32.mrf.mxu0 }
 0x3c2   : > { %v7241_v12 = vpop.f32.mrf.mxu1 }
 0x3c3   : > { %v17947_v58 = vadd.f32 %v17917_v47, %v7385_v48  ;;  %v7384_v38 = vadd.f32 %v7241_v12, %v6997_v34  ;;  %14297 = vset.pattern.permute.xlu1 %v22497_v56  ;;  %14296 = vset.pattern.permute.xlu0 %v22485_v13  ;;  %v22501_v48 = vmov 5   ;;  %v22481_v12 = vmov 4  }
 0x3c4   : > { %v14177_v40 = vpop.f32.mrf.mxu1  ;;  %8227 = vperm.xlu1 %14297, %v17928_v19   ;;  %8002 = vperm.xlu0 %14296, %v17928_v19  }
 0x3c5   : > { %v17958_v21 = vadd.f32 %v17917_v47, %v7384_v38  ;;  %v7387_v51 = vadd.f32 %v14177_v40, %v7000_v23  ;;  %v7004_v23 = vadd.f32 %v17860_v53, %v17823_v54  ;;  %v7006_v53 = vadd.f32 %v17876_v29, %v17831_v62 }
 0x3c6   : > { %v7251_v43 = vpop.f32.mrf.mxu1  ;;  %v7008_v62 = vadd.f32 %v17892_v6, %v17839_v59  ;;  %v6993_v59 = vadd.f32 %v17788_v44, %v17786_v36  ;;  %v7009_v36 = vadd.f32 %v17924_v60, %v17850_v1  ;;  %v22483_v1 = vmov 13  }
 0x3c7   : > { %v17963_v49 = vadd.f32 %v17917_v47, %v7387_v51  ;;  %v7386_v52 = vadd.f32 %v7251_v43, %v6999_v25  ;;  %v17981_v25 = vpop.f32.mrf.mxu0  ;;  %v7011_v60 = vadd.f32 %v17951_v55, %v17858_v41 }
 0x3c8   : > { %v14180_v34 = vpop.f32.mrf.mxu1  ;;  %14299 = vset.pattern.permute.xlu1 %v22501_v48  ;;  %14298 = vset.pattern.permute.xlu0 %v22481_v12  ;;  %v7013_v55 = vadd.f32 %v17981_v25, %v17866_v45 }
 0x3c9   : > { %v17972_v8 = vadd.f32 %v17917_v47, %v7386_v52  ;;  %v7389_v32 = vadd.f32 %v14180_v34, %v7002_v26  ;;  %8677 = vperm.xlu1 %14299, %v17928_v19   ;;  %8452 = vperm.xlu0 %14298, %v17928_v19   ;;  %v22475_v26 = vmov 7   ;;  %v22479_v52 = vmov 6   ;;  %v17997_v34 = vpop.f32.mrf.mxu0 }
 0x3ca   : > { %v7261_v28 = vpop.f32.mrf.mxu1 }
 0x3cb   : > { %v17979_v38 = vadd.f32 %v17917_v47, %v7389_v32  ;;  %v7388_v40 = vadd.f32 %v7261_v28, %v7001_v61  ;;  %v7005_v32 = vadd.f32 %v17884_v7, %v17834_v46  ;;  %v6944_v46 = vpop.f32.mrf.mxu0 }
 0x3cc   : > { %v14183_v51 = vpop.f32.mrf.mxu1 }
 0x3cd   : > { %v17986_v14 = vadd.f32 %v17917_v47, %v7388_v40  ;;  %v7391_v43 = vadd.f32 %v14183_v51, %v7004_v23  ;;  %14301 = vset.pattern.permute.xlu1 %v22475_v26  ;;  %14300 = vset.pattern.permute.xlu0 %v22479_v52  ;;  %v22491_v51 = vmov 9   ;;  %v22487_v26 = vmov 8  }
 0x3ce   : > { %v7271_v54 = vpop.f32.mrf.mxu1  ;;  %9127 = vperm.xlu1 %14301, %v17928_v19   ;;  %8902 = vperm.xlu0 %14300, %v17928_v19  }
 0x3cf   : > { %v17995_v42 = vadd.f32 %v17917_v47, %v7391_v43  ;;  %v7390_v18 = vadd.f32 %v7271_v54, %v7003_v37  ;;  %v7007_v43 = vadd.f32 %v17903_v27, %v17842_v20  ;;  %v14154_v20 = vpop.f32.mrf.mxu0  ;;  %v7380_v27 = vadd.f32 %v17919_v16, %v6993_v59 }
 0x3d0   : > { %v14186_v61 = vpop.f32.mrf.mxu1 }
 0x3d1   : > { %v18002_v28 = vadd.f32 %v17917_v47, %v7390_v18  ;;  %v7393_v23 = vadd.f32 %v14186_v61, %v7006_v53  ;;  %v7010_v18 = vadd.f32 %v17912_v30, %v17847_v57 }
 0x3d2   : > { %v7281_v40 = vpop.f32.mrf.mxu1  ;;  %14303 = vset.pattern.permute.xlu1 %v22491_v51  ;;  %14302 = vset.pattern.permute.xlu0 %v22487_v26 }
 0x3d3   : > { %v18009_v29 = vadd.f32 %v17917_v47, %v7393_v23  ;;  %v7392_v37 = vadd.f32 %v7281_v40, %v7005_v32  ;;  %9577 = vperm.xlu1 %14303, %v17928_v19   ;;  %9352 = vperm.xlu0 %14302, %v17928_v19   ;;  %v22499_v23 = vmov 11   ;;  %v22495_v40 = vmov 10  }
 0x3d4   : > { %v14189_v7 = vpop.f32.mrf.mxu1 }
 0x3d5   : > { %v18016_v54 = vadd.f32 %v17917_v47, %v7392_v37  ;;  %v7395_v53 = vadd.f32 %v14189_v7, %v7008_v62  ;;  %v7012_v37 = vadd.f32 %v17937_v31, %v17855_v63 }
 0x3d6   : > { %v7291_v6 = vpop.f32.mrf.mxu1 }
 0x3d7   : > { %v18023_v61 = vadd.f32 %v17917_v47, %v7395_v53  ;;  %v7394_v32 = vadd.f32 %v7291_v6, %v7007_v43  ;;  %14305 = vset.pattern.permute.xlu1 %v22499_v23  ;;  %14304 = vset.pattern.permute.xlu0 %v22495_v40  ;;  %v6954_v43 = vpop.f32.mrf.mxu0  ;;  %v7419_v53 = vadd.f32 %v17917_v47, %v7380_v27  ;;  %v22477_v6 = vmov 12  }
 0x3d8   : > { %v14192_v62 = vpop.f32.mrf.mxu1  ;;  %10027 = vperm.xlu1 %14305, %v17928_v19   ;;  %9802 = vperm.xlu0 %14304, %v17928_v19  }
 0x3d9   : > { %v18033_v44 = vadd.f32 %v17917_v47, %v7394_v32  ;;  %v7397_v57 = vadd.f32 %v14192_v62, %v7010_v18  ;;  %v7014_v32 = vadd.f32 %v17965_v11, %v17863_v50  ;;  %v7016_v11 = vadd.f32 %v17997_v34, %v17871_v5 }
 0x3da   : > { %v7301_v30 = vpop.f32.mrf.mxu1 }
 0x3db   : > { %v18038_v7 = vadd.f32 %v17917_v47, %v7397_v57  ;;  %v7396_v16 = vadd.f32 %v7301_v30, %v7009_v36  ;;  %v14157_v36 = vpop.f32.mrf.mxu0  ;;  %v18055_v57 = vmax.f32 %v7419_v53, 0.0 }
 0x3dc   : > { %v14195_v59 = vpop.f32.mrf.mxu1  ;;  %14306 = vset.pattern.permute.xlu1 %v22477_v6  ;;  %14307 = vset.pattern.permute.xlu0 %v22483_v1 }
 0x3dd   : > { %v18046_v18 = vadd.f32 %v17917_v47, %v7396_v16  ;;  %v7399_v63 = vadd.f32 %v14195_v59, %v7012_v37  ;;  %10252 = vperm.xlu1 %14306, %v17928_v19   ;;  %10477 = vperm.xlu0 %14307, %v17928_v19   ;;  %v22503_v16 = vmov 14   ;;  %v6964_v25 = vpop.f32.mrf.mxu0 }
 0x3de   : > { %v7311_v31 = vpop.f32.mrf.mxu1 }
 0x3df   : > { %v18053_v27 = vadd.f32 %v17917_v47, %v7399_v63  ;;  %v7398_v62 = vadd.f32 %v7311_v31, %v7011_v60  ;;  %v7015_v60 = vadd.f32 %v6944_v46, %v17874_v17  ;;  %v14160_v17 = vpop.f32.mrf.mxu0 }
 0x3e0   : > { %v14198_v41 = vpop.f32.mrf.mxu1 }
 0x3e1   : > { %v18060_v30 = vadd.f32 %v17917_v47, %v7398_v62  ;;  %v7401_v37 = vadd.f32 %v14198_v41, %v7014_v32  ;;  %14311 = vset.pattern.permute.xlu1 %v22485_v13  ;;  %14308 = vset.pattern.permute.xlu0 %v22503_v16  ;;  %v7018_v62 = vadd.f32 %v14154_v20, %v17879_v2 }
 0x3e2   : > { %v7321_v50 = vpop.f32.mrf.mxu1  ;;  %10702 = vperm.xlu0 %14308, %v17928_v19   ;;  %7998 = vperm.xlu1 %14311, %v18055_v57   ;;  %v7017_v41 = vadd.f32 %v6954_v43, %v17882_v22  ;;  %v7019_v22 = vadd.f32 %v6964_v25, %v17890_v10 }
 0x3e3   : > { %v18069_v53 = vadd.f32 %v17917_v47, %v7401_v37  ;;  %v7400_v45 = vadd.f32 %v7321_v50, %v7013_v55 }
 0x3e4   : > { %v14201_v59 = vpop.f32.mrf.mxu1 }
 0x3e5   : > { %v18073_v63 = vadd.f32 %v17917_v47, %v7400_v45  ;;  %v7403_v31 = vadd.f32 %v14201_v59, %v7016_v11  ;;  %v7020_v11 = vadd.f32 %v14157_v36, %v17887_v3  ;;  %v6974_v45 = vpop.f32.mrf.mxu0 }
 0x3e6   : > { %v7331_v32 = vpop.f32.mrf.mxu1  ;;  %14309 = vset.pattern.permute.xlu0 %v22489_v4  ;;  %14313 = vset.pattern.permute.xlu1 %v22481_v12 }
 0x3e7   : > { %v18079_v5 = vadd.f32 %v17917_v47, %v7403_v31  ;;  %v7402_v34 = vadd.f32 %v7331_v32, %v7015_v60  ;;  %8448 = vperm.xlu1 %14313, %v18055_v57   ;;  %7517 = vperm.xlu0 %14309, %v18055_v57   ;;  %v14163_v36 = vpop.f32.mrf.mxu0  ;;  %v7022_v31 = vadd.f32 %v14160_v17, %v17897_v39 }
 0x3e8   : > { %v14204_v46 = vpop.f32.mrf.mxu1 }
 0x3e9   : > { %v18085_v55 = vadd.f32 %v17917_v47, %v7402_v34  ;;  %v7405_v37 = vadd.f32 %v14204_v46, %v7018_v62  ;;  %v7021_v46 = vadd.f32 %v6974_v45, %v17901_v9  ;;  %v6984_v39 = vpop.f32.mrf.mxu0 }
 0x3ea   : > { %v7341_v50 = vpop.f32.mrf.mxu1 }
 0x3eb   : > { %v18089_v2 = vadd.f32 %v17917_v47, %v7405_v37  ;;  %v7404_v20 = vadd.f32 %v7341_v50, %v7017_v41  ;;  %14315 = vset.pattern.permute.xlu1 %v22479_v52  ;;  %14310 = vset.pattern.permute.xlu0 %v22493_v35  ;;  %v7024_v41 = vadd.f32 %v14163_v36, %v17906_v24  ;;  %v22505_v36 = vmov 15  }
 0x3ec   : > { %v14207_v59 = vpop.f32.mrf.mxu1  ;;  %8898 = vperm.xlu1 %14315, %v18055_v57   ;;  %7773 = vperm.xlu0 %14310, %v18055_v57  }
 0x3ed   : > { %v18097_v43 = vadd.f32 %v17917_v47, %v7404_v20  ;;  %v7407_v3 = vadd.f32 %v14207_v59, %v7020_v11  ;;  %v7023_v20 = vadd.f32 %v6984_v39, %v17910_v15  ;;  %v22870_v15 = vmov 7  }
 0x3ee   : > { %v7351_v60 = vpop.f32.mrf.mxu1 }
 0x3ef   : > { %v18101_v32 = vadd.f32 %v17917_v47, %v7407_v3  ;;  %v7406_v62 = vadd.f32 %v7351_v60, %v7019_v22  ;;  %v18160_v60 = vmax.f32 %v17947_v58, 0.0 }
 0x3f0   : > { %v14210_v34 = vpop.f32.mrf.mxu1  ;;  %14317 = vset.pattern.permute.xlu1 %v22487_v26  ;;  %14312 = vset.pattern.permute.xlu0 %v22497_v56 }
 0x3f1   : > { %v18107_v10 = vadd.f32 %v17917_v47, %v7406_v62  ;;  %v7409_v25 = vadd.f32 %v14210_v34, %v7022_v31  ;;  %9348 = vperm.xlu1 %14317, %v18055_v57   ;;  %8223 = vperm.xlu0 %14312, %v18055_v57   ;;  %v18188_v34 = vmax.f32 %v17958_v21, 0.0 }
 0x3f2   : > { %v7361_v17 = vpop.f32.mrf.mxu1 }
 0x3f3   : > { %v18113_v37 = vadd.f32 %v17917_v47, %v7409_v25  ;;  %v7408_v50 = vadd.f32 %v7361_v17, %v7021_v46 }
 0x3f4   : > { %v14213_v11 = vpop.f32.mrf.mxu1 }
 0x3f5   : > { %v18117_v9 = vadd.f32 %v17917_v47, %v7408_v50  ;;  %v7411_v45 = vadd.f32 %v14213_v11, %v7024_v41  ;;  %14319 = vset.pattern.permute.xlu1 %v22495_v40  ;;  %14314 = vset.pattern.permute.xlu0 %v22501_v48 }
 0x3f6   : > { %v7371_v59 = vpop.f32.mrf.mxu1  ;;  %9798 = vperm.xlu1 %14319, %v18055_v57   ;;  %8673 = vperm.xlu0 %14314, %v18055_v57  }
 0x3f7   : > { %v18124_v24 = vadd.f32 %v17917_v47, %v7411_v45  ;;  %v7410_v22 = vadd.f32 %v7371_v59, %v7023_v20 }
 0x3f9   : > { %v18127_v3 = vadd.f32 %v17917_v47, %v7410_v22  ;;  %v7454_v47 = vmax.f32 %v17933_v0, 0.0  ;;  %v18155_v0 = vmax.f32 %v17942_v33, 0.0 }
 0x3fa   : > { %14321 = vset.pattern.permute.xlu1 %v22483_v1  ;;  %14316 = vset.pattern.permute.xlu0 %v22870_v15 }
 0x3fb   : > { %10473 = vperm.xlu1 %14321, %v18055_v57   ;;  %9123 = vperm.xlu0 %14316, %v18055_v57  }
 0x3ff   : > { %14322 = vset.pattern.permute.xlu1 %v22503_v16  ;;  %14318 = vset.pattern.permute.xlu0 %v22491_v51 }
 0x400   : > { %10698 = vperm.xlu1 %14322, %v18055_v57   ;;  %9573 = vperm.xlu0 %14318, %v18055_v57  }
 0x404   : > { %14323 = vset.pattern.permute.xlu1 %v22505_v36  ;;  %14320 = vset.pattern.permute.xlu0 %v22499_v23 }
 0x405   : > { %10923 = vperm.xlu1 %14323, %v18055_v57   ;;  %10023 = vperm.xlu0 %14320, %v18055_v57  }
 0x409   : > { %14324 = vset.pattern.permute.xlu1 %v22489_v4  ;;  %14325 = vset.pattern.permute.xlu0 %v22493_v35 }
 0x40a   : > { %7785 = vperm.xlu0 %14325, %v7454_v47   ;;  %7532 = vperm.xlu1 %14324, %v7454_v47  }
 0x40e   : > { %14327 = vset.pattern.permute.xlu0 %v22497_v56  ;;  %14326 = vset.pattern.permute.xlu1 %v22485_v13 }
 0x40f   : > { %8235 = vperm.xlu0 %14327, %v7454_v47   ;;  %8010 = vperm.xlu1 %14326, %v7454_v47  }
 0x413   : > { %14329 = vset.pattern.permute.xlu0 %v22501_v48  ;;  %14328 = vset.pattern.permute.xlu1 %v22481_v12 }
 0x414   : > { %8685 = vperm.xlu0 %14329, %v7454_v47   ;;  %8460 = vperm.xlu1 %14328, %v7454_v47  }
 0x418   : > { %14331 = vset.pattern.permute.xlu0 %v22870_v15  ;;  %14330 = vset.pattern.permute.xlu1 %v22479_v52 }
 0x419   : > { %9135 = vperm.xlu0 %14331, %v7454_v47   ;;  %8910 = vperm.xlu1 %14330, %v7454_v47  }
 0x41d   : > { %14333 = vset.pattern.permute.xlu0 %v22491_v51  ;;  %14332 = vset.pattern.permute.xlu1 %v22487_v26 }
 0x41e   : > { %9585 = vperm.xlu0 %14333, %v7454_v47   ;;  %9360 = vperm.xlu1 %14332, %v7454_v47  }
 0x422   : > { %14337 = vset.pattern.permute.xlu0 %v22483_v1  ;;  %14334 = vset.pattern.permute.xlu1 %v22495_v40 }
 0x423   : > { %10485 = vperm.xlu0 %14337, %v7454_v47   ;;  %9810 = vperm.xlu1 %14334, %v7454_v47  }
 0x427   : > { %14335 = vset.pattern.permute.xlu1 %v22499_v23  ;;  %10481 = vperm.xlu0 %14337, %v18155_v0  }
 0x428   : > { %10035 = vperm.xlu1 %14335, %v7454_v47  }
 0x42b   : > { %14355 = vset.pattern.permute.xlu0 %v22493_v35 }
 0x42c   : > { %14336 = vset.pattern.permute.xlu1 %v22477_v6  ;;  %7793 = vperm.xlu0 %14355, %v18160_v60  }
 0x42d   : > { %10260 = vperm.xlu1 %14336, %v7454_v47  }
 0x430   : > { %14357 = vset.pattern.permute.xlu0 %v22497_v56 }
 0x431   : > { %14338 = vset.pattern.permute.xlu1 %v22503_v16  ;;  %8243 = vperm.xlu0 %14357, %v18160_v60  }
 0x432   : > { %10710 = vperm.xlu1 %14338, %v7454_v47  }
 0x435   : > { %14359 = vset.pattern.permute.xlu0 %v22501_v48 }
 0x436   : > { %14339 = vset.pattern.permute.xlu1 %v22505_v36  ;;  %8693 = vperm.xlu0 %14359, %v18160_v60  }
 0x437   : > { %10935 = vperm.xlu1 %14339, %v7454_v47  }
 0x43a   : > { %v18171_v33 = vpop.permute.xlu1 %7777  ;;  %v18173_v58 = vpop.permute.xlu0 %7522  ;;  %14361 = vset.pattern.permute.xlu0 %v22870_v15 }
 0x43b   : > { %14340 = vset.pattern.permute.xlu1 %v22489_v4  ;;  %9143 = vperm.xlu0 %14361, %v18160_v60  }
 0x43c   : > { %7527 = vperm.xlu1 %14340, %v18155_v0  }
 0x43f   : > { %v18179_v31 = vpop.permute.xlu1 %8227  ;;  %v18181_v62 = vpop.permute.xlu0 %8002  ;;  %14363 = vset.pattern.permute.xlu0 %v22491_v51 }
 0x440   : > { %9593 = vperm.xlu0 %14363, %v18160_v60   ;;  %14341 = vset.pattern.permute.xlu1 %v22493_v35 }
 0x441   : > { %7781 = vperm.xlu1 %14341, %v18155_v0  }
 0x444   : > { %v18190_v46 = vpop.permute.xlu1 %8677  ;;  %v18192_v25 = vpop.permute.xlu0 %8452  ;;  %14370 = vset.pattern.permute.xlu0 %v22489_v4 }
 0x445   : > { %7537 = vperm.xlu0 %14370, %v18188_v34   ;;  %14342 = vset.pattern.permute.xlu1 %v22485_v13 }
 0x446   : > { %8006 = vperm.xlu1 %14342, %v18155_v0  }
 0x449   : > { %v18198_v39 = vpop.permute.xlu1 %9127  ;;  %v18200_v17 = vpop.permute.xlu0 %8902  ;;  %14372 = vset.pattern.permute.xlu0 %v22485_v13 }
 0x44a   : > { %8014 = vperm.xlu0 %14372, %v18188_v34   ;;  %14343 = vset.pattern.permute.xlu1 %v22497_v56 }
 0x44b   : > { %8231 = vperm.xlu1 %14343, %v18155_v0  }
 0x44e   : > { %v18206_v21 = vpop.permute.xlu1 %9577  ;;  %v18208_v41 = vpop.permute.xlu0 %9352  ;;  %14374 = vset.pattern.permute.xlu0 %v22481_v12 }
 0x44f   : > { %22871 = vst [vmem:[#allocation42_spill] sm:$0xff] %v18206_v21  ;;  %22872 = vst [vmem:[#allocation41_spill] sm:$0xff] %v18208_v41  ;;  %8464 = vperm.xlu0 %14374, %v18188_v34   ;;  %14344 = vset.pattern.permute.xlu1 %v22481_v12  ;;  %v22921_v41 = vmov 3  }
 0x450   : > { %8456 = vperm.xlu1 %14344, %v18155_v0  }
 0x453   : > { %v18214_v50 = vpop.permute.xlu1 %10027  ;;  %v18216_v11 = vpop.permute.xlu0 %9802  ;;  %14376 = vset.pattern.permute.xlu0 %v22479_v52 }
 0x454   : > { %22873 = vst [vmem:[#allocation85_spill] sm:$0xff] %v18214_v50  ;;  %22874 = vst [vmem:[#allocation44_spill] sm:$0xff] %v18216_v11  ;;  %8914 = vperm.xlu0 %14376, %v18188_v34   ;;  %14345 = vset.pattern.permute.xlu1 %v22501_v48  ;;  %v22900_v50 = vmov 6  }
 0x455   : > { %8681 = vperm.xlu1 %14345, %v18155_v0  }
 0x458   : > { %v18222_v20 = vpop.permute.xlu1 %10252  ;;  %v18224_v45 = vpop.permute.xlu0 %10477  ;;  %14378 = vset.pattern.permute.xlu0 %v22487_v26 }
 0x459   : > { %22875 = vst [vmem:[#allocation47_spill] sm:$0xff] %v18222_v20  ;;  %22876 = vst [vmem:[#allocation98_spill] sm:$0xff] %v18224_v45  ;;  %9364 = vperm.xlu0 %14378, %v18188_v34   ;;  %14346 = vset.pattern.permute.xlu1 %v22479_v52  ;;  %v22896_v45 = vmov 4  }
 0x45a   : > { %8906 = vperm.xlu1 %14346, %v18155_v0  }
 0x45d   : > { %v18230_v59 = vpop.permute.xlu0 %10702  ;;  %v18232_v22 = vpop.permute.xlu1 %7998  ;;  %14380 = vset.pattern.permute.xlu0 %v22495_v40 }
 0x45e   : > { %22877 = vst [vmem:[#allocation86_spill] sm:$0xff] %v18230_v59  ;;  %9814 = vperm.xlu0 %14380, %v18188_v34   ;;  %14347 = vset.pattern.permute.xlu1 %v22870_v15  ;;  %v22892_v59 = vmov 11  }
 0x45f   : > { %9131 = vperm.xlu1 %14347, %v18155_v0  }
 0x462   : > { %v18238_v47 = vpop.permute.xlu1 %8448  ;;  %v18240_v6 = vpop.permute.xlu0 %7517  ;;  %14383 = vset.pattern.permute.xlu0 %v22483_v1  ;;  %v18255_v1 = vmax.f32 %v17963_v49, 0.0 }
 0x463   : > { %22878 = vst [vmem:[#allocation19_spill] sm:$0xff] %v18238_v47  ;;  %10489 = vperm.xlu0 %14383, %v18188_v34   ;;  %14348 = vset.pattern.permute.xlu1 %v22487_v26  ;;  %v22911_v47 = vmov 12  }
 0x464   : > { %9356 = vperm.xlu1 %14348, %v18155_v0  }
 0x467   : > { %v18246_v52 = vpop.permute.xlu1 %8898  ;;  %v18248_v12 = vpop.permute.xlu0 %7773  ;;  %14384 = vset.pattern.permute.xlu0 %v22503_v16 }
 0x468   : > { %22879 = vst [vmem:[#allocation20_spill] sm:$0xff] %v18246_v52  ;;  %10714 = vperm.xlu0 %14384, %v18188_v34   ;;  %14349 = vset.pattern.permute.xlu1 %v22491_v51  ;;  %v18322_v52 = vmax.f32 %v17972_v8, 0.0  ;;  %v22906_v8 = vmov 10  }
 0x469   : > { %9581 = vperm.xlu1 %14349, %v18155_v0  }
 0x46c   : > { %v18257_v13 = vpop.permute.xlu1 %9348  ;;  %v18259_v26 = vpop.permute.xlu0 %8223  ;;  %14386 = vset.pattern.permute.xlu0 %v22493_v35 }
 0x46d   : > { %22880 = vst [vmem:[#allocation46_spill] sm:$0xff] %v18257_v13  ;;  %22881 = vst [vmem:[#allocation45_spill] sm:$0xff] %v18259_v26  ;;  %7801 = vperm.xlu0 %14386, %v18255_v1   ;;  %14350 = vset.pattern.permute.xlu1 %v22495_v40 }
 0x46e   : > { %9806 = vperm.xlu1 %14350, %v18155_v0  }
 0x471   : > { %v18265_v4 = vpop.permute.xlu1 %9798  ;;  %v18267_v51 = vpop.permute.xlu0 %8673  ;;  %14388 = vset.pattern.permute.xlu0 %v22497_v56 }
 0x472   : > { %22882 = vst [vmem:[#allocation88_spill] sm:$0xff] %v18265_v4  ;;  %22883 = vst [vmem:[#allocation48_spill] sm:$0xff] %v18267_v51  ;;  %8251 = vperm.xlu0 %14388, %v18255_v1   ;;  %14351 = vset.pattern.permute.xlu1 %v22499_v23 }
 0x473   : > { %10031 = vperm.xlu1 %14351, %v18155_v0  }
 0x476   : > { %v18273_v49 = vpop.permute.xlu1 %10473  ;;  %v18275_v35 = vpop.permute.xlu0 %9123  ;;  %14390 = vset.pattern.permute.xlu0 %v22501_v48 }
 0x477   : > { %22884 = vst [vmem:[#allocation51_spill] sm:$0xff] %v18273_v49  ;;  %22885 = vst [vmem:[#allocation89_spill] sm:$0xff] %v18275_v35  ;;  %8701 = vperm.xlu0 %14390, %v18255_v1   ;;  %14352 = vset.pattern.permute.xlu1 %v22503_v16  ;;  %v22890_v49 = vmov 9   ;;  %v22891_v16 = vmov 0   ;;  %v22899_v35 = vmov 14  }
 0x478   : > { %10706 = vperm.xlu1 %14352, %v18155_v0  }
 0x47b   : > { %v18281_v40 = vpop.permute.xlu1 %10698  ;;  %v18283_v56 = vpop.permute.xlu0 %9573  ;;  %14392 = vset.pattern.permute.xlu0 %v22870_v15 }
 0x47c   : > { %22886 = vst [vmem:[#allocation103_spill] sm:$0xff] %v18281_v40  ;;  %22887 = vst [vmem:[#allocation21_spill] sm:$0xff] %v18283_v56  ;;  %9151 = vperm.xlu0 %14392, %v18255_v1   ;;  %14353 = vset.pattern.permute.xlu1 %v22505_v36  ;;  %v22893_v36 = vmov 2   ;;  %v22895_v56 = vmov 13  }
 0x47d   : > { %10931 = vperm.xlu1 %14353, %v18155_v0  }
 0x480   : > { %v18289_v23 = vpop.permute.xlu1 %10923  ;;  %v18291_v48 = vpop.permute.xlu0 %10023  ;;  %14394 = vset.pattern.permute.xlu0 %v22890_v49 }
 0x481   : > { %22888 = vst [vmem:[#allocation22_spill] sm:$0xff] %v18289_v23  ;;  %22889 = vst [vmem:[#allocation50_spill] sm:$0xff] %v18291_v48  ;;  %9601 = vperm.xlu0 %14394, %v18255_v1   ;;  %14354 = vset.pattern.permute.xlu1 %v22891_v16 }
 0x482   : > { %7542 = vperm.xlu1 %14354, %v18160_v60  }
 0x485   : > { %v18297_v40 = vpop.permute.xlu0 %7785  ;;  %v18299_v4 = vpop.permute.xlu1 %7532  ;;  %14396 = vset.pattern.permute.xlu0 %v22892_v59 }
 0x486   : > { %10051 = vperm.xlu0 %14396, %v18255_v1   ;;  %14356 = vset.pattern.permute.xlu1 %v22893_v36 }
 0x487   : > { %8018 = vperm.xlu1 %14356, %v18160_v60  }
 0x48a   : > { %v18305_v48 = vpop.permute.xlu0 %8235  ;;  %v18307_v23 = vpop.permute.xlu1 %8010  ;;  %14397 = vset.pattern.permute.xlu0 %v22895_v56 }
 0x48b   : > { %22894 = vst [vmem:[#allocation49_spill] sm:$0xff] %v18305_v48  ;;  %10501 = vperm.xlu0 %14397, %v18255_v1   ;;  %14358 = vset.pattern.permute.xlu1 %v22896_v45  ;;  %v22918_v48 = vmov 1  }
 0x48c   : > { %8468 = vperm.xlu1 %14358, %v18160_v60  }
 0x48f   : > { %v18313_v13 = vpop.permute.xlu0 %8685  ;;  %v18315_v20 = vpop.permute.xlu1 %8460  ;;  %14398 = vset.pattern.permute.xlu0 %v22899_v35 }
 0x490   : > { %22897 = vst [vmem:[#allocation91_spill] sm:$0xff] %v18313_v13  ;;  %22898 = vst [vmem:[#allocation52_spill] sm:$0xff] %v18315_v20  ;;  %10726 = vperm.xlu0 %14398, %v18255_v1   ;;  %14360 = vset.pattern.permute.xlu1 %v22900_v50  ;;  %v22903_v13 = vmov 8  }
 0x491   : > { %8918 = vperm.xlu1 %14360, %v18160_v60  }
 0x494   : > { %v18324_v11 = vpop.permute.xlu0 %9135  ;;  %v18326_v19 = vpop.permute.xlu1 %8910  ;;  %14399 = vset.pattern.permute.xlu0 %v22891_v16 }
 0x495   : > { %22901 = vst [vmem:[#allocation55_spill] sm:$0xff] %v18324_v11  ;;  %22902 = vst [vmem:[#allocation92_spill] sm:$0xff] %v18326_v19  ;;  %7547 = vperm.xlu0 %14399, %v18322_v52   ;;  %14362 = vset.pattern.permute.xlu1 %v22903_v13 }
 0x496   : > { %9368 = vperm.xlu1 %14362, %v18160_v60  }
 0x499   : > { %v18332_v51 = vpop.permute.xlu0 %9585  ;;  %v18334_v21 = vpop.permute.xlu1 %9360  ;;  %14401 = vset.pattern.permute.xlu0 %v22893_v36 }
 0x49a   : > { %22904 = vst [vmem:[#allocation23_spill] sm:$0xff] %v18332_v51  ;;  %22905 = vst [vmem:[#allocation24_spill] sm:$0xff] %v18334_v21  ;;  %8022 = vperm.xlu0 %14401, %v18322_v52   ;;  %14364 = vset.pattern.permute.xlu1 %v22906_v8 }
 0x49b   : > { %9818 = vperm.xlu1 %14364, %v18160_v60  }
 0x49e   : > { %v18340_v11 = vpop.permute.xlu0 %10485  ;;  %v18342_v19 = vpop.permute.xlu1 %9810  ;;  %14403 = vset.pattern.permute.xlu0 %v22896_v45 }
 0x49f   : > { %22907 = vst [vmem:[#allocation54_spill] sm:$0xff] %v18340_v11  ;;  %22908 = vst [vmem:[#allocation53_spill] sm:$0xff] %v18342_v19  ;;  %8472 = vperm.xlu0 %14403, %v18322_v52   ;;  %14365 = vset.pattern.permute.xlu1 %v22892_v59 }
 0x4a0   : > { %10043 = vperm.xlu1 %14365, %v18160_v60  }
 0x4a2   : > { %v18348_v51 = vpop.permute.xlu0 %10481 }
 0x4a3   : > { %22909 = vst [vmem:[#allocation94_spill] sm:$0xff] %v18348_v51  ;;  %v18350_v21 = vpop.permute.xlu1 %10035  ;;  %14405 = vset.pattern.permute.xlu0 %v22900_v50 }
 0x4a4   : > { %22910 = vst [vmem:[#allocation56_spill] sm:$0xff] %v18350_v21  ;;  %8922 = vperm.xlu0 %14405, %v18322_v52   ;;  %14366 = vset.pattern.permute.xlu1 %v22911_v47 }
 0x4a5   : > { %10268 = vperm.xlu1 %14366, %v18160_v60  }
 0x4a7   : > { %v18356_v11 = vpop.permute.xlu0 %7793 }
 0x4a8   : > { %22912 = vst [vmem:[#allocation59_spill] sm:$0xff] %v18356_v11  ;;  %v18358_v19 = vpop.permute.xlu1 %10260  ;;  %14407 = vset.pattern.permute.xlu0 %v22903_v13 }
 0x4a9   : > { %22913 = vst [vmem:[#allocation95_spill] sm:$0xff] %v18358_v19  ;;  %9372 = vperm.xlu0 %14407, %v18322_v52   ;;  %14367 = vset.pattern.permute.xlu1 %v22895_v56  ;;  %v18373_v19 = vmax.f32 %v17979_v38, 0.0 }
 0x4aa   : > { %10493 = vperm.xlu1 %14367, %v18160_v60  }
 0x4ac   : > { %v18364_v51 = vpop.permute.xlu0 %8243 }
 0x4ad   : > { %22914 = vst [vmem:[#allocation25_spill] sm:$0xff] %v18364_v51  ;;  %v18366_v21 = vpop.permute.xlu1 %10710  ;;  %14409 = vset.pattern.permute.xlu0 %v22906_v8 }
 0x4ae   : > { %22915 = vst [vmem:[#allocation26_spill] sm:$0xff] %v18366_v21  ;;  %9822 = vperm.xlu0 %14409, %v18322_v52   ;;  %14368 = vset.pattern.permute.xlu1 %v22899_v35  ;;  %v22919_v21 = vmov 15  }
 0x4af   : > { %10718 = vperm.xlu1 %14368, %v18160_v60  }
 0x4b1   : > { %v18375_v11 = vpop.permute.xlu0 %8693 }
 0x4b2   : > { %22916 = vst [vmem:[#allocation58_spill] sm:$0xff] %v18375_v11  ;;  %v18377_v20 = vpop.permute.xlu1 %10935  ;;  %14416 = vset.pattern.permute.xlu0 %v22918_v48 }
 0x4b3   : > { %22917 = vst [vmem:[#allocation57_spill] sm:$0xff] %v18377_v20  ;;  %7809 = vperm.xlu0 %14416, %v18373_v19   ;;  %14369 = vset.pattern.permute.xlu1 %v22919_v21  ;;  %v22924_v20 = vmov 5  }
 0x4b4   : > { %10943 = vperm.xlu1 %14369, %v18160_v60  }
 0x4b6   : > { %v18383_v51 = vpop.permute.xlu0 %9143 }
 0x4b7   : > { %22920 = vst [vmem:[#allocation96_spill] sm:$0xff] %v18383_v51  ;;  %14418 = vset.pattern.permute.xlu0 %v22921_v41  ;;  %v18386_v26 = vpop.permute.xlu1 %7527 }
 0x4b8   : > { %22922 = vst [vmem:[#allocation60_spill] sm:$0xff] %v18386_v26  ;;  %8259 = vperm.xlu0 %14418, %v18373_v19   ;;  %14371 = vset.pattern.permute.xlu1 %v22918_v48 }
 0x4b9   : > { %7789 = vperm.xlu1 %14371, %v18188_v34  }
 0x4bb   : > { %v18391_v38 = vpop.permute.xlu0 %9593 }
 0x4bc   : > { %22923 = vst [vmem:[#allocation63_spill] sm:$0xff] %v18391_v38  ;;  %14420 = vset.pattern.permute.xlu0 %v22924_v20  ;;  %v18394_v11 = vpop.permute.xlu1 %7781 }
 0x4bd   : > { %22925 = vst [vmem:[#allocation97_spill] sm:$0xff] %v18394_v11  ;;  %8709 = vperm.xlu0 %14420, %v18373_v19   ;;  %14373 = vset.pattern.permute.xlu1 %v22921_v41 }
 0x4be   : > { %8239 = vperm.xlu1 %14373, %v18188_v34  }
 0x4c0   : > { %v18399_v60 = vpop.permute.xlu0 %7537 }
 0x4c1   : > { %22926 = vst [vmem:[#allocation27_spill] sm:$0xff] %v18399_v60  ;;  %14422 = vset.pattern.permute.xlu0 %v22870_v15  ;;  %v18402_v51 = vpop.permute.xlu1 %8006 }
 0x4c2   : > { %22927 = vst [vmem:[#allocation28_spill] sm:$0xff] %v18402_v51  ;;  %9159 = vperm.xlu0 %14422, %v18373_v19   ;;  %14375 = vset.pattern.permute.xlu1 %v22924_v20  ;;  %v18416_v51 = vmax.f32 %v17986_v14, 0.0 }
 0x4c3   : > { %8689 = vperm.xlu1 %14375, %v18188_v34  }
 0x4c5   : > { %v18407_v38 = vpop.permute.xlu0 %8014 }
 0x4c6   : > { %22928 = vst [vmem:[#allocation62_spill] sm:$0xff] %v18407_v38  ;;  %14424 = vset.pattern.permute.xlu0 %v22890_v49  ;;  %v18410_v26 = vpop.permute.xlu1 %8231 }
 0x4c7   : > { %22929 = vst [vmem:[#allocation61_spill] sm:$0xff] %v18410_v26  ;;  %9609 = vperm.xlu0 %14424, %v18373_v19   ;;  %14377 = vset.pattern.permute.xlu1 %v22870_v15 }
 0x4c8   : > { %9139 = vperm.xlu1 %14377, %v18188_v34  }
 0x4ca   : > { %v18418_v11 = vpop.permute.xlu0 %8464 }
 0x4cb   : > { %22930 = vst [vmem:[#allocation99_spill] sm:$0xff] %v18418_v11  ;;  %14431 = vset.pattern.permute.xlu0 %v22891_v16  ;;  %v18421_v60 = vpop.permute.xlu1 %8456 }
 0x4cc   : > { %22931 = vst [vmem:[#allocation64_spill] sm:$0xff] %v18421_v60  ;;  %7557 = vperm.xlu0 %14431, %v18416_v51   ;;  %14379 = vset.pattern.permute.xlu1 %v22890_v49 }
 0x4cd   : > { %9589 = vperm.xlu1 %14379, %v18188_v34  }
 0x4cf   : > { %v18426_v26 = vpop.permute.xlu0 %8914 }
 0x4d0   : > { %22932 = vst [vmem:[#allocation67_spill] sm:$0xff] %v18426_v26  ;;  %14433 = vset.pattern.permute.xlu0 %v22893_v36  ;;  %v18429_v38 = vpop.permute.xlu1 %8681 }
 0x4d1   : > { %22933 = vst [vmem:[#allocation100_spill] sm:$0xff] %v18429_v38  ;;  %8030 = vperm.xlu0 %14433, %v18416_v51   ;;  %14381 = vset.pattern.permute.xlu1 %v22892_v59 }
 0x4d2   : > { %10039 = vperm.xlu1 %14381, %v18188_v34  }
 0x4d4   : > { %v18434_v14 = vpop.permute.xlu0 %9364 }
 0x4d5   : > { %22934 = vst [vmem:[#allocation29_spill] sm:$0xff] %v18434_v14  ;;  %14435 = vset.pattern.permute.xlu0 %v22896_v45  ;;  %v18437_v60 = vpop.permute.xlu1 %8906 }
 0x4d6   : > { %22935 = vst [vmem:[#allocation30_spill] sm:$0xff] %v18437_v60  ;;  %8480 = vperm.xlu0 %14435, %v18416_v51   ;;  %14382 = vset.pattern.permute.xlu1 %v22911_v47 }
 0x4d7   : > { %10264 = vperm.xlu1 %14382, %v18188_v34  }
 0x4d9   : > { %v18442_v26 = vpop.permute.xlu0 %9814 }
 0x4da   : > { %22936 = vst [vmem:[#allocation66_spill] sm:$0xff] %v18442_v26  ;;  %14437 = vset.pattern.permute.xlu0 %v22900_v50  ;;  %v18445_v38 = vpop.permute.xlu1 %9131 }
 0x4db   : > { %22937 = vst [vmem:[#allocation65_spill] sm:$0xff] %v18445_v38  ;;  %8930 = vperm.xlu0 %14437, %v18416_v51   ;;  %14385 = vset.pattern.permute.xlu1 %v22891_v16 }
 0x4dc   : > { %7552 = vperm.xlu1 %14385, %v18255_v1  }
 0x4de   : > { %v18450_v14 = vpop.permute.xlu0 %10489 }
 0x4df   : > { %22938 = vst [vmem:[#allocation101_spill] sm:$0xff] %v18450_v14  ;;  %14439 = vset.pattern.permute.xlu0 %v22903_v13  ;;  %v18453_v60 = vpop.permute.xlu1 %9356  ;;  %v18467_v14 = vmax.f32 %v17995_v42, 0.0 }
 0x4e0   : > { %22939 = vst [vmem:[#allocation68_spill] sm:$0xff] %v18453_v60  ;;  %9380 = vperm.xlu0 %14439, %v18416_v51   ;;  %14387 = vset.pattern.permute.xlu1 %v22893_v36 }
 0x4e1   : > { %8026 = vperm.xlu1 %14387, %v18255_v1  }
 0x4e3   : > { %v18458_v26 = vpop.permute.xlu0 %10714 }
 0x4e4   : > { %22940 = vst [vmem:[#allocation71_spill] sm:$0xff] %v18458_v26  ;;  %14441 = vset.pattern.permute.xlu0 %v22906_v8  ;;  %v18461_v38 = vpop.permute.xlu1 %9581 }
 0x4e5   : > { %22941 = vst [vmem:[#allocation102_spill] sm:$0xff] %v18461_v38  ;;  %9830 = vperm.xlu0 %14441, %v18416_v51   ;;  %14389 = vset.pattern.permute.xlu1 %v22896_v45 }
 0x4e6   : > { %8476 = vperm.xlu1 %14389, %v18255_v1  }
 0x4e8   : > { %v18469_v60 = vpop.permute.xlu0 %7801 }
 0x4e9   : > { %22942 = vst [vmem:[#allocation31_spill] sm:$0xff] %v18469_v60  ;;  %14448 = vset.pattern.permute.xlu0 %v22918_v48  ;;  %v18472_v11 = vpop.permute.xlu1 %9806 }
 0x4ea   : > { %22943 = vst [vmem:[#allocation70_spill] sm:$0xff] %v18472_v11  ;;  %7817 = vperm.xlu0 %14448, %v18467_v14   ;;  %14391 = vset.pattern.permute.xlu1 %v22900_v50 }
 0x4eb   : > { %8926 = vperm.xlu1 %14391, %v18255_v1  }
 0x4ed   : > { %v18477_v26 = vpop.permute.xlu0 %8251 }
 0x4ee   : > { %22944 = vst [vmem:[#allocation69_spill] sm:$0xff] %v18477_v26  ;;  %14450 = vset.pattern.permute.xlu0 %v22921_v41  ;;  %v18480_v38 = vpop.permute.xlu1 %10031 }
 0x4ef   : > { %22945 = vst [vmem:[#allocation72_spill] sm:$0xff] %v18480_v38  ;;  %8267 = vperm.xlu0 %14450, %v18467_v14   ;;  %14393 = vset.pattern.permute.xlu1 %v22903_v13 }
 0x4f0   : > { %9376 = vperm.xlu1 %14393, %v18255_v1  }
 0x4f2   : > { %v18485_v42 = vpop.permute.xlu0 %8701 }
 0x4f3   : > { %22946 = vst [vmem:[#allocation75_spill] sm:$0xff] %v18485_v42  ;;  %14452 = vset.pattern.permute.xlu0 %v22924_v20  ;;  %v18488_v11 = vpop.permute.xlu1 %10706 }
 0x4f4   : > { %22947 = vst [vmem:[#allocation104_spill] sm:$0xff] %v18488_v11  ;;  %8717 = vperm.xlu0 %14452, %v18467_v14   ;;  %14395 = vset.pattern.permute.xlu1 %v22906_v8 }
 0x4f5   : > { %9826 = vperm.xlu1 %14395, %v18255_v1  }
 0x4f7   : > { %v18493_v26 = vpop.permute.xlu0 %9151 }
 0x4f8   : > { %22948 = vst [vmem:[#allocation74_spill] sm:$0xff] %v18493_v26  ;;  %14454 = vset.pattern.permute.xlu0 %v22870_v15  ;;  %v18496_v38 = vpop.permute.xlu1 %10931 }
 0x4f9   : > { %22949 = vst [vmem:[#allocation73_spill] sm:$0xff] %v18496_v38  ;;  %9167 = vperm.xlu0 %14454, %v18467_v14   ;;  %14400 = vset.pattern.permute.xlu1 %v22918_v48  ;;  %v18510_v38 = vmax.f32 %v18002_v28, 0.0 }
 0x4fa   : > { %7797 = vperm.xlu1 %14400, %v18322_v52  }
 0x4fc   : > { %v18501_v42 = vpop.permute.xlu0 %9601 }
 0x4fd   : > { %22950 = vst [vmem:[#allocation76_spill] sm:$0xff] %v18501_v42  ;;  %14456 = vset.pattern.permute.xlu0 %v22890_v49  ;;  %v18504_v11 = vpop.permute.xlu1 %7542 }
 0x4fe   : > { %22951 = vst [vmem:[#allocation77_spill] sm:$0xff] %v18504_v11  ;;  %9617 = vperm.xlu0 %14456, %v18467_v14   ;;  %14402 = vset.pattern.permute.xlu1 %v22921_v41 }
 0x4ff   : > { %8247 = vperm.xlu1 %14402, %v18322_v52  }
 0x501   : > { %v18512_v26 = vpop.permute.xlu0 %10051 }
 0x502   : > { %22952 = vst [vmem:[#allocation12_spill] sm:$0xff] %v18512_v26  ;;  %14462 = vset.pattern.permute.xlu0 %v22891_v16  ;;  %v18515_v60 = vpop.permute.xlu1 %8018 }
 0x503   : > { %22953 = vst [vmem:[#allocation35_spill] sm:$0xff] %v18515_v60  ;;  %7567 = vperm.xlu0 %14462, %v18510_v38   ;;  %14404 = vset.pattern.permute.xlu1 %v22924_v20 }
 0x504   : > { %8697 = vperm.xlu1 %14404, %v18322_v52  }
 0x506   : > { %v18520_v42 = vpop.permute.xlu0 %10501 }
 0x507   : > { %22954 = vst [vmem:[#allocation84_spill] sm:$0xff] %v18520_v42  ;;  %14464 = vset.pattern.permute.xlu0 %v22893_v36  ;;  %v18523_v11 = vpop.permute.xlu1 %8468 }
 0x508   : > { %22955 = vst [vmem:[#allocation36_spill] sm:$0xff] %v18523_v11  ;;  %8038 = vperm.xlu0 %14464, %v18510_v38   ;;  %14406 = vset.pattern.permute.xlu1 %v22870_v15 }
 0x509   : > { %9147 = vperm.xlu1 %14406, %v18322_v52  }
 0x50b   : > { %v18528_v28 = vpop.permute.xlu0 %10726 }
 0x50c   : > { %22956 = vst [vmem:[#allocation32_spill] sm:$0xff] %v18528_v28  ;;  %14466 = vset.pattern.permute.xlu0 %v22896_v45  ;;  %v18531_v26 = vpop.permute.xlu1 %8918 }
 0x50d   : > { %22957 = vst [vmem:[#allocation33_spill] sm:$0xff] %v18531_v26  ;;  %8488 = vperm.xlu0 %14466, %v18510_v38   ;;  %14408 = vset.pattern.permute.xlu1 %v22890_v49 }
 0x50e   : > { %9597 = vperm.xlu1 %14408, %v18322_v52  }
 0x510   : > { %v18536_v42 = vpop.permute.xlu0 %7547 }
 0x511   : > { %22958 = vst [vmem:[#allocation78_spill] sm:$0xff] %v18536_v42  ;;  %14468 = vset.pattern.permute.xlu0 %v22900_v50  ;;  %v18539_v11 = vpop.permute.xlu1 %9368 }
 0x512   : > { %22959 = vst [vmem:[#allocation81_spill] sm:$0xff] %v18539_v11  ;;  %8938 = vperm.xlu0 %14468, %v18510_v38   ;;  %14410 = vset.pattern.permute.xlu1 %v22892_v59 }
 0x513   : > { %10047 = vperm.xlu1 %14410, %v18322_v52  }
 0x515   : > { %v18544_v28 = vpop.permute.xlu0 %8022 }
 0x516   : > { %22960 = vst [vmem:[#allocation6_spill] sm:$0xff] %v18544_v28  ;;  %14470 = vset.pattern.permute.xlu0 %v22903_v13  ;;  %v18547_v26 = vpop.permute.xlu1 %9818 }
 0x517   : > { %22961 = vst [vmem:[#allocation7_spill] sm:$0xff] %v18547_v26  ;;  %9388 = vperm.xlu0 %14470, %v18510_v38   ;;  %14411 = vset.pattern.permute.xlu1 %v22911_v47 }
 0x518   : > { %10272 = vperm.xlu1 %14411, %v18322_v52  }
 0x51a   : > { %v18552_v42 = vpop.permute.xlu0 %8472 }
 0x51b   : > { %22962 = vst [vmem:[#allocation13_spill] sm:$0xff] %v18552_v42  ;;  %14472 = vset.pattern.permute.xlu0 %v22906_v8  ;;  %v18555_v11 = vpop.permute.xlu1 %10043 }
 0x51c   : > { %22963 = vst [vmem:[#allocation34_spill] sm:$0xff] %v18555_v11  ;;  %9838 = vperm.xlu0 %14472, %v18510_v38   ;;  %14412 = vset.pattern.permute.xlu1 %v22895_v56 }
 0x51d   : > { %10497 = vperm.xlu1 %14412, %v18322_v52  }
 0x51f   : > { %v18560_v28 = vpop.permute.xlu0 %8922 }
 0x520   : > { %22964 = vst [vmem:[#allocation79_spill] sm:$0xff] %v18560_v28  ;;  %14473 = vset.pattern.permute.xlu0 %v22892_v59  ;;  %v18563_v26 = vpop.permute.xlu1 %10268 }
 0x521   : > { %22965 = vst [vmem:[#allocation8_spill] sm:$0xff] %v18563_v26  ;;  %10063 = vperm.xlu0 %14473, %v18510_v38   ;;  %14413 = vset.pattern.permute.xlu1 %v22899_v35 }
 0x522   : > { %10722 = vperm.xlu1 %14413, %v18322_v52  }
 0x524   : > { %v18568_v42 = vpop.permute.xlu0 %9372 }
 0x525   : > { %22966 = vst [vmem:[#allocation9_spill] sm:$0xff] %v18568_v42  ;;  %14474 = vset.pattern.permute.xlu0 %v22895_v56  ;;  %v18571_v11 = vpop.permute.xlu1 %10493 }
 0x526   : > { %22967 = vst [vmem:[#allocation39_spill] sm:$0xff] %v18571_v11  ;;  %10513 = vperm.xlu0 %14474, %v18510_v38   ;;  %14414 = vset.pattern.permute.xlu1 %v22919_v21  ;;  %v18585_v11 = vmax.f32 %v18009_v29, 0.0 }
 0x527   : > { %10947 = vperm.xlu1 %14414, %v18322_v52  }
 0x529   : > { %v18576_v28 = vpop.permute.xlu0 %9822 }
 0x52a   : > { %22968 = vst [vmem:[#allocation87_spill] sm:$0xff] %v18576_v28  ;;  %14475 = vset.pattern.permute.xlu0 %v22899_v35  ;;  %v18579_v26 = vpop.permute.xlu1 %10718 }
 0x52b   : > { %22969 = vst [vmem:[#allocation80_spill] sm:$0xff] %v18579_v26  ;;  %10738 = vperm.xlu0 %14475, %v18510_v38   ;;  %14415 = vset.pattern.permute.xlu1 %v22891_v16 }
 0x52c   : > { %7562 = vperm.xlu1 %14415, %v18373_v19  }
 0x52e   : > { %v18587_v42 = vpop.permute.xlu0 %7809 }
 0x52f   : > { %22970 = vst [vmem:[#allocation10_spill] sm:$0xff] %v18587_v42  ;;  %14477 = vset.pattern.permute.xlu0 %v22918_v48  ;;  %v18590_v52 = vpop.permute.xlu1 %10943 }
 0x530   : > { %22971 = vst [vmem:[#allocation11_spill] sm:$0xff] %v18590_v52  ;;  %7825 = vperm.xlu0 %14477, %v18585_v11   ;;  %14417 = vset.pattern.permute.xlu1 %v22893_v36 }
 0x531   : > { %8034 = vperm.xlu1 %14417, %v18373_v19  }
 0x533   : > { %v18595_v28 = vpop.permute.xlu0 %8259 }
 0x534   : > { %22972 = vst [vmem:[#allocation15_spill] sm:$0xff] %v18595_v28  ;;  %14479 = vset.pattern.permute.xlu0 %v22921_v41  ;;  %v18598_v26 = vpop.permute.xlu1 %7789 }
 0x535   : > { %8275 = vperm.xlu0 %14479, %v18585_v11   ;;  %14419 = vset.pattern.permute.xlu1 %v22896_v45 }
 0x536   : > { %8484 = vperm.xlu1 %14419, %v18373_v19  }
 0x538   : > { %v18603_v29 = vpop.permute.xlu0 %8709 }
 0x539   : > { %22973 = vst [vmem:[#allocation14_spill] sm:$0xff] %v18603_v29  ;;  %14481 = vset.pattern.permute.xlu0 %v22924_v20  ;;  %v18606_v52 = vpop.permute.xlu1 %8239 }
 0x53a   : > { %22974 = vst [vmem:[#allocation38_spill] sm:$0xff] %v18606_v52  ;;  %8725 = vperm.xlu0 %14481, %v18585_v11   ;;  %14421 = vset.pattern.permute.xlu1 %v22900_v50 }
 0x53b   : > { %8934 = vperm.xlu1 %14421, %v18373_v19  }
 0x53d   : > { %v18611_v28 = vpop.permute.xlu0 %9159 }
 0x53e   : > { %22975 = vst [vmem:[#allocation37_spill] sm:$0xff] %v18611_v28  ;;  %14483 = vset.pattern.permute.xlu0 %v22870_v15  ;;  %v18614_v42 = vpop.permute.xlu1 %8689 }
 0x53f   : > { %22976 = vst [vmem:[#allocation90_spill] sm:$0xff] %v18614_v42  ;;  %9175 = vperm.xlu0 %14483, %v18585_v11   ;;  %14423 = vset.pattern.permute.xlu1 %v22903_v13 }
 0x540   : > { %9384 = vperm.xlu1 %14423, %v18373_v19  }
 0x542   : > { %v18619_v29 = vpop.permute.xlu0 %9609 }
 0x543   : > { %22977 = vst [vmem:[#allocation82_spill] sm:$0xff] %v18619_v29  ;;  %14485 = vset.pattern.permute.xlu0 %v22890_v49  ;;  %v18622_v52 = vpop.permute.xlu1 %9139  ;;  %v18636_v29 = vmax.f32 %v18016_v54, 0.0 }
 0x544   : > { %22978 = vst [vmem:[#allocation40_spill] sm:$0xff] %v18622_v52  ;;  %9625 = vperm.xlu0 %14485, %v18585_v11   ;;  %14425 = vset.pattern.permute.xlu1 %v22906_v8 }
 0x545   : > { %9834 = vperm.xlu1 %14425, %v18373_v19  }
 0x547   : > { %v18627_v28 = vpop.permute.xlu0 %7557 }
 0x548   : > { %22979 = vst [vmem:[#allocation43_spill] sm:$0xff] %v18627_v28  ;;  %14487 = vset.pattern.permute.xlu0 %v22892_v59  ;;  %v18630_v42 = vpop.permute.xlu1 %9589 }
 0x549   : > { %22980 = vst [vmem:[#allocation93_spill] sm:$0xff] %v18630_v42  ;;  %10075 = vperm.xlu0 %14487, %v18585_v11   ;;  %14426 = vset.pattern.permute.xlu1 %v22892_v59 }
 0x54a   : > { %10059 = vperm.xlu1 %14426, %v18373_v19  }
 0x54c   : > { %v18638_v52 = vpop.permute.xlu0 %8030 }
 0x54d   : > { %22981 = vst [vmem:[#allocation83_spill] sm:$0xff] %v18638_v52  ;;  %14490 = vset.pattern.permute.xlu0 %v22891_v16  ;;  %v18641_v60 = vpop.permute.xlu1 %10039 }
 0x54e   : > { %22982 = vst [vmem:[#allocation17_spill] sm:$0xff] %v18641_v60  ;;  %7577 = vperm.xlu0 %14490, %v18636_v29   ;;  %14427 = vset.pattern.permute.xlu1 %v22911_v47 }
 0x54f   : > { %10284 = vperm.xlu1 %14427, %v18373_v19  }
 0x551   : > { %v18646_v28 = vpop.permute.xlu0 %8480 }
 0x552   : > { %22983 = vst [vmem:[#allocation16_spill] sm:$0xff] %v18646_v28  ;;  %14492 = vset.pattern.permute.xlu0 %v22893_v36  ;;  %v18649_v42 = vpop.permute.xlu1 %10264 }
 0x553   : > { %22984 = vst [vmem:[#allocation105_spill] sm:$0xff] %v18649_v42  ;;  %8046 = vperm.xlu0 %14492, %v18636_v29   ;;  %14428 = vset.pattern.permute.xlu1 %v22895_v56 }
 0x554   : > { %10509 = vperm.xlu1 %14428, %v18373_v19  }
 0x556   : > { %v18654_v54 = vpop.permute.xlu0 %8930 }
 0x557   : > { %22985 = vst [vmem:[#allocation106_spill] sm:$0xff] %v18654_v54  ;;  %14494 = vset.pattern.permute.xlu0 %v22896_v45  ;;  %v18657_v60 = vpop.permute.xlu1 %7552 }
 0x558   : > { %22986 = vst [vmem:[#allocation107_spill] sm:$0xff] %v18657_v60  ;;  %8496 = vperm.xlu0 %14494, %v18636_v29   ;;  %14429 = vset.pattern.permute.xlu1 %v22899_v35 }
 0x559   : > { %10734 = vperm.xlu1 %14429, %v18373_v19  }
 0x55b   : > { %v18662_v28 = vpop.permute.xlu0 %9380 }
 0x55c   : > { %22987 = vst [vmem:[#allocation108_spill] sm:$0xff] %v18662_v28  ;;  %14496 = vset.pattern.permute.xlu0 %v22900_v50  ;;  %v18665_v42 = vpop.permute.xlu1 %8026 }
 0x55d   : > { %22988 = vst [vmem:[#allocation109_spill] sm:$0xff] %v18665_v42  ;;  %8946 = vperm.xlu0 %14496, %v18636_v29   ;;  %14430 = vset.pattern.permute.xlu1 %v22919_v21 }
 0x55e   : > { %10959 = vperm.xlu1 %14430, %v18373_v19   ;;  %v18687_v19 = vmax.f32 %v18023_v61, 0.0 }
 0x560   : > { %v18670_v54 = vpop.permute.xlu0 %9830 }
 0x561   : > { %22989 = vst [vmem:[#allocation110_spill] sm:$0xff] %v18670_v54  ;;  %14498 = vset.pattern.permute.xlu0 %v22903_v13  ;;  %v18673_v52 = vpop.permute.xlu1 %8476 }
 0x562   : > { %22990 = vst [vmem:[#allocation111_spill] sm:$0xff] %v18673_v52  ;;  %9396 = vperm.xlu0 %14498, %v18636_v29   ;;  %14432 = vset.pattern.permute.xlu1 %v22918_v48 }
 0x563   : > { %7805 = vperm.xlu1 %14432, %v18416_v51  }
 0x565   : > { %v18678_v28 = vpop.permute.xlu0 %7817 }
 0x566   : > { %22991 = vst [vmem:[#allocation112_spill] sm:$0xff] %v18678_v28  ;;  %14500 = vset.pattern.permute.xlu0 %v22906_v8  ;;  %v18681_v42 = vpop.permute.xlu1 %8926 }
 0x567   : > { %22992 = vst [vmem:[#allocation113_spill] sm:$0xff] %v18681_v42  ;;  %9846 = vperm.xlu0 %14500, %v18636_v29   ;;  %14434 = vset.pattern.permute.xlu1 %v22921_v41 }
 0x568   : > { %8255 = vperm.xlu1 %14434, %v18416_v51  }
 0x56a   : > { %v18689_v54 = vpop.permute.xlu0 %8267 }
 0x56b   : > { %22993 = vst [vmem:[#allocation114_spill] sm:$0xff] %v18689_v54  ;;  %14506 = vset.pattern.permute.xlu0 %v22918_v48  ;;  %v18692_v52 = vpop.permute.xlu1 %9376 }
 0x56c   : > { %22994 = vst [vmem:[#allocation115_spill] sm:$0xff] %v18692_v52  ;;  %7833 = vperm.xlu0 %14506, %v18687_v19   ;;  %14436 = vset.pattern.permute.xlu1 %v22924_v20 }
 0x56d   : > { %8705 = vperm.xlu1 %14436, %v18416_v51  }
 0x56f   : > { %v18697_v28 = vpop.permute.xlu0 %8717 }
 0x570   : > { %22995 = vst [vmem:[#allocation116_spill] sm:$0xff] %v18697_v28  ;;  %14508 = vset.pattern.permute.xlu0 %v22921_v41  ;;  %v18700_v42 = vpop.permute.xlu1 %9826 }
 0x571   : > { %22996 = vst [vmem:[#allocation117_spill] sm:$0xff] %v18700_v42  ;;  %8283 = vperm.xlu0 %14508, %v18687_v19   ;;  %14438 = vset.pattern.permute.xlu1 %v22870_v15 }
 0x572   : > { %9155 = vperm.xlu1 %14438, %v18416_v51  }
 0x574   : > { %v18705_v61 = vpop.permute.xlu0 %9167 }
 0x575   : > { %22997 = vst [vmem:[#allocation118_spill] sm:$0xff] %v18705_v61  ;;  %14510 = vset.pattern.permute.xlu0 %v22924_v20  ;;  %v18708_v54 = vpop.permute.xlu1 %7797 }
 0x576   : > { %8733 = vperm.xlu0 %14510, %v18687_v19   ;;  %14440 = vset.pattern.permute.xlu1 %v22890_v49 }
 0x577   : > { %9605 = vperm.xlu1 %14440, %v18416_v51  }
 0x579   : > { %v18713_v28 = vpop.permute.xlu0 %9617 }
 0x57a   : > { %22998 = vst [vmem:[#allocation119_spill] sm:$0xff] %v18713_v28  ;;  %14512 = vset.pattern.permute.xlu0 %v22870_v15  ;;  %v18716_v42 = vpop.permute.xlu1 %8247  ;;  %v18730_v28 = vmax.f32 %v18033_v44, 0.0 }
 0x57b   : > { %22999 = vst [vmem:[#allocation120_spill] sm:$0xff] %v18716_v42  ;;  %9183 = vperm.xlu0 %14512, %v18687_v19   ;;  %14442 = vset.pattern.permute.xlu1 %v22892_v59 }
 0x57c   : > { %10055 = vperm.xlu1 %14442, %v18416_v51  }
 0x57e   : > { %v18721_v61 = vpop.permute.xlu0 %7567 }
 0x57f   : > { %23000 = vst [vmem:[#allocation121_spill] sm:$0xff] %v18721_v61  ;;  %14514 = vset.pattern.permute.xlu0 %v22890_v49  ;;  %v18724_v52 = vpop.permute.xlu1 %8697 }
 0x580   : > { %23001 = vst [vmem:[#allocation122_spill] sm:$0xff] %v18724_v52  ;;  %9633 = vperm.xlu0 %14514, %v18687_v19   ;;  %14443 = vset.pattern.permute.xlu1 %v22911_v47 }
 0x581   : > { %10280 = vperm.xlu1 %14443, %v18416_v51  }
 0x583   : > { %v18732_v42 = vpop.permute.xlu0 %8038 }
 0x584   : > { %23002 = vst [vmem:[#allocation123_spill] sm:$0xff] %v18732_v42  ;;  %14519 = vset.pattern.permute.xlu0 %v22891_v16  ;;  %v18735_v60 = vpop.permute.xlu1 %9147 }
 0x585   : > { %23003 = vst [vmem:[#allocation124_spill] sm:$0xff] %v18735_v60  ;;  %7587 = vperm.xlu0 %14519, %v18730_v28   ;;  %14444 = vset.pattern.permute.xlu1 %v22895_v56 }
 0x586   : > { %10505 = vperm.xlu1 %14444, %v18416_v51  }
 0x588   : > { %v18740_v61 = vpop.permute.xlu0 %8488 }
 0x589   : > { %23004 = vst [vmem:[#allocation125_spill] sm:$0xff] %v18740_v61  ;;  %14521 = vset.pattern.permute.xlu0 %v22893_v36  ;;  %v18743_v52 = vpop.permute.xlu1 %9597 }
 0x58a   : > { %23005 = vst [vmem:[#allocation126_spill] sm:$0xff] %v18743_v52  ;;  %8054 = vperm.xlu0 %14521, %v18730_v28   ;;  %14445 = vset.pattern.permute.xlu1 %v22899_v35 }
 0x58b   : > { %10730 = vperm.xlu1 %14445, %v18416_v51  }
 0x58d   : > { %v18748_v44 = vpop.permute.xlu0 %8938 }
 0x58e   : > { %23006 = vst [vmem:[#allocation127_spill] sm:$0xff] %v18748_v44  ;;  %14523 = vset.pattern.permute.xlu0 %v22896_v45  ;;  %v18751_v42 = vpop.permute.xlu1 %10047 }
 0x58f   : > { %23007 = vst [vmem:[#allocation128_spill] sm:$0xff] %v18751_v42  ;;  %8504 = vperm.xlu0 %14523, %v18730_v28   ;;  %14446 = vset.pattern.permute.xlu1 %v22919_v21 }
 0x590   : > { %10955 = vperm.xlu1 %14446, %v18416_v51  }
 0x592   : > { %v18756_v61 = vpop.permute.xlu0 %9388 }
 0x593   : > { %23008 = vst [vmem:[#allocation129_spill] sm:$0xff] %v18756_v61  ;;  %14525 = vset.pattern.permute.xlu0 %v22900_v50  ;;  %v18759_v52 = vpop.permute.xlu1 %10272 }
 0x594   : > { %23009 = vst [vmem:[#allocation130_spill] sm:$0xff] %v18759_v52  ;;  %8954 = vperm.xlu0 %14525, %v18730_v28   ;;  %14447 = vset.pattern.permute.xlu1 %v22891_v16 }
 0x595   : > { %7572 = vperm.xlu1 %14447, %v18467_v14  }
 0x597   : > { %v18764_v44 = vpop.permute.xlu0 %9838 }
 0x598   : > { %23010 = vst [vmem:[#allocation131_spill] sm:$0xff] %v18764_v44  ;;  %14527 = vset.pattern.permute.xlu0 %v22903_v13  ;;  %v18767_v42 = vpop.permute.xlu1 %10497  ;;  %v18781_v44 = vmax.f32 %v18038_v7, 0.0 }
 0x599   : > { %23011 = vst [vmem:[#allocation132_spill] sm:$0xff] %v18767_v42  ;;  %9404 = vperm.xlu0 %14527, %v18730_v28   ;;  %14449 = vset.pattern.permute.xlu1 %v22893_v36 }
 0x59a   : > { %8042 = vperm.xlu1 %14449, %v18467_v14  }
 0x59c   : > { %v18772_v51 = vpop.permute.xlu0 %10063 }
 0x59d   : > { %23012 = vst [vmem:[#allocation133_spill] sm:$0xff] %v18772_v51  ;;  %14529 = vset.pattern.permute.xlu0 %v22906_v8  ;;  %v18775_v61 = vpop.permute.xlu1 %10722 }
 0x59e   : > { %23013 = vst [vmem:[#allocation134_spill] sm:$0xff] %v18775_v61  ;;  %9854 = vperm.xlu0 %14529, %v18730_v28   ;;  %14451 = vset.pattern.permute.xlu1 %v22896_v45 }
 0x59f   : > { %8492 = vperm.xlu1 %14451, %v18467_v14  }
 0x5a1   : > { %v18783_v42 = vpop.permute.xlu0 %10513 }
 0x5a2   : > { %23014 = vst [vmem:[#allocation135_spill] sm:$0xff] %v18783_v42  ;;  %14534 = vset.pattern.permute.xlu0 %v22918_v48  ;;  %v18786_v52 = vpop.permute.xlu1 %10947 }
 0x5a3   : > { %23015 = vst [vmem:[#allocation136_spill] sm:$0xff] %v18786_v52  ;;  %7841 = vperm.xlu0 %14534, %v18781_v44   ;;  %14453 = vset.pattern.permute.xlu1 %v22900_v50 }
 0x5a4   : > { %8942 = vperm.xlu1 %14453, %v18467_v14  }
 0x5a6   : > { %v18791_v51 = vpop.permute.xlu0 %10738 }
 0x5a7   : > { %23016 = vst [vmem:[#allocation137_spill] sm:$0xff] %v18791_v51  ;;  %14536 = vset.pattern.permute.xlu0 %v22921_v41  ;;  %v18794_v61 = vpop.permute.xlu1 %7562 }
 0x5a8   : > { %8291 = vperm.xlu0 %14536, %v18781_v44   ;;  %14455 = vset.pattern.permute.xlu1 %v22903_v13 }
 0x5a9   : > { %9392 = vperm.xlu1 %14455, %v18467_v14  }
 0x5ab   : > { %v18799_v7 = vpop.permute.xlu0 %7825 }
 0x5ac   : > { %23017 = vst [vmem:[#allocation138_spill] sm:$0xff] %v18799_v7  ;;  %14538 = vset.pattern.permute.xlu0 %v22924_v20  ;;  %v18802_v42 = vpop.permute.xlu1 %8034 }
 0x5ad   : > { %23018 = vst [vmem:[#allocation139_spill] sm:$0xff] %v18802_v42  ;;  %8741 = vperm.xlu0 %14538, %v18781_v44   ;;  %14457 = vset.pattern.permute.xlu1 %v22906_v8 }
 0x5ae   : > { %9842 = vperm.xlu1 %14457, %v18467_v14  }
 0x5b0   : > { %v18807_v51 = vpop.permute.xlu0 %8275 }
 0x5b1   : > { %23019 = vst [vmem:[#allocation140_spill] sm:$0xff] %v18807_v51  ;;  %14540 = vset.pattern.permute.xlu0 %v22870_v15  ;;  %v18810_v52 = vpop.permute.xlu1 %8484  ;;  %v18824_v51 = vmax.f32 %v18046_v18, 0.0 }
 0x5b2   : > { %23020 = vst [vmem:[#allocation141_spill] sm:$0xff] %v18810_v52  ;;  %9191 = vperm.xlu0 %14540, %v18781_v44   ;;  %14458 = vset.pattern.permute.xlu1 %v22892_v59 }
 0x5b3   : > { %10067 = vperm.xlu1 %14458, %v18467_v14  }
 0x5b5   : > { %v18815_v7 = vpop.permute.xlu0 %8725 }
 0x5b6   : > { %23021 = vst [vmem:[#allocation142_spill] sm:$0xff] %v18815_v7  ;;  %14542 = vset.pattern.permute.xlu0 %v22890_v49  ;;  %v18818_v60 = vpop.permute.xlu1 %8934 }
 0x5b7   : > { %23022 = vst [vmem:[#allocation143_spill] sm:$0xff] %v18818_v60  ;;  %9641 = vperm.xlu0 %14542, %v18781_v44   ;;  %14459 = vset.pattern.permute.xlu1 %v22911_v47 }
 0x5b8   : > { %10292 = vperm.xlu1 %14459, %v18467_v14  }
 0x5ba   : > { %v18826_v52 = vpop.permute.xlu0 %9175 }
 0x5bb   : > { %23023 = vst [vmem:[#allocation144_spill] sm:$0xff] %v18826_v52  ;;  %14547 = vset.pattern.permute.xlu0 %v22891_v16  ;;  %v18829_v42 = vpop.permute.xlu1 %9384 }
 0x5bc   : > { %23024 = vst [vmem:[#allocation145_spill] sm:$0xff] %v18829_v42  ;;  %7597 = vperm.xlu0 %14547, %v18824_v51   ;;  %14460 = vset.pattern.permute.xlu1 %v22895_v56 }
 0x5bd   : > { %10517 = vperm.xlu1 %14460, %v18467_v14  }
 0x5bf   : > { %v18834_v7 = vpop.permute.xlu0 %9625 }
 0x5c0   : > { %23025 = vst [vmem:[#allocation146_spill] sm:$0xff] %v18834_v7  ;;  %14549 = vset.pattern.permute.xlu0 %v22893_v36  ;;  %v18837_v60 = vpop.permute.xlu1 %9834 }
 0x5c1   : > { %23026 = vst [vmem:[#allocation147_spill] sm:$0xff] %v18837_v60  ;;  %8062 = vperm.xlu0 %14549, %v18824_v51   ;;  %14461 = vset.pattern.permute.xlu1 %v22899_v35 }
 0x5c2   : > { %10742 = vperm.xlu1 %14461, %v18467_v14  }
 0x5c4   : > { %v18842_v18 = vpop.permute.xlu0 %10075 }
 0x5c5   : > { %23027 = vst [vmem:[#allocation148_spill] sm:$0xff] %v18842_v18  ;;  %14551 = vset.pattern.permute.xlu0 %v22896_v45  ;;  %v18845_v52 = vpop.permute.xlu1 %10059 }
 0x5c6   : > { %23028 = vst [vmem:[#allocation149_spill] sm:$0xff] %v18845_v52  ;;  %8512 = vperm.xlu0 %14551, %v18824_v51   ;;  %14463 = vset.pattern.permute.xlu1 %v22918_v48 }
 0x5c7   : > { %7813 = vperm.xlu1 %14463, %v18510_v38  }
 0x5c9   : > { %v18850_v7 = vpop.permute.xlu0 %7577 }
 0x5ca   : > { %23029 = vst [vmem:[#allocation150_spill] sm:$0xff] %v18850_v7  ;;  %14553 = vset.pattern.permute.xlu0 %v22900_v50  ;;  %v18853_v60 = vpop.permute.xlu1 %10284  ;;  %v18867_v7 = vmax.f32 %v18053_v27, 0.0 }
 0x5cb   : > { %23030 = vst [vmem:[#allocation151_spill] sm:$0xff] %v18853_v60  ;;  %8962 = vperm.xlu0 %14553, %v18824_v51   ;;  %14465 = vset.pattern.permute.xlu1 %v22921_v41 }
 0x5cc   : > { %8263 = vperm.xlu1 %14465, %v18510_v38  }
 0x5ce   : > { %v18858_v18 = vpop.permute.xlu0 %8046 }
 0x5cf   : > { %23031 = vst [vmem:[#allocation152_spill] sm:$0xff] %v18858_v18  ;;  %14555 = vset.pattern.permute.xlu0 %v22903_v13  ;;  %v18861_v52 = vpop.permute.xlu1 %10509 }
 0x5d0   : > { %23032 = vst [vmem:[#allocation153_spill] sm:$0xff] %v18861_v52  ;;  %9412 = vperm.xlu0 %14555, %v18824_v51   ;;  %14467 = vset.pattern.permute.xlu1 %v22924_v20 }
 0x5d1   : > { %8713 = vperm.xlu1 %14467, %v18510_v38  }
 0x5d3   : > { %v18869_v60 = vpop.permute.xlu0 %8496 }
 0x5d4   : > { %23033 = vst [vmem:[#allocation154_spill] sm:$0xff] %v18869_v60  ;;  %14562 = vset.pattern.permute.xlu0 %v22918_v48  ;;  %v18872_v42 = vpop.permute.xlu1 %10734 }
 0x5d5   : > { %23034 = vst [vmem:[#allocation155_spill] sm:$0xff] %v18872_v42  ;;  %7849 = vperm.xlu0 %14562, %v18867_v7   ;;  %14469 = vset.pattern.permute.xlu1 %v22870_v15 }
 0x5d6   : > { %9163 = vperm.xlu1 %14469, %v18510_v38  }
 0x5d8   : > { %v18877_v18 = vpop.permute.xlu0 %8946 }
 0x5d9   : > { %23035 = vst [vmem:[#allocation156_spill] sm:$0xff] %v18877_v18  ;;  %14564 = vset.pattern.permute.xlu0 %v22921_v41  ;;  %v18880_v52 = vpop.permute.xlu1 %10959 }
 0x5da   : > { %23036 = vst [vmem:[#allocation157_spill] sm:$0xff] %v18880_v52  ;;  %8299 = vperm.xlu0 %14564, %v18867_v7   ;;  %14471 = vset.pattern.permute.xlu1 %v22890_v49 }
 0x5db   : > { %9613 = vperm.xlu1 %14471, %v18510_v38  }
 0x5dd   : > { %v18885_v27 = vpop.permute.xlu0 %9396 }
 0x5de   : > { %23037 = vst [vmem:[#allocation158_spill] sm:$0xff] %v18885_v27  ;;  %14566 = vset.pattern.permute.xlu0 %v22924_v20  ;;  %v18888_v60 = vpop.permute.xlu1 %7805 }
 0x5df   : > { %23038 = vst [vmem:[#allocation159_spill] sm:$0xff] %v18888_v60  ;;  %8749 = vperm.xlu0 %14566, %v18867_v7   ;;  %14476 = vset.pattern.permute.xlu1 %v22891_v16 }
 0x5e0   : > { %7582 = vperm.xlu1 %14476, %v18585_v11  }
 0x5e2   : > { %v18893_v18 = vpop.permute.xlu0 %9846 }
 0x5e3   : > { %23039 = vst [vmem:[#allocation160_spill] sm:$0xff] %v18893_v18  ;;  %14568 = vset.pattern.permute.xlu0 %v22870_v15  ;;  %v18896_v52 = vpop.permute.xlu1 %8255  ;;  %v18910_v18 = vmax.f32 %v18060_v30, 0.0 }
 0x5e4   : > { %23040 = vst [vmem:[#allocation161_spill] sm:$0xff] %v18896_v52  ;;  %9199 = vperm.xlu0 %14568, %v18867_v7   ;;  %14478 = vset.pattern.permute.xlu1 %v22893_v36 }
 0x5e5   : > { %8050 = vperm.xlu1 %14478, %v18585_v11  }
 0x5e7   : > { %v18901_v27 = vpop.permute.xlu0 %7833 }
 0x5e8   : > { %23041 = vst [vmem:[#allocation162_spill] sm:$0xff] %v18901_v27  ;;  %14570 = vset.pattern.permute.xlu0 %v22890_v49  ;;  %v18904_v42 = vpop.permute.xlu1 %8705 }
 0x5e9   : > { %23042 = vst [vmem:[#allocation163_spill] sm:$0xff] %v18904_v42  ;;  %9649 = vperm.xlu0 %14570, %v18867_v7   ;;  %14480 = vset.pattern.permute.xlu1 %v22896_v45 }
 0x5ea   : > { %8500 = vperm.xlu1 %14480, %v18585_v11  }
 0x5ec   : > { %v18912_v52 = vpop.permute.xlu0 %8283 }
 0x5ed   : > { %23043 = vst [vmem:[#allocation164_spill] sm:$0xff] %v18912_v52  ;;  %14575 = vset.pattern.permute.xlu0 %v22891_v16  ;;  %v18915_v60 = vpop.permute.xlu1 %9155 }
 0x5ee   : > { %23044 = vst [vmem:[#allocation165_spill] sm:$0xff] %v18915_v60  ;;  %7607 = vperm.xlu0 %14575, %v18910_v18   ;;  %14482 = vset.pattern.permute.xlu1 %v22900_v50 }
 0x5ef   : > { %8950 = vperm.xlu1 %14482, %v18585_v11  }
 0x5f1   : > { %v18920_v27 = vpop.permute.xlu0 %8733 }
 0x5f2   : > { %23045 = vst [vmem:[#allocation166_spill] sm:$0xff] %v18920_v27  ;;  %14577 = vset.pattern.permute.xlu0 %v22893_v36  ;;  %v18923_v42 = vpop.permute.xlu1 %9605 }
 0x5f3   : > { %23046 = vst [vmem:[#allocation167_spill] sm:$0xff] %v18923_v42  ;;  %8070 = vperm.xlu0 %14577, %v18910_v18   ;;  %14484 = vset.pattern.permute.xlu1 %v22903_v13 }
 0x5f4   : > { %9400 = vperm.xlu1 %14484, %v18585_v11  }
 0x5f6   : > { %v18928_v30 = vpop.permute.xlu0 %9183 }
 0x5f7   : > { %23047 = vst [vmem:[#allocation168_spill] sm:$0xff] %v18928_v30  ;;  %14579 = vset.pattern.permute.xlu0 %v22896_v45  ;;  %v18931_v52 = vpop.permute.xlu1 %10055 }
 0x5f8   : > { %23048 = vst [vmem:[#allocation169_spill] sm:$0xff] %v18931_v52  ;;  %8520 = vperm.xlu0 %14579, %v18910_v18   ;;  %14486 = vset.pattern.permute.xlu1 %v22906_v8 }
 0x5f9   : > { %9850 = vperm.xlu1 %14486, %v18585_v11  }
 0x5fb   : > { %v18936_v27 = vpop.permute.xlu0 %9633 }
 0x5fc   : > { %23049 = vst [vmem:[#allocation170_spill] sm:$0xff] %v18936_v27  ;;  %14581 = vset.pattern.permute.xlu0 %v22900_v50  ;;  %v18939_v42 = vpop.permute.xlu1 %10280  ;;  %v18953_v27 = vmax.f32 %v18069_v53, 0.0 }
 0x5fd   : > { %23050 = vst [vmem:[#allocation171_spill] sm:$0xff] %v18939_v42  ;;  %8970 = vperm.xlu0 %14581, %v18910_v18   ;;  %14488 = vset.pattern.permute.xlu1 %v22895_v56 }
 0x5fe   : > { %10525 = vperm.xlu1 %14488, %v18585_v11   ;;  %23053 = vst [vmem:[#allocation174_spill] sm:$0xff] %v18953_v27 }
 0x600   : > { %v18944_v30 = vpop.permute.xlu0 %7587 }
 0x601   : > { %23051 = vst [vmem:[#allocation172_spill] sm:$0xff] %v18944_v30  ;;  %14583 = vset.pattern.permute.xlu0 %v22903_v13  ;;  %v18947_v52 = vpop.permute.xlu1 %10505 }
 0x602   : > { %23052 = vst [vmem:[#allocation173_spill] sm:$0xff] %v18947_v52  ;;  %9420 = vperm.xlu0 %14583, %v18910_v18   ;;  %14489 = vset.pattern.permute.xlu1 %v22899_v35 }
 0x603   : > { %10750 = vperm.xlu1 %14489, %v18585_v11  }
 0x605   : > { %v18955_v42 = vpop.permute.xlu0 %8054 }
 0x606   : > { %23054 = vst [vmem:[#allocation175_spill] sm:$0xff] %v18955_v42  ;;  %14590 = vset.pattern.permute.xlu0 %v22918_v48  ;;  %v18958_v60 = vpop.permute.xlu1 %10730 }
 0x607   : > { %23055 = vst [vmem:[#allocation176_spill] sm:$0xff] %v18958_v60  ;;  %7857 = vperm.xlu0 %14590, %v18953_v27   ;;  %14491 = vset.pattern.permute.xlu1 %v22918_v48 }
 0x608   : > { %7821 = vperm.xlu1 %14491, %v18636_v29  }
 0x60a   : > { %v18963_v30 = vpop.permute.xlu0 %8504 }
 0x60b   : > { %23056 = vst [vmem:[#allocation177_spill] sm:$0xff] %v18963_v30  ;;  %14592 = vset.pattern.permute.xlu0 %v22921_v41  ;;  %v18966_v52 = vpop.permute.xlu1 %10955 }
 0x60c   : > { %23057 = vst [vmem:[#allocation178_spill] sm:$0xff] %v18966_v52  ;;  %8307 = vperm.xlu0 %14592, %v18953_v27   ;;  %14493 = vset.pattern.permute.xlu1 %v22921_v41 }
 0x60d   : > { %8271 = vperm.xlu1 %14493, %v18636_v29  }
 0x60f   : > { %v18971_v53 = vpop.permute.xlu0 %8954 }
 0x610   : > { %23058 = vst [vmem:[#allocation179_spill] sm:$0xff] %v18971_v53  ;;  %14594 = vset.pattern.permute.xlu0 %v22924_v20  ;;  %v18974_v42 = vpop.permute.xlu1 %7572 }
 0x611   : > { %23059 = vst [vmem:[#allocation180_spill] sm:$0xff] %v18974_v42  ;;  %8757 = vperm.xlu0 %14594, %v18953_v27   ;;  %14495 = vset.pattern.permute.xlu1 %v22924_v20 }
 0x612   : > { %8721 = vperm.xlu1 %14495, %v18636_v29  }
 0x614   : > { %v18979_v30 = vpop.permute.xlu0 %9404 }
 0x615   : > { %23060 = vst [vmem:[#allocation181_spill] sm:$0xff] %v18979_v30  ;;  %14596 = vset.pattern.permute.xlu0 %v22870_v15  ;;  %v18982_v52 = vpop.permute.xlu1 %8042  ;;  %v18996_v30 = vmax.f32 %v18073_v63, 0.0 }
 0x616   : > { %23061 = vst [vmem:[#allocation182_spill] sm:$0xff] %v18982_v52  ;;  %9207 = vperm.xlu0 %14596, %v18953_v27   ;;  %14497 = vset.pattern.permute.xlu1 %v22870_v15 }
 0x617   : > { %9171 = vperm.xlu1 %14497, %v18636_v29   ;;  %23064 = vst [vmem:[#allocation185_spill] sm:$0xff] %v18996_v30 }
 0x619   : > { %v18987_v53 = vpop.permute.xlu0 %9854 }
 0x61a   : > { %23062 = vst [vmem:[#allocation183_spill] sm:$0xff] %v18987_v53  ;;  %14598 = vset.pattern.permute.xlu0 %v22890_v49  ;;  %v18990_v60 = vpop.permute.xlu1 %8492 }
 0x61b   : > { %23063 = vst [vmem:[#allocation184_spill] sm:$0xff] %v18990_v60  ;;  %9657 = vperm.xlu0 %14598, %v18953_v27   ;;  %14499 = vset.pattern.permute.xlu1 %v22890_v49 }
 0x61c   : > { %9621 = vperm.xlu1 %14499, %v18636_v29  }
 0x61e   : > { %v18998_v52 = vpop.permute.xlu0 %7841 }
 0x61f   : > { %23065 = vst [vmem:[#allocation186_spill] sm:$0xff] %v18998_v52  ;;  %14601 = vset.pattern.permute.xlu0 %v22891_v16  ;;  %v19001_v42 = vpop.permute.xlu1 %8942 }
 0x620   : > { %23066 = vst [vmem:[#allocation187_spill] sm:$0xff] %v19001_v42  ;;  %7617 = vperm.xlu0 %14601, %v18996_v30   ;;  %14501 = vset.pattern.permute.xlu1 %v22892_v59 }
 0x621   : > { %10071 = vperm.xlu1 %14501, %v18636_v29  }
 0x623   : > { %v19006_v53 = vpop.permute.xlu0 %8291 }
 0x624   : > { %23067 = vst [vmem:[#allocation188_spill] sm:$0xff] %v19006_v53  ;;  %14603 = vset.pattern.permute.xlu0 %v22893_v36  ;;  %v19009_v60 = vpop.permute.xlu1 %9392 }
 0x625   : > { %23068 = vst [vmem:[#allocation189_spill] sm:$0xff] %v19009_v60  ;;  %8078 = vperm.xlu0 %14603, %v18996_v30   ;;  %14502 = vset.pattern.permute.xlu1 %v22911_v47 }
 0x626   : > { %10296 = vperm.xlu1 %14502, %v18636_v29  }
 0x628   : > { %v19014_v63 = vpop.permute.xlu0 %8741 }
 0x629   : > { %23069 = vst [vmem:[#allocation190_spill] sm:$0xff] %v19014_v63  ;;  %14605 = vset.pattern.permute.xlu0 %v22896_v45  ;;  %v19017_v52 = vpop.permute.xlu1 %9842 }
 0x62a   : > { %23070 = vst [vmem:[#allocation191_spill] sm:$0xff] %v19017_v52  ;;  %8528 = vperm.xlu0 %14605, %v18996_v30   ;;  %14503 = vset.pattern.permute.xlu1 %v22895_v56 }
 0x62b   : > { %10521 = vperm.xlu1 %14503, %v18636_v29  }
 0x62d   : > { %v19022_v53 = vpop.permute.xlu0 %9191 }
 0x62e   : > { %23071 = vst [vmem:[#allocation192_spill] sm:$0xff] %v19022_v53  ;;  %14607 = vset.pattern.permute.xlu0 %v22900_v50  ;;  %v19025_v60 = vpop.permute.xlu1 %10067  ;;  %v19039_v53 = vmax.f32 %v18079_v5, 0.0 }
 0x62f   : > { %23072 = vst [vmem:[#allocation193_spill] sm:$0xff] %v19025_v60  ;;  %8978 = vperm.xlu0 %14607, %v18996_v30   ;;  %14504 = vset.pattern.permute.xlu1 %v22899_v35 }
 0x630   : > { %10746 = vperm.xlu1 %14504, %v18636_v29   ;;  %23075 = vst [vmem:[#allocation196_spill] sm:$0xff] %v19039_v53 }
 0x632   : > { %v19030_v63 = vpop.permute.xlu0 %9641 }
 0x633   : > { %23073 = vst [vmem:[#allocation194_spill] sm:$0xff] %v19030_v63  ;;  %14609 = vset.pattern.permute.xlu0 %v22903_v13  ;;  %v19033_v52 = vpop.permute.xlu1 %10292 }
 0x634   : > { %23074 = vst [vmem:[#allocation195_spill] sm:$0xff] %v19033_v52  ;;  %9428 = vperm.xlu0 %14609, %v18996_v30   ;;  %14505 = vset.pattern.permute.xlu1 %v22891_v16 }
 0x635   : > { %7592 = vperm.xlu1 %14505, %v18687_v19  }
 0x637   : > { %v19041_v60 = vpop.permute.xlu0 %7597 }
 0x638   : > { %23076 = vst [vmem:[#allocation197_spill] sm:$0xff] %v19041_v60  ;;  %14615 = vset.pattern.permute.xlu0 %v22918_v48  ;;  %v19044_v42 = vpop.permute.xlu1 %10517 }
 0x639   : > { %23077 = vst [vmem:[#allocation198_spill] sm:$0xff] %v19044_v42  ;;  %7865 = vperm.xlu0 %14615, %v19039_v53   ;;  %14507 = vset.pattern.permute.xlu1 %v22893_v36 }
 0x63a   : > { %8058 = vperm.xlu1 %14507, %v18687_v19  }
 0x63c   : > { %v19049_v63 = vpop.permute.xlu0 %8062 }
 0x63d   : > { %23078 = vst [vmem:[#allocation199_spill] sm:$0xff] %v19049_v63  ;;  %14617 = vset.pattern.permute.xlu0 %v22921_v41  ;;  %v19052_v52 = vpop.permute.xlu1 %10742 }
 0x63e   : > { %23079 = vst [vmem:[#allocation200_spill] sm:$0xff] %v19052_v52  ;;  %8315 = vperm.xlu0 %14617, %v19039_v53   ;;  %14509 = vset.pattern.permute.xlu1 %v22896_v45 }
 0x63f   : > { %8508 = vperm.xlu1 %14509, %v18687_v19  }
 0x641   : > { %v19057_v5 = vpop.permute.xlu0 %8512 }
 0x642   : > { %23080 = vst [vmem:[#allocation201_spill] sm:$0xff] %v19057_v5  ;;  %14619 = vset.pattern.permute.xlu0 %v22924_v20  ;;  %v19060_v60 = vpop.permute.xlu1 %7813 }
 0x643   : > { %23081 = vst [vmem:[#allocation202_spill] sm:$0xff] %v19060_v60  ;;  %8765 = vperm.xlu0 %14619, %v19039_v53   ;;  %14511 = vset.pattern.permute.xlu1 %v22900_v50 }
 0x644   : > { %8958 = vperm.xlu1 %14511, %v18687_v19  }
 0x646   : > { %v19065_v63 = vpop.permute.xlu0 %8962 }
 0x647   : > { %23082 = vst [vmem:[#allocation203_spill] sm:$0xff] %v19065_v63  ;;  %14621 = vset.pattern.permute.xlu0 %v22870_v15  ;;  %v19068_v52 = vpop.permute.xlu1 %8263  ;;  %v19082_v63 = vmax.f32 %v18085_v55, 0.0 }
 0x648   : > { %23083 = vst [vmem:[#allocation204_spill] sm:$0xff] %v19068_v52  ;;  %9215 = vperm.xlu0 %14621, %v19039_v53   ;;  %14513 = vset.pattern.permute.xlu1 %v22903_v13 }
 0x649   : > { %9408 = vperm.xlu1 %14513, %v18687_v19   ;;  %23086 = vst [vmem:[#allocation207_spill] sm:$0xff] %v19082_v63 }
 0x64b   : > { %v19073_v5 = vpop.permute.xlu0 %9412 }
 0x64c   : > { %23084 = vst [vmem:[#allocation205_spill] sm:$0xff] %v19073_v5  ;;  %14623 = vset.pattern.permute.xlu0 %v22890_v49  ;;  %v19076_v42 = vpop.permute.xlu1 %8713 }
 0x64d   : > { %23085 = vst [vmem:[#allocation206_spill] sm:$0xff] %v19076_v42  ;;  %9665 = vperm.xlu0 %14623, %v19039_v53   ;;  %14515 = vset.pattern.permute.xlu1 %v22906_v8 }
 0x64e   : > { %9858 = vperm.xlu1 %14515, %v18687_v19  }
 0x650   : > { %v19084_v52 = vpop.permute.xlu0 %7849 }
 0x651   : > { %23087 = vst [vmem:[#allocation208_spill] sm:$0xff] %v19084_v52  ;;  %14625 = vset.pattern.permute.xlu0 %v22891_v16  ;;  %v19087_v60 = vpop.permute.xlu1 %9163 }
 0x652   : > { %23088 = vst [vmem:[#allocation209_spill] sm:$0xff] %v19087_v60  ;;  %7627 = vperm.xlu0 %14625, %v19082_v63   ;;  %14516 = vset.pattern.permute.xlu1 %v22892_v59 }
 0x653   : > { %10083 = vperm.xlu1 %14516, %v18687_v19  }
 0x655   : > { %v19092_v5 = vpop.permute.xlu0 %8299 }
 0x656   : > { %23089 = vst [vmem:[#allocation210_spill] sm:$0xff] %v19092_v5  ;;  %14627 = vset.pattern.permute.xlu0 %v22893_v36  ;;  %v19095_v42 = vpop.permute.xlu1 %9613 }
 0x657   : > { %23090 = vst [vmem:[#allocation211_spill] sm:$0xff] %v19095_v42  ;;  %8086 = vperm.xlu0 %14627, %v19082_v63   ;;  %14517 = vset.pattern.permute.xlu1 %v22895_v56 }
 0x658   : > { %10533 = vperm.xlu1 %14517, %v18687_v19  }
 0x65a   : > { %v19100_v55 = vpop.permute.xlu0 %8749 }
 0x65b   : > { %23091 = vst [vmem:[#allocation212_spill] sm:$0xff] %v19100_v55  ;;  %14629 = vset.pattern.permute.xlu0 %v22896_v45  ;;  %v19103_v52 = vpop.permute.xlu1 %7582 }
 0x65c   : > { %23092 = vst [vmem:[#allocation213_spill] sm:$0xff] %v19103_v52  ;;  %8536 = vperm.xlu0 %14629, %v19082_v63   ;;  %14518 = vset.pattern.permute.xlu1 %v22899_v35 }
 0x65d   : > { %10758 = vperm.xlu1 %14518, %v18687_v19  }
 0x65f   : > { %v19108_v5 = vpop.permute.xlu0 %9199 }
 0x660   : > { %23093 = vst [vmem:[#allocation214_spill] sm:$0xff] %v19108_v5  ;;  %14631 = vset.pattern.permute.xlu0 %v22900_v50  ;;  %v19111_v42 = vpop.permute.xlu1 %8050  ;;  %v19125_v5 = vmax.f32 %v18089_v2, 0.0 }
 0x661   : > { %23094 = vst [vmem:[#allocation215_spill] sm:$0xff] %v19111_v42  ;;  %8986 = vperm.xlu0 %14631, %v19082_v63   ;;  %14520 = vset.pattern.permute.xlu1 %v22918_v48 }
 0x662   : > { %7829 = vperm.xlu1 %14520, %v18730_v28   ;;  %23097 = vst [vmem:[#allocation218_spill] sm:$0xff] %v19125_v5 }
 0x664   : > { %v19116_v55 = vpop.permute.xlu0 %9649 }
 0x665   : > { %23095 = vst [vmem:[#allocation216_spill] sm:$0xff] %v19116_v55  ;;  %14633 = vset.pattern.permute.xlu0 %v22903_v13  ;;  %v19119_v60 = vpop.permute.xlu1 %8500 }
 0x666   : > { %23096 = vst [vmem:[#allocation217_spill] sm:$0xff] %v19119_v60  ;;  %9436 = vperm.xlu0 %14633, %v19082_v63   ;;  %14522 = vset.pattern.permute.xlu1 %v22921_v41 }
 0x667   : > { %8279 = vperm.xlu1 %14522, %v18730_v28  }
 0x669   : > { %v19127_v42 = vpop.permute.xlu0 %7607 }
 0x66a   : > { %23098 = vst [vmem:[#allocation219_spill] sm:$0xff] %v19127_v42  ;;  %14638 = vset.pattern.permute.xlu0 %v22918_v48  ;;  %v19130_v52 = vpop.permute.xlu1 %8950 }
 0x66b   : > { %23099 = vst [vmem:[#allocation220_spill] sm:$0xff] %v19130_v52  ;;  %7873 = vperm.xlu0 %14638, %v19125_v5   ;;  %14524 = vset.pattern.permute.xlu1 %v22924_v20 }
 0x66c   : > { %8729 = vperm.xlu1 %14524, %v18730_v28  }
 0x66e   : > { %v19135_v55 = vpop.permute.xlu0 %8070 }
 0x66f   : > { %23100 = vst [vmem:[#allocation221_spill] sm:$0xff] %v19135_v55  ;;  %14640 = vset.pattern.permute.xlu0 %v22921_v41  ;;  %v19138_v60 = vpop.permute.xlu1 %9400 }
 0x670   : > { %23101 = vst [vmem:[#allocation222_spill] sm:$0xff] %v19138_v60  ;;  %8323 = vperm.xlu0 %14640, %v19125_v5   ;;  %14526 = vset.pattern.permute.xlu1 %v22870_v15 }
 0x671   : > { %9179 = vperm.xlu1 %14526, %v18730_v28  }
 0x673   : > { %v19143_v2 = vpop.permute.xlu0 %8520 }
 0x674   : > { %23102 = vst [vmem:[#allocation223_spill] sm:$0xff] %v19143_v2  ;;  %14642 = vset.pattern.permute.xlu0 %v22924_v20  ;;  %v19146_v42 = vpop.permute.xlu1 %9850 }
 0x675   : > { %23103 = vst [vmem:[#allocation224_spill] sm:$0xff] %v19146_v42  ;;  %8773 = vperm.xlu0 %14642, %v19125_v5   ;;  %14528 = vset.pattern.permute.xlu1 %v22890_v49 }
 0x676   : > { %9629 = vperm.xlu1 %14528, %v18730_v28  }
 0x678   : > { %v19151_v55 = vpop.permute.xlu0 %8970 }
 0x679   : > { %23104 = vst [vmem:[#allocation225_spill] sm:$0xff] %v19151_v55  ;;  %14644 = vset.pattern.permute.xlu0 %v22870_v15  ;;  %v19154_v60 = vpop.permute.xlu1 %10525 }
 0x67a   : > { %23105 = vst [vmem:[#allocation226_spill] sm:$0xff] %v19154_v60  ;;  %9223 = vperm.xlu0 %14644, %v19125_v5   ;;  %14530 = vset.pattern.permute.xlu1 %v22892_v59  ;;  %v19168_v60 = vmax.f32 %v18097_v43, 0.0 }
 0x67b   : > { %10079 = vperm.xlu1 %14530, %v18730_v28  }
 0x67c   : > { %23108 = vst [vmem:[#allocation229_spill] sm:$0xff] %v19168_v60 }
 0x67d   : > { %v19159_v2 = vpop.permute.xlu0 %9420 }
 0x67e   : > { %23106 = vst [vmem:[#allocation227_spill] sm:$0xff] %v19159_v2  ;;  %14646 = vset.pattern.permute.xlu0 %v22890_v49  ;;  %v19162_v42 = vpop.permute.xlu1 %10750 }
 0x67f   : > { %23107 = vst [vmem:[#allocation228_spill] sm:$0xff] %v19162_v42  ;;  %9673 = vperm.xlu0 %14646, %v19125_v5   ;;  %14531 = vset.pattern.permute.xlu1 %v22895_v56 }
 0x680   : > { %10529 = vperm.xlu1 %14531, %v18730_v28  }
 0x682   : > { %v19170_v55 = vpop.permute.xlu0 %7857 }
 0x683   : > { %23109 = vst [vmem:[#allocation230_spill] sm:$0xff] %v19170_v55  ;;  %14647 = vset.pattern.permute.xlu0 %v22891_v16  ;;  %v19173_v52 = vpop.permute.xlu1 %7821 }
 0x684   : > { %23110 = vst [vmem:[#allocation231_spill] sm:$0xff] %v19173_v52  ;;  %7637 = vperm.xlu0 %14647, %v19168_v60   ;;  %14532 = vset.pattern.permute.xlu1 %v22899_v35 }
 0x685   : > { %10754 = vperm.xlu1 %14532, %v18730_v28  }
 0x687   : > { %v19178_v42 = vpop.permute.xlu0 %8307 }
 0x688   : > { %23111 = vst [vmem:[#allocation232_spill] sm:$0xff] %v19178_v42  ;;  %14649 = vset.pattern.permute.xlu0 %v22893_v36  ;;  %v19181_v2 = vpop.permute.xlu1 %8271 }
 0x689   : > { %23112 = vst [vmem:[#allocation233_spill] sm:$0xff] %v19181_v2  ;;  %8094 = vperm.xlu0 %14649, %v19168_v60   ;;  %14533 = vset.pattern.permute.xlu1 %v22891_v16 }
 0x68a   : > { %7602 = vperm.xlu1 %14533, %v18781_v44  }
 0x68c   : > { %v19186_v43 = vpop.permute.xlu0 %8757 }
 0x68d   : > { %23113 = vst [vmem:[#allocation234_spill] sm:$0xff] %v19186_v43  ;;  %14651 = vset.pattern.permute.xlu0 %v22896_v45  ;;  %v19189_v55 = vpop.permute.xlu1 %8721 }
 0x68e   : > { %23114 = vst [vmem:[#allocation235_spill] sm:$0xff] %v19189_v55  ;;  %8544 = vperm.xlu0 %14651, %v19168_v60   ;;  %14535 = vset.pattern.permute.xlu1 %v22893_v36 }
 0x68f   : > { %8066 = vperm.xlu1 %14535, %v18781_v44  }
 0x691   : > { %v19194_v42 = vpop.permute.xlu0 %9207 }
 0x692   : > { %23115 = vst [vmem:[#allocation236_spill] sm:$0xff] %v19194_v42  ;;  %14653 = vset.pattern.permute.xlu0 %v22900_v50  ;;  %v19197_v2 = vpop.permute.xlu1 %9171  ;;  %v19211_v42 = vmax.f32 %v18101_v32, 0.0 }
 0x693   : > { %23116 = vst [vmem:[#allocation237_spill] sm:$0xff] %v19197_v2  ;;  %8994 = vperm.xlu0 %14653, %v19168_v60   ;;  %14537 = vset.pattern.permute.xlu1 %v22896_v45 }
 0x694   : > { %8516 = vperm.xlu1 %14537, %v18781_v44   ;;  %23119 = vst [vmem:[#allocation240_spill] sm:$0xff] %v19211_v42 }
 0x696   : > { %v19202_v43 = vpop.permute.xlu0 %9657 }
 0x697   : > { %23117 = vst [vmem:[#allocation238_spill] sm:$0xff] %v19202_v43  ;;  %14655 = vset.pattern.permute.xlu0 %v22903_v13  ;;  %v19205_v55 = vpop.permute.xlu1 %9621 }
 0x698   : > { %23118 = vst [vmem:[#allocation239_spill] sm:$0xff] %v19205_v55  ;;  %9444 = vperm.xlu0 %14655, %v19168_v60   ;;  %14539 = vset.pattern.permute.xlu1 %v22900_v50 }
 0x699   : > { %8966 = vperm.xlu1 %14539, %v18781_v44  }
 0x69b   : > { %v19213_v2 = vpop.permute.xlu0 %7617 }
 0x69c   : > { %23120 = vst [vmem:[#allocation241_spill] sm:$0xff] %v19213_v2  ;;  %14659 = vset.pattern.permute.xlu0 %v22918_v48  ;;  %v19216_v52 = vpop.permute.xlu1 %10071 }
 0x69d   : > { %23121 = vst [vmem:[#allocation242_spill] sm:$0xff] %v19216_v52  ;;  %7881 = vperm.xlu0 %14659, %v19211_v42   ;;  %14541 = vset.pattern.permute.xlu1 %v22903_v13 }
 0x69e   : > { %9416 = vperm.xlu1 %14541, %v18781_v44  }
 0x6a0   : > { %v19221_v43 = vpop.permute.xlu0 %8078 }
 0x6a1   : > { %23122 = vst [vmem:[#allocation243_spill] sm:$0xff] %v19221_v43  ;;  %14661 = vset.pattern.permute.xlu0 %v22921_v41  ;;  %v19224_v55 = vpop.permute.xlu1 %10296 }
 0x6a2   : > { %23123 = vst [vmem:[#allocation244_spill] sm:$0xff] %v19224_v55  ;;  %8331 = vperm.xlu0 %14661, %v19211_v42   ;;  %14543 = vset.pattern.permute.xlu1 %v22906_v8 }
 0x6a3   : > { %9866 = vperm.xlu1 %14543, %v18781_v44  }
 0x6a5   : > { %v19229_v32 = vpop.permute.xlu0 %8528 }
 0x6a6   : > { %23124 = vst [vmem:[#allocation245_spill] sm:$0xff] %v19229_v32  ;;  %14663 = vset.pattern.permute.xlu0 %v22924_v20  ;;  %v19232_v2 = vpop.permute.xlu1 %10521 }
 0x6a7   : > { %23125 = vst [vmem:[#allocation246_spill] sm:$0xff] %v19232_v2  ;;  %8781 = vperm.xlu0 %14663, %v19211_v42   ;;  %14544 = vset.pattern.permute.xlu1 %v22892_v59 }
 0x6a8   : > { %10091 = vperm.xlu1 %14544, %v18781_v44  }
 0x6aa   : > { %v19237_v43 = vpop.permute.xlu0 %8978 }
 0x6ab   : > { %23126 = vst [vmem:[#allocation247_spill] sm:$0xff] %v19237_v43  ;;  %14665 = vset.pattern.permute.xlu0 %v22870_v15  ;;  %v19240_v55 = vpop.permute.xlu1 %10746  ;;  %v19254_v43 = vmax.f32 %v18107_v10, 0.0 }
 0x6ac   : > { %23127 = vst [vmem:[#allocation248_spill] sm:$0xff] %v19240_v55  ;;  %9231 = vperm.xlu0 %14665, %v19211_v42   ;;  %14545 = vset.pattern.permute.xlu1 %v22895_v56 }
 0x6ad   : > { %10541 = vperm.xlu1 %14545, %v18781_v44   ;;  %23130 = vst [vmem:[#allocation251_spill] sm:$0xff] %v19254_v43 }
 0x6af   : > { %v19245_v32 = vpop.permute.xlu0 %9428 }
 0x6b0   : > { %23128 = vst [vmem:[#allocation249_spill] sm:$0xff] %v19245_v32  ;;  %14667 = vset.pattern.permute.xlu0 %v22890_v49  ;;  %v19248_v2 = vpop.permute.xlu1 %7592 }
 0x6b1   : > { %23129 = vst [vmem:[#allocation250_spill] sm:$0xff] %v19248_v2  ;;  %9681 = vperm.xlu0 %14667, %v19211_v42   ;;  %14546 = vset.pattern.permute.xlu1 %v22899_v35 }
 0x6b2   : > { %10766 = vperm.xlu1 %14546, %v18781_v44  }
 0x6b4   : > { %v19256_v55 = vpop.permute.xlu0 %7865 }
 0x6b5   : > { %23131 = vst [vmem:[#allocation252_spill] sm:$0xff] %v19256_v55  ;;  %14668 = vset.pattern.permute.xlu0 %v22891_v16  ;;  %v19259_v52 = vpop.permute.xlu1 %8058 }
 0x6b6   : > { %23132 = vst [vmem:[#allocation253_spill] sm:$0xff] %v19259_v52  ;;  %7647 = vperm.xlu0 %14668, %v19254_v43   ;;  %14548 = vset.pattern.permute.xlu1 %v22918_v48 }
 0x6b7   : > { %7837 = vperm.xlu1 %14548, %v18824_v51  }
 0x6b9   : > { %v19264_v32 = vpop.permute.xlu0 %8315 }
 0x6ba   : > { %23133 = vst [vmem:[#allocation254_spill] sm:$0xff] %v19264_v32  ;;  %14670 = vset.pattern.permute.xlu0 %v22893_v36  ;;  %v19267_v2 = vpop.permute.xlu1 %8508 }
 0x6bb   : > { %23134 = vst [vmem:[#allocation255_spill] sm:$0xff] %v19267_v2  ;;  %8102 = vperm.xlu0 %14670, %v19254_v43   ;;  %14550 = vset.pattern.permute.xlu1 %v22921_v41 }
 0x6bc   : > { %8287 = vperm.xlu1 %14550, %v18824_v51  }
 0x6be   : > { %v19272_v10 = vpop.permute.xlu0 %8765 }
 0x6bf   : > { %23135 = vst [vmem:[#allocation256_spill] sm:$0xff] %v19272_v10  ;;  %14672 = vset.pattern.permute.xlu0 %v22896_v45  ;;  %v19275_v55 = vpop.permute.xlu1 %8958 }
 0x6c0   : > { %23136 = vst [vmem:[#allocation257_spill] sm:$0xff] %v19275_v55  ;;  %8552 = vperm.xlu0 %14672, %v19254_v43   ;;  %14552 = vset.pattern.permute.xlu1 %v22924_v20 }
 0x6c1   : > { %8737 = vperm.xlu1 %14552, %v18824_v51  }
 0x6c3   : > { %v19280_v32 = vpop.permute.xlu0 %9215 }
 0x6c4   : > { %23137 = vst [vmem:[#allocation258_spill] sm:$0xff] %v19280_v32  ;;  %14674 = vset.pattern.permute.xlu0 %v22900_v50  ;;  %v19283_v2 = vpop.permute.xlu1 %9408  ;;  %v19297_v32 = vmax.f32 %v18113_v37, 0.0 }
 0x6c5   : > { %23138 = vst [vmem:[#allocation259_spill] sm:$0xff] %v19283_v2  ;;  %9002 = vperm.xlu0 %14674, %v19254_v43   ;;  %14554 = vset.pattern.permute.xlu1 %v22870_v15 }
 0x6c6   : > { %9187 = vperm.xlu1 %14554, %v18824_v51   ;;  %23141 = vst [vmem:[#allocation262_spill] sm:$0xff] %v19297_v32 }
 0x6c8   : > { %v19288_v10 = vpop.permute.xlu0 %9665 }
 0x6c9   : > { %23139 = vst [vmem:[#allocation260_spill] sm:$0xff] %v19288_v10  ;;  %14676 = vset.pattern.permute.xlu0 %v22903_v13  ;;  %v19291_v55 = vpop.permute.xlu1 %9858 }
 0x6ca   : > { %23140 = vst [vmem:[#allocation261_spill] sm:$0xff] %v19291_v55  ;;  %9452 = vperm.xlu0 %14676, %v19254_v43   ;;  %14556 = vset.pattern.permute.xlu1 %v22890_v49 }
 0x6cb   : > { %9637 = vperm.xlu1 %14556, %v18824_v51  }
 0x6cd   : > { %v19299_v2 = vpop.permute.xlu0 %7627 }
 0x6ce   : > { %23142 = vst [vmem:[#allocation263_spill] sm:$0xff] %v19299_v2  ;;  %14679 = vset.pattern.permute.xlu0 %v22918_v48  ;;  %v19302_v52 = vpop.permute.xlu1 %10083 }
 0x6cf   : > { %23143 = vst [vmem:[#allocation264_spill] sm:$0xff] %v19302_v52  ;;  %7889 = vperm.xlu0 %14679, %v19297_v32   ;;  %14557 = vset.pattern.permute.xlu1 %v22906_v8 }
 0x6d0   : > { %9862 = vperm.xlu1 %14557, %v18824_v51  }
 0x6d2   : > { %v19307_v10 = vpop.permute.xlu0 %8086 }
 0x6d3   : > { %23144 = vst [vmem:[#allocation265_spill] sm:$0xff] %v19307_v10  ;;  %14681 = vset.pattern.permute.xlu0 %v22921_v41  ;;  %v19310_v55 = vpop.permute.xlu1 %10533 }
 0x6d4   : > { %23145 = vst [vmem:[#allocation266_spill] sm:$0xff] %v19310_v55  ;;  %8339 = vperm.xlu0 %14681, %v19297_v32   ;;  %14558 = vset.pattern.permute.xlu1 %v22892_v59 }
 0x6d5   : > { %10087 = vperm.xlu1 %14558, %v18824_v51  }
 0x6d7   : > { %v19315_v37 = vpop.permute.xlu0 %8536 }
 0x6d8   : > { %23146 = vst [vmem:[#allocation267_spill] sm:$0xff] %v19315_v37  ;;  %14683 = vset.pattern.permute.xlu0 %v22924_v20  ;;  %v19318_v2 = vpop.permute.xlu1 %10758 }
 0x6d9   : > { %23147 = vst [vmem:[#allocation268_spill] sm:$0xff] %v19318_v2  ;;  %8789 = vperm.xlu0 %14683, %v19297_v32   ;;  %14559 = vset.pattern.permute.xlu1 %v22895_v56 }
 0x6da   : > { %10537 = vperm.xlu1 %14559, %v18824_v51  }
 0x6dc   : > { %v19323_v10 = vpop.permute.xlu0 %8986 }
 0x6dd   : > { %23148 = vst [vmem:[#allocation269_spill] sm:$0xff] %v19323_v10  ;;  %14685 = vset.pattern.permute.xlu0 %v22870_v15  ;;  %v19326_v55 = vpop.permute.xlu1 %7829  ;;  %v19340_v10 = vmax.f32 %v18117_v9, 0.0 }
 0x6de   : > { %23149 = vst [vmem:[#allocation270_spill] sm:$0xff] %v19326_v55  ;;  %9239 = vperm.xlu0 %14685, %v19297_v32   ;;  %14560 = vset.pattern.permute.xlu1 %v22899_v35 }
 0x6df   : > { %10762 = vperm.xlu1 %14560, %v18824_v51   ;;  %23152 = vst [vmem:[#allocation273_spill] sm:$0xff] %v19340_v10 }
 0x6e1   : > { %v19331_v37 = vpop.permute.xlu0 %9436 }
 0x6e2   : > { %23150 = vst [vmem:[#allocation271_spill] sm:$0xff] %v19331_v37  ;;  %14687 = vset.pattern.permute.xlu0 %v22890_v49  ;;  %v19334_v2 = vpop.permute.xlu1 %8279 }
 0x6e3   : > { %23151 = vst [vmem:[#allocation272_spill] sm:$0xff] %v19334_v2  ;;  %9689 = vperm.xlu0 %14687, %v19297_v32   ;;  %14561 = vset.pattern.permute.xlu1 %v22891_v16 }
 0x6e4   : > { %7612 = vperm.xlu1 %14561, %v18867_v7  }
 0x6e6   : > { %v19342_v52 = vpop.permute.xlu0 %7873 }
 0x6e7   : > { %23153 = vst [vmem:[#allocation274_spill] sm:$0xff] %v19342_v52  ;;  %14688 = vset.pattern.permute.xlu0 %v22891_v16  ;;  %v19345_v55 = vpop.permute.xlu1 %8729 }
 0x6e8   : > { %23154 = vst [vmem:[#allocation275_spill] sm:$0xff] %v19345_v55  ;;  %7657 = vperm.xlu0 %14688, %v19340_v10   ;;  %14563 = vset.pattern.permute.xlu1 %v22893_v36 }
 0x6e9   : > { %8074 = vperm.xlu1 %14563, %v18867_v7  }
 0x6eb   : > { %v19350_v37 = vpop.permute.xlu0 %8323 }
 0x6ec   : > { %23155 = vst [vmem:[#allocation276_spill] sm:$0xff] %v19350_v37  ;;  %14690 = vset.pattern.permute.xlu0 %v22893_v36  ;;  %v19353_v2 = vpop.permute.xlu1 %9179 }
 0x6ed   : > { %23156 = vst [vmem:[#allocation277_spill] sm:$0xff] %v19353_v2  ;;  %8110 = vperm.xlu0 %14690, %v19340_v10   ;;  %14565 = vset.pattern.permute.xlu1 %v22896_v45 }
 0x6ee   : > { %8524 = vperm.xlu1 %14565, %v18867_v7  }
 0x6f0   : > { %v19358_v9 = vpop.permute.xlu0 %8773 }
 0x6f1   : > { %23157 = vst [vmem:[#allocation278_spill] sm:$0xff] %v19358_v9  ;;  %14692 = vset.pattern.permute.xlu0 %v22896_v45  ;;  %v19361_v52 = vpop.permute.xlu1 %9629 }
 0x6f2   : > { %23158 = vst [vmem:[#allocation279_spill] sm:$0xff] %v19361_v52  ;;  %8560 = vperm.xlu0 %14692, %v19340_v10   ;;  %14567 = vset.pattern.permute.xlu1 %v22900_v50 }
 0x6f3   : > { %8974 = vperm.xlu1 %14567, %v18867_v7  }
 0x6f5   : > { %v19366_v37 = vpop.permute.xlu0 %9223 }
 0x6f6   : > { %23159 = vst [vmem:[#allocation280_spill] sm:$0xff] %v19366_v37  ;;  %14694 = vset.pattern.permute.xlu0 %v22900_v50  ;;  %v19369_v2 = vpop.permute.xlu1 %10079  ;;  %v19383_v37 = vmax.f32 %v18124_v24, 0.0 }
 0x6f7   : > { %23160 = vst [vmem:[#allocation281_spill] sm:$0xff] %v19369_v2  ;;  %9010 = vperm.xlu0 %14694, %v19340_v10   ;;  %14569 = vset.pattern.permute.xlu1 %v22903_v13 }
 0x6f8   : > { %9424 = vperm.xlu1 %14569, %v18867_v7   ;;  %23163 = vst [vmem:[#allocation284_spill] sm:$0xff] %v19383_v37 }
 0x6fa   : > { %v19374_v9 = vpop.permute.xlu0 %9673 }
 0x6fb   : > { %23161 = vst [vmem:[#allocation282_spill] sm:$0xff] %v19374_v9  ;;  %14696 = vset.pattern.permute.xlu0 %v22903_v13  ;;  %v19377_v52 = vpop.permute.xlu1 %10529 }
 0x6fc   : > { %23162 = vst [vmem:[#allocation283_spill] sm:$0xff] %v19377_v52  ;;  %9460 = vperm.xlu0 %14696, %v19340_v10   ;;  %14571 = vset.pattern.permute.xlu1 %v22906_v8 }
 0x6fd   : > { %9874 = vperm.xlu1 %14571, %v18867_v7  }
 0x6ff   : > { %v19385_v2 = vpop.permute.xlu0 %7637 }
 0x700   : > { %23164 = vst [vmem:[#allocation285_spill] sm:$0xff] %v19385_v2  ;;  %14699 = vset.pattern.permute.xlu0 %v22918_v48  ;;  %v19388_v55 = vpop.permute.xlu1 %10754 }
 0x701   : > { %23165 = vst [vmem:[#allocation286_spill] sm:$0xff] %v19388_v55  ;;  %7897 = vperm.xlu0 %14699, %v19383_v37   ;;  %14572 = vset.pattern.permute.xlu1 %v22892_v59 }
 0x702   : > { %10099 = vperm.xlu1 %14572, %v18867_v7  }
 0x704   : > { %v19393_v9 = vpop.permute.xlu0 %8094 }
 0x705   : > { %23166 = vst [vmem:[#allocation287_spill] sm:$0xff] %v19393_v9  ;;  %14701 = vset.pattern.permute.xlu0 %v22921_v41  ;;  %v19396_v52 = vpop.permute.xlu1 %7602 }
 0x706   : > { %23167 = vst [vmem:[#allocation288_spill] sm:$0xff] %v19396_v52  ;;  %8347 = vperm.xlu0 %14701, %v19383_v37   ;;  %14573 = vset.pattern.permute.xlu1 %v22895_v56 }
 0x707   : > { %10549 = vperm.xlu1 %14573, %v18867_v7  }
 0x709   : > { %v19401_v24 = vpop.permute.xlu0 %8544 }
 0x70a   : > { %23168 = vst [vmem:[#allocation289_spill] sm:$0xff] %v19401_v24  ;;  %14703 = vset.pattern.permute.xlu0 %v22924_v20  ;;  %v19404_v2 = vpop.permute.xlu1 %8066 }
 0x70b   : > { %23169 = vst [vmem:[#allocation290_spill] sm:$0xff] %v19404_v2  ;;  %8797 = vperm.xlu0 %14703, %v19383_v37   ;;  %14574 = vset.pattern.permute.xlu1 %v22899_v35 }
 0x70c   : > { %10774 = vperm.xlu1 %14574, %v18867_v7  }
 0x70e   : > { %v19409_v9 = vpop.permute.xlu0 %8994 }
 0x70f   : > { %23170 = vst [vmem:[#allocation291_spill] sm:$0xff] %v19409_v9  ;;  %14705 = vset.pattern.permute.xlu0 %v22870_v15  ;;  %v19412_v55 = vpop.permute.xlu1 %8516  ;;  %v19426_v9 = vmax.f32 %v18127_v3, 0.0 }
 0x710   : > { %23171 = vst [vmem:[#allocation292_spill] sm:$0xff] %v19412_v55  ;;  %9247 = vperm.xlu0 %14705, %v19383_v37   ;;  %14576 = vset.pattern.permute.xlu1 %v22918_v48 }
 0x711   : > { %7845 = vperm.xlu1 %14576, %v18910_v18   ;;  %23174 = vst [vmem:[#allocation295_spill] sm:$0xff] %v19426_v9 }
 0x713   : > { %v19417_v24 = vpop.permute.xlu0 %9444 }
 0x714   : > { %23172 = vst [vmem:[#allocation293_spill] sm:$0xff] %v19417_v24  ;;  %14707 = vset.pattern.permute.xlu0 %v22890_v49  ;;  %v19420_v2 = vpop.permute.xlu1 %8966 }
 0x715   : > { %23173 = vst [vmem:[#allocation294_spill] sm:$0xff] %v19420_v2  ;;  %9697 = vperm.xlu0 %14707, %v19383_v37   ;;  %14578 = vset.pattern.permute.xlu1 %v22921_v41 }
 0x716   : > { %8295 = vperm.xlu1 %14578, %v18910_v18  }
 0x718   : > { %v19428_v55 = vpop.permute.xlu0 %7881 }
 0x719   : > { %23175 = vst [vmem:[#allocation296_spill] sm:$0xff] %v19428_v55  ;;  %14708 = vset.pattern.permute.xlu0 %v22891_v16  ;;  %v19431_v52 = vpop.permute.xlu1 %9416 }
 0x71a   : > { %23176 = vst [vmem:[#allocation297_spill] sm:$0xff] %v19431_v52  ;;  %7667 = vperm.xlu0 %14708, %v19426_v9   ;;  %14580 = vset.pattern.permute.xlu1 %v22924_v20 }
 0x71b   : > { %8745 = vperm.xlu1 %14580, %v18910_v18  }
 0x71d   : > { %v19436_v24 = vpop.permute.xlu0 %8331 }
 0x71e   : > { %23177 = vst [vmem:[#allocation298_spill] sm:$0xff] %v19436_v24  ;;  %14710 = vset.pattern.permute.xlu0 %v22893_v36  ;;  %v19439_v2 = vpop.permute.xlu1 %9866 }
 0x71f   : > { %23178 = vst [vmem:[#allocation299_spill] sm:$0xff] %v19439_v2  ;;  %8118 = vperm.xlu0 %14710, %v19426_v9   ;;  %14582 = vset.pattern.permute.xlu1 %v22870_v15 }
 0x720   : > { %9195 = vperm.xlu1 %14582, %v18910_v18  }
 0x722   : > { %v19444_v3 = vpop.permute.xlu0 %8781 }
 0x723   : > { %23179 = vst [vmem:[#allocation300_spill] sm:$0xff] %v19444_v3  ;;  %14712 = vset.pattern.permute.xlu0 %v22896_v45  ;;  %v19447_v55 = vpop.permute.xlu1 %10091 }
 0x724   : > { %23180 = vst [vmem:[#allocation301_spill] sm:$0xff] %v19447_v55  ;;  %8568 = vperm.xlu0 %14712, %v19426_v9   ;;  %14584 = vset.pattern.permute.xlu1 %v22890_v49 }
 0x725   : > { %9645 = vperm.xlu1 %14584, %v18910_v18  }
 0x727   : > { %v19452_v24 = vpop.permute.xlu0 %9231 }
 0x728   : > { %23181 = vst [vmem:[#allocation302_spill] sm:$0xff] %v19452_v24  ;;  %14714 = vset.pattern.permute.xlu0 %v22900_v50  ;;  %v19455_v2 = vpop.permute.xlu1 %10541 }
 0x729   : > { %23182 = vst [vmem:[#allocation303_spill] sm:$0xff] %v19455_v2  ;;  %9018 = vperm.xlu0 %14714, %v19426_v9   ;;  %14585 = vset.pattern.permute.xlu1 %v22906_v8 }
 0x72a   : > { %9870 = vperm.xlu1 %14585, %v18910_v18  }
 0x72c   : > { %v19460_v3 = vpop.permute.xlu0 %9681 }
 0x72d   : > { %23183 = vst [vmem:[#allocation304_spill] sm:$0xff] %v19460_v3  ;;  %14716 = vset.pattern.permute.xlu0 %v22903_v13  ;;  %v19463_v55 = vpop.permute.xlu1 %10766 }
 0x72e   : > { %23184 = vst [vmem:[#allocation305_spill] sm:$0xff] %v19463_v55  ;;  %9468 = vperm.xlu0 %14716, %v19426_v9   ;;  %14586 = vset.pattern.permute.xlu1 %v22892_v59 }
 0x72f   : > { %10095 = vperm.xlu1 %14586, %v18910_v18  }
 0x731   : > { %v19468_v24 = vpop.permute.xlu0 %7647 }
 0x732   : > { %23185 = vst [vmem:[#allocation306_spill] sm:$0xff] %v19468_v24  ;;  %14751 = vset.pattern.permute.xlu0 %v22895_v56  ;;  %v19471_v2 = vpop.permute.xlu1 %7837 }
 0x733   : > { %23186 = vst [vmem:[#allocation307_spill] sm:$0xff] %v19471_v2  ;;  %10589 = vperm.xlu0 %14751, %v19297_v32   ;;  %14587 = vset.pattern.permute.xlu1 %v22895_v56 }
 0x734   : > { %10545 = vperm.xlu1 %14587, %v18910_v18  }
 0x736   : > { %v19476_v3 = vpop.permute.xlu0 %8102 }
 0x737   : > { %23187 = vst [vmem:[#allocation308_spill] sm:$0xff] %v19476_v3  ;;  %14752 = vset.pattern.permute.xlu0 %v22911_v47  ;;  %v19479_v55 = vpop.permute.xlu1 %8287 }
 0x738   : > { %23188 = vst [vmem:[#allocation309_spill] sm:$0xff] %v19479_v55  ;;  %10248 = vperm.xlu0 %14752, %v18055_v57   ;;  %14588 = vset.pattern.permute.xlu1 %v22899_v35 }
 0x739   : > { %10770 = vperm.xlu1 %14588, %v18910_v18  }
 0x73b   : > { %v19484_v24 = vpop.permute.xlu0 %8552 }
 0x73c   : > { %23189 = vst [vmem:[#allocation310_spill] sm:$0xff] %v19484_v24  ;;  %10256 = vperm.xlu0 %14752, %v18155_v0   ;;  %v19487_v52 = vpop.permute.xlu1 %8737 }
 0x73d   : > { %23190 = vst [vmem:[#allocation311_spill] sm:$0xff] %v19487_v52  ;;  %14589 = vset.pattern.permute.xlu1 %v22891_v16 }
 0x73e   : > { %7622 = vperm.xlu1 %14589, %v18953_v27  }
 0x740   : > { %10276 = vperm.xlu0 %14752, %v18255_v1   ;;  %v19492_v47 = vpop.permute.xlu0 %9002 }
 0x741   : > { %23191 = vst [vmem:[#allocation312_spill] sm:$0xff] %v19492_v47  ;;  %v19494_v3 = vpop.permute.xlu1 %9187 }
 0x742   : > { %23192 = vst [vmem:[#allocation313_spill] sm:$0xff] %v19494_v3  ;;  %14591 = vset.pattern.permute.xlu1 %v22893_v36  ;;  %v7484_v3 = vld [vmem:[%s22399_s5 + $0x8] sm:$0xff] }
 0x743   : > { %8082 = vperm.xlu1 %14591, %v18953_v27  }
 0x744   : > { %10288 = vperm.xlu0 %14752, %v18510_v38  }
 0x745   : > { %v19499_v57 = vpop.permute.xlu0 %9452 }
 0x746   : > { %23193 = vst [vmem:[#allocation314_spill] sm:$0xff] %v19499_v57  ;;  %v19501_v0 = vpop.permute.xlu1 %9637 }
 0x747   : > { %23194 = vst [vmem:[#allocation315_spill] sm:$0xff] %v19501_v0  ;;  %14593 = vset.pattern.permute.xlu1 %v22896_v45 }
 0x748   : > { %10300 = vperm.xlu0 %14752, %v18585_v11   ;;  %8532 = vperm.xlu1 %14593, %v18953_v27  }
 0x74a   : > { %v19506_v24 = vpop.permute.xlu0 %7889 }
 0x74b   : > { %23195 = vst [vmem:[#allocation316_spill] sm:$0xff] %v19506_v24  ;;  %v19508_v47 = vpop.permute.xlu1 %9862 }
 0x74c   : > { %23196 = vst [vmem:[#allocation317_spill] sm:$0xff] %v19508_v47  ;;  %10304 = vperm.xlu0 %14752, %v18730_v28   ;;  %14595 = vset.pattern.permute.xlu1 %v22900_v50 }
 0x74d   : > { %8982 = vperm.xlu1 %14595, %v18953_v27  }
 0x74f   : > { %v19513_v35 = vpop.permute.xlu0 %8339 }
 0x750   : > { %23197 = vst [vmem:[#allocation318_spill] sm:$0xff] %v19513_v35  ;;  %10308 = vperm.xlu0 %14752, %v18687_v19   ;;  %v19516_v57 = vpop.permute.xlu1 %10087 }
 0x751   : > { %23198 = vst [vmem:[#allocation319_spill] sm:$0xff] %v19516_v57  ;;  %14597 = vset.pattern.permute.xlu1 %v22903_v13 }
 0x752   : > { %9432 = vperm.xlu1 %14597, %v18953_v27  }
 0x754   : > { %10312 = vperm.xlu0 %14752, %v18824_v51   ;;  %v19521_v24 = vpop.permute.xlu0 %8789 }
 0x755   : > { %23199 = vst [vmem:[#allocation320_spill] sm:$0xff] %v19521_v24  ;;  %v19523_v47 = vpop.permute.xlu1 %10537 }
 0x756   : > { %23200 = vst [vmem:[#allocation321_spill] sm:$0xff] %v19523_v47  ;;  %14599 = vset.pattern.permute.xlu1 %v22906_v8 }
 0x757   : > { %9882 = vperm.xlu1 %14599, %v18953_v27  }
 0x758   : > { %10316 = vperm.xlu0 %14752, %v18781_v44  }
 0x759   : > { %v19528_v35 = vpop.permute.xlu0 %9239 }
 0x75a   : > { %23201 = vst [vmem:[#allocation322_spill] sm:$0xff] %v19528_v35  ;;  %v19530_v0 = vpop.permute.xlu1 %10762 }
 0x75b   : > { %23202 = vst [vmem:[#allocation323_spill] sm:$0xff] %v19530_v0  ;;  %14600 = vset.pattern.permute.xlu1 %v22892_v59 }
 0x75c   : > { %10320 = vperm.xlu0 %14752, %v18910_v18   ;;  %10107 = vperm.xlu1 %14600, %v18953_v27  }
 0x75e   : > { %v19535_v57 = vpop.permute.xlu0 %9689 }
 0x75f   : > { %23203 = vst [vmem:[#allocation324_spill] sm:$0xff] %v19535_v57  ;;  %v19537_v24 = vpop.permute.xlu1 %7612 }
 0x760   : > { %23204 = vst [vmem:[#allocation325_spill] sm:$0xff] %v19537_v24  ;;  %10324 = vperm.xlu0 %14752, %v18867_v7   ;;  %14602 = vset.pattern.permute.xlu1 %v22918_v48  ;;  %v7676_v24 = vmul.f32 %v18173_v58, %v7484_v3  ;;  %v12322_v58 = vld [vmem:[%s22399_s5 + $0x408] sm:$0xff] }
 0x761   : > { %7853 = vperm.xlu1 %14602, %v18996_v30   ;;  %v8576_v3 = vmul.f32 %v12322_v58, %v18192_v25  ;;  %v12386_v25 = vld [vmem:[%s22399_s5 + $0x608] sm:$0xff]  ;;  %v7483_v58 = vld [vmem:[%s22399_s5] sm:$0xff] }
 0x763   : > { %v19542_v47 = vpop.permute.xlu0 %7657 }
 0x764   : > { %23205 = vst [vmem:[#allocation326_spill] sm:$0xff] %v19542_v47  ;;  %10328 = vperm.xlu0 %14752, %v18996_v30   ;;  %v19545_v35 = vpop.permute.xlu1 %8074  ;;  %v12226_v47 = vld [vmem:[%s22399_s5 + $0x108] sm:$0xff] }
 0x765   : > { %23206 = vst [vmem:[#allocation327_spill] sm:$0xff] %v19545_v35  ;;  %14604 = vset.pattern.permute.xlu1 %v22921_v41  ;;  %v7901_v35 = vmul.f32 %v12226_v47, %v18171_v33 }
 0x766   : > { %8303 = vperm.xlu1 %14604, %v18996_v30  }
 0x768   : > { %10332 = vperm.xlu0 %14752, %v18953_v27   ;;  %v19550_v57 = vpop.permute.xlu0 %8110 }
 0x769   : > { %23207 = vst [vmem:[#allocation328_spill] sm:$0xff] %v19550_v57  ;;  %v19552_v0 = vpop.permute.xlu1 %8524  ;;  %v12258_v57 = vld [vmem:[%s22399_s5 + $0x208] sm:$0xff] }
 0x76a   : > { %23208 = vst [vmem:[#allocation329_spill] sm:$0xff] %v19552_v0  ;;  %14606 = vset.pattern.permute.xlu1 %v22924_v20  ;;  %v8126_v55 = vmul.f32 %v12258_v57, %v18181_v62  ;;  %v12225_v57 = vld [vmem:[%s22399_s5 + $0x100] sm:$0xff] }
 0x76b   : > { %8753 = vperm.xlu1 %14606, %v18996_v30  }
 0x76c   : > { %10336 = vperm.xlu0 %14752, %v19082_v63  }
 0x76d   : > { %v19563_v52 = vpop.permute.xlu0 %8560 }
 0x76e   : > { %23209 = vst [vmem:[#allocation330_spill] sm:$0xff] %v19563_v52  ;;  %v19568_v0 = vpop.permute.xlu1 %8974  ;;  %v7933_v52 = vadd.f32 %v7901_v35, %v7676_v24 }
 0x76f   : > { %23210 = vst [vmem:[#allocation331_spill] sm:$0xff] %v19568_v0  ;;  %14608 = vset.pattern.permute.xlu1 %v22870_v15  ;;  %v12290_v0 = vld [vmem:[%s22399_s5 + $0x308] sm:$0xff] }
 0x770   : > { %10340 = vperm.xlu0 %14752, %v19039_v53   ;;  %9203 = vperm.xlu1 %14608, %v18996_v30   ;;  %v8158_v33 = vadd.f32 %v8126_v55, %v7933_v52  ;;  %v8351_v62 = vmul.f32 %v12290_v0, %v18179_v31  ;;  %v12354_v52 = vld [vmem:[%s22399_s5 + $0x508] sm:$0xff] }
 0x772   : > { %v19576_v2 = vpop.permute.xlu0 %9010  ;;  %v8383_v24 = vadd.f32 %v8351_v62, %v8158_v33  ;;  %v8801_v33 = vmul.f32 %v12354_v52, %v18190_v46  ;;  %v12228_v62 = vld [vmem:[%s22399_s5 + $0x118] sm:$0xff] }
 0x773   : > { %23211 = vst [vmem:[#allocation332_spill] sm:$0xff] %v19576_v2  ;;  %v19578_v9 = vpop.permute.xlu1 %9424  ;;  %v12260_v46 = vld [vmem:[%s22399_s5 + $0x218] sm:$0xff]  ;;  %v9026_v2 = vmul.f32 %v12386_v25, %v18200_v17 }
 0x774   : > { %23212 = vst [vmem:[#allocation333_spill] sm:$0xff] %v19578_v9  ;;  %10344 = vperm.xlu0 %14752, %v19168_v60   ;;  %14610 = vset.pattern.permute.xlu1 %v22890_v49  ;;  %v8608_v55 = vadd.f32 %v8576_v3, %v8383_v24  ;;  %v7486_v24 = vld [vmem:[%s22399_s5 + $0x18] sm:$0xff]  ;;  %v7900_v3 = vmul.f32 %v12225_v57, %v18248_v12  ;;  %v12257_v12 = vld [vmem:[%s22399_s5 + $0x200] sm:$0xff] }
 0x775   : > { %9653 = vperm.xlu1 %14610, %v18996_v30   ;;  %v8128_v17 = vmul.f32 %v12260_v46, %v18307_v23  ;;  %v12450_v23 = vld [vmem:[%s22399_s5 + $0x808] sm:$0xff] }
 0x776   : > { %v23223_v46 = vld [vmem:[#allocation49_spill] sm:$0xff] }
 0x777   : > { %v19590_v35 = vpop.permute.xlu0 %9460 }
 0x778   : > { %23213 = vst [vmem:[#allocation334_spill] sm:$0xff] %v19590_v35  ;;  %10348 = vperm.xlu0 %14752, %v19125_v5   ;;  %v19593_v47 = vpop.permute.xlu1 %9874  ;;  %v8833_v35 = vadd.f32 %v8801_v33, %v8608_v55  ;;  %v12418_v55 = vld [vmem:[%s22399_s5 + $0x708] sm:$0xff] }
 0x779   : > { %23214 = vst [vmem:[#allocation335_spill] sm:$0xff] %v19593_v47  ;;  %14611 = vset.pattern.permute.xlu1 %v22906_v8  ;;  %v7678_v47 = vmul.f32 %v18299_v4, %v7486_v24  ;;  %v12289_v4 = vld [vmem:[%s22399_s5 + $0x300] sm:$0xff] }
 0x77a   : > { %9878 = vperm.xlu1 %14611, %v18996_v30  }
 0x77c   : > { %10352 = vperm.xlu0 %14752, %v19254_v43   ;;  %v19602_v31 = vpop.permute.xlu0 %7897 }
 0x77d   : > { %23215 = vst [vmem:[#allocation336_spill] sm:$0xff] %v19602_v31  ;;  %v19607_v0 = vpop.permute.xlu1 %10099  ;;  %v7675_v31 = vmul.f32 %v18240_v6, %v7483_v58  ;;  %v8125_v6 = vmul.f32 %v12257_v12, %v18232_v22  ;;  %v9251_v58 = vmul.f32 %v12418_v55, %v18198_v39  ;;  %v12324_v39 = vld [vmem:[%s22399_s5 + $0x418] sm:$0xff]  ;;  %v12321_v55 = vld [vmem:[%s22399_s5 + $0x400] sm:$0xff] }
 0x77e   : > { %23216 = vst [vmem:[#allocation337_spill] sm:$0xff] %v19607_v0  ;;  %14612 = vset.pattern.permute.xlu1 %v22892_v59  ;;  %v7903_v0 = vmul.f32 %v12228_v62, %v18297_v40  ;;  %v9058_v40 = vadd.f32 %v9026_v2, %v8833_v35 }
 0x77f   : > { %10103 = vperm.xlu1 %14612, %v18996_v30   ;;  %v7932_v57 = vadd.f32 %v7900_v3, %v7675_v31  ;;  %v12292_v31 = vld [vmem:[%s22399_s5 + $0x318] sm:$0xff]  ;;  %v23221_v3 = vld [vmem:[#allocation45_spill] sm:$0xff] }
 0x780   : > { %10356 = vperm.xlu0 %14752, %v19211_v42   ;;  %v7935_v25 = vadd.f32 %v7903_v0, %v7678_v47  ;;  %v8350_v2 = vmul.f32 %v12289_v4, %v23221_v3  ;;  %v9283_v22 = vadd.f32 %v9251_v58, %v9058_v40  ;;  %v23222_v47 = vld [vmem:[#allocation41_spill] sm:$0xff]  ;;  %v8353_v12 = vmul.f32 %v12292_v31, %v23223_v46  ;;  %v12353_v58 = vld [vmem:[%s22399_s5 + $0x500] sm:$0xff] }
 0x781   : > { %v19629_v52 = vpop.permute.xlu0 %8347  ;;  %v8157_v24 = vadd.f32 %v8125_v6, %v7932_v57  ;;  %v9476_v0 = vmul.f32 %v12450_v23, %v23222_v47  ;;  %v23225_v6 = vld [vmem:[#allocation52_spill] sm:$0xff]  ;;  %v23227_v31 = vld [vmem:[#allocation19_spill] sm:$0xff] }
 0x782   : > { %23217 = vst [vmem:[#allocation338_spill] sm:$0xff] %v19629_v52  ;;  %v19635_v9 = vpop.permute.xlu1 %10549  ;;  %v8160_v35 = vadd.f32 %v8128_v17, %v7935_v25  ;;  %v8578_v25 = vmul.f32 %v12324_v39, %v23225_v6  ;;  %v12482_v40 = vld [vmem:[%s22399_s5 + $0x908] sm:$0xff]  ;;  %v23228_v39 = vld [vmem:[#allocation42_spill] sm:$0xff] }
 0x783   : > { %23218 = vst [vmem:[#allocation339_spill] sm:$0xff] %v19635_v9  ;;  %14613 = vset.pattern.permute.xlu1 %v22895_v56  ;;  %v8382_v17 = vadd.f32 %v8350_v2, %v8157_v24  ;;  %v9508_v23 = vadd.f32 %v9476_v0, %v9283_v22  ;;  %v8575_v24 = vmul.f32 %v12321_v55, %v23227_v31  ;;  %v12514_v2 = vld [vmem:[%s22399_s5 + $0xa08] sm:$0xff]  ;;  %v12388_v0 = vld [vmem:[%s22399_s5 + $0x618] sm:$0xff]  ;;  %v12293_v9 = vld [vmem:[%s22399_s5 + $0x320] sm:$0xff] }
 0x784   : > { %10360 = vperm.xlu0 %14752, %v19340_v10   ;;  %10553 = vperm.xlu1 %14613, %v18996_v30   ;;  %v8385_v4 = vadd.f32 %v8353_v12, %v8160_v35  ;;  %v12356_v35 = vld [vmem:[%s22399_s5 + $0x518] sm:$0xff]  ;;  %v9701_v47 = vmul.f32 %v12482_v40, %v23228_v39  ;;  %v23229_v12 = vld [vmem:[#allocation48_spill] sm:$0xff] }
 0x785   : > { %v8607_v46 = vadd.f32 %v8575_v24, %v8382_v17  ;;  %v8800_v6 = vmul.f32 %v12353_v58, %v23229_v12  ;;  %v23231_v55 = vld [vmem:[#allocation18_spill] sm:$0xff]  ;;  %v23233_v52 = vld [vmem:[#allocation44_spill] sm:$0xff]  ;;  %v23234_v40 = vld [vmem:[#allocation91_spill] sm:$0xff] }
 0x786   : > { %v19651_v33 = vpop.permute.xlu0 %8797  ;;  %v9926_v56 = vmul.f32 %v12514_v2, %v23233_v52  ;;  %v8803_v17 = vmul.f32 %v12356_v35, %v23234_v40  ;;  %v23235_v24 = vld [vmem:[#allocation92_spill] sm:$0xff]  ;;  %v23240_v40 = vld [vmem:[#allocation89_spill] sm:$0xff] }
 0x787   : > { %23219 = vst [vmem:[#allocation340_spill] sm:$0xff] %v19651_v33  ;;  %v19660_v62 = vpop.permute.xlu1 %10774  ;;  %v9733_v33 = vadd.f32 %v9701_v47, %v9508_v23  ;;  %v9028_v39 = vmul.f32 %v12388_v0, %v23235_v24  ;;  %v12546_v23 = vld [vmem:[%s22399_s5 + $0xb08] sm:$0xff]  ;;  %v12417_v52 = vld [vmem:[%s22399_s5 + $0x700] sm:$0xff] }
 0x788   : > { %23220 = vst [vmem:[#allocation341_spill] sm:$0xff] %v19660_v62  ;;  %10364 = vperm.xlu0 %14752, %v19297_v32   ;;  %14614 = vset.pattern.permute.xlu1 %v22891_v16  ;;  %v23237_v47 = vld [vmem:[#allocation20_spill] sm:$0xff]  ;;  %v23241_v24 = vld [vmem:[#allocation47_spill] sm:$0xff] }
 0x789   : > { %7632 = vperm.xlu1 %14614, %v19039_v53   ;;  %v9958_v35 = vadd.f32 %v9926_v56, %v9733_v33  ;;  %v12229_v33 = vld [vmem:[%s22399_s5 + $0x120] sm:$0xff] }
 0x78b   : > { %v19674_v57 = vpop.permute.xlu0 %9247 }
 0x78c   : > { %23224 = vst [vmem:[#allocation45_spill] sm:$0xff] %v19674_v57  ;;  %10372 = vperm.xlu0 %14752, %v19383_v37   ;;  %v19678_v3 = vpop.permute.xlu1 %7845  ;;  %v8610_v57 = vadd.f32 %v8578_v25, %v8385_v4  ;;  %v12385_v4 = vld [vmem:[%s22399_s5 + $0x600] sm:$0xff]  ;;  %v8832_v25 = vadd.f32 %v8800_v6, %v8607_v46  ;;  %v12420_v46 = vld [vmem:[%s22399_s5 + $0x718] sm:$0xff]  ;;  %v23239_v6 = vld [vmem:[#allocation85_spill] sm:$0xff] }
 0x78d   : > { %23226 = vst [vmem:[#allocation41_spill] sm:$0xff] %v19678_v3  ;;  %14616 = vset.pattern.permute.xlu1 %v22893_v36  ;;  %v9025_v12 = vmul.f32 %v12385_v4, %v23237_v47  ;;  %v10151_v0 = vmul.f32 %v12546_v23, %v23239_v6  ;;  %v12610_v6 = vld [vmem:[%s22399_s5 + $0xd08] sm:$0xff]  ;;  %v23285_v3 = vld [vmem:[#allocation50_spill] sm:$0xff] }
 0x78e   : > { %8090 = vperm.xlu1 %14616, %v19039_v53   ;;  %v8835_v58 = vadd.f32 %v8803_v17, %v8610_v57  ;;  %v12578_v57 = vld [vmem:[%s22399_s5 + $0xc08] sm:$0xff]  ;;  %v9250_v17 = vmul.f32 %v12417_v52, %v23240_v40 }
 0x78f   : > { %v10183_v4 = vadd.f32 %v10151_v0, %v9958_v35  ;;  %v10376_v47 = vmul.f32 %v12578_v57, %v23241_v24  ;;  %v12230_v57 = vld [vmem:[%s22399_s5 + $0x128] sm:$0xff]  ;;  %v23248_v24 = vld [vmem:[#allocation46_spill] sm:$0xff] }
 0x790   : > { %14755 = vset.pattern.permute.xlu0 %v22919_v21  ;;  %v19698_v22 = vpop.permute.xlu0 %9697  ;;  %v9060_v56 = vadd.f32 %v9028_v39, %v8835_v58  ;;  %v7487_v58 = vld [vmem:[%s22399_s5 + $0x20] sm:$0xff]  ;;  %v7488_v39 = vld [vmem:[%s22399_s5 + $0x28] sm:$0xff] }
 0x791   : > { %23230 = vst [vmem:[#allocation49_spill] sm:$0xff] %v19698_v22  ;;  %10927 = vperm.xlu0 %14755, %v23231_v55   ;;  %v19704_v31 = vpop.permute.xlu1 %8295  ;;  %v23242_v22 = vld [vmem:[#allocation55_spill] sm:$0xff]  ;;  %v23245_v0 = vld [vmem:[#allocation24_spill] sm:$0xff] }
 0x792   : > { %23232 = vst [vmem:[#allocation52_spill] sm:$0xff] %v19704_v31  ;;  %14618 = vset.pattern.permute.xlu1 %v22896_v45  ;;  %v9253_v21 = vmul.f32 %v12420_v46, %v23242_v22  ;;  %v7904_v22 = vmul.f32 %v12229_v33, %v18598_v26  ;;  %v12262_v46 = vld [vmem:[%s22399_s5 + $0x228] sm:$0xff]  ;;  %v12481_v26 = vld [vmem:[%s22399_s5 + $0x900] sm:$0xff]  ;;  %v10408_v33 = vadd.f32 %v10376_v47, %v10183_v4 }
 0x793   : > { %8540 = vperm.xlu1 %14618, %v19039_v53   ;;  %v12642_v37 = vld [vmem:[%s22399_s5 + $0xe08] sm:$0xff] }
 0x794   : > { %v23253_v47 = vld [vmem:[#allocation21_spill] sm:$0xff] }
 0x795   : > { %10939 = vperm.xlu0 %14755, %v18188_v34   ;;  %v19721_v2 = vpop.permute.xlu0 %7667  ;;  %v9057_v34 = vadd.f32 %v9025_v12, %v8832_v25  ;;  %v12452_v25 = vld [vmem:[%s22399_s5 + $0x818] sm:$0xff]  ;;  %v9285_v12 = vadd.f32 %v9253_v21, %v9060_v56 }
 0x796   : > { %23236 = vst [vmem:[#allocation19_spill] sm:$0xff] %v19721_v2  ;;  %v19724_v55 = vpop.permute.xlu1 %8745  ;;  %v9478_v21 = vmul.f32 %v12452_v25, %v23245_v0  ;;  %v12261_v2 = vld [vmem:[%s22399_s5 + $0x220] sm:$0xff] }
 0x797   : > { %23238 = vst [vmem:[#allocation42_spill] sm:$0xff] %v19724_v55  ;;  %14620 = vset.pattern.permute.xlu1 %v22900_v50  ;;  %v9282_v35 = vadd.f32 %v9250_v17, %v9057_v34  ;;  %v23246_v34 = vld [vmem:[#allocation27_spill] sm:$0xff]  ;;  %v23247_v17 = vld [vmem:[#allocation77_spill] sm:$0xff] }
 0x798   : > { %8990 = vperm.xlu1 %14620, %v19039_v53   ;;  %v7679_v40 = vmul.f32 %v23246_v34, %v7487_v58  ;;  %v7680_v56 = vmul.f32 %v23247_v17, %v7488_v39  ;;  %v23249_v25 = vld [vmem:[#allocation59_spill] sm:$0xff] }
 0x799   : > { %10951 = vperm.xlu0 %14755, %v18255_v1   ;;  %v12449_v1 = vld [vmem:[%s22399_s5 + $0x800] sm:$0xff]  ;;  %v7905_v0 = vmul.f32 %v12230_v57, %v23249_v25  ;;  %v9510_v57 = vadd.f32 %v9478_v21, %v9285_v12  ;;  %v12294_v25 = vld [vmem:[%s22399_s5 + $0x328] sm:$0xff] }
 0x79a   : > { %v19751_v23 = vpop.permute.xlu0 %8118  ;;  %v23250_v58 = vld [vmem:[#allocation35_spill] sm:$0xff]  ;;  %v7936_v39 = vadd.f32 %v7904_v22, %v7679_v40 }
 0x79b   : > { %23243 = vst [vmem:[#allocation48_spill] sm:$0xff] %v19751_v23  ;;  %v19757_v52 = vpop.permute.xlu1 %9195  ;;  %v9475_v23 = vmul.f32 %v12449_v1, %v23248_v24  ;;  %v8130_v34 = vmul.f32 %v12262_v46, %v23250_v58  ;;  %v9700_v1 = vmul.f32 %v12481_v26, %v23253_v47  ;;  %v12484_v24 = vld [vmem:[%s22399_s5 + $0x918] sm:$0xff]  ;;  %v7937_v40 = vadd.f32 %v7905_v0, %v7680_v56  ;;  %v12609_v0 = vld [vmem:[%s22399_s5 + $0xd00] sm:$0xff] }
 0x79c   : > { %23244 = vst [vmem:[#allocation18_spill] sm:$0xff] %v19757_v52  ;;  %14622 = vset.pattern.permute.xlu1 %v22903_v13  ;;  %v23255_v46 = vld [vmem:[#allocation62_spill] sm:$0xff]  ;;  %v12641_v58 = vld [vmem:[%s22399_s5 + $0xe00] sm:$0xff] }
 0x79d   : > { %10963 = vperm.xlu0 %14755, %v18510_v38   ;;  %9440 = vperm.xlu1 %14622, %v19039_v53   ;;  %v23252_v38 = vld [vmem:[#allocation98_spill] sm:$0xff]  ;;  %v9507_v4 = vadd.f32 %v9475_v23, %v9282_v35  ;;  %v8129_v22 = vmul.f32 %v12261_v2, %v23255_v46  ;;  %v12513_v2 = vld [vmem:[%s22399_s5 + $0xa00] sm:$0xff] }
 0x79e   : > { %v10601_v62 = vmul.f32 %v12610_v6, %v23252_v38  ;;  %v23256_v35 = vld [vmem:[#allocation86_spill] sm:$0xff]  ;;  %v12326_v38 = vld [vmem:[%s22399_s5 + $0x428] sm:$0xff] }
 0x79f   : > { %v19786_v17 = vpop.permute.xlu0 %8568  ;;  %v10826_v6 = vmul.f32 %v12642_v37, %v23256_v35  ;;  %v12516_v26 = vld [vmem:[%s22399_s5 + $0xa18] sm:$0xff]  ;;  %v12227_v37 = vld [vmem:[%s22399_s5 + $0x110] sm:$0xff]  ;;  %v8161_v21 = vadd.f32 %v8129_v22, %v7936_v39 }
 0x7a0   : > { %23251 = vst [vmem:[#allocation44_spill] sm:$0xff] %v19786_v17  ;;  %v19796_v52 = vpop.permute.xlu1 %9645  ;;  %v10633_v23 = vadd.f32 %v10601_v62, %v10408_v33  ;;  %v8162_v62 = vadd.f32 %v8130_v34, %v7937_v40  ;;  %v23258_v56 = vld [vmem:[#allocation38_spill] sm:$0xff]  ;;  %v23260_v34 = vld [vmem:[#allocation53_spill] sm:$0xff]  ;;  %v23271_v17 = vld [vmem:[#allocation60_spill] sm:$0xff] }
 0x7a1   : > { %23254 = vst [vmem:[#allocation91_spill] sm:$0xff] %v19796_v52  ;;  %10967 = vperm.xlu0 %14755, %v18467_v14   ;;  %14624 = vset.pattern.permute.xlu1 %v22906_v8  ;;  %v23257_v14 = vld [vmem:[#allocation23_spill] sm:$0xff]  ;;  %v8354_v33 = vmul.f32 %v12293_v9, %v23258_v56  ;;  %v9928_v39 = vmul.f32 %v12516_v26, %v23260_v34  ;;  %v23261_v22 = vld [vmem:[#allocation25_spill] sm:$0xff]  ;;  %v23272_v52 = vld [vmem:[#allocation28_spill] sm:$0xff] }
 0x7a2   : > { %9890 = vperm.xlu1 %14624, %v19039_v53   ;;  %v9703_v12 = vmul.f32 %v12484_v24, %v23257_v14  ;;  %v9732_v24 = vadd.f32 %v9700_v1, %v9507_v4  ;;  %v8355_v9 = vmul.f32 %v12294_v25, %v23261_v22  ;;  %v7485_v40 = vld [vmem:[%s22399_s5 + $0x10] sm:$0xff]  ;;  %v19842_v1 = vadd.f32 %v10826_v6, %v10633_v23  ;;  %v12673_v25 = vld [vmem:[%s22399_s5 + $0xf00] sm:$0xff]  ;;  %v12548_v23 = vld [vmem:[%s22399_s5 + $0xb18] sm:$0xff] }
 0x7a3   : > { %v12259_v35 = vld [vmem:[%s22399_s5 + $0x210] sm:$0xff]  ;;  %v12325_v34 = vld [vmem:[%s22399_s5 + $0x420] sm:$0xff] }
 0x7a4   : > { %v19826_v47 = vpop.permute.xlu0 %9018  ;;  %v9735_v46 = vadd.f32 %v9703_v12, %v9510_v57  ;;  %v12231_v14 = vld [vmem:[%s22399_s5 + $0x130] sm:$0xff]  ;;  %23263 = vst [vmem:[#allocation85_spill] sm:$0xff] %v19842_v1  ;;  %v23264_v57 = vld [vmem:[#allocation88_spill] sm:$0xff]  ;;  %v23266_v22 = vld [vmem:[#allocation51_spill] sm:$0xff]  ;;  %v8127_v55 = vmul.f32 %v12259_v35, %v23272_v52 }
 0x7a5   : > { %23259 = vst [vmem:[#allocation92_spill] sm:$0xff] %v19826_v47  ;;  %10971 = vperm.xlu0 %14755, %v18636_v29   ;;  %v19840_v4 = vpop.permute.xlu1 %9870  ;;  %v9925_v26 = vmul.f32 %v12513_v2, %v23264_v57  ;;  %v23265_v12 = vld [vmem:[#allocation97_spill] sm:$0xff]  ;;  %v19854_v29 = vmul.f32 %v12609_v0, %v23266_v22  ;;  %v8387_v2 = vadd.f32 %v8355_v9, %v8162_v62  ;;  %v23268_v57 = vld [vmem:[#allocation36_spill] sm:$0xff]  ;;  %v23269_v0 = vld [vmem:[#allocation103_spill] sm:$0xff] }
 0x7a6   : > { %23262 = vst [vmem:[#allocation20_spill] sm:$0xff] %v19840_v4  ;;  %v7902_v56 = vmul.f32 %v12227_v37, %v23265_v12  ;;  %14626 = vset.pattern.permute.xlu1 %v22918_v48  ;;  %v12291_v6 = vld [vmem:[%s22399_s5 + $0x310] sm:$0xff]  ;;  %v8580_v37 = vmul.f32 %v12326_v38, %v23268_v57  ;;  %v8386_v47 = vadd.f32 %v8354_v33, %v8161_v21  ;;  %v12357_v62 = vld [vmem:[%s22399_s5 + $0x520] sm:$0xff]  ;;  %v7490_v38 = vld [vmem:[%s22399_s5 + $0x38] sm:$0xff] }
 0x7a7   : > { %23267 = vst [vmem:[#allocation89_spill] sm:$0xff] %v19854_v29  ;;  %v7489_v12 = vld [vmem:[%s22399_s5 + $0x30] sm:$0xff]  ;;  %7861 = vperm.xlu1 %14626, %v19082_v63   ;;  %v19868_v22 = vmul.f32 %v12641_v58, %v23269_v0  ;;  %v7677_v4 = vmul.f32 %v23271_v17, %v7485_v40  ;;  %v7906_v9 = vmul.f32 %v12231_v14, %v18708_v54  ;;  %v12545_v17 = vld [vmem:[%s22399_s5 + $0xb00] sm:$0xff]  ;;  %v12580_v58 = vld [vmem:[%s22399_s5 + $0xc18] sm:$0xff] }
 0x7a8   : > { %v23273_v21 = vld [vmem:[#allocation22_spill] sm:$0xff]  ;;  %v19882_v57 = vadd.f32 %v9925_v26, %v9732_v24  ;;  %v9960_v52 = vadd.f32 %v9928_v39, %v9735_v46  ;;  %v23275_v40 = vld [vmem:[#allocation99_spill] sm:$0xff]  ;;  %v23277_v24 = vld [vmem:[#allocation56_spill] sm:$0xff] }
 0x7a9   : > { %23270 = vst [vmem:[#allocation47_spill] sm:$0xff] %v19868_v22  ;;  %v19880_v33 = vmul.f32 %v12673_v25, %v23273_v21  ;;  %v8579_v35 = vmul.f32 %v12325_v34, %v23275_v40  ;;  %v12323_v54 = vld [vmem:[%s22399_s5 + $0x410] sm:$0xff]  ;;  %10975 = vperm.xlu0 %14755, %v18585_v11   ;;  %v19895_v14 = vpop.permute.xlu0 %9468  ;;  %v10153_v26 = vmul.f32 %v12548_v23, %v23277_v24  ;;  %v12358_v46 = vld [vmem:[%s22399_s5 + $0x528] sm:$0xff]  ;;  %v12232_v34 = vld [vmem:[%s22399_s5 + $0x138] sm:$0xff] }
 0x7aa   : > { %23276 = vst [vmem:[#allocation24_spill] sm:$0xff] %v19895_v14  ;;  %v7934_v39 = vadd.f32 %v7902_v56, %v7677_v4  ;;  %v23278_v25 = vld [vmem:[#allocation61_spill] sm:$0xff]  ;;  %v23279_v21 = vld [vmem:[#allocation78_spill] sm:$0xff]  ;;  %v19909_v14 = vpop.permute.xlu1 %10095  ;;  %v8612_v24 = vadd.f32 %v8580_v37, %v8387_v2  ;;  %v23282_v1 = vld [vmem:[#allocation107_spill] sm:$0xff] }
 0x7ab   : > { %23274 = vst [vmem:[#allocation55_spill] sm:$0xff] %v19880_v33  ;;  %v8352_v0 = vmul.f32 %v12291_v6, %v23278_v25  ;;  %v7681_v40 = vmul.f32 %v23279_v21, %v7489_v12  ;;  %v12264_v11 = vld [vmem:[%s22399_s5 + $0x238] sm:$0xff]  ;;  %23280 = vst [vmem:[#allocation27_spill] sm:$0xff] %v19909_v14  ;;  %v12355_v23 = vld [vmem:[%s22399_s5 + $0x510] sm:$0xff]  ;;  %v8611_v56 = vadd.f32 %v8579_v35, %v8386_v47  ;;  %14628 = vset.pattern.permute.xlu1 %v22921_v41 }
 0x7ac   : > { %v12263_v4 = vld [vmem:[%s22399_s5 + $0x230] sm:$0xff]  ;;  %v7682_v12 = vmul.f32 %v23282_v1, %v7490_v38  ;;  %v23283_v21 = vld [vmem:[#allocation95_spill] sm:$0xff]  ;;  %v8159_v33 = vadd.f32 %v8127_v55, %v7934_v39  ;;  %v23284_v14 = vld [vmem:[#allocation64_spill] sm:$0xff]  ;;  %8311 = vperm.xlu1 %14628, %v19082_v63   ;;  %v10150_v47 = vmul.f32 %v12545_v17, %v23285_v3 }
 0x7ad   : > { %v23281_v6 = vld [vmem:[#allocation90_spill] sm:$0xff]  ;;  %v10378_v31 = vmul.f32 %v12580_v58, %v23283_v21  ;;  %v8577_v22 = vmul.f32 %v12323_v54, %v23284_v14  ;;  %v12390_v2 = vld [vmem:[%s22399_s5 + $0x628] sm:$0xff]  ;;  %v7938_v37 = vadd.f32 %v7906_v9, %v7681_v40  ;;  %10979 = vperm.xlu0 %14755, %v18730_v28   ;;  %v10185_v58 = vadd.f32 %v10153_v26, %v9960_v52  ;;  %v12389_v9 = vld [vmem:[%s22399_s5 + $0x620] sm:$0xff] }
 0x7ae   : > { %v8804_v25 = vmul.f32 %v12357_v62, %v23281_v6  ;;  %v23286_v35 = vld [vmem:[#allocation58_spill] sm:$0xff]  ;;  %v23287_v6 = vld [vmem:[#allocation31_spill] sm:$0xff]  ;;  %v23288_v38 = vld [vmem:[#allocation109_spill] sm:$0xff]  ;;  %v8384_v54 = vadd.f32 %v8352_v0, %v8159_v33 }
 0x7af   : > { %v8805_v62 = vmul.f32 %v12358_v46, %v23286_v35  ;;  %v7907_v1 = vmul.f32 %v12232_v34, %v23287_v6  ;;  %v8132_v29 = vmul.f32 %v12264_v11, %v23288_v38  ;;  %v12295_v55 = vld [vmem:[%s22399_s5 + $0x330] sm:$0xff]  ;;  %v23289_v14 = vld [vmem:[#allocation100_spill] sm:$0xff]  ;;  %v19942_v34 = vpop.permute.xlu0 %10589  ;;  %v12612_v28 = vld [vmem:[%s22399_s5 + $0xd18] sm:$0xff]  ;;  %v10410_v21 = vadd.f32 %v10378_v31, %v10185_v58 }
 0x7b0   : > { %v8802_v3 = vmul.f32 %v12355_v23, %v23289_v14  ;;  %v12387_v17 = vld [vmem:[%s22399_s5 + $0x610] sm:$0xff]  ;;  %23291 = vst [vmem:[#allocation77_spill] sm:$0xff] %v19942_v34  ;;  %v8836_v40 = vadd.f32 %v8804_v25, %v8611_v56  ;;  %v19951_v23 = vpop.permute.xlu1 %10545  ;;  %v8609_v35 = vadd.f32 %v8577_v22, %v8384_v54  ;;  %v12421_v6 = vld [vmem:[%s22399_s5 + $0x720] sm:$0xff]  ;;  %14630 = vset.pattern.permute.xlu1 %v22924_v20  ;;  %v12422_v31 = vld [vmem:[%s22399_s5 + $0x728] sm:$0xff] }
 0x7b1   : > { %v23290_v46 = vld [vmem:[#allocation6_spill] sm:$0xff]  ;;  %v8837_v52 = vadd.f32 %v8805_v62, %v8612_v24  ;;  %v23292_v26 = vld [vmem:[#allocation33_spill] sm:$0xff]  ;;  %v7939_v11 = vadd.f32 %v7907_v1, %v7682_v12  ;;  %23293 = vst [vmem:[#allocation46_spill] sm:$0xff] %v19951_v23  ;;  %v23294_v14 = vld [vmem:[#allocation120_spill] sm:$0xff]  ;;  %10983 = vperm.xlu0 %14755, %v18687_v19   ;;  %8761 = vperm.xlu1 %14630, %v19082_v63  }
 0x7b2   : > { %v8131_v39 = vmul.f32 %v12263_v4, %v23290_v46  ;;  %v12419_v33 = vld [vmem:[%s22399_s5 + $0x710] sm:$0xff]  ;;  %v9030_v0 = vmul.f32 %v12390_v2, %v23292_v26  ;;  %v12296_v4 = vld [vmem:[%s22399_s5 + $0x338] sm:$0xff]  ;;  %v8356_v46 = vmul.f32 %v12295_v55, %v23294_v14  ;;  %v8834_v58 = vadd.f32 %v8802_v3, %v8609_v35  ;;  %v23300_v26 = vld [vmem:[#allocation40_spill] sm:$0xff] }
 0x7b3   : > { %v12644_v24 = vld [vmem:[%s22399_s5 + $0xe18] sm:$0xff]  ;;  %v8164_v2 = vadd.f32 %v8132_v29, %v7939_v11  ;;  %v12611_v55 = vld [vmem:[%s22399_s5 + $0xd10] sm:$0xff]  ;;  %v9254_v3 = vmul.f32 %v12421_v6, %v23300_v26  ;;  %v19993_v11 = vpop.permute.xlu0 %10248  ;;  %v12234_v6 = vld [vmem:[%s22399_s5 + $0x148] sm:$0xff] }
 0x7b4   : > { %v8163_v38 = vadd.f32 %v8131_v39, %v7938_v37  ;;  %v23295_v22 = vld [vmem:[#allocation67_spill] sm:$0xff]  ;;  %v23296_v25 = vld [vmem:[#allocation30_spill] sm:$0xff]  ;;  %v19972_v37 = vadd.f32 %v10150_v47, %v19882_v57  ;;  %v23298_v54 = vld [vmem:[#allocation65_spill] sm:$0xff]  ;;  %v9062_v47 = vadd.f32 %v9030_v0, %v8837_v52 }
 0x7b5   : > { %v9029_v56 = vmul.f32 %v12389_v9, %v23295_v22  ;;  %v9027_v12 = vmul.f32 %v12387_v17, %v23296_v25  ;;  %v23297_v62 = vld [vmem:[#allocation54_spill] sm:$0xff]  ;;  %v9252_v39 = vmul.f32 %v12419_v33, %v23298_v54  ;;  %v23299_v9 = vld [vmem:[#allocation69_spill] sm:$0xff]  ;;  %v23302_v25 = vld [vmem:[#allocation96_spill] sm:$0xff]  ;;  %10987 = vperm.xlu0 %14755, %v18824_v51   ;;  %14632 = vset.pattern.permute.xlu1 %v22870_v15 }
 0x7b6   : > { %v10603_v1 = vmul.f32 %v12612_v28, %v23297_v62  ;;  %v12328_v29 = vld [vmem:[%s22399_s5 + $0x438] sm:$0xff]  ;;  %v12451_v19 = vld [vmem:[%s22399_s5 + $0x810] sm:$0xff]  ;;  %v8357_v57 = vmul.f32 %v12296_v4, %v23299_v9  ;;  %v7492_v33 = vld [vmem:[%s22399_s5 + $0x48] sm:$0xff]  ;;  %v9255_v62 = vmul.f32 %v12422_v31, %v23302_v25  ;;  %v8388_v0 = vadd.f32 %v8356_v46, %v8163_v38  ;;  %v20000_v4 = vpop.permute.xlu1 %10770  ;;  %9211 = vperm.xlu1 %14632, %v19082_v63  }
 0x7b7   : > { %v12327_v17 = vld [vmem:[%s22399_s5 + $0x430] sm:$0xff]  ;;  %v9061_v28 = vadd.f32 %v9029_v56, %v8836_v40  ;;  %v12454_v52 = vld [vmem:[%s22399_s5 + $0x828] sm:$0xff]  ;;  %23303 = vst [vmem:[#allocation59_spill] sm:$0xff] %v20000_v4  ;;  %v9059_v40 = vadd.f32 %v9027_v12, %v8834_v58  ;;  %v23304_v54 = vld [vmem:[#allocation111_spill] sm:$0xff] }
 0x7b8   : > { %v10635_v35 = vadd.f32 %v10603_v1, %v10410_v21  ;;  %v23301_v14 = vld [vmem:[#allocation26_spill] sm:$0xff]  ;;  %v8389_v56 = vadd.f32 %v8357_v57, %v8164_v2  ;;  %v8582_v9 = vmul.f32 %v12328_v29, %v23304_v54  ;;  %v12453_v31 = vld [vmem:[%s22399_s5 + $0x820] sm:$0xff]  ;;  %v23308_v58 = vld [vmem:[#allocation13_spill] sm:$0xff]  ;;  %v7684_v57 = vmul.f32 %v18794_v61, %v7492_v33 }
 0x7b9   : > { %v10828_v22 = vmul.f32 %v12644_v24, %v23301_v14  ;;  %v12359_v21 = vld [vmem:[%s22399_s5 + $0x530] sm:$0xff]  ;;  %v12266_v24 = vld [vmem:[%s22399_s5 + $0x248] sm:$0xff]  ;;  %v8581_v29 = vmul.f32 %v12327_v17, %v23308_v58  ;;  %v12676_v51 = vld [vmem:[%s22399_s5 + $0xf18] sm:$0xff]  ;;  %v9287_v26 = vadd.f32 %v9255_v62, %v9062_v47  ;;  %v9286_v54 = vadd.f32 %v9254_v3, %v9061_v28  ;;  %10991 = vperm.xlu0 %14755, %v18781_v44  }
 0x7ba   : > { %v23305_v38 = vld [vmem:[#allocation94_spill] sm:$0xff]  ;;  %v23307_v12 = vld [vmem:[#allocation68_spill] sm:$0xff]  ;;  %v23309_v14 = vld [vmem:[#allocation81_spill] sm:$0xff]  ;;  %14634 = vset.pattern.permute.xlu1 %v22890_v49 }
 0x7bb   : > { %v20015_v46 = vmul.f32 %v12611_v55, %v23305_v38  ;;  %v9477_v2 = vmul.f32 %v12451_v19, %v23307_v12  ;;  %v12483_v1 = vld [vmem:[%s22399_s5 + $0x910] sm:$0xff]  ;;  %v9284_v55 = vadd.f32 %v9252_v39, %v9059_v40  ;;  %v9480_v25 = vmul.f32 %v12454_v52, %v23309_v14  ;;  %v12233_v19 = vld [vmem:[%s22399_s5 + $0x140] sm:$0xff]  ;;  %v20034_v38 = vpop.permute.xlu0 %10256  ;;  %v12360_v61 = vld [vmem:[%s22399_s5 + $0x538] sm:$0xff]  ;;  %9661 = vperm.xlu1 %14634, %v19082_v63  }
 0x7bc   : > { %v23310_v17 = vld [vmem:[#allocation10_spill] sm:$0xff]  ;;  %v12485_v39 = vld [vmem:[%s22399_s5 + $0x920] sm:$0xff]  ;;  %v8613_v47 = vadd.f32 %v8581_v29, %v8388_v0  ;;  %v10860_v40 = vadd.f32 %v10828_v22, %v10635_v35  ;;  %v12486_v12 = vld [vmem:[%s22399_s5 + $0x928] sm:$0xff]  ;;  %v20054_v0 = vpop.permute.xlu1 %7622 }
 0x7bd   : > { %23306 = vst [vmem:[#allocation35_spill] sm:$0xff] %v20015_v46  ;;  %v7909_v33 = vmul.f32 %v12234_v6, %v23310_v17  ;;  %v23311_v62 = vld [vmem:[#allocation122_spill] sm:$0xff]  ;;  %v23312_v28 = vld [vmem:[#allocation139_spill] sm:$0xff]  ;;  %v23313_v58 = vld [vmem:[#allocation29_spill] sm:$0xff]  ;;  %v8614_v17 = vadd.f32 %v8582_v9, %v8389_v56  ;;  %v9509_v35 = vadd.f32 %v9477_v2, %v9284_v55  ;;  %v9512_v2 = vadd.f32 %v9480_v25, %v9287_v26 }
 0x7be   : > { %v8806_v52 = vmul.f32 %v12359_v21, %v23311_v62  ;;  %v8134_v3 = vmul.f32 %v12266_v24, %v23312_v28  ;;  %v9479_v14 = vmul.f32 %v12453_v31, %v23313_v58  ;;  %v23314_v34 = vld [vmem:[#allocation102_spill] sm:$0xff]  ;;  %v7491_v6 = vld [vmem:[%s22399_s5 + $0x40] sm:$0xff]  ;;  %23315 = vst [vmem:[#allocation98_spill] sm:$0xff] %v20054_v0  ;;  %v23316_v21 = vld [vmem:[#allocation57_spill] sm:$0xff]  ;;  %10995 = vperm.xlu0 %14755, %v18910_v18  }
 0x7bf   : > { %v9702_v4 = vmul.f32 %v12483_v1, %v23314_v34  ;;  %v11053_v24 = vmul.f32 %v12676_v51, %v23316_v21  ;;  %v12515_v22 = vld [vmem:[%s22399_s5 + $0xa10] sm:$0xff]  ;;  %v12392_v34 = vld [vmem:[%s22399_s5 + $0x638] sm:$0xff]  ;;  %v7941_v31 = vadd.f32 %v7909_v33, %v7684_v57  ;;  %v12298_v55 = vld [vmem:[%s22399_s5 + $0x348] sm:$0xff]  ;;  %v20076_v62 = vpop.permute.xlu0 %10276  ;;  %14635 = vset.pattern.permute.xlu1 %v22906_v8 }
 0x7c0   : > { %v23317_v1 = vld [vmem:[#allocation159_spill] sm:$0xff]  ;;  %v12547_v44 = vld [vmem:[%s22399_s5 + $0xb10] sm:$0xff]  ;;  %v9511_v57 = vadd.f32 %v9479_v14, %v9286_v54  ;;  %23320 = vst [vmem:[#allocation21_spill] sm:$0xff] %v20076_v62  ;;  %v12518_v26 = vld [vmem:[%s22399_s5 + $0xa28] sm:$0xff]  ;;  %9886 = vperm.xlu1 %14635, %v19082_v63  }
 0x7c1   : > { %v7908_v29 = vmul.f32 %v12233_v19, %v23317_v1  ;;  %v23318_v56 = vld [vmem:[#allocation75_spill] sm:$0xff]  ;;  %v12391_v51 = vld [vmem:[%s22399_s5 + $0x630] sm:$0xff]  ;;  %v8838_v1 = vadd.f32 %v8806_v52, %v8613_v47  ;;  %v8166_v54 = vadd.f32 %v8134_v3, %v7941_v31  ;;  %v9734_v14 = vadd.f32 %v9702_v4, %v9509_v35  ;;  %v23325_v52 = vld [vmem:[#allocation72_spill] sm:$0xff]  ;;  %v20105_v31 = vpop.permute.xlu1 %8082 }
 0x7c2   : > { %v8807_v9 = vmul.f32 %v12360_v61, %v23318_v56  ;;  %v23319_v33 = vld [vmem:[#allocation93_spill] sm:$0xff]  ;;  %v23321_v28 = vld [vmem:[#allocation63_spill] sm:$0xff]  ;;  %v10152_v3 = vmul.f32 %v12547_v44, %v23325_v52  ;;  %23328 = vst [vmem:[#allocation62_spill] sm:$0xff] %v20105_v31  ;;  %v23334_v52 = vld [vmem:[#allocation66_spill] sm:$0xff]  ;;  %10999 = vperm.xlu0 %14755, %v18867_v7  }
 0x7c3   : > { %v9704_v19 = vmul.f32 %v12485_v39, %v23319_v33  ;;  %v9705_v58 = vmul.f32 %v12486_v12, %v23321_v28  ;;  %v23322_v25 = vld [vmem:[#allocation43_spill] sm:$0xff]  ;;  %v23323_v39 = vld [vmem:[#allocation70_spill] sm:$0xff]  ;;  %v23324_v0 = vld [vmem:[#allocation113_spill] sm:$0xff] }
 0x7c4   : > { %v7683_v61 = vmul.f32 %v23322_v25, %v7491_v6  ;;  %v12265_v21 = vld [vmem:[%s22399_s5 + $0x240] sm:$0xff]  ;;  %v9927_v56 = vmul.f32 %v12515_v22, %v23323_v39  ;;  %v8839_v33 = vadd.f32 %v8807_v9, %v8614_v17  ;;  %v9032_v23 = vmul.f32 %v12392_v34, %v23324_v0  ;;  %v12423_v12 = vld [vmem:[%s22399_s5 + $0x730] sm:$0xff]  ;;  %v12330_v6 = vld [vmem:[%s22399_s5 + $0x448] sm:$0xff]  ;;  %14636 = vset.pattern.permute.xlu1 %v22892_v59 }
 0x7c5   : > { %v12517_v47 = vld [vmem:[%s22399_s5 + $0xa20] sm:$0xff]  ;;  %v9737_v9 = vadd.f32 %v9705_v58, %v9512_v2  ;;  %v9736_v39 = vadd.f32 %v9704_v19, %v9511_v57  ;;  %v12550_v2 = vld [vmem:[%s22399_s5 + $0xb28] sm:$0xff]  ;;  %v12455_v7 = vld [vmem:[%s22399_s5 + $0x830] sm:$0xff]  ;;  %10111 = vperm.xlu1 %14636, %v19082_v63  }
 0x7c6   : > { %v12613_v4 = vld [vmem:[%s22399_s5 + $0xd20] sm:$0xff]  ;;  %v7940_v34 = vadd.f32 %v7908_v29, %v7683_v61  ;;  %v12424_v29 = vld [vmem:[%s22399_s5 + $0x738] sm:$0xff]  ;;  %v9064_v31 = vadd.f32 %v9032_v23, %v8839_v33  ;;  %11003 = vperm.xlu0 %14755, %v18996_v30  }
 0x7c7   : > { %v23326_v17 = vld [vmem:[#allocation79_spill] sm:$0xff]  ;;  %v23332_v19 = vld [vmem:[#allocation124_spill] sm:$0xff]  ;;  %v23339_v23 = vld [vmem:[#allocation34_spill] sm:$0xff] }
 0x7c8   : > { %v9031_v0 = vmul.f32 %v12391_v51, %v23326_v17  ;;  %v23327_v35 = vld [vmem:[#allocation15_spill] sm:$0xff]  ;;  %v20115_v51 = vpop.permute.xlu0 %10288  ;;  %v9929_v17 = vmul.f32 %v12517_v47, %v23334_v52  ;;  %v23338_v47 = vld [vmem:[#allocation74_spill] sm:$0xff]  ;;  %v10155_v33 = vmul.f32 %v12550_v2, %v23339_v23 }
 0x7c9   : > { %v8359_v22 = vmul.f32 %v12298_v55, %v23327_v35  ;;  %v12645_v18 = vld [vmem:[%s22399_s5 + $0xe20] sm:$0xff]  ;;  %23331 = vst [vmem:[#allocation86_spill] sm:$0xff] %v20115_v51  ;;  %v23335_v35 = vld [vmem:[#allocation101_spill] sm:$0xff]  ;;  %14637 = vset.pattern.permute.xlu1 %v22891_v16  ;;  %v12364_v59 = vld [vmem:[%s22399_s5 + $0x558] sm:$0xff] }
 0x7ca   : > { %v23329_v28 = vld [vmem:[#allocation7_spill] sm:$0xff]  ;;  %v9063_v57 = vadd.f32 %v9031_v0, %v8838_v1  ;;  %v9959_v1 = vadd.f32 %v9927_v56, %v9734_v14  ;;  %v12362_v14 = vld [vmem:[%s22399_s5 + $0x548] sm:$0xff]  ;;  %v9961_v56 = vadd.f32 %v9929_v17, %v9736_v39  ;;  %11007 = vperm.xlu0 %14755, %v18953_v27   ;;  %7642 = vperm.xlu1 %14637, %v19125_v5  }
 0x7cb   : > { %v9930_v25 = vmul.f32 %v12518_v26, %v23329_v28  ;;  %v23330_v62 = vld [vmem:[#allocation83_spill] sm:$0xff]  ;;  %v8391_v58 = vadd.f32 %v8359_v22, %v8166_v54  ;;  %v23333_v26 = vld [vmem:[#allocation141_spill] sm:$0xff]  ;;  %v20134_v28 = vmul.f32 %v12613_v4, %v23335_v35  ;;  %v9257_v4 = vmul.f32 %v12424_v29, %v23338_v47 }
 0x7cc   : > { %v8133_v46 = vmul.f32 %v12265_v21, %v23330_v62  ;;  %v12297_v44 = vld [vmem:[%s22399_s5 + $0x340] sm:$0xff]  ;;  %v9256_v62 = vmul.f32 %v12423_v12, %v23332_v19  ;;  %v8584_v61 = vmul.f32 %v12330_v6, %v23333_v26  ;;  %v20130_v21 = vadd.f32 %v11053_v24, %v10860_v40  ;;  %v12582_v54 = vld [vmem:[%s22399_s5 + $0xc28] sm:$0xff]  ;;  %v12456_v40 = vld [vmem:[%s22399_s5 + $0x838] sm:$0xff] }
 0x7cd   : > { %v12549_v55 = vld [vmem:[%s22399_s5 + $0xb20] sm:$0xff]  ;;  %v23337_v12 = vld [vmem:[#allocation161_spill] sm:$0xff]  ;;  %v9289_v52 = vadd.f32 %v9257_v4, %v9064_v31 }
 0x7ce   : > { %v23336_v51 = vld [vmem:[#allocation71_spill] sm:$0xff]  ;;  %v8165_v24 = vadd.f32 %v8133_v46, %v7940_v34  ;;  %v8358_v6 = vmul.f32 %v12297_v44, %v23337_v12  ;;  %v23340_v0 = vld [vmem:[#allocation17_spill] sm:$0xff]  ;;  %v20159_v34 = vpop.permute.xlu0 %10300  ;;  %v20163_v44 = vadd.f32 %v10152_v3, %v9959_v1  ;;  %v9288_v2 = vadd.f32 %v9256_v62, %v9063_v57  ;;  %v23343_v19 = vld [vmem:[#allocation8_spill] sm:$0xff]  ;;  %11011 = vperm.xlu0 %14755, %v19082_v63  }
 0x7cf   : > { %v20138_v42 = vmul.f32 %v12645_v18, %v23336_v51  ;;  %v10154_v22 = vmul.f32 %v12549_v55, %v23340_v0  ;;  %v12581_v46 = vld [vmem:[%s22399_s5 + $0xc20] sm:$0xff]  ;;  %23341 = vst [vmem:[#allocation23_spill] sm:$0xff] %v20159_v34  ;;  %v20161_v18 = vpop.permute.xlu1 %8532  ;;  %v9962_v51 = vadd.f32 %v9930_v25, %v9737_v9  ;;  %v12614_v29 = vld [vmem:[%s22399_s5 + $0xd28] sm:$0xff]  ;;  %v8616_v55 = vadd.f32 %v8584_v61, %v8391_v58  ;;  %v12487_v3 = vld [vmem:[%s22399_s5 + $0x930] sm:$0xff] }
 0x7d0   : > { %23342 = vst [vmem:[#allocation38_spill] sm:$0xff] %v20161_v18  ;;  %v12329_v39 = vld [vmem:[%s22399_s5 + $0x440] sm:$0xff]  ;;  %v10380_v26 = vmul.f32 %v12582_v54, %v23343_v19  ;;  %v12394_v9 = vld [vmem:[%s22399_s5 + $0x648] sm:$0xff]  ;;  %v12643_v25 = vld [vmem:[%s22399_s5 + $0xe10] sm:$0xff]  ;;  %14639 = vset.pattern.permute.xlu1 %v22893_v36 }
 0x7d1   : > { %v23344_v17 = vld [vmem:[#allocation115_spill] sm:$0xff]  ;;  %v12675_v31 = vld [vmem:[%s22399_s5 + $0xf10] sm:$0xff]  ;;  %v10187_v47 = vadd.f32 %v10155_v33, %v9962_v51  ;;  %v10186_v0 = vadd.f32 %v10154_v22, %v9961_v56  ;;  %v23349_v19 = vld [vmem:[#allocation16_spill] sm:$0xff]  ;;  %8098 = vperm.xlu1 %14639, %v19125_v5  }
 0x7d2   : > { %v9482_v35 = vmul.f32 %v12456_v40, %v23344_v17  ;;  %v23345_v57 = vld [vmem:[#allocation9_spill] sm:$0xff]  ;;  %v23346_v58 = vld [vmem:[#allocation14_spill] sm:$0xff]  ;;  %v8390_v40 = vadd.f32 %v8358_v6, %v8165_v24  ;;  %v23348_v4 = vld [vmem:[#allocation39_spill] sm:$0xff]  ;;  %v8583_v17 = vmul.f32 %v12329_v39, %v23349_v19  ;;  %11015 = vperm.xlu0 %14755, %v19039_v53  }
 0x7d3   : > { %v9481_v62 = vmul.f32 %v12455_v7, %v23345_v57  ;;  %v8809_v61 = vmul.f32 %v12362_v14, %v23346_v58  ;;  %v23347_v1 = vld [vmem:[#allocation105_spill] sm:$0xff]  ;;  %v12488_v12 = vld [vmem:[%s22399_s5 + $0x938] sm:$0xff]  ;;  %v10605_v23 = vmul.f32 %v12614_v29, %v23348_v4  ;;  %v12361_v18 = vld [vmem:[%s22399_s5 + $0x540] sm:$0xff]  ;;  %v20199_v7 = vpop.permute.xlu0 %10304  ;;  %v20212_v39 = vpop.permute.xlu1 %8982 }
 0x7d4   : > { %v10379_v54 = vmul.f32 %v12581_v46, %v23347_v1  ;;  %23350 = vst [vmem:[#allocation53_spill] sm:$0xff] %v20199_v7  ;;  %v12552_v24 = vld [vmem:[%s22399_s5 + $0xb38] sm:$0xff]  ;;  %v12646_v33 = vld [vmem:[%s22399_s5 + $0xe28] sm:$0xff]  ;;  %23353 = vst [vmem:[#allocation25_spill] sm:$0xff] %v20212_v39  ;;  %v9514_v30 = vadd.f32 %v9482_v35, %v9289_v52 }
 0x7d5   : > { %v12616_v6 = vld [vmem:[%s22399_s5 + $0xd38] sm:$0xff]  ;;  %v9513_v14 = vadd.f32 %v9481_v62, %v9288_v2  ;;  %v8841_v46 = vadd.f32 %v8809_v61, %v8616_v55  ;;  %v23354_v57 = vld [vmem:[#allocation104_spill] sm:$0xff]  ;;  %v23355_v1 = vld [vmem:[#allocation73_spill] sm:$0xff]  ;;  %v10412_v2 = vadd.f32 %v10380_v26, %v10187_v47  ;;  %14641 = vset.pattern.permute.xlu1 %v22896_v45 }
 0x7d6   : > { %v23351_v56 = vld [vmem:[#allocation126_spill] sm:$0xff]  ;;  %v23352_v51 = vld [vmem:[#allocation143_spill] sm:$0xff]  ;;  %v20215_v58 = vmul.f32 %v12643_v25, %v23354_v57  ;;  %v20218_v4 = vmul.f32 %v12675_v31, %v23355_v1  ;;  %v12678_v55 = vld [vmem:[%s22399_s5 + $0xf28] sm:$0xff]  ;;  %v8615_v25 = vadd.f32 %v8583_v17, %v8390_v40  ;;  %8548 = vperm.xlu1 %14641, %v19125_v5   ;;  %11019 = vperm.xlu0 %14755, %v19168_v60  }
 0x7d7   : > { %v9706_v22 = vmul.f32 %v12487_v3, %v23351_v56  ;;  %v9034_v29 = vmul.f32 %v12394_v9, %v23352_v51  ;;  %v12648_v19 = vld [vmem:[%s22399_s5 + $0xe38] sm:$0xff]  ;;  %v10411_v3 = vadd.f32 %v10379_v54, %v10186_v0  ;;  %v23357_v35 = vld [vmem:[#allocation76_spill] sm:$0xff]  ;;  %v12519_v40 = vld [vmem:[%s22399_s5 + $0xa30] sm:$0xff]  ;;  %v20250_v51 = vpop.permute.xlu0 %10308 }
 0x7d8   : > { %v12520_v9 = vld [vmem:[%s22399_s5 + $0xa38] sm:$0xff]  ;;  %v9707_v26 = vmul.f32 %v12488_v12, %v23357_v35  ;;  %v23358_v61 = vld [vmem:[#allocation12_spill] sm:$0xff]  ;;  %23361 = vst [vmem:[#allocation88_spill] sm:$0xff] %v20250_v51  ;;  %v12615_v51 = vld [vmem:[%s22399_s5 + $0xd30] sm:$0xff] }
 0x7d9   : > { %v23356_v31 = vld [vmem:[#allocation163_spill] sm:$0xff]  ;;  %v20238_v47 = vmul.f32 %v12552_v24, %v23358_v61  ;;  %v23359_v56 = vld [vmem:[#allocation84_spill] sm:$0xff]  ;;  %v10637_v24 = vadd.f32 %v10605_v23, %v10412_v2  ;;  %v12551_v23 = vld [vmem:[%s22399_s5 + $0xb30] sm:$0xff] }
 0x7da   : > { %v8808_v62 = vmul.f32 %v12361_v18, %v23356_v31  ;;  %v7494_v52 = vld [vmem:[%s22399_s5 + $0x58] sm:$0xff]  ;;  %v20241_v54 = vmul.f32 %v12616_v6, %v23359_v56  ;;  %v23360_v0 = vld [vmem:[#allocation80_spill] sm:$0xff]  ;;  %v9738_v31 = vadd.f32 %v9706_v22, %v9513_v14  ;;  %v20274_v22 = vpop.permute.xlu1 %9432  ;;  %14643 = vset.pattern.permute.xlu1 %v22900_v50  ;;  %11023 = vperm.xlu0 %14755, %v19125_v5  }
 0x7db   : > { %v10830_v18 = vmul.f32 %v12646_v33, %v23360_v0  ;;  %v12426_v17 = vld [vmem:[%s22399_s5 + $0x748] sm:$0xff]  ;;  %v12393_v6 = vld [vmem:[%s22399_s5 + $0x640] sm:$0xff]  ;;  %v12236_v1 = vld [vmem:[%s22399_s5 + $0x158] sm:$0xff]  ;;  %v9066_v33 = vadd.f32 %v9034_v29, %v8841_v46  ;;  %v9739_v0 = vadd.f32 %v9707_v26, %v9514_v30  ;;  %23367 = vst [vmem:[#allocation51_spill] sm:$0xff] %v20274_v22  ;;  %v10636_v26 = vadd.f32 %v20134_v28, %v10411_v3  ;;  %v20292_v22 = vpop.permute.xlu0 %10312 }
 0x7dc   : > { %v23362_v57 = vld [vmem:[#allocation32_spill] sm:$0xff]  ;;  %v12268_v35 = vld [vmem:[%s22399_s5 + $0x258] sm:$0xff]  ;;  %v23369_v30 = vld [vmem:[#allocation37_spill] sm:$0xff]  ;;  %23373 = vst [vmem:[#allocation36_spill] sm:$0xff] %v20292_v22  ;;  %8998 = vperm.xlu1 %14643, %v19125_v5  }
 0x7dd   : > { %v20253_v12 = vmul.f32 %v12648_v19, %v23362_v57  ;;  %v23364_v61 = vld [vmem:[#allocation11_spill] sm:$0xff]  ;;  %v23365_v19 = vld [vmem:[#allocation117_spill] sm:$0xff]  ;;  %v23366_v39 = vld [vmem:[#allocation180_spill] sm:$0xff] }
 0x7de   : > { %v11055_v56 = vmul.f32 %v12678_v55, %v23364_v61  ;;  %v9932_v57 = vmul.f32 %v12520_v9, %v23365_v19  ;;  %v12458_v2 = vld [vmem:[%s22399_s5 + $0x848] sm:$0xff]  ;;  %v7686_v14 = vmul.f32 %v23366_v39, %v7494_v52  ;;  %v23368_v46 = vld [vmem:[#allocation87_spill] sm:$0xff]  ;;  %v9259_v55 = vmul.f32 %v12426_v17, %v23369_v30  ;;  %v23370_v39 = vld [vmem:[#allocation106_spill] sm:$0xff]  ;;  %11027 = vperm.xlu0 %14755, %v19254_v43  }
 0x7df   : > { %23363 = vst [vmem:[#allocation97_spill] sm:$0xff] %v20253_v12  ;;  %v9931_v29 = vmul.f32 %v12519_v40, %v23368_v46  ;;  %v12490_v9 = vld [vmem:[%s22399_s5 + $0x948] sm:$0xff]  ;;  %v8840_v61 = vadd.f32 %v8808_v62, %v8615_v25  ;;  %v10862_v19 = vadd.f32 %v10830_v18, %v10637_v24  ;;  %v9033_v52 = vmul.f32 %v12393_v6, %v23370_v39  ;;  %v12583_v40 = vld [vmem:[%s22399_s5 + $0xc30] sm:$0xff]  ;;  %v12425_v17 = vld [vmem:[%s22399_s5 + $0x740] sm:$0xff] }
 0x7e0   : > { %v23371_v63 = vld [vmem:[#allocation112_spill] sm:$0xff]  ;;  %v23372_v46 = vld [vmem:[#allocation182_spill] sm:$0xff]  ;;  %v9291_v24 = vadd.f32 %v9259_v55, %v9066_v33  ;;  %v23375_v6 = vld [vmem:[#allocation145_spill] sm:$0xff]  ;;  %v9964_v22 = vadd.f32 %v9932_v57, %v9739_v0  ;;  %14645 = vset.pattern.permute.xlu1 %v22903_v13 }
 0x7e1   : > { %v7911_v27 = vmul.f32 %v12236_v1, %v23371_v63  ;;  %v8136_v30 = vmul.f32 %v12268_v35, %v23372_v46  ;;  %v12457_v28 = vld [vmem:[%s22399_s5 + $0x840] sm:$0xff]  ;;  %v12300_v3 = vld [vmem:[%s22399_s5 + $0x358] sm:$0xff]  ;;  %v9963_v25 = vadd.f32 %v9931_v29, %v9738_v31  ;;  %v9484_v1 = vmul.f32 %v12458_v2, %v23375_v6  ;;  %v23378_v29 = vld [vmem:[#allocation165_spill] sm:$0xff]  ;;  %9448 = vperm.xlu1 %14645, %v19125_v5  }
 0x7e2   : > { %v12521_v63 = vld [vmem:[%s22399_s5 + $0xa40] sm:$0xff]  ;;  %v20306_v35 = vadd.f32 %v11055_v56, %v10862_v19  ;;  %v23376_v39 = vld [vmem:[#allocation82_spill] sm:$0xff]  ;;  %v9065_v2 = vadd.f32 %v9033_v52, %v8840_v61  ;;  %v9258_v0 = vmul.f32 %v12425_v17, %v23378_v29  ;;  %v20343_v17 = vpop.permute.xlu0 %10316  ;;  %11035 = vperm.xlu0 %14755, %v19340_v10  }
 0x7e3   : > { %v23374_v62 = vld [vmem:[#allocation128_spill] sm:$0xff]  ;;  %v9709_v46 = vmul.f32 %v12490_v9, %v23376_v39  ;;  %v7943_v7 = vadd.f32 %v7911_v27, %v7686_v14  ;;  %v12428_v31 = vld [vmem:[%s22399_s5 + $0x758] sm:$0xff]  ;;  %v12235_v57 = vld [vmem:[%s22399_s5 + $0x150] sm:$0xff]  ;;  %v20327_v27 = vpop.permute.xlu1 %9882  ;;  %v20330_v14 = vadd.f32 %v20138_v42, %v10636_v26  ;;  %23383 = vst [vmem:[#allocation60_spill] sm:$0xff] %v20343_v17 }
 0x7e4   : > { %v10156_v18 = vmul.f32 %v12551_v23, %v23374_v62  ;;  %v12492_v33 = vld [vmem:[%s22399_s5 + $0x958] sm:$0xff]  ;;  %23379 = vst [vmem:[#allocation103_spill] sm:$0xff] %v20327_v27  ;;  %v23380_v55 = vld [vmem:[#allocation108_spill] sm:$0xff]  ;;  %v7493_v61 = vld [vmem:[%s22399_s5 + $0x50] sm:$0xff]  ;;  %v9290_v53 = vadd.f32 %v9258_v0, %v9065_v2 }
 0x7e5   : > { %v23377_v56 = vld [vmem:[#allocation130_spill] sm:$0xff]  ;;  %v9483_v9 = vmul.f32 %v12457_v28, %v23380_v55  ;;  %v23384_v42 = vld [vmem:[#allocation116_spill] sm:$0xff]  ;;  %v9516_v55 = vadd.f32 %v9484_v1, %v9291_v24  ;;  %v20374_v24 = vadd.f32 %v20238_v47, %v9964_v22  ;;  %v23389_v1 = vld [vmem:[#allocation121_spill] sm:$0xff]  ;;  %14648 = vset.pattern.permute.xlu1 %v22918_v48 }
 0x7e6   : > { %v10381_v23 = vmul.f32 %v12583_v40, %v23377_v56  ;;  %v23381_v19 = vld [vmem:[#allocation110_spill] sm:$0xff]  ;;  %v8168_v40 = vadd.f32 %v8136_v30, %v7943_v7  ;;  %v20347_v26 = vmul.f32 %v12364_v59, %v23384_v42  ;;  %v23385_v56 = vld [vmem:[#allocation132_spill] sm:$0xff]  ;;  %v23392_v47 = vld [vmem:[#allocation125_spill] sm:$0xff]  ;;  %7869 = vperm.xlu1 %14648, %v19168_v60   ;;  %11039 = vperm.xlu0 %14755, %v19297_v32  }
 0x7e7   : > { %v20334_v62 = vmul.f32 %v12521_v63, %v23381_v19  ;;  %v23382_v6 = vld [vmem:[#allocation114_spill] sm:$0xff]  ;;  %v10606_v29 = vmul.f32 %v12615_v51, %v23385_v56  ;;  %v23387_v19 = vld [vmem:[#allocation119_spill] sm:$0xff]  ;;  %v12522_v51 = vld [vmem:[%s22399_s5 + $0xa48] sm:$0xff] }
 0x7e8   : > { %v8361_v39 = vmul.f32 %v12300_v3, %v23382_v6  ;;  %v12647_v52 = vld [vmem:[%s22399_s5 + $0xe30] sm:$0xff]  ;;  %v10188_v3 = vadd.f32 %v10156_v18, %v9963_v25  ;;  %v12332_v7 = vld [vmem:[%s22399_s5 + $0x458] sm:$0xff]  ;;  %v20364_v6 = vmul.f32 %v12492_v33, %v23387_v19  ;;  %v23393_v34 = vld [vmem:[#allocation184_spill] sm:$0xff] }
 0x7e9   : > { %v12267_v28 = vld [vmem:[%s22399_s5 + $0x250] sm:$0xff]  ;;  %v8586_v12 = vmul.f32 %v12332_v7, %v23393_v34  ;;  %v12554_v34 = vld [vmem:[%s22399_s5 + $0xb48] sm:$0xff]  ;;  %v12301_v5 = vld [vmem:[%s22399_s5 + $0x360] sm:$0xff] }
 0x7ea   : > { %v12331_v63 = vld [vmem:[%s22399_s5 + $0x450] sm:$0xff]  ;;  %v8393_v17 = vadd.f32 %v8361_v39, %v8168_v40  ;;  %v20414_v40 = vsel %vm11114_vm4, %v20130_v21, 0.0  ;;  %v23401_v21 = vld [vmem:[#allocation131_spill] sm:$0xff]  ;;  %14650 = vset.pattern.permute.xlu1 %v22921_v41 }
 0x7eb   : > { %v23386_v59 = vld [vmem:[#allocation118_spill] sm:$0xff]  ;;  %v20387_v22 = vmul.f32 %v12331_v63, %v23392_v47  ;;  %v23396_v63 = vld [vmem:[#allocation136_spill] sm:$0xff]  ;;  %23398 = vst [vmem:[#allocation99_spill] sm:$0xff] %v20414_v40  ;;  %8319 = vperm.xlu1 %14650, %v19168_v60  }
 0x7ec   : > { %v20361_v30 = vmul.f32 %v12428_v31, %v23386_v59  ;;  %v12679_v42 = vld [vmem:[%s22399_s5 + $0xf30] sm:$0xff]  ;;  %v7685_v31 = vmul.f32 %v23389_v1, %v7493_v61  ;;  %v10413_v59 = vadd.f32 %v10381_v23, %v10188_v3  ;;  %v12489_v1 = vld [vmem:[%s22399_s5 + $0x940] sm:$0xff]  ;;  %v20396_v23 = vpop.permute.xlu0 %10320 }
 0x7ed   : > { %v23388_v25 = vld [vmem:[#allocation202_spill] sm:$0xff]  ;;  %23394 = vst [vmem:[#allocation28_spill] sm:$0xff] %v20396_v23  ;;  %v11056_v3 = vmul.f32 %v12679_v42, %v23396_v63  ;;  %v12681_v32 = vld [vmem:[%s22399_s5 + $0xf40] sm:$0xff] }
 0x7ee   : > { %v7910_v18 = vmul.f32 %v12235_v57, %v23388_v25  ;;  %v12395_v33 = vld [vmem:[%s22399_s5 + $0x650] sm:$0xff]  ;;  %v23391_v57 = vld [vmem:[#allocation123_spill] sm:$0xff]  ;;  %v10638_v2 = vadd.f32 %v10606_v29, %v10413_v59 }
 0x7ef   : > { %v12459_v56 = vld [vmem:[%s22399_s5 + $0x850] sm:$0xff]  ;;  %v8135_v25 = vmul.f32 %v12267_v28, %v23391_v57  ;;  %v23397_v57 = vld [vmem:[#allocation147_spill] sm:$0xff]  ;;  %14652 = vset.pattern.permute.xlu1 %v22924_v20 }
 0x7f0   : > { %v23390_v19 = vld [vmem:[#allocation134_spill] sm:$0xff]  ;;  %v9934_v39 = vmul.f32 %v12522_v51, %v23397_v57  ;;  %v23399_v29 = vld [vmem:[#allocation127_spill] sm:$0xff]  ;;  %v23400_v59 = vld [vmem:[#allocation129_spill] sm:$0xff]  ;;  %v7942_v42 = vadd.f32 %v7910_v18, %v7685_v31  ;;  %v9515_v31 = vadd.f32 %v9483_v9, %v9290_v53  ;;  %v8618_v9 = vadd.f32 %v8586_v12, %v8393_v17  ;;  %8769 = vperm.xlu1 %14652, %v19168_v60  }
 0x7f1   : > { %v10831_v27 = vmul.f32 %v12647_v52, %v23390_v19  ;;  %v12523_v61 = vld [vmem:[%s22399_s5 + $0xa50] sm:$0xff]  ;;  %v20398_v52 = vpop.permute.xlu1 %10107  ;;  %v9741_v19 = vadd.f32 %v9709_v46, %v9516_v55  ;;  %v20417_v7 = vmul.f32 %v12395_v33, %v23399_v29  ;;  %v20420_v47 = vmul.f32 %v12459_v56, %v23400_v59  ;;  %v7496_v46 = vld [vmem:[%s22399_s5 + $0x68] sm:$0xff]  ;;  %v12237_v55 = vld [vmem:[%s22399_s5 + $0x160] sm:$0xff] }
 0x7f2   : > { %23395 = vst [vmem:[#allocation22_spill] sm:$0xff] %v20398_v52  ;;  %v12555_v0 = vld [vmem:[%s22399_s5 + $0xb50] sm:$0xff]  ;;  %v20431_v51 = vmul.f32 %v12523_v61, %v23401_v21  ;;  %v12586_v18 = vld [vmem:[%s22399_s5 + $0xc48] sm:$0xff]  ;;  %v23402_v56 = vld [vmem:[#allocation167_spill] sm:$0xff] }
 0x7f3   : > { %v12619_v28 = vld [vmem:[%s22399_s5 + $0xd50] sm:$0xff]  ;;  %v10863_v33 = vadd.f32 %v10831_v27, %v10638_v2  ;;  %v9708_v63 = vmul.f32 %v12489_v1, %v23402_v56  ;;  %v23404_v52 = vld [vmem:[#allocation135_spill] sm:$0xff]  ;;  %v12238_v27 = vld [vmem:[%s22399_s5 + $0x168] sm:$0xff] }
 0x7f4   : > { %v12299_v57 = vld [vmem:[%s22399_s5 + $0x350] sm:$0xff]  ;;  %v20444_v23 = vmul.f32 %v12619_v28, %v23404_v52  ;;  %v7495_v53 = vld [vmem:[%s22399_s5 + $0x60] sm:$0xff]  ;;  %v12270_v1 = vld [vmem:[%s22399_s5 + $0x268] sm:$0xff]  ;;  %v9966_v52 = vadd.f32 %v9934_v39, %v9741_v19  ;;  %14654 = vset.pattern.permute.xlu1 %v22870_v15 }
 0x7f5   : > { %v23403_v29 = vld [vmem:[#allocation133_spill] sm:$0xff]  ;;  %v11088_v21 = vadd.f32 %v11056_v3, %v10863_v33  ;;  %v20466_v17 = vpop.permute.xlu1 %7853  ;;  %v23412_v19 = vld [vmem:[#allocation151_spill] sm:$0xff]  ;;  %v8167_v33 = vadd.f32 %v8135_v25, %v7942_v42  ;;  %v23463_v20 = vld [vmem:[#allocation166_spill] sm:$0xff]  ;;  %9219 = vperm.xlu1 %14654, %v19168_v60  }
 0x7f6   : > { %v20441_v59 = vmul.f32 %v12555_v0, %v23403_v29  ;;  %23405 = vst [vmem:[#allocation56_spill] sm:$0xff] %v20444_v23  ;;  %v23406_v61 = vld [vmem:[#allocation149_spill] sm:$0xff]  ;;  %v20456_v0 = vpop.permute.xlu0 %10324  ;;  %23410 = vst [vmem:[#allocation78_spill] sm:$0xff] %v20466_v17  ;;  %v20470_v23 = vsel %vm11114_vm4, %v20306_v35, 0.0  ;;  %v10384_v39 = vmul.f32 %v12586_v18, %v23412_v19  ;;  %v9740_v18 = vadd.f32 %v9708_v63, %v9515_v31  ;;  %v23416_v25 = vld [vmem:[#allocation215_spill] sm:$0xff] }
 0x7f7   : > { %v10159_v2 = vmul.f32 %v12554_v34, %v23406_v61  ;;  %23407 = vst [vmem:[#allocation61_spill] sm:$0xff] %v20456_v0  ;;  %v12618_v28 = vld [vmem:[%s22399_s5 + $0xd48] sm:$0xff]  ;;  %v12396_v34 = vld [vmem:[%s22399_s5 + $0x658] sm:$0xff]  ;;  %23411 = vst [vmem:[#allocation90_spill] sm:$0xff] %v20470_v23  ;;  %v8138_v42 = vmul.f32 %v12270_v1, %v23416_v25  ;;  %v20501_v63 = vsel %vm11114_vm4, %v11088_v21, 0.0 }
 0x7f8   : > { %v23408_v56 = vld [vmem:[#allocation213_spill] sm:$0xff]  ;;  %v23409_v61 = vld [vmem:[#allocation231_spill] sm:$0xff]  ;;  %v23413_v0 = vld [vmem:[#allocation204_spill] sm:$0xff]  ;;  %23420 = vst [vmem:[#allocation95_spill] sm:$0xff] %v20501_v63 }
 0x7f9   : > { %v7688_v29 = vmul.f32 %v23408_v56, %v7496_v46  ;;  %v7912_v12 = vmul.f32 %v12237_v55, %v23409_v61  ;;  %v12651_v3 = vld [vmem:[%s22399_s5 + $0xe50] sm:$0xff]  ;;  %v8360_v40 = vmul.f32 %v12299_v57, %v23413_v0  ;;  %v12302_v35 = vld [vmem:[%s22399_s5 + $0x368] sm:$0xff]  ;;  %v10191_v57 = vadd.f32 %v10159_v2, %v9966_v52  ;;  %v7499_v15 = vld [vmem:[%s22399_s5 + $0x80] sm:$0xff]  ;;  %14656 = vset.pattern.permute.xlu1 %v22890_v49 }
 0x7fa   : > { %v23414_v46 = vld [vmem:[#allocation138_spill] sm:$0xff]  ;;  %v12650_v17 = vld [vmem:[%s22399_s5 + $0xe48] sm:$0xff]  ;;  %v20498_v31 = vpop.permute.xlu0 %10328  ;;  %9669 = vperm.xlu1 %14656, %v19168_v60   ;;  %v23499_v49 = vld [vmem:[#allocation239_spill] sm:$0xff] }
 0x7fb   : > { %v7913_v55 = vmul.f32 %v12238_v27, %v23414_v46  ;;  %v23415_v56 = vld [vmem:[#allocation150_spill] sm:$0xff]  ;;  %v12269_v27 = vld [vmem:[%s22399_s5 + $0x260] sm:$0xff]  ;;  %v23417_v0 = vld [vmem:[#allocation153_spill] sm:$0xff]  ;;  %v8843_v46 = vadd.f32 %v20347_v26, %v8618_v9  ;;  %23419 = vst [vmem:[#allocation107_spill] sm:$0xff] %v20498_v31  ;;  %v8392_v31 = vadd.f32 %v8360_v40, %v8167_v33 }
 0x7fc   : > { %v7687_v61 = vmul.f32 %v23415_v56, %v7495_v53  ;;  %v10609_v19 = vmul.f32 %v12618_v28, %v23417_v0  ;;  %v12553_v53 = vld [vmem:[%s22399_s5 + $0xb40] sm:$0xff]  ;;  %v23421_v2 = vld [vmem:[#allocation137_spill] sm:$0xff]  ;;  %v10416_v0 = vadd.f32 %v10384_v39, %v10191_v57  ;;  %v23428_v57 = vld [vmem:[#allocation142_spill] sm:$0xff] }
 0x7fd   : > { %v23418_v56 = vld [vmem:[#allocation187_spill] sm:$0xff]  ;;  %v20504_v1 = vmul.f32 %v12651_v3, %v23421_v2  ;;  %v12366_v52 = vld [vmem:[%s22399_s5 + $0x568] sm:$0xff]  ;;  %v7945_v25 = vadd.f32 %v7913_v55, %v7688_v29  ;;  %v20524_v29 = vpop.permute.xlu1 %8303  ;;  %v12363_v40 = vld [vmem:[%s22399_s5 + $0x550] sm:$0xff] }
 0x7fe   : > { %v9036_v43 = vmul.f32 %v12396_v34, %v23418_v56  ;;  %v12682_v28 = vld [vmem:[%s22399_s5 + $0xf48] sm:$0xff]  ;;  %v7944_v26 = vadd.f32 %v7912_v12, %v7687_v61  ;;  %v23424_v56 = vld [vmem:[#allocation155_spill] sm:$0xff]  ;;  %23425 = vst [vmem:[#allocation50_spill] sm:$0xff] %v20524_v29  ;;  %14657 = vset.pattern.permute.xlu1 %v22906_v8 }
 0x7ff   : > { %23422 = vst [vmem:[#allocation64_spill] sm:$0xff] %v20504_v1  ;;  %v23423_v9 = vld [vmem:[#allocation140_spill] sm:$0xff]  ;;  %v10834_v3 = vmul.f32 %v12650_v17, %v23424_v56  ;;  %v9965_v17 = vadd.f32 %v20334_v62, %v9740_v18  ;;  %v8170_v33 = vadd.f32 %v8138_v42, %v7945_v25  ;;  %v10641_v56 = vadd.f32 %v10609_v19, %v10416_v0  ;;  %v23429_v29 = vld [vmem:[#allocation157_spill] sm:$0xff] }
 0x800   : > { %v8363_v34 = vmul.f32 %v12302_v35, %v23423_v9  ;;  %v12430_v21 = vld [vmem:[%s22399_s5 + $0x768] sm:$0xff]  ;;  %v12585_v2 = vld [vmem:[%s22399_s5 + $0xc40] sm:$0xff]  ;;  %v20537_v9 = vmul.f32 %v12366_v52, %v23428_v57  ;;  %v11059_v10 = vmul.f32 %v12682_v28, %v23429_v29  ;;  %v9068_v62 = vadd.f32 %v9036_v43, %v8843_v46  ;;  %v12460_v43 = vld [vmem:[%s22399_s5 + $0x858] sm:$0xff]  ;;  %9894 = vperm.xlu1 %14657, %v19168_v60  }
 0x801   : > { %v12494_v12 = vld [vmem:[%s22399_s5 + $0x968] sm:$0xff]  ;;  %v23432_v52 = vld [vmem:[#allocation171_spill] sm:$0xff]  ;;  %v10866_v57 = vadd.f32 %v10834_v3, %v10641_v56 }
 0x802   : > { %v23426_v39 = vld [vmem:[#allocation152_spill] sm:$0xff]  ;;  %v23427_v35 = vld [vmem:[#allocation169_spill] sm:$0xff]  ;;  %v10383_v28 = vmul.f32 %v12585_v2, %v23432_v52  ;;  %v7498_v2 = vld [vmem:[%s22399_s5 + $0x78] sm:$0xff]  ;;  %v9293_v63 = vadd.f32 %v20361_v30, %v9068_v62 }
 0x803   : > { %v8137_v55 = vmul.f32 %v12269_v27, %v23426_v39  ;;  %v10158_v61 = vmul.f32 %v12553_v53, %v23427_v35  ;;  %v12617_v27 = vld [vmem:[%s22399_s5 + $0xd40] sm:$0xff]  ;;  %v12334_v18 = vld [vmem:[%s22399_s5 + $0x468] sm:$0xff]  ;;  %v20546_v53 = vpop.permute.xlu0 %10332  ;;  %v23434_v39 = vld [vmem:[#allocation146_spill] sm:$0xff] }
 0x804   : > { %23430 = vst [vmem:[#allocation58_spill] sm:$0xff] %v20546_v53  ;;  %v23431_v42 = vld [vmem:[#allocation144_spill] sm:$0xff]  ;;  %v23433_v0 = vld [vmem:[#allocation233_spill] sm:$0xff]  ;;  %v20561_v35 = vmul.f32 %v12494_v12, %v23434_v39  ;;  %v23435_v53 = vld [vmem:[#allocation206_spill] sm:$0xff]  ;;  %v11091_v39 = vadd.f32 %v11059_v10, %v10866_v57  ;;  %14658 = vset.pattern.permute.xlu1 %v22891_v16 }
 0x805   : > { %v20550_v25 = vmul.f32 %v12430_v21, %v23431_v42  ;;  %v12558_v19 = vld [vmem:[%s22399_s5 + $0xb68] sm:$0xff]  ;;  %v8169_v46 = vadd.f32 %v8137_v55, %v7944_v26  ;;  %v8362_v29 = vmul.f32 %v12301_v5, %v23433_v0  ;;  %v12649_v21 = vld [vmem:[%s22399_s5 + $0xe40] sm:$0xff]  ;;  %v8617_v42 = vadd.f32 %v20387_v22, %v8392_v31  ;;  %v12240_v22 = vld [vmem:[%s22399_s5 + $0x178] sm:$0xff] }
 0x806   : > { %v8810_v1 = vmul.f32 %v12363_v40, %v23435_v53  ;;  %v12333_v5 = vld [vmem:[%s22399_s5 + $0x460] sm:$0xff]  ;;  %v10190_v31 = vadd.f32 %v10158_v61, %v9965_v17  ;;  %v23436_v3 = vld [vmem:[#allocation173_spill] sm:$0xff]  ;;  %v8395_v55 = vadd.f32 %v8363_v34, %v8170_v33  ;;  %v20583_v53 = vpop.permute.xlu1 %8753  ;;  %v12272_v34 = vld [vmem:[%s22399_s5 + $0x278] sm:$0xff] }
 0x807   : > { %v12397_v26 = vld [vmem:[%s22399_s5 + $0x660] sm:$0xff]  ;;  %v10608_v12 = vmul.f32 %v12617_v27, %v23436_v3  ;;  %v23437_v40 = vld [vmem:[#allocation217_spill] sm:$0xff]  ;;  %23438 = vst [vmem:[#allocation31_spill] sm:$0xff] %v20583_v53  ;;  %v20596_v17 = vpop.permute.xlu0 %10336  ;;  %v23444_v62 = vld [vmem:[#allocation154_spill] sm:$0xff] }
 0x808   : > { %v8588_v56 = vmul.f32 %v12334_v18, %v23437_v40  ;;  %v23439_v52 = vld [vmem:[#allocation148_spill] sm:$0xff]  ;;  %v23440_v23 = vld [vmem:[#allocation189_spill] sm:$0xff]  ;;  %23441 = vst [vmem:[#allocation109_spill] sm:$0xff] %v20596_v17  ;;  %v10415_v61 = vadd.f32 %v10383_v28, %v10190_v31  ;;  %v8394_v18 = vadd.f32 %v8362_v29, %v8169_v46  ;;  %v23446_v40 = vld [vmem:[#allocation162_spill] sm:$0xff]  ;;  %v8842_v17 = vadd.f32 %v8810_v1, %v8617_v42 }
 0x809   : > { %v20586_v0 = vmul.f32 %v12558_v19, %v23439_v52  ;;  %v9486_v48 = vmul.f32 %v12460_v43, %v23440_v23  ;;  %v12461_v10 = vld [vmem:[%s22399_s5 + $0x860] sm:$0xff]  ;;  %v23443_v19 = vld [vmem:[#allocation250_spill] sm:$0xff]  ;;  %v8587_v43 = vmul.f32 %v12333_v5, %v23444_v62  ;;  %v7915_v52 = vmul.f32 %v12240_v22, %v23446_v40  ;;  %v23449_v22 = vld [vmem:[#allocation253_spill] sm:$0xff] }
 0x80a   : > { %v23442_v33 = vld [vmem:[#allocation176_spill] sm:$0xff]  ;;  %v7690_v30 = vmul.f32 %v23443_v19, %v7498_v2  ;;  %v12239_v23 = vld [vmem:[%s22399_s5 + $0x170] sm:$0xff]  ;;  %v23447_v46 = vld [vmem:[#allocation295_spill] sm:$0xff]  ;;  %v10640_v2 = vadd.f32 %v10608_v12, %v10415_v61  ;;  %v8620_v42 = vadd.f32 %v8588_v56, %v8395_v55  ;;  %v8140_v31 = vmul.f32 %v12272_v34, %v23449_v22 }
 0x80b   : > { %v10833_v27 = vmul.f32 %v12649_v21, %v23442_v33  ;;  %v23445_v57 = vld [vmem:[#allocation156_spill] sm:$0xff]  ;;  %11043 = vperm.xlu0 %14755, %v23447_v46   ;;  %v7497_v21 = vld [vmem:[%s22399_s5 + $0x70] sm:$0xff]  ;;  %v20629_v33 = vsel %vm11114_vm4, %v11091_v39, 0.0  ;;  %v20638_v40 = vpop.permute.xlu0 %10340  ;;  %v12304_v55 = vld [vmem:[%s22399_s5 + $0x378] sm:$0xff] }
 0x80c   : > { %v20610_v3 = vmul.f32 %v12397_v26, %v23445_v57  ;;  %v12365_v28 = vld [vmem:[%s22399_s5 + $0x560] sm:$0xff]  ;;  %v23448_v5 = vld [vmem:[#allocation178_spill] sm:$0xff]  ;;  %23450 = vst [vmem:[#allocation100_spill] sm:$0xff] %v20629_v33  ;;  %v9518_v57 = vadd.f32 %v9486_v48, %v9293_v63  ;;  %v12398_v12 = vld [vmem:[%s22399_s5 + $0x668] sm:$0xff]  ;;  %v8619_v48 = vadd.f32 %v8587_v43, %v8394_v18 }
 0x80d   : > { %v12525_v29 = vld [vmem:[%s22399_s5 + $0xa60] sm:$0xff]  ;;  %v11058_v26 = vmul.f32 %v12681_v32, %v23448_v5  ;;  %v12427_v1 = vld [vmem:[%s22399_s5 + $0x750] sm:$0xff]  ;;  %23453 = vst [vmem:[#allocation6_spill] sm:$0xff] %v20638_v40  ;;  %v20640_v5 = vpop.permute.xlu1 %9203  ;;  %v10865_v56 = vadd.f32 %v10833_v27, %v10640_v2  ;;  %v12524_v39 = vld [vmem:[%s22399_s5 + $0xa58] sm:$0xff] }
 0x80e   : > { %v23451_v19 = vld [vmem:[#allocation158_spill] sm:$0xff]  ;;  %23454 = vst [vmem:[#allocation33_spill] sm:$0xff] %v20640_v5  ;;  %v23455_v63 = vld [vmem:[#allocation235_spill] sm:$0xff]  ;;  %v23457_v43 = vld [vmem:[#allocation172_spill] sm:$0xff]  ;;  %v9743_v40 = vadd.f32 %v20364_v6, %v9518_v57 }
 0x80f   : > { %v20632_v62 = vmul.f32 %v12461_v10, %v23451_v19  ;;  %v23452_v61 = vld [vmem:[#allocation270_spill] sm:$0xff]  ;;  %v8812_v34 = vmul.f32 %v12365_v28, %v23455_v63  ;;  %v7947_v10 = vadd.f32 %v7915_v52, %v7690_v30  ;;  %v7689_v28 = vmul.f32 %v23457_v43, %v7497_v21  ;;  %v23458_v52 = vld [vmem:[#allocation209_spill] sm:$0xff]  ;;  %v23460_v43 = vld [vmem:[#allocation164_spill] sm:$0xff] }
 0x810   : > { %v7914_v32 = vmul.f32 %v12239_v23, %v23452_v61  ;;  %v23456_v23 = vld [vmem:[#allocation160_spill] sm:$0xff]  ;;  %v12368_v19 = vld [vmem:[%s22399_s5 + $0x578] sm:$0xff]  ;;  %v9067_v30 = vadd.f32 %v20417_v7, %v8842_v17  ;;  %v9260_v2 = vmul.f32 %v12427_v1, %v23458_v52  ;;  %v12335_v61 = vld [vmem:[%s22399_s5 + $0x470] sm:$0xff]  ;;  %v11090_v63 = vadd.f32 %v11058_v26, %v10865_v56  ;;  %v20683_v56 = vpop.permute.xlu0 %10344 }
 0x811   : > { %v20651_v22 = vmul.f32 %v12525_v29, %v23456_v23  ;;  %v12432_v27 = vld [vmem:[%s22399_s5 + $0x778] sm:$0xff]  ;;  %v12271_v29 = vld [vmem:[%s22399_s5 + $0x270] sm:$0xff]  ;;  %v8845_v21 = vadd.f32 %v20537_v9, %v8620_v42  ;;  %v23459_v7 = vld [vmem:[#allocation220_spill] sm:$0xff]  ;;  %v8172_v1 = vadd.f32 %v8140_v31, %v7947_v10  ;;  %v8365_v52 = vmul.f32 %v12304_v55, %v23460_v43  ;;  %23462 = vst [vmem:[#allocation120_spill] sm:$0xff] %v20683_v56 }
 0x812   : > { %v12496_v18 = vld [vmem:[%s22399_s5 + $0x978] sm:$0xff]  ;;  %v9038_v17 = vmul.f32 %v12398_v12, %v23459_v7  ;;  %v7946_v26 = vadd.f32 %v7914_v32, %v7689_v28  ;;  %v20686_v33 = vmul.f32 %v12368_v19, %v23463_v20  ;;  %v23464_v9 = vld [vmem:[#allocation168_spill] sm:$0xff]  ;;  %v8844_v57 = vadd.f32 %v8812_v34, %v8619_v48  ;;  %v12303_v32 = vld [vmem:[%s22399_s5 + $0x370] sm:$0xff] }
 0x813   : > { %v12556_v23 = vld [vmem:[%s22399_s5 + $0xb58] sm:$0xff]  ;;  %v20689_v42 = vmul.f32 %v12432_v27, %v23464_v9  ;;  %v12399_v19 = vld [vmem:[%s22399_s5 + $0x670] sm:$0xff]  ;;  %v12429_v28 = vld [vmem:[%s22399_s5 + $0x760] sm:$0xff] }
 0x814   : > { %v23461_v5 = vld [vmem:[#allocation191_spill] sm:$0xff]  ;;  %v23465_v31 = vld [vmem:[#allocation170_spill] sm:$0xff]  ;;  %v23469_v48 = vld [vmem:[#allocation193_spill] sm:$0xff]  ;;  %v9070_v43 = vadd.f32 %v9038_v17, %v8845_v21  ;;  %v20736_v21 = vpop.permute.xlu0 %10348 }
 0x815   : > { %v9936_v53 = vmul.f32 %v12524_v39, %v23461_v5  ;;  %v12336_v46 = vld [vmem:[%s22399_s5 + $0x478] sm:$0xff]  ;;  %v20692_v12 = vmul.f32 %v12496_v18, %v23465_v31  ;;  %v20700_v5 = vpop.permute.xlu1 %9653  ;;  %v23468_v39 = vld [vmem:[#allocation177_spill] sm:$0xff]  ;;  %v10161_v34 = vmul.f32 %v12556_v23, %v23469_v48  ;;  %v9292_v18 = vadd.f32 %v9260_v2, %v9067_v30  ;;  %v23473_v56 = vld [vmem:[#allocation272_spill] sm:$0xff]  ;;  %23474 = vst [vmem:[#allocation54_spill] sm:$0xff] %v20736_v21 }
 0x816   : > { %v12588_v6 = vld [vmem:[%s22399_s5 + $0xc58] sm:$0xff]  ;;  %23466 = vst [vmem:[#allocation67_spill] sm:$0xff] %v20700_v5  ;;  %v20704_v10 = vmul.f32 %v12335_v61, %v23468_v39  ;;  %v12463_v27 = vld [vmem:[%s22399_s5 + $0x870] sm:$0xff]  ;;  %v8397_v23 = vadd.f32 %v8365_v52, %v8172_v1  ;;  %v12462_v39 = vld [vmem:[%s22399_s5 + $0x868] sm:$0xff]  ;;  %v8364_v5 = vmul.f32 %v12303_v32, %v23473_v56 }
 0x817   : > { %v23467_v55 = vld [vmem:[#allocation175_spill] sm:$0xff]  ;;  %v12491_v7 = vld [vmem:[%s22399_s5 + $0x950] sm:$0xff]  ;;  %v12306_v32 = vld [vmem:[%s22399_s5 + $0x388] sm:$0xff] }
 0x818   : > { %v8139_v20 = vmul.f32 %v12271_v29, %v23467_v55  ;;  %v20718_v29 = vsel %vm11114_vm4, %v11090_v63, 0.0  ;;  %v12620_v61 = vld [vmem:[%s22399_s5 + $0xd58] sm:$0xff]  ;;  %v12527_v9 = vld [vmem:[%s22399_s5 + $0xa70] sm:$0xff]  ;;  %v9968_v63 = vadd.f32 %v9936_v53, %v9743_v40  ;;  %v12242_v53 = vld [vmem:[%s22399_s5 + $0x188] sm:$0xff] }
 0x819   : > { %23470 = vst [vmem:[#allocation30_spill] sm:$0xff] %v20718_v29  ;;  %v23471_v30 = vld [vmem:[#allocation255_spill] sm:$0xff]  ;;  %v23476_v1 = vld [vmem:[#allocation181_spill] sm:$0xff] }
 0x81a   : > { %v8590_v2 = vmul.f32 %v12336_v46, %v23471_v30  ;;  %v23472_v31 = vld [vmem:[#allocation195_spill] sm:$0xff]  ;;  %v8171_v48 = vadd.f32 %v8139_v20, %v7946_v26  ;;  %v20742_v52 = vmul.f32 %v12463_v27, %v23476_v1  ;;  %v9069_v26 = vadd.f32 %v20610_v3, %v8844_v57  ;;  %v12370_v20 = vld [vmem:[%s22399_s5 + $0x588] sm:$0xff]  ;;  %v23478_v30 = vld [vmem:[#allocation198_spill] sm:$0xff] }
 0x81b   : > { %v10386_v55 = vmul.f32 %v12588_v6, %v23472_v31  ;;  %v23475_v17 = vld [vmem:[#allocation179_spill] sm:$0xff]  ;;  %v23477_v6 = vld [vmem:[#allocation237_spill] sm:$0xff]  ;;  %v10193_v27 = vadd.f32 %v10161_v34, %v9968_v63  ;;  %v10611_v31 = vmul.f32 %v12620_v61, %v23478_v30  ;;  %v9295_v34 = vadd.f32 %v20550_v25, %v9070_v43  ;;  %v23482_v61 = vld [vmem:[#allocation222_spill] sm:$0xff]  ;;  %v20786_v25 = vpop.permute.xlu0 %10352 }
 0x81c   : > { %v20739_v46 = vmul.f32 %v12399_v19, %v23475_v17  ;;  %v12652_v40 = vld [vmem:[%s22399_s5 + $0xe58] sm:$0xff]  ;;  %v9262_v56 = vmul.f32 %v12429_v28, %v23477_v6  ;;  %v12434_v19 = vld [vmem:[%s22399_s5 + $0x788] sm:$0xff]  ;;  %v9517_v17 = vadd.f32 %v20420_v47, %v9292_v18  ;;  %v20764_v28 = vpop.permute.xlu1 %9878  ;;  %v9488_v63 = vmul.f32 %v12462_v39, %v23482_v61  ;;  %23485 = vst [vmem:[#allocation69_spill] sm:$0xff] %v20786_v25 }
 0x81d   : > { %v23479_v3 = vld [vmem:[#allocation211_spill] sm:$0xff]  ;;  %23480 = vst [vmem:[#allocation65_spill] sm:$0xff] %v20764_v28  ;;  %v12498_v21 = vld [vmem:[%s22399_s5 + $0x988] sm:$0xff]  ;;  %v8622_v47 = vadd.f32 %v8590_v2, %v8397_v23  ;;  %v23483_v18 = vld [vmem:[#allocation186_spill] sm:$0xff]  ;;  %v10418_v30 = vadd.f32 %v10386_v55, %v10193_v27  ;;  %v8396_v29 = vadd.f32 %v8364_v5, %v8171_v48 }
 0x81e   : > { %v9710_v57 = vmul.f32 %v12491_v7, %v23479_v3  ;;  %v23481_v1 = vld [vmem:[#allocation183_spill] sm:$0xff]  ;;  %v7917_v7 = vmul.f32 %v12242_v53, %v23483_v18  ;;  %v23484_v3 = vld [vmem:[#allocation200_spill] sm:$0xff]  ;;  %v23487_v2 = vld [vmem:[#allocation190_spill] sm:$0xff]  ;;  %v9294_v27 = vadd.f32 %v9262_v56, %v9069_v26 }
 0x81f   : > { %v20767_v6 = vmul.f32 %v12527_v9, %v23481_v1  ;;  %v12273_v9 = vld [vmem:[%s22399_s5 + $0x280] sm:$0xff]  ;;  %v10836_v1 = vmul.f32 %v12652_v40, %v23484_v3  ;;  %v12400_v28 = vld [vmem:[%s22399_s5 + $0x678] sm:$0xff]  ;;  %v20793_v55 = vmul.f32 %v12370_v20, %v23487_v2  ;;  %v12367_v40 = vld [vmem:[%s22399_s5 + $0x570] sm:$0xff]  ;;  %v10643_v3 = vadd.f32 %v10611_v31, %v10418_v30 }
 0x820   : > { %v23486_v43 = vld [vmem:[#allocation188_spill] sm:$0xff]  ;;  %v23489_v48 = vld [vmem:[#allocation194_spill] sm:$0xff]  ;;  %v8847_v31 = vadd.f32 %v20686_v33, %v8622_v47  ;;  %v23492_v30 = vld [vmem:[#allocation257_spill] sm:$0xff] }
 0x821   : > { %v20790_v23 = vmul.f32 %v12306_v32, %v23486_v43  ;;  %v23488_v39 = vld [vmem:[#allocation192_spill] sm:$0xff]  ;;  %v20805_v61 = vmul.f32 %v12498_v21, %v23489_v48  ;;  %v23490_v32 = vld [vmem:[#allocation197_spill] sm:$0xff]  ;;  %v23491_v43 = vld [vmem:[#allocation199_spill] sm:$0xff]  ;;  %v9520_v21 = vadd.f32 %v9488_v63, %v9295_v34  ;;  %v20831_v48 = vpop.permute.xlu1 %10103 }
 0x822   : > { %v20796_v53 = vmul.f32 %v12434_v19, %v23488_v39  ;;  %v7500_v5 = vld [vmem:[%s22399_s5 + $0x88] sm:$0xff]  ;;  %v7691_v18 = vmul.f32 %v23490_v32, %v7499_v15  ;;  %v12337_v20 = vld [vmem:[%s22399_s5 + $0x480] sm:$0xff]  ;;  %v9742_v19 = vadd.f32 %v9710_v57, %v9517_v17  ;;  %v20818_v2 = vmul.f32 %v12273_v9, %v23491_v43  ;;  %23493 = vst [vmem:[#allocation40_spill] sm:$0xff] %v20831_v48  ;;  %v12244_v33 = vld [vmem:[%s22399_s5 + $0x198] sm:$0xff] }
 0x823   : > { %v12493_v26 = vld [vmem:[%s22399_s5 + $0x960] sm:$0xff]  ;;  %v9040_v17 = vmul.f32 %v12400_v28, %v23492_v30  ;;  %v12274_v57 = vld [vmem:[%s22399_s5 + $0x288] sm:$0xff]  ;;  %v20833_v9 = vadd.f32 %v10836_v1, %v10643_v3  ;;  %v8621_v28 = vadd.f32 %v20704_v10, %v8396_v29  ;;  %v20844_v30 = vpop.permute.xlu0 %10356  ;;  %v9519_v48 = vadd.f32 %v20632_v62, %v9294_v27  ;;  %v23502_v62 = vld [vmem:[#allocation290_spill] sm:$0xff] }
 0x824   : > { %v12241_v56 = vld [vmem:[%s22399_s5 + $0x180] sm:$0xff]  ;;  %23497 = vst [vmem:[#allocation96_spill] sm:$0xff] %v20844_v30  ;;  %v23498_v1 = vld [vmem:[#allocation201_spill] sm:$0xff]  ;;  %v8142_v27 = vmul.f32 %v12274_v57, %v23502_v62  ;;  %v12500_v30 = vld [vmem:[%s22399_s5 + $0x998] sm:$0xff] }
 0x825   : > { %v12401_v15 = vld [vmem:[%s22399_s5 + $0x680] sm:$0xff]  ;;  %23494 = vst [vmem:[#allocation26_spill] sm:$0xff] %v20833_v9  ;;  %v20848_v3 = vmul.f32 %v12337_v20, %v23498_v1  ;;  %v12526_v25 = vld [vmem:[%s22399_s5 + $0xa68] sm:$0xff]  ;;  %v9712_v9 = vmul.f32 %v12493_v26, %v23499_v49  ;;  %v12308_v20 = vld [vmem:[%s22399_s5 + $0x398] sm:$0xff] }
 0x826   : > { %v12577_v39 = vld [vmem:[%s22399_s5 + $0xc00] sm:$0xff]  ;;  %v12372_v49 = vld [vmem:[%s22399_s5 + $0x598] sm:$0xff] }
 0x827   : > { %v12465_v34 = vld [vmem:[%s22399_s5 + $0x880] sm:$0xff]  ;;  %v10375_v26 = vmul.f32 %v12577_v39, %v19993_v11  ;;  %v7501_v11 = vld [vmem:[%s22399_s5 + $0x90] sm:$0xff]  ;;  %v9744_v8 = vadd.f32 %v9712_v9, %v9519_v48 }
 0x828   : > { %v23495_v63 = vld [vmem:[#allocation275_spill] sm:$0xff]  ;;  %v23496_v32 = vld [vmem:[#allocation288_spill] sm:$0xff] }
 0x829   : > { %v8814_v47 = vmul.f32 %v12367_v40, %v23495_v63  ;;  %v7692_v43 = vmul.f32 %v23496_v32, %v7500_v5  ;;  %v23500_v10 = vld [vmem:[#allocation307_spill] sm:$0xff]  ;;  %v12579_v40 = vld [vmem:[%s22399_s5 + $0xc10] sm:$0xff]  ;;  %v9967_v32 = vadd.f32 %v20431_v51, %v9742_v19  ;;  %v9745_v51 = vadd.f32 %v20561_v35, %v9520_v21  ;;  %v23505_v57 = vld [vmem:[#allocation224_spill] sm:$0xff]  ;;  %v20893_v35 = vpop.permute.xlu0 %10360  ;;  %v20895_v21 = vpop.permute.xlu1 %10553 }
 0x82a   : > { %v7916_v29 = vmul.f32 %v12241_v56, %v23500_v10  ;;  %v23501_v5 = vld [vmem:[#allocation203_spill] sm:$0xff]  ;;  %v23503_v56 = vld [vmem:[#allocation205_spill] sm:$0xff]  ;;  %v23504_v10 = vld [vmem:[#allocation208_spill] sm:$0xff]  ;;  %v9072_v19 = vadd.f32 %v9040_v17, %v8847_v31  ;;  %v9938_v39 = vmul.f32 %v12526_v25, %v23505_v57  ;;  %23506 = vst [vmem:[#allocation111_spill] sm:$0xff] %v20893_v35  ;;  %v10407_v48 = vadd.f32 %v10375_v26, %v19972_v37 }
 0x82b   : > { %v20861_v63 = vmul.f32 %v12401_v15, %v23501_v5  ;;  %v20873_v1 = vmul.f32 %v12465_v34, %v23503_v56  ;;  %v20876_v15 = vmul.f32 %v12244_v33, %v23504_v10  ;;  %v12436_v5 = vld [vmem:[%s22399_s5 + $0x798] sm:$0xff]  ;;  %v8846_v33 = vadd.f32 %v8814_v47, %v8621_v28  ;;  %23507 = vst [vmem:[#allocation94_spill] sm:$0xff] %v20895_v21  ;;  %v23509_v10 = vld [vmem:[#allocation212_spill] sm:$0xff]  ;;  %v12431_v25 = vld [vmem:[%s22399_s5 + $0x770] sm:$0xff] }
 0x82c   : > { %v12464_v34 = vld [vmem:[%s22399_s5 + $0x878] sm:$0xff]  ;;  %v7949_v62 = vadd.f32 %v7917_v7, %v7692_v43  ;;  %v10377_v56 = vmul.f32 %v12579_v40, %v20034_v38  ;;  %v20901_v60 = vmul.f32 %v12372_v49, %v23509_v10  ;;  %v7948_v57 = vadd.f32 %v7916_v29, %v7691_v18  ;;  %v12275_v28 = vld [vmem:[%s22399_s5 + $0x290] sm:$0xff]  ;;  %v12305_v43 = vld [vmem:[%s22399_s5 + $0x380] sm:$0xff] }
 0x82d   : > { %v23508_v31 = vld [vmem:[#allocation210_spill] sm:$0xff]  ;;  %v20918_v9 = vadd.f32 %v20441_v59, %v9967_v32  ;;  %v23511_v18 = vld [vmem:[#allocation240_spill] sm:$0xff]  ;;  %v9071_v26 = vadd.f32 %v20739_v46, %v8846_v33  ;;  %v23518_v33 = vld [vmem:[#allocation309_spill] sm:$0xff] }
 0x82e   : > { %v20898_v17 = vmul.f32 %v12308_v20, %v23508_v31  ;;  %v23510_v7 = vld [vmem:[#allocation214_spill] sm:$0xff]  ;;  %v8174_v47 = vadd.f32 %v8142_v27, %v7949_v62  ;;  %7652 = vperm.xlu1 %14658, %v23511_v18   ;;  %v23512_v29 = vld [vmem:[#allocation216_spill] sm:$0xff]  ;;  %v23513_v20 = vld [vmem:[#allocation219_spill] sm:$0xff]  ;;  %v8173_v46 = vadd.f32 %v20818_v2, %v7948_v57 }
 0x82f   : > { %v20908_v38 = vmul.f32 %v12436_v5, %v23510_v7  ;;  %v20922_v40 = vmul.f32 %v12500_v30, %v23512_v29  ;;  %v7693_v49 = vmul.f32 %v23513_v20, %v7501_v11  ;;  %v12557_v27 = vld [vmem:[%s22399_s5 + $0xb60] sm:$0xff]  ;;  %v9297_v5 = vadd.f32 %v20689_v42, %v9072_v19  ;;  %v12338_v37 = vld [vmem:[%s22399_s5 + $0x488] sm:$0xff]  ;;  %v12339_v59 = vld [vmem:[%s22399_s5 + $0x490] sm:$0xff]  ;;  %v20956_v20 = vpop.permute.xlu1 %7632 }
 0x830   : > { %v23514_v62 = vld [vmem:[#allocation259_spill] sm:$0xff]  ;;  %v9970_v30 = vadd.f32 %v9938_v39, %v9745_v51  ;;  %v12403_v32 = vld [vmem:[%s22399_s5 + $0x690] sm:$0xff]  ;;  %v10409_v19 = vadd.f32 %v10377_v56, %v20163_v44  ;;  %v12622_v51 = vld [vmem:[%s22399_s5 + $0xd68] sm:$0xff]  ;;  %v9969_v39 = vadd.f32 %v20651_v22, %v9744_v8  ;;  %23519 = vst [vmem:[#allocation13_spill] sm:$0xff] %v20956_v20 }
 0x831   : > { %v9490_v31 = vmul.f32 %v12464_v34, %v23514_v62  ;;  %v23515_v11 = vld [vmem:[#allocation277_spill] sm:$0xff]  ;;  %v20945_v34 = vpop.permute.xlu0 %10364  ;;  %v7502_v22 = vld [vmem:[%s22399_s5 + $0x98] sm:$0xff] }
 0x832   : > { %v9264_v10 = vmul.f32 %v12431_v25, %v23515_v11  ;;  %v12243_v42 = vld [vmem:[%s22399_s5 + $0x190] sm:$0xff]  ;;  %23516 = vst [vmem:[#allocation68_spill] sm:$0xff] %v20945_v34  ;;  %v8366_v25 = vmul.f32 %v12305_v43, %v23518_v33  ;;  %v12654_v56 = vld [vmem:[%s22399_s5 + $0xe68] sm:$0xff]  ;;  %v8399_v11 = vadd.f32 %v20790_v23, %v8174_v47  ;;  %14660 = vset.pattern.permute.xlu1 %v22893_v36  ;;  %v23523_v43 = vld [vmem:[#allocation223_spill] sm:$0xff] }
 0x833   : > { %v23517_v7 = vld [vmem:[#allocation221_spill] sm:$0xff]  ;;  %v20973_v33 = vmul.f32 %v12339_v59, %v23523_v43  ;;  %v12589_v23 = vld [vmem:[%s22399_s5 + $0xc60] sm:$0xff]  ;;  %v9522_v47 = vadd.f32 %v9490_v31, %v9297_v5  ;;  %8106 = vperm.xlu1 %14660, %v23511_v18   ;;  %v20994_v5 = vadd.f32 %v20586_v0, %v9970_v30  ;;  %v12584_v0 = vld [vmem:[%s22399_s5 + $0xc38] sm:$0xff] }
 0x834   : > { %v20948_v29 = vmul.f32 %v12275_v28, %v23517_v7  ;;  %v12467_v44 = vld [vmem:[%s22399_s5 + $0x890] sm:$0xff]  ;;  %v23521_v7 = vld [vmem:[#allocation292_spill] sm:$0xff]  ;;  %v9296_v59 = vadd.f32 %v9264_v10, %v9071_v26  ;;  %v12528_v26 = vld [vmem:[%s22399_s5 + $0xa78] sm:$0xff]  ;;  %v8398_v10 = vadd.f32 %v8366_v25, %v8173_v46  ;;  %v21019_v25 = vpop.permute.xlu1 %8090 }
 0x835   : > { %v23520_v28 = vld [vmem:[#allocation242_spill] sm:$0xff]  ;;  %v8592_v8 = vmul.f32 %v12338_v37, %v23521_v7  ;;  %v23522_v2 = vld [vmem:[#allocation89_spill] sm:$0xff]  ;;  %v20996_v31 = vpop.permute.xlu0 %10372  ;;  %23534 = vst [vmem:[#allocation10_spill] sm:$0xff] %v21019_v25 }
 0x836   : > { %v10162_v62 = vmul.f32 %v12557_v27, %v23520_v28  ;;  %v10632_v57 = vadd.f32 %v23522_v2, %v10407_v48  ;;  %v23524_v34 = vld [vmem:[#allocation225_spill] sm:$0xff]  ;;  %v23526_v28 = vld [vmem:[#allocation226_spill] sm:$0xff]  ;;  %v12621_v48 = vld [vmem:[%s22399_s5 + $0xd60] sm:$0xff]  ;;  %23528 = vst [vmem:[#allocation81_spill] sm:$0xff] %v20996_v31  ;;  %v9747_v31 = vadd.f32 %v20692_v12, %v9522_v47  ;;  %v9521_v20 = vadd.f32 %v20742_v52, %v9296_v59 }
 0x837   : > { %v20976_v35 = vmul.f32 %v12403_v32, %v23524_v34  ;;  %v23525_v27 = vld [vmem:[#allocation41_spill] sm:$0xff]  ;;  %v20984_v7 = vmul.f32 %v12622_v51, %v23526_v28  ;;  %v12276_v32 = vld [vmem:[%s22399_s5 + $0x298] sm:$0xff]  ;;  %v23530_v51 = vld [vmem:[#allocation228_spill] sm:$0xff]  ;;  %14662 = vset.pattern.permute.xlu1 %v22896_v45 }
 0x838   : > { %v7918_v37 = vmul.f32 %v12243_v42, %v23525_v27  ;;  %v23527_v34 = vld [vmem:[#allocation35_spill] sm:$0xff]  ;;  %v21002_v27 = vmul.f32 %v12654_v56, %v23530_v51  ;;  %v23531_v28 = vld [vmem:[#allocation325_spill] sm:$0xff]  ;;  %v10194_v30 = vadd.f32 %v10162_v62, %v9969_v39  ;;  %v8624_v56 = vadd.f32 %v8592_v8, %v8399_v11  ;;  %8556 = vperm.xlu1 %14662, %v23511_v18   ;;  %v23542_v25 = vld [vmem:[#allocation294_spill] sm:$0xff] }
 0x839   : > { %v10634_v2 = vadd.f32 %v23527_v34, %v10409_v19  ;;  %v23529_v42 = vld [vmem:[#allocation227_spill] sm:$0xff]  ;;  %v7694_v21 = vmul.f32 %v23531_v28, %v7502_v22  ;;  %v23532_v19 = vld [vmem:[#allocation244_spill] sm:$0xff]  ;;  %v23535_v22 = vld [vmem:[#allocation246_spill] sm:$0xff] }
 0x83a   : > { %v20999_v43 = vmul.f32 %v12467_v44, %v23529_v42  ;;  %v10387_v34 = vmul.f32 %v12589_v23, %v23532_v19  ;;  %v12495_v44 = vld [vmem:[%s22399_s5 + $0x970] sm:$0xff]  ;;  %v12369_v42 = vld [vmem:[%s22399_s5 + $0x580] sm:$0xff]  ;;  %v10612_v28 = vmul.f32 %v12621_v48, %v23535_v22  ;;  %v7950_v23 = vadd.f32 %v7918_v37, %v7693_v49  ;;  %v12674_v11 = vld [vmem:[%s22399_s5 + $0xf08] sm:$0xff]  ;;  %v10928_v22 = vpop.permute.xlu0 %10927 }
 0x83b   : > { %v23533_v51 = vld [vmem:[#allocation47_spill] sm:$0xff]  ;;  %v23537_v8 = vld [vmem:[#allocation261_spill] sm:$0xff]  ;;  %v10859_v49 = vadd.f32 %v20215_v58, %v10634_v2  ;;  %v7951_v59 = vadd.f32 %v20876_v15, %v7694_v21  ;;  %v8849_v58 = vadd.f32 %v20793_v55, %v8624_v56  ;;  %v21054_v21 = vpop.permute.xlu1 %8540 }
 0x83c   : > { %v10857_v46 = vadd.f32 %v23533_v51, %v10632_v57  ;;  %v23536_v39 = vld [vmem:[#allocation327_spill] sm:$0xff]  ;;  %v9940_v19 = vmul.f32 %v12528_v26, %v23537_v8  ;;  %v12402_v57 = vld [vmem:[%s22399_s5 + $0x688] sm:$0xff]  ;;  %v12307_v12 = vld [vmem:[%s22399_s5 + $0x390] sm:$0xff]  ;;  %v8623_v26 = vadd.f32 %v20848_v3, %v8398_v10  ;;  %v8175_v3 = vadd.f32 %v20948_v29, %v7950_v23  ;;  %14664 = vset.pattern.permute.xlu1 %v22900_v50 }
 0x83d   : > { %v8144_v62 = vmul.f32 %v12276_v32, %v23536_v39  ;;  %v23538_v47 = vld [vmem:[#allocation21_spill] sm:$0xff]  ;;  %v23539_v48 = vld [vmem:[#allocation279_spill] sm:$0xff]  ;;  %v10419_v39 = vadd.f32 %v10387_v34, %v10194_v30  ;;  %v9042_v45 = vmul.f32 %v12402_v57, %v23542_v25  ;;  %v23543_v10 = vld [vmem:[#allocation52_spill] sm:$0xff]  ;;  %v11084_v34 = vadd.f32 %v20218_v4, %v10859_v49  ;;  %9006 = vperm.xlu1 %14664, %v23511_v18  }
 0x83e   : > { %v10382_v37 = vmul.f32 %v12584_v0, %v23538_v47  ;;  %v9714_v32 = vmul.f32 %v12495_v44, %v23539_v48  ;;  %v23540_v51 = vld [vmem:[#allocation311_spill] sm:$0xff]  ;;  %v11051_v47 = vmul.f32 %v12674_v11, %v10928_v22  ;;  %v12587_v15 = vld [vmem:[%s22399_s5 + $0xc50] sm:$0xff]  ;;  %v23545_v29 = vld [vmem:[#allocation248_spill] sm:$0xff]  ;;  %v9972_v23 = vadd.f32 %v9940_v19, %v9747_v31  ;;  %v10940_v48 = vpop.permute.xlu0 %10939 }
 0x83f   : > { %v8816_v52 = vmul.f32 %v12369_v42, %v23540_v51  ;;  %v12653_v8 = vld [vmem:[%s22399_s5 + $0xe60] sm:$0xff]  ;;  %v8176_v44 = vadd.f32 %v8144_v62, %v7951_v59  ;;  %v8368_v42 = vmul.f32 %v12307_v12, %v23543_v10  ;;  %v10644_v30 = vadd.f32 %v10612_v28, %v10419_v39  ;;  %v12340_v12 = vld [vmem:[%s22399_s5 + $0x498] sm:$0xff]  ;;  %v23547_v22 = vld [vmem:[#allocation329_spill] sm:$0xff] }
 0x840   : > { %v23541_v2 = vld [vmem:[#allocation55_spill] sm:$0xff]  ;;  %v10414_v56 = vadd.f32 %v10382_v37, %v20374_v24  ;;  %v10837_v62 = vmul.f32 %v12653_v8, %v23545_v29  ;;  %v9746_v11 = vadd.f32 %v9714_v32, %v9521_v20  ;;  %v23546_v28 = vld [vmem:[#allocation86_spill] sm:$0xff]  ;;  %v9074_v32 = vadd.f32 %v9042_v45, %v8849_v58  ;;  %v21091_v58 = vpop.permute.xlu1 %8990  ;;  %v23549_v10 = vld [vmem:[#allocation313_spill] sm:$0xff] }
 0x841   : > { %v11082_v0 = vadd.f32 %v23541_v2, %v10857_v46  ;;  %v12677_v55 = vld [vmem:[%s22399_s5 + $0xf20] sm:$0xff]  ;;  %v23544_v46 = vld [vmem:[#allocation85_spill] sm:$0xff]  ;;  %v8848_v57 = vadd.f32 %v8816_v52, %v8623_v26  ;;  %v12560_v4 = vld [vmem:[%s22399_s5 + $0xb78] sm:$0xff]  ;;  %v10385_v49 = vmul.f32 %v12587_v15, %v23546_v28  ;;  %v8401_v26 = vadd.f32 %v20898_v17, %v8176_v44  ;;  %14666 = vset.pattern.permute.xlu1 %v22903_v13 }
 0x842   : > { %v11083_v25 = vadd.f32 %v11051_v47, %v23544_v46  ;;  %v12433_v24 = vld [vmem:[%s22399_s5 + $0x780] sm:$0xff]  ;;  %v11054_v19 = vmul.f32 %v12677_v55, %v10940_v48  ;;  %v12559_v37 = vld [vmem:[%s22399_s5 + $0xb70] sm:$0xff]  ;;  %v8400_v51 = vadd.f32 %v8368_v42, %v8175_v3  ;;  %v12680_v59 = vld [vmem:[%s22399_s5 + $0xf38] sm:$0xff]  ;;  %v8594_v39 = vmul.f32 %v12340_v12, %v23547_v22  ;;  %v10952_v55 = vpop.permute.xlu0 %10951  ;;  %9456 = vperm.xlu1 %14666, %v23511_v18  }
 0x843   : > { %v11115_v20 = vsel %vm11114_vm4, %v11082_v0, 0.0  ;;  %v12371_v8 = vld [vmem:[%s22399_s5 + $0x590] sm:$0xff]  ;;  %v10639_v2 = vadd.f32 %v20241_v54, %v10414_v56  ;;  %v11118_v0 = vsel %vm11114_vm4, %v11084_v34, 0.0  ;;  %v23548_v17 = vld [vmem:[#allocation264_spill] sm:$0xff]  ;;  %v9073_v3 = vadd.f32 %v20861_v63, %v8848_v57  ;;  %v12624_v63 = vld [vmem:[%s22399_s5 + $0xd78] sm:$0xff] }
 0x844   : > { %v11116_v31 = vsel %vm11114_vm4, %v11083_v25, 0.0  ;;  %v11086_v45 = vadd.f32 %v11054_v19, %v20330_v14  ;;  %v10165_v47 = vmul.f32 %v12560_v4, %v23548_v17  ;;  %v12466_v44 = vld [vmem:[%s22399_s5 + $0x888] sm:$0xff]  ;;  %v9266_v42 = vmul.f32 %v12433_v24, %v23549_v10  ;;  %v23552_v12 = vld [vmem:[#allocation99_spill] sm:$0xff] }
 0x845   : > { %v11117_v52 = vadd.f32 %v11116_v31, %v11115_v20  ;;  %v9971_v54 = vadd.f32 %v20767_v6, %v9746_v11  ;;  %v23550_v34 = vld [vmem:[#allocation281_spill] sm:$0xff]  ;;  %v10417_v56 = vadd.f32 %v10385_v49, %v20918_v9  ;;  %v11057_v25 = vmul.f32 %v12680_v59, %v10952_v55  ;;  %v23551_v6 = vld [vmem:[#allocation42_spill] sm:$0xff] }
 0x846   : > { %v10164_v14 = vmul.f32 %v12559_v37, %v23550_v34  ;;  %v12590_v46 = vld [vmem:[%s22399_s5 + $0xc68] sm:$0xff]  ;;  %v9299_v29 = vadd.f32 %v20796_v53, %v9074_v32  ;;  %v8625_v57 = vadd.f32 %v20973_v33, %v8400_v51  ;;  %v8818_v11 = vmul.f32 %v12371_v8, %v23551_v6  ;;  %v12623_v9 = vld [vmem:[%s22399_s5 + $0xd70] sm:$0xff]  ;;  %v12404_v33 = vld [vmem:[%s22399_s5 + $0x698] sm:$0xff]  ;;  %v10964_v59 = vpop.permute.xlu0 %10963 }
 0x847   : > { %v11119_v15 = vadd.f32 %v11118_v0, %v11117_v52  ;;  %v23553_v4 = vld [vmem:[#allocation297_spill] sm:$0xff]  ;;  %v8626_v28 = vadd.f32 %v8594_v39, %v8401_v26  ;;  %v11122_v49 = vsel %vm11114_vm4, %v11086_v45, 0.0  ;;  %v21120_v19 = vadd.f32 %v10837_v62, %v10644_v30  ;;  %v23555_v37 = vld [vmem:[#allocation23_spill] sm:$0xff]  ;;  %v21129_v26 = vpop.permute.xlu1 %9440  ;;  %v23556_v39 = vld [vmem:[#allocation266_spill] sm:$0xff] }
 0x848   : > { %v9492_v24 = vmul.f32 %v12466_v44, %v23553_v4  ;;  %v23554_v20 = vld [vmem:[#allocation97_spill] sm:$0xff]  ;;  %v9298_v53 = vadd.f32 %v9266_v42, %v9073_v3  ;;  %v10388_v32 = vmul.f32 %v12590_v46, %v23555_v37  ;;  %v21131_v22 = vadd.f32 %v10165_v47, %v9972_v23  ;;  %v23557_v8 = vld [vmem:[#allocation56_spill] sm:$0xff]  ;;  %v23559_v44 = vld [vmem:[#allocation283_spill] sm:$0xff] }
 0x849   : > { %v11121_v48 = vadd.f32 %v23552_v12, %v11119_v15  ;;  %v10864_v31 = vadd.f32 %v23554_v20, %v10639_v2  ;;  %v12683_v52 = vld [vmem:[%s22399_s5 + $0xf50] sm:$0xff]  ;;  %v21134_v30 = vmul.f32 %v12624_v63, %v23556_v39  ;;  %v10642_v2 = vadd.f32 %v23557_v8, %v10417_v56  ;;  %v23561_v15 = vld [vmem:[#allocation251_spill] sm:$0xff]  ;;  %v12562_v4 = vld [vmem:[%s22399_s5 + $0xb88] sm:$0xff] }
 0x84a   : > { %v12655_v62 = vld [vmem:[%s22399_s5 + $0xe70] sm:$0xff]  ;;  %v23558_v45 = vmov 1   ;;  %v10196_v17 = vadd.f32 %v10164_v14, %v9971_v54  ;;  %v21142_v3 = vmul.f32 %v12623_v9, %v23559_v44  ;;  %v8850_v10 = vadd.f32 %v8818_v11, %v8625_v57  ;;  %v12684_v55 = vld [vmem:[%s22399_s5 + $0xf58] sm:$0xff]  ;;  %v12497_v54 = vld [vmem:[%s22399_s5 + $0x980] sm:$0xff]  ;;  %v10968_v9 = vpop.permute.xlu0 %10967 }
 0x84b   : > { %v11123_v51 = vadd.f32 %v11122_v49, %v11121_v48  ;;  %v11089_v0 = vadd.f32 %v11057_v25, %v10864_v31  ;;  %14669 = vset.pattern.permute.xlu1 %v23558_v45  ;;  %v12591_v23 = vld [vmem:[%s22399_s5 + $0xc70] sm:$0xff]  ;;  %v9524_v34 = vadd.f32 %v9492_v24, %v9299_v29  ;;  %v8851_v14 = vadd.f32 %v20901_v60, %v8626_v28  ;;  %v23562_v56 = vld [vmem:[#allocation331_spill] sm:$0xff]  ;;  %v12530_v29 = vld [vmem:[%s22399_s5 + $0xa88] sm:$0xff] }
 0x84c   : > { %v23560_v47 = vld [vmem:[#allocation90_spill] sm:$0xff]  ;;  %7877 = vperm.xlu1 %14669, %v23561_v15   ;;  %v9044_v46 = vmul.f32 %v12404_v33, %v23562_v56  ;;  %v11060_v63 = vmul.f32 %v12683_v52, %v10964_v59  ;;  %v9523_v11 = vadd.f32 %v20873_v1, %v9298_v53  ;;  %v10420_v12 = vadd.f32 %v10388_v32, %v20994_v5  ;;  %v23564_v48 = vld [vmem:[#allocation95_spill] sm:$0xff]  ;;  %v23565_v28 = vld [vmem:[#allocation53_spill] sm:$0xff]  ;;  %v21178_v53 = vpop.permute.xlu1 %9890 }
 0x84d   : > { %v11125_v42 = vadd.f32 %v23560_v47, %v11123_v51  ;;  %v12435_v25 = vld [vmem:[%s22399_s5 + $0x790] sm:$0xff]  ;;  %v12529_v24 = vld [vmem:[%s22399_s5 + $0xa80] sm:$0xff]  ;;  %v10389_v49 = vmul.f32 %v12591_v23, %v23565_v28  ;;  %v11128_v20 = vsel %vm11114_vm4, %v11089_v0, 0.0  ;;  %v11061_v1 = vmul.f32 %v12684_v55, %v10968_v9  ;;  %v12592_v59 = vld [vmem:[%s22399_s5 + $0xc78] sm:$0xff] }
 0x84e   : > { %v23563_v57 = vld [vmem:[#allocation286_spill] sm:$0xff]  ;;  %v23566_v31 = vld [vmem:[#allocation64_spill] sm:$0xff]  ;;  %v23567_v5 = vld [vmem:[#allocation315_spill] sm:$0xff]  ;;  %v9075_v32 = vadd.f32 %v20976_v35, %v8850_v10  ;;  %v9749_v8 = vadd.f32 %v20805_v61, %v9524_v34  ;;  %v9076_v44 = vadd.f32 %v9044_v46, %v8851_v14  ;;  %v10645_v61 = vadd.f32 %v20984_v7, %v10420_v12 }
 0x84f   : > { %v21161_v6 = vmul.f32 %v12655_v62, %v23563_v57  ;;  %v11127_v60 = vadd.f32 %v23564_v48, %v11125_v42  ;;  %v10867_v33 = vadd.f32 %v23566_v31, %v10642_v2  ;;  %v9716_v37 = vmul.f32 %v12497_v54, %v23567_v5  ;;  %v23568_v51 = vld [vmem:[#allocation18_spill] sm:$0xff]  ;;  %v12685_v62 = vld [vmem:[%s22399_s5 + $0xf60] sm:$0xff]  ;;  %v23570_v23 = vld [vmem:[#allocation301_spill] sm:$0xff] }
 0x850   : > { %v9268_v52 = vmul.f32 %v12435_v25, %v23568_v51  ;;  %14671 = vset.pattern.permute.xlu1 %v22921_v41  ;;  %v23569_v2 = vld [vmem:[#allocation299_spill] sm:$0xff]  ;;  %v10167_v47 = vmul.f32 %v12562_v4, %v23570_v23  ;;  %v23571_v42 = vld [vmem:[#allocation317_spill] sm:$0xff]  ;;  %v23572_v34 = vld [vmem:[#allocation30_spill] sm:$0xff]  ;;  %v10972_v25 = vpop.permute.xlu0 %10971  ;;  %v10421_v57 = vadd.f32 %v10389_v49, %v10196_v17  ;;  %v21210_v7 = vpop.permute.xlu1 %7861  ;;  %v9301_v12 = vadd.f32 %v20908_v38, %v9076_v44 }
 0x851   : > { %v11129_v39 = vadd.f32 %v11128_v20, %v11127_v60  ;;  %v9942_v0 = vmul.f32 %v12530_v29, %v23569_v2  ;;  %v12561_v35 = vld [vmem:[%s22399_s5 + $0xb80] sm:$0xff]  ;;  %v11092_v10 = vadd.f32 %v11060_v63, %v10867_v33  ;;  %8327 = vperm.xlu1 %14671, %v23561_v15   ;;  %v9941_v55 = vmul.f32 %v12529_v24, %v23571_v42  ;;  %v12468_v54 = vld [vmem:[%s22399_s5 + $0x898] sm:$0xff]  ;;  %v12686_v17 = vld [vmem:[%s22399_s5 + $0xf68] sm:$0xff] }
 0x852   : > { %v23573_v29 = vld [vmem:[#allocation88_spill] sm:$0xff]  ;;  %v23574_v46 = vld [vmem:[#allocation26_spill] sm:$0xff]  ;;  %v11062_v60 = vmul.f32 %v12685_v62, %v10972_v25  ;;  %v9748_v9 = vadd.f32 %v9716_v37, %v9523_v11  ;;  %v23575_v4 = vld [vmem:[#allocation319_spill] sm:$0xff]  ;;  %v9300_v28 = vadd.f32 %v9268_v52, %v9075_v32  ;;  %v23578_v37 = vmov 5  }
 0x853   : > { %v11131_v56 = vadd.f32 %v23572_v34, %v11129_v39  ;;  %v10390_v48 = vmul.f32 %v12592_v59, %v23573_v29  ;;  %v12593_v14 = vld [vmem:[%s22399_s5 + $0xc80] sm:$0xff]  ;;  %v11093_v63 = vadd.f32 %v11061_v1, %v23574_v46  ;;  %v10166_v24 = vmul.f32 %v12561_v35, %v23575_v4  ;;  %v23577_v49 = vld [vmem:[#allocation333_spill] sm:$0xff]  ;;  %v12532_v4 = vld [vmem:[%s22399_s5 + $0xa98] sm:$0xff] }
 0x854   : > { %v23576_v20 = vld [vmem:[#allocation100_spill] sm:$0xff]  ;;  %v9494_v33 = vmul.f32 %v12468_v54, %v23577_v49  ;;  %v12499_v1 = vld [vmem:[%s22399_s5 + $0x990] sm:$0xff]  ;;  %v11134_v11 = vsel %vm11114_vm4, %v11092_v10, 0.0  ;;  %v11094_v5 = vadd.f32 %v11062_v60, %v21120_v19  ;;  %v9973_v32 = vadd.f32 %v9941_v55, %v9748_v9  ;;  %v10976_v39 = vpop.permute.xlu0 %10975  ;;  %v23580_v42 = vld [vmem:[#allocation91_spill] sm:$0xff] }
 0x855   : > { %v11133_v31 = vadd.f32 %v23576_v20, %v11131_v56  ;;  %14673 = vset.pattern.permute.xlu1 %v23578_v37  ;;  %v23579_v51 = vld [vmem:[#allocation36_spill] sm:$0xff]  ;;  %v10870_v62 = vadd.f32 %v21002_v27, %v10645_v61  ;;  %v12531_v38 = vld [vmem:[%s22399_s5 + $0xa90] sm:$0xff]  ;;  %v10646_v2 = vadd.f32 %v21142_v3, %v10421_v57  ;;  %v10422_v35 = vadd.f32 %v10390_v48, %v21131_v22  ;;  %v21244_v57 = vpop.permute.xlu1 %8311 }
 0x856   : > { %v10391_v52 = vmul.f32 %v12593_v14, %v23579_v51  ;;  %8777 = vperm.xlu1 %14673, %v23561_v15   ;;  %v12594_v19 = vld [vmem:[%s22399_s5 + $0xc88] sm:$0xff]  ;;  %v11136_v44 = vsel %vm11114_vm4, %v11093_v63, 0.0  ;;  %v11063_v10 = vmul.f32 %v12686_v17, %v10976_v39  ;;  %v10198_v23 = vadd.f32 %v10166_v24, %v9973_v32  ;;  %v12687_v61 = vld [vmem:[%s22399_s5 + $0xf70] sm:$0xff]  ;;  %v12625_v22 = vld [vmem:[%s22399_s5 + $0xd80] sm:$0xff] }
 0x857   : > { %v11135_v59 = vadd.f32 %v11134_v11, %v11133_v31  ;;  %v9525_v27 = vadd.f32 %v20999_v43, %v9300_v28  ;;  %v9718_v55 = vmul.f32 %v12499_v1, %v23580_v42  ;;  %v9974_v3 = vadd.f32 %v9942_v0, %v9749_v8  ;;  %v12656_v43 = vld [vmem:[%s22399_s5 + $0xe78] sm:$0xff]  ;;  %v23581_v29 = vld [vmem:[#allocation20_spill] sm:$0xff]  ;;  %v12563_v8 = vld [vmem:[%s22399_s5 + $0xb90] sm:$0xff] }
 0x858   : > { %v9526_v34 = vadd.f32 %v9494_v33, %v9301_v12  ;;  %v11138_v56 = vsel %vm11114_vm4, %v11094_v5, 0.0  ;;  %v11095_v25 = vadd.f32 %v11063_v10, %v10870_v62  ;;  %v9943_v48 = vmul.f32 %v12531_v38, %v23581_v29  ;;  %v23582_v14 = vld [vmem:[#allocation60_spill] sm:$0xff]  ;;  %v10980_v60 = vpop.permute.xlu0 %10979  ;;  %v23584_v12 = vld [vmem:[#allocation321_spill] sm:$0xff]  ;;  %v23587_v62 = vld [vmem:[#allocation335_spill] sm:$0xff] }
 0x859   : > { %v11137_v54 = vadd.f32 %v11136_v44, %v11135_v59  ;;  %v10423_v0 = vadd.f32 %v10391_v52, %v10198_v23  ;;  %v10392_v46 = vmul.f32 %v12594_v19, %v23582_v14  ;;  %v23583_v9 = vmov 7   ;;  %v12595_v1 = vld [vmem:[%s22399_s5 + $0xc90] sm:$0xff]  ;;  %v23585_v5 = vld [vmem:[#allocation268_spill] sm:$0xff]  ;;  %v23586_v52 = vld [vmem:[#allocation27_spill] sm:$0xff]  ;;  %v21282_v23 = vpop.permute.xlu1 %8761 }
 0x85a   : > { %14675 = vset.pattern.permute.xlu1 %v23583_v9  ;;  %v10647_v24 = vadd.f32 %v21134_v30, %v10422_v35  ;;  %v11140_v28 = vsel %vm11114_vm4, %v11095_v25, 0.0  ;;  %v10871_v20 = vadd.f32 %v21161_v6, %v10646_v2  ;;  %v11064_v31 = vmul.f32 %v12687_v61, %v10980_v60  ;;  %v12688_v30 = vld [vmem:[%s22399_s5 + $0xf78] sm:$0xff]  ;;  %v12626_v6 = vld [vmem:[%s22399_s5 + $0xd88] sm:$0xff]  ;;  %v12689_v29 = vld [vmem:[%s22399_s5 + $0xf80] sm:$0xff] }
 0x85b   : > { %v11139_v63 = vadd.f32 %v11138_v56, %v11137_v54  ;;  %9227 = vperm.xlu1 %14675, %v23561_v15   ;;  %v10199_v17 = vadd.f32 %v10167_v47, %v9974_v3  ;;  %v10616_v49 = vmul.f32 %v12625_v22, %v23584_v12  ;;  %v9750_v33 = vadd.f32 %v9718_v55, %v9525_v27  ;;  %v12657_v47 = vld [vmem:[%s22399_s5 + $0xe80] sm:$0xff]  ;;  %v12564_v2 = vld [vmem:[%s22399_s5 + $0xb98] sm:$0xff]  ;;  %v12627_v60 = vld [vmem:[%s22399_s5 + $0xd90] sm:$0xff] }
 0x85c   : > { %v10840_v32 = vmul.f32 %v12656_v43, %v23585_v5  ;;  %v9751_v51 = vadd.f32 %v20922_v40, %v9526_v34  ;;  %v10168_v59 = vmul.f32 %v12563_v8, %v23586_v52  ;;  %v11096_v39 = vadd.f32 %v11064_v31, %v10871_v20  ;;  %v10984_v10 = vpop.permute.xlu0 %10983  ;;  %v23588_v27 = vld [vmem:[#allocation28_spill] sm:$0xff]  ;;  %v23590_v3 = vld [vmem:[#allocation303_spill] sm:$0xff]  ;;  %v23592_v8 = vld [vmem:[#allocation337_spill] sm:$0xff] }
 0x85d   : > { %v11141_v11 = vadd.f32 %v11140_v28, %v11139_v63  ;;  %v9944_v38 = vmul.f32 %v12532_v4, %v23587_v62  ;;  %v9975_v35 = vadd.f32 %v9943_v48, %v9750_v33  ;;  %v10648_v19 = vadd.f32 %v10616_v49, %v10423_v0  ;;  %v23591_v34 = vld [vmem:[#allocation323_spill] sm:$0xff]  ;;  %v12658_v48 = vld [vmem:[%s22399_s5 + $0xe88] sm:$0xff]  ;;  %v21305_v33 = vpop.permute.xlu1 %9211  ;;  %v23596_v52 = vld [vmem:[#allocation262_spill] sm:$0xff] }
 0x85e   : > { %v10424_v44 = vadd.f32 %v10392_v46, %v10199_v17  ;;  %v10393_v42 = vmul.f32 %v12595_v1, %v23588_v27  ;;  %v11142_v55 = vsel %vm11114_vm4, %v11096_v39, 0.0  ;;  %v10872_v40 = vadd.f32 %v10840_v32, %v10647_v24  ;;  %v12596_v25 = vld [vmem:[%s22399_s5 + $0xc98] sm:$0xff]  ;;  %v23593_v31 = vld [vmem:[#allocation61_spill] sm:$0xff] }
 0x85f   : > { %v11065_v54 = vmul.f32 %v12688_v30, %v10984_v10  ;;  %v23589_v61 = vmov 9   ;;  %v10617_v22 = vmul.f32 %v12626_v6, %v23590_v3  ;;  %v10841_v56 = vmul.f32 %v12657_v47, %v23591_v34  ;;  %v23594_v1 = vld [vmem:[#allocation305_spill] sm:$0xff]  ;;  %v23595_v6 = vld [vmem:[#allocation46_spill] sm:$0xff] }
 0x860   : > { %14677 = vset.pattern.permute.xlu1 %v23589_v61  ;;  %v11143_v43 = vadd.f32 %v11142_v55, %v11141_v11  ;;  %v10169_v0 = vmul.f32 %v12564_v2, %v23592_v8  ;;  %v10200_v14 = vadd.f32 %v10168_v59, %v9975_v35  ;;  %v9976_v63 = vadd.f32 %v9944_v38, %v9751_v51  ;;  %v10988_v24 = vpop.permute.xlu0 %10987  ;;  %v12690_v5 = vld [vmem:[%s22399_s5 + $0xf88] sm:$0xff]  ;;  %v12628_v59 = vld [vmem:[%s22399_s5 + $0xd98] sm:$0xff]  ;;  %v12659_v39 = vld [vmem:[%s22399_s5 + $0xe90] sm:$0xff] }
 0x861   : > { %9677 = vperm.xlu1 %14677, %v23561_v15   ;;  %v11097_v46 = vadd.f32 %v11065_v54, %v10872_v40  ;;  %v10649_v4 = vadd.f32 %v10617_v22, %v10424_v44  ;;  %v10873_v28 = vadd.f32 %v10841_v56, %v10648_v19  ;;  %v10394_v17 = vmul.f32 %v12596_v25, %v23593_v31  ;;  %v21321_v27 = vpop.permute.xlu1 %9661  ;;  %v23597_v55 = vld [vmem:[#allocation339_spill] sm:$0xff] }
 0x862   : > { %v10425_v20 = vadd.f32 %v10393_v42, %v10200_v14  ;;  %v11066_v49 = vmul.f32 %v12689_v29, %v10988_v24  ;;  %v10842_v11 = vmul.f32 %v12658_v48, %v23594_v1  ;;  %v10201_v32 = vadd.f32 %v10169_v0, %v9976_v63  ;;  %v12691_v42 = vld [vmem:[%s22399_s5 + $0xf90] sm:$0xff]  ;;  %v23598_v54 = vld [vmem:[#allocation59_spill] sm:$0xff] }
 0x863   : > { %v11144_v12 = vsel %vm11114_vm4, %v11097_v46, 0.0  ;;  %v10618_v47 = vmul.f32 %v12627_v60, %v23595_v6  ;;  %v10619_v40 = vmul.f32 %v12628_v59, %v23597_v55  ;;  %v10843_v3 = vmul.f32 %v12659_v39, %v23598_v54  ;;  %v12660_v34 = vld [vmem:[%s22399_s5 + $0xe98] sm:$0xff]  ;;  %v23599_v14 = vld [vmem:[#allocation341_spill] sm:$0xff] }
 0x864   : > { %v11145_v30 = vadd.f32 %v11144_v12, %v11143_v43  ;;  %v11098_v51 = vadd.f32 %v11066_v49, %v10873_v28  ;;  %v10992_v62 = vpop.permute.xlu0 %10991  ;;  %v10874_v38 = vadd.f32 %v10842_v11, %v10649_v4  ;;  %v10426_v35 = vadd.f32 %v10394_v17, %v10201_v32  ;;  %v12692_v0 = vld [vmem:[%s22399_s5 + $0xf98] sm:$0xff]  ;;  %v23601_v32 = vld [vmem:[#allocation273_spill] sm:$0xff] }
 0x865   : > { %14678 = vset.pattern.permute.xlu1 %v22891_v16  ;;  %v10650_v2 = vadd.f32 %v10618_v47, %v10425_v20  ;;  %v11067_v44 = vmul.f32 %v12690_v5, %v10992_v62  ;;  %v10844_v46 = vmul.f32 %v12660_v34, %v23599_v14  ;;  %v21338_v60 = vpop.permute.xlu1 %9886  ;;  %v23600_v24 = vmov 4   ;;  %v23602_v62 = vld [vmem:[#allocation284_spill] sm:$0xff]  ;;  %v23618_v34 = vld [vmem:[#allocation218_spill] sm:$0xff] }
 0x866   : > { %7662 = vperm.xlu1 %14678, %v23596_v52   ;;  %v11146_v19 = vsel %vm11114_vm4, %v11098_v51, 0.0  ;;  %v10651_v25 = vadd.f32 %v10619_v40, %v10426_v35  ;;  %v23611_v55 = vmov 13   ;;  %v23612_v40 = vld [vmem:[#allocation174_spill] sm:$0xff]  ;;  %v23614_v54 = vmov 14  }
 0x867   : > { %v11147_v10 = vadd.f32 %v11146_v19, %v11145_v30  ;;  %v11099_v22 = vadd.f32 %v11067_v44, %v10874_v38  ;;  %v10875_v29 = vadd.f32 %v10843_v3, %v10650_v2  ;;  %v23604_v19 = vld [vmem:[#allocation295_spill] sm:$0xff]  ;;  %v23615_v3 = vld [vmem:[#allocation185_spill] sm:$0xff] }
 0x868   : > { %v10996_v56 = vpop.permute.xlu0 %10995  ;;  %v10876_v20 = vadd.f32 %v10844_v46, %v10651_v25  ;;  %v23620_v25 = vld [vmem:[#allocation229_spill] sm:$0xff] }
 0x869   : > { %v11148_v43 = vsel %vm11114_vm4, %v11099_v22, 0.0  ;;  %v11068_v48 = vmul.f32 %v12691_v42, %v10996_v56  ;;  %v21343_v49 = vpop.permute.xlu1 %10111  ;;  %v23610_v42 = vld [vmem:[#allocation196_spill] sm:$0xff]  ;;  %v23617_v22 = vmov 10  }
 0x86a   : > { %14680 = vset.pattern.permute.xlu1 %v22893_v36  ;;  %v11149_v8 = vadd.f32 %v11148_v43, %v11147_v10  ;;  %v23609_v10 = vmov 11  }
 0x86b   : > { %8114 = vperm.xlu1 %14680, %v23596_v52   ;;  %v11100_v63 = vadd.f32 %v11068_v48, %v10875_v29  ;;  %v23622_v29 = vld [vmem:[#allocation207_spill] sm:$0xff] }
 0x86c   : > { %v11000_v4 = vpop.permute.xlu0 %10999 }
 0x86d   : > { %v11150_v28 = vsel %vm11114_vm4, %v11100_v63, 0.0  ;;  %v11069_v31 = vmul.f32 %v12692_v0, %v11000_v4  ;;  %v21350_v30 = vpop.permute.xlu1 %7642 }
 0x86e   : > { %v11151_v17 = vadd.f32 %v11150_v28, %v11149_v8 }
 0x86f   : > { %14682 = vset.pattern.permute.xlu1 %v23600_v24  ;;  %v11101_v12 = vadd.f32 %v11069_v31, %v10876_v20  ;;  %v7514_v20 = vld [vmem:[%s22399_s5 + $0xf8] sm:$0xff] }
 0x870   : > { %8564 = vperm.xlu1 %14682, %v23596_v52  }
 0x871   : > { %v11152_v1 = vsel %vm11114_vm4, %v11101_v12, 0.0  ;;  %v21354_v5 = vpop.permute.xlu1 %8098 }
 0x872   : > { %v21347_v11 = vadd.f32 %v11152_v1, %v11151_v17  ;;  %v12256_v17 = vld [vmem:[%s22399_s5 + $0x1f8] sm:$0xff] }
 0x873   : > { %v12288_v1 = vld [vmem:[%s22399_s5 + $0x2f8] sm:$0xff] }
 0x874   : > { %14684 = vset.pattern.permute.xlu1 %v22900_v50 }
 0x875   : > { %9014 = vperm.xlu1 %14684, %v23596_v52   ;;  %v21358_v6 = vpop.permute.xlu1 %8548 }
 0x879   : > { %14686 = vset.pattern.permute.xlu1 %v22903_v13  ;;  %v21362_v47 = vpop.permute.xlu1 %8998 }
 0x87a   : > { %9464 = vperm.xlu1 %14686, %v23596_v52  }
 0x87d   : > { %v21366_v51 = vpop.permute.xlu1 %9448 }
 0x87e   : > { %14689 = vset.pattern.permute.xlu1 %v23558_v45 }
 0x87f   : > { %7885 = vperm.xlu1 %14689, %v23601_v32  }
 0x881   : > { %v21370_v59 = vpop.permute.xlu1 %7869 }
 0x883   : > { %14691 = vset.pattern.permute.xlu1 %v22921_v41 }
 0x884   : > { %8335 = vperm.xlu1 %14691, %v23601_v32  }
 0x885   : > { %v21374_v39 = vpop.permute.xlu1 %8319 }
 0x888   : > { %14693 = vset.pattern.permute.xlu1 %v23578_v37 }
 0x889   : > { %8785 = vperm.xlu1 %14693, %v23601_v32   ;;  %v21378_v38 = vpop.permute.xlu1 %8769 }
 0x88d   : > { %14695 = vset.pattern.permute.xlu1 %v23583_v9  ;;  %v21382_v2 = vpop.permute.xlu1 %9219 }
 0x88e   : > { %9235 = vperm.xlu1 %14695, %v23601_v32  }
 0x891   : > { %v21386_v35 = vpop.permute.xlu1 %9669 }
 0x892   : > { %14697 = vset.pattern.permute.xlu1 %v23589_v61 }
 0x893   : > { %9685 = vperm.xlu1 %14697, %v23601_v32  }
 0x897   : > { %14698 = vset.pattern.permute.xlu1 %v22891_v16  ;;  %v21390_v16 = vpop.permute.xlu1 %9894 }
 0x898   : > { %7672 = vperm.xlu1 %14698, %v23602_v62  }
 0x89c   : > { %14700 = vset.pattern.permute.xlu1 %v22893_v36 }
 0x89d   : > { %8122 = vperm.xlu1 %14700, %v23602_v62  }
 0x8a1   : > { %14702 = vset.pattern.permute.xlu1 %v23600_v24 }
 0x8a2   : > { %8572 = vperm.xlu1 %14702, %v23602_v62  }
 0x8a6   : > { %14704 = vset.pattern.permute.xlu1 %v22900_v50 }
 0x8a7   : > { %9022 = vperm.xlu1 %14704, %v23602_v62  }
 0x8a9   : > { %v21394_v36 = vpop.permute.xlu1 %7652 }
 0x8aa   : > { %23603 = vst [vmem:[#allocation122_spill] sm:$0xff] %v21394_v36  ;;  %v23641_v36 = vld [vmem:[#allocation252_spill] sm:$0xff] }
 0x8ab   : > { %14706 = vset.pattern.permute.xlu1 %v22903_v13 }
 0x8ac   : > { %9472 = vperm.xlu1 %14706, %v23602_v62  }
 0x8ae   : > { %v21398_v44 = vpop.permute.xlu1 %8106 }
 0x8af   : > { %23605 = vst [vmem:[#allocation139_spill] sm:$0xff] %v21398_v44 }
 0x8b0   : > { %14709 = vset.pattern.permute.xlu1 %v23558_v45 }
 0x8b1   : > { %7893 = vperm.xlu1 %14709, %v23604_v19  }
 0x8b3   : > { %v21402_v50 = vpop.permute.xlu1 %8556 }
 0x8b4   : > { %23606 = vst [vmem:[#allocation29_spill] sm:$0xff] %v21402_v50 }
 0x8b5   : > { %14711 = vset.pattern.permute.xlu1 %v22921_v41 }
 0x8b6   : > { %8343 = vperm.xlu1 %14711, %v23604_v19  }
 0x8b8   : > { %v21406_v13 = vpop.permute.xlu1 %9006 }
 0x8b9   : > { %23607 = vst [vmem:[#allocation102_spill] sm:$0xff] %v21406_v13  ;;  %v12416_v13 = vld [vmem:[%s22399_s5 + $0x6f8] sm:$0xff] }
 0x8ba   : > { %14713 = vset.pattern.permute.xlu1 %v23578_v37 }
 0x8bb   : > { %8793 = vperm.xlu1 %14713, %v23604_v19  }
 0x8bd   : > { %v21410_v45 = vpop.permute.xlu1 %9456 }
 0x8be   : > { %23608 = vst [vmem:[#allocation57_spill] sm:$0xff] %v21410_v45 }
 0x8bf   : > { %14715 = vset.pattern.permute.xlu1 %v23583_v9 }
 0x8c0   : > { %9243 = vperm.xlu1 %14715, %v23604_v19  }
 0x8c4   : > { %14717 = vset.pattern.permute.xlu1 %v23589_v61 }
 0x8c5   : > { %9693 = vperm.xlu1 %14717, %v23604_v19  }
 0x8c7   : > { %v21414_v41 = vpop.permute.xlu1 %7877 }
 0x8c9   : > { %14718 = vset.pattern.permute.xlu1 %v23609_v10 }
 0x8ca   : > { %10115 = vperm.xlu1 %14718, %v23610_v42  }
 0x8cc   : > { %v21418_v37 = vpop.permute.xlu1 %8327 }
 0x8ce   : > { %14719 = vset.pattern.permute.xlu1 %v23611_v55 }
 0x8cf   : > { %10557 = vperm.xlu1 %14719, %v23612_v40  }
 0x8d1   : > { %v21422_v9 = vpop.permute.xlu1 %8777 }
 0x8d2   : > { %23613 = vst [vmem:[#allocation159_spill] sm:$0xff] %v21422_v9 }
 0x8d3   : > { %14720 = vset.pattern.permute.xlu1 %v23614_v54 }
 0x8d4   : > { %10778 = vperm.xlu1 %14720, %v23615_v3   ;;  %v12320_v3 = vld [vmem:[%s22399_s5 + $0x3f8] sm:$0xff] }
 0x8d6   : > { %v21426_v61 = vpop.permute.xlu1 %9227 }
 0x8d7   : > { %23616 = vst [vmem:[#allocation75_spill] sm:$0xff] %v21426_v61  ;;  %v23640_v61 = vld [vmem:[#allocation241_spill] sm:$0xff] }
 0x8d8   : > { %14721 = vset.pattern.permute.xlu1 %v23617_v22 }
 0x8d9   : > { %9898 = vperm.xlu1 %14721, %v23618_v34  }
 0x8dc   : > { %v21430_v56 = vpop.permute.xlu1 %9677 }
 0x8dd   : > { %23619 = vst [vmem:[#allocation93_spill] sm:$0xff] %v21430_v56  ;;  %14722 = vset.pattern.permute.xlu1 %v23609_v10  ;;  %v23638_v56 = vld [vmem:[#allocation230_spill] sm:$0xff] }
 0x8de   : > { %10119 = vperm.xlu1 %14722, %v23620_v25  }
 0x8e1   : > { %v21434_v43 = vpop.permute.xlu1 %7662 }
 0x8e2   : > { %23621 = vst [vmem:[#allocation63_spill] sm:$0xff] %v21434_v43  ;;  %14723 = vset.pattern.permute.xlu1 %v23611_v55  ;;  %v23635_v43 = vld [vmem:[#allocation340_spill] sm:$0xff] }
 0x8e3   : > { %10561 = vperm.xlu1 %14723, %v23622_v29  }
 0x8e6   : > { %v21438_v48 = vpop.permute.xlu1 %8114 }
 0x8e7   : > { %23623 = vst [vmem:[#allocation43_spill] sm:$0xff] %v21438_v48  ;;  %14724 = vset.pattern.permute.xlu1 %v23614_v54  ;;  %v12280_v48 = vld [vmem:[%s22399_s5 + $0x2b8] sm:$0xff] }
 0x8e8   : > { %10782 = vperm.xlu1 %14724, %v23612_v40   ;;  %v23632_v40 = vld [vmem:[#allocation336_spill] sm:$0xff] }
 0x8eb   : > { %v21442_v8 = vpop.permute.xlu1 %8564 }
 0x8ec   : > { %23624 = vst [vmem:[#allocation70_spill] sm:$0xff] %v21442_v8  ;;  %14725 = vset.pattern.permute.xlu1 %v23617_v22  ;;  %v12352_v8 = vld [vmem:[%s22399_s5 + $0x4f8] sm:$0xff] }
 0x8ed   : > { %9902 = vperm.xlu1 %14725, %v23561_v15  }
 0x8f0   : > { %v21446_v0 = vpop.permute.xlu1 %9014 }
 0x8f1   : > { %23625 = vst [vmem:[#allocation113_spill] sm:$0xff] %v21446_v0  ;;  %14726 = vset.pattern.permute.xlu1 %v23609_v10 }
 0x8f2   : > { %10123 = vperm.xlu1 %14726, %v23618_v34  }
 0x8f5   : > { %v21450_v14 = vpop.permute.xlu1 %9464 }
 0x8f6   : > { %23626 = vst [vmem:[#allocation72_spill] sm:$0xff] %v21450_v14  ;;  %14727 = vset.pattern.permute.xlu1 %v23611_v55 }
 0x8f7   : > { %10565 = vperm.xlu1 %14727, %v23610_v42  }
 0x8fa   : > { %v21454_v46 = vpop.permute.xlu1 %7885 }
 0x8fb   : > { %23627 = vst [vmem:[#allocation79_spill] sm:$0xff] %v21454_v46  ;;  %14728 = vset.pattern.permute.xlu1 %v23614_v54 }
 0x8fc   : > { %10786 = vperm.xlu1 %14728, %v23622_v29  }
 0x8ff   : > { %v21458_v63 = vpop.permute.xlu1 %8335 }
 0x900   : > { %23628 = vst [vmem:[#allocation15_spill] sm:$0xff] %v21458_v63  ;;  %14729 = vset.pattern.permute.xlu1 %v23617_v22  ;;  %v23637_v63 = vld [vmem:[#allocation13_spill] sm:$0xff] }
 0x901   : > { %9906 = vperm.xlu1 %14729, %v23511_v18  }
 0x904   : > { %v21462_v4 = vpop.permute.xlu1 %8785 }
 0x905   : > { %23629 = vst [vmem:[#allocation7_spill] sm:$0xff] %v21462_v4  ;;  %14730 = vset.pattern.permute.xlu1 %v23609_v10 }
 0x906   : > { %10127 = vperm.xlu1 %14730, %v23561_v15  }
 0x909   : > { %v21466_v24 = vpop.permute.xlu1 %9235 }
 0x90a   : > { %23630 = vst [vmem:[#allocation83_spill] sm:$0xff] %v21466_v24  ;;  %14731 = vset.pattern.permute.xlu1 %v23611_v55 }
 0x90b   : > { %10569 = vperm.xlu1 %14731, %v23620_v25  }
 0x90e   : > { %v21470_v28 = vpop.permute.xlu1 %9685 }
 0x90f   : > { %23631 = vst [vmem:[#allocation124_spill] sm:$0xff] %v21470_v28  ;;  %14732 = vset.pattern.permute.xlu1 %v23614_v54 }
 0x910   : > { %10790 = vperm.xlu1 %14732, %v23610_v42   ;;  %v7931_v42 = vmul.f32 %v12256_v17, %v23632_v40  ;;  %v7504_v17 = vld [vmem:[%s22399_s5 + $0xa8] sm:$0xff] }
 0x913   : > { %v7673_v31 = vpop.permute.xlu1 %7672 }
 0x914   : > { %14733 = vset.pattern.permute.xlu1 %v23617_v22  ;;  %v7706_v12 = vmul.f32 %v7673_v31, %v7514_v20  ;;  %v23633_v20 = vld [vmem:[#allocation338_spill] sm:$0xff] }
 0x915   : > { %9910 = vperm.xlu1 %14733, %v23601_v32   ;;  %v8381_v31 = vmul.f32 %v12320_v3, %v23633_v20  ;;  %v12278_v3 = vld [vmem:[%s22399_s5 + $0x2a8] sm:$0xff]  ;;  %v7503_v20 = vld [vmem:[%s22399_s5 + $0xa0] sm:$0xff] }
 0x916   : > { %v7963_v14 = vadd.f32 %v7931_v42, %v7706_v12  ;;  %v12384_v12 = vld [vmem:[%s22399_s5 + $0x5f8] sm:$0xff]  ;;  %v12246_v42 = vld [vmem:[%s22399_s5 + $0x1a8] sm:$0xff]  ;;  %v7695_v44 = vmul.f32 %v23640_v61, %v7503_v20 }
 0x917   : > { %v7921_v50 = vmul.f32 %v12246_v42, %v23638_v56 }
 0x918   : > { %v8123_v29 = vpop.permute.xlu1 %8122 }
 0x919   : > { %v8156_v0 = vmul.f32 %v12288_v1, %v8123_v29  ;;  %14734 = vset.pattern.permute.xlu1 %v23609_v10  ;;  %v12245_v1 = vld [vmem:[%s22399_s5 + $0x1a0] sm:$0xff] }
 0x91a   : > { %10131 = vperm.xlu1 %14734, %v23511_v18  }
 0x91b   : > { %v8188_v28 = vadd.f32 %v8156_v0, %v7963_v14  ;;  %v7506_v0 = vld [vmem:[%s22399_s5 + $0xb8] sm:$0xff] }
 0x91c   : > { %v7698_v45 = vmul.f32 %v23637_v63, %v7506_v0 }
 0x91d   : > { %v8413_v14 = vadd.f32 %v8381_v31, %v8188_v28  ;;  %v8573_v40 = vpop.permute.xlu1 %8572  ;;  %v12248_v28 = vld [vmem:[%s22399_s5 + $0x1b8] sm:$0xff] }
 0x91e   : > { %v8606_v29 = vmul.f32 %v12352_v8, %v8573_v40  ;;  %14735 = vset.pattern.permute.xlu1 %v23611_v55  ;;  %v23634_v31 = vld [vmem:[#allocation98_spill] sm:$0xff]  ;;  %v8831_v8 = vmul.f32 %v12384_v12, %v23635_v43  ;;  %v7923_v9 = vmul.f32 %v12248_v28, %v23641_v36  ;;  %v12310_v36 = vld [vmem:[%s22399_s5 + $0x3a8] sm:$0xff] }
 0x91f   : > { %v7696_v24 = vmul.f32 %v23634_v31, %v7504_v17  ;;  %10573 = vperm.xlu1 %14735, %v23618_v34   ;;  %v23636_v40 = vld [vmem:[#allocation78_spill] sm:$0xff] }
 0x920   : > { %v7920_v4 = vmul.f32 %v12245_v1, %v23636_v40  ;;  %v8638_v46 = vadd.f32 %v8606_v29, %v8413_v14  ;;  %v23639_v17 = vld [vmem:[#allocation62_spill] sm:$0xff]  ;;  %v12277_v14 = vld [vmem:[%s22399_s5 + $0x2a0] sm:$0xff]  ;;  %v7955_v42 = vadd.f32 %v7923_v9, %v7698_v45  ;;  %v12342_v9 = vld [vmem:[%s22399_s5 + $0x4a8] sm:$0xff] }
 0x921   : > { %v8146_v31 = vmul.f32 %v12278_v3, %v23639_v17  ;;  %v12448_v43 = vld [vmem:[%s22399_s5 + $0x7f8] sm:$0xff]  ;;  %v7953_v29 = vadd.f32 %v7921_v50, %v7696_v24  ;;  %v12309_v50 = vld [vmem:[%s22399_s5 + $0x3a0] sm:$0xff] }
 0x922   : > { %v23642_v12 = vld [vmem:[#allocation10_spill] sm:$0xff]  ;;  %v8863_v63 = vadd.f32 %v8831_v8, %v8638_v46  ;;  %v9023_v0 = vpop.permute.xlu1 %9022  ;;  %v7952_v61 = vadd.f32 %v7920_v4, %v7695_v44  ;;  %v23643_v46 = vld [vmem:[#allocation45_spill] sm:$0xff]  ;;  %v23644_v44 = vld [vmem:[#allocation243_spill] sm:$0xff] }
 0x923   : > { %v8148_v1 = vmul.f32 %v12280_v48, %v23642_v12  ;;  %v9056_v56 = vmul.f32 %v12416_v13, %v9023_v0  ;;  %14736 = vset.pattern.permute.xlu1 %v23614_v54  ;;  %v12312_v48 = vld [vmem:[%s22399_s5 + $0x3b8] sm:$0xff]  ;;  %v9281_v3 = vmul.f32 %v12448_v43, %v23643_v46  ;;  %v8178_v20 = vadd.f32 %v8146_v31, %v7953_v29  ;;  %v23645_v4 = vld [vmem:[#allocation232_spill] sm:$0xff] }
 0x924   : > { %10794 = vperm.xlu1 %14736, %v23620_v25   ;;  %v12480_v24 = vld [vmem:[%s22399_s5 + $0x8f8] sm:$0xff]  ;;  %v8145_v45 = vmul.f32 %v12277_v14, %v23644_v44  ;;  %v8371_v28 = vmul.f32 %v12310_v36, %v23645_v4 }
 0x925   : > { %v9088_v13 = vadd.f32 %v9056_v56, %v8863_v63  ;;  %v8180_v25 = vadd.f32 %v8148_v1, %v7955_v42  ;;  %v12344_v8 = vld [vmem:[%s22399_s5 + $0x4b8] sm:$0xff]  ;;  %v7513_v1 = vld [vmem:[%s22399_s5 + $0xf0] sm:$0xff] }
 0x926   : > { %v23646_v31 = vld [vmem:[#allocation254_spill] sm:$0xff]  ;;  %v8177_v12 = vadd.f32 %v8145_v45, %v7952_v61  ;;  %v8403_v14 = vadd.f32 %v8371_v28, %v8178_v20  ;;  %v8598_v42 = vmul.f32 %v12344_v8, %v21054_v21  ;;  %v12374_v20 = vld [vmem:[%s22399_s5 + $0x5a8] sm:$0xff]  ;;  %v23650_v44 = vld [vmem:[#allocation19_spill] sm:$0xff] }
 0x927   : > { %v9313_v40 = vadd.f32 %v9281_v3, %v9088_v13  ;;  %v9473_v17 = vpop.permute.xlu1 %9472  ;;  %v8373_v43 = vmul.f32 %v12312_v48, %v23646_v31  ;;  %v23647_v63 = vld [vmem:[#allocation50_spill] sm:$0xff]  ;;  %v12341_v48 = vld [vmem:[%s22399_s5 + $0x4a0] sm:$0xff]  ;;  %v7705_v45 = vmul.f32 %v23650_v44, %v7513_v1  ;;  %v23651_v28 = vld [vmem:[#allocation245_spill] sm:$0xff] }
 0x928   : > { %v8370_v0 = vmul.f32 %v12309_v50, %v23647_v63  ;;  %v9506_v29 = vmul.f32 %v12480_v24, %v9473_v17  ;;  %14737 = vset.pattern.permute.xlu1 %v23617_v22  ;;  %v23648_v56 = vld [vmem:[#allocation38_spill] sm:$0xff]  ;;  %v8595_v8 = vmul.f32 %v12341_v48, %v23651_v28  ;;  %v12249_v44 = vld [vmem:[%s22399_s5 + $0x1c0] sm:$0xff] }
 0x929   : > { %v8596_v46 = vmul.f32 %v12342_v9, %v23648_v56  ;;  %9914 = vperm.xlu1 %14737, %v23596_v52   ;;  %v8405_v36 = vadd.f32 %v8373_v43, %v8180_v25  ;;  %v12255_v61 = vld [vmem:[%s22399_s5 + $0x1f0] sm:$0xff]  ;;  %v12376_v24 = vld [vmem:[%s22399_s5 + $0x5b8] sm:$0xff]  ;;  %v12373_v25 = vld [vmem:[%s22399_s5 + $0x5a0] sm:$0xff] }
 0x92a   : > { %v21574_v3 = vadd.f32 %v9506_v29, %v9313_v40  ;;  %v12287_v50 = vld [vmem:[%s22399_s5 + $0x2f0] sm:$0xff]  ;;  %v8402_v13 = vadd.f32 %v8370_v0, %v8177_v12  ;;  %v12406_v40 = vld [vmem:[%s22399_s5 + $0x6a8] sm:$0xff]  ;;  %v12408_v0 = vld [vmem:[%s22399_s5 + $0x6b8] sm:$0xff] }
 0x92b   : > { %v8628_v9 = vadd.f32 %v8596_v46, %v8403_v14  ;;  %v8630_v17 = vadd.f32 %v8598_v42, %v8405_v36  ;;  %v23652_v31 = vld [vmem:[#allocation234_spill] sm:$0xff]  ;;  %v23653_v12 = vld [vmem:[#allocation48_spill] sm:$0xff] }
 0x92c   : > { %23649 = vst [vmem:[#allocation141_spill] sm:$0xff] %v21574_v3  ;;  %v7894_v21 = vpop.permute.xlu1 %7893  ;;  %v8821_v43 = vmul.f32 %v12374_v20, %v23652_v31  ;;  %v8155_v63 = vmul.f32 %v12287_v50, %v23653_v12  ;;  %v12319_v14 = vld [vmem:[%s22399_s5 + $0x3f0] sm:$0xff]  ;;  %v23654_v56 = vld [vmem:[#allocation256_spill] sm:$0xff]  ;;  %v8627_v1 = vadd.f32 %v8595_v8, %v8402_v13  ;;  %v23666_v3 = vld [vmem:[#allocation51_spill] sm:$0xff] }
 0x92d   : > { %v7930_v4 = vmul.f32 %v12255_v61, %v7894_v21  ;;  %14738 = vset.pattern.permute.xlu1 %v23609_v10  ;;  %v8823_v46 = vmul.f32 %v12376_v24, %v23654_v56  ;;  %v23655_v61 = vld [vmem:[#allocation31_spill] sm:$0xff]  ;;  %v12247_v42 = vld [vmem:[%s22399_s5 + $0x1b0] sm:$0xff]  ;;  %v23657_v31 = vld [vmem:[#allocation44_spill] sm:$0xff] }
 0x92e   : > { %10135 = vperm.xlu1 %14738, %v23601_v32   ;;  %v8820_v36 = vmul.f32 %v12373_v25, %v23655_v61  ;;  %v12351_v48 = vld [vmem:[%s22399_s5 + $0x4f0] sm:$0xff]  ;;  %v8853_v20 = vadd.f32 %v8821_v43, %v8628_v9  ;;  %v12405_v9 = vld [vmem:[%s22399_s5 + $0x6a0] sm:$0xff] }
 0x92f   : > { %v7962_v29 = vadd.f32 %v7930_v4, %v7705_v45  ;;  %v23656_v50 = vld [vmem:[#allocation25_spill] sm:$0xff]  ;;  %v8855_v25 = vadd.f32 %v8823_v46, %v8630_v17  ;;  %v9048_v4 = vmul.f32 %v12408_v0, %v21091_v58  ;;  %v7507_v8 = vld [vmem:[%s22399_s5 + $0xc0] sm:$0xff]  ;;  %v12440_v58 = vld [vmem:[%s22399_s5 + $0x7b8] sm:$0xff]  ;;  %v8605_v43 = vmul.f32 %v12351_v48, %v23657_v31 }
 0x930   : > { %v9046_v21 = vmul.f32 %v12406_v40, %v23656_v50  ;;  %v7505_v13 = vld [vmem:[%s22399_s5 + $0xb0] sm:$0xff]  ;;  %v7922_v40 = vmul.f32 %v12247_v42, %v21210_v7  ;;  %v12438_v17 = vld [vmem:[%s22399_s5 + $0x7a8] sm:$0xff]  ;;  %v8852_v12 = vadd.f32 %v8820_v36, %v8627_v1  ;;  %v12437_v61 = vld [vmem:[%s22399_s5 + $0x7a0] sm:$0xff] }
 0x931   : > { %v8187_v45 = vadd.f32 %v8155_v63, %v7962_v29  ;;  %v8344_v24 = vpop.permute.xlu1 %8343  ;;  %v7924_v63 = vmul.f32 %v12249_v44, %v21370_v59  ;;  %v12383_v7 = vld [vmem:[%s22399_s5 + $0x5f0] sm:$0xff]  ;;  %v23658_v29 = vld [vmem:[#allocation263_spill] sm:$0xff]  ;;  %v12470_v50 = vld [vmem:[%s22399_s5 + $0x8a8] sm:$0xff]  ;;  %v9080_v44 = vadd.f32 %v9048_v4, %v8855_v25 }
 0x932   : > { %v8380_v28 = vmul.f32 %v12319_v14, %v8344_v24  ;;  %14739 = vset.pattern.permute.xlu1 %v23611_v55  ;;  %v7697_v14 = vmul.f32 %v23658_v29, %v7505_v13  ;;  %v12279_v56 = vld [vmem:[%s22399_s5 + $0x2b0] sm:$0xff]  ;;  %v9078_v46 = vadd.f32 %v9046_v21, %v8853_v20  ;;  %v23659_v42 = vld [vmem:[#allocation247_spill] sm:$0xff]  ;;  %v23661_v20 = vld [vmem:[#allocation236_spill] sm:$0xff] }
 0x933   : > { %10577 = vperm.xlu1 %14739, %v23561_v15   ;;  %v9045_v1 = vmul.f32 %v12405_v9, %v23659_v42  ;;  %v23660_v36 = vld [vmem:[#allocation285_spill] sm:$0xff]  ;;  %v9271_v21 = vmul.f32 %v12438_v17, %v23661_v20  ;;  %v23662_v13 = vld [vmem:[#allocation258_spill] sm:$0xff]  ;;  %v12281_v9 = vld [vmem:[%s22399_s5 + $0x2c0] sm:$0xff] }
 0x934   : > { %v8412_v0 = vadd.f32 %v8380_v28, %v8187_v45  ;;  %v7699_v59 = vmul.f32 %v23660_v36, %v7507_v8  ;;  %v12415_v48 = vld [vmem:[%s22399_s5 + $0x6f0] sm:$0xff]  ;;  %v9273_v28 = vmul.f32 %v12440_v58, %v23662_v13  ;;  %v12472_v8 = vld [vmem:[%s22399_s5 + $0x8b8] sm:$0xff]  ;;  %v7954_v31 = vadd.f32 %v7922_v40, %v7697_v14  ;;  %v23665_v36 = vld [vmem:[#allocation92_spill] sm:$0xff] }
 0x935   : > { %v23663_v42 = vld [vmem:[#allocation265_spill] sm:$0xff]  ;;  %v9077_v4 = vadd.f32 %v9045_v1, %v8852_v12  ;;  %v9055_v20 = vmul.f32 %v12415_v48, %v23665_v36  ;;  %v9303_v13 = vadd.f32 %v9271_v21, %v9078_v46  ;;  %v9496_v40 = vmul.f32 %v12470_v50, %v23666_v3  ;;  %v23671_v36 = vld [vmem:[#allocation260_spill] sm:$0xff] }
 0x936   : > { %v8637_v45 = vadd.f32 %v8605_v43, %v8412_v0  ;;  %v8794_v24 = vpop.permute.xlu1 %8793  ;;  %v8147_v25 = vmul.f32 %v12279_v56, %v23663_v42  ;;  %v23664_v43 = vld [vmem:[#allocation33_spill] sm:$0xff]  ;;  %v7956_v58 = vadd.f32 %v7924_v63, %v7699_v59  ;;  %v23667_v56 = vld [vmem:[#allocation287_spill] sm:$0xff]  ;;  %v9305_v1 = vadd.f32 %v9273_v28, %v9080_v44  ;;  %v23669_v42 = vld [vmem:[#allocation24_spill] sm:$0xff] }
 0x937   : > { %v8830_v29 = vmul.f32 %v12383_v7, %v8794_v24  ;;  %14740 = vset.pattern.permute.xlu1 %v23614_v54  ;;  %v9270_v0 = vmul.f32 %v12437_v61, %v23664_v43  ;;  %v12311_v17 = vld [vmem:[%s22399_s5 + $0x3b0] sm:$0xff]  ;;  %v12313_v7 = vld [vmem:[%s22399_s5 + $0x3c0] sm:$0xff]  ;;  %v8149_v61 = vmul.f32 %v12281_v9, %v23667_v56  ;;  %v9498_v63 = vmul.f32 %v12472_v8, %v21129_v26  ;;  %v12504_v26 = vld [vmem:[%s22399_s5 + $0x9b8] sm:$0xff] }
 0x938   : > { %10798 = vperm.xlu1 %14740, %v23618_v34   ;;  %v12447_v12 = vld [vmem:[%s22399_s5 + $0x7f0] sm:$0xff]  ;;  %v12469_v34 = vld [vmem:[%s22399_s5 + $0x8a0] sm:$0xff]  ;;  %v8179_v46 = vadd.f32 %v8147_v25, %v7954_v31  ;;  %v8372_v59 = vmul.f32 %v12311_v17, %v21244_v57  ;;  %v8374_v21 = vmul.f32 %v12313_v7, %v21374_v39  ;;  %v9528_v9 = vadd.f32 %v9496_v40, %v9303_v13  ;;  %v12534_v39 = vld [vmem:[%s22399_s5 + $0xaa8] sm:$0xff] }
 0x939   : > { %v8862_v14 = vadd.f32 %v8830_v29, %v8637_v45  ;;  %v12479_v3 = vld [vmem:[%s22399_s5 + $0x8f0] sm:$0xff]  ;;  %v12502_v45 = vld [vmem:[%s22399_s5 + $0x9a8] sm:$0xff]  ;;  %v9302_v44 = vadd.f32 %v9270_v0, %v9077_v4  ;;  %v8181_v24 = vadd.f32 %v8149_v61, %v7956_v58  ;;  %v12501_v57 = vld [vmem:[%s22399_s5 + $0x9a0] sm:$0xff]  ;;  %v9530_v4 = vadd.f32 %v9498_v63, %v9305_v1 }
 0x93a   : > { %v23668_v8 = vld [vmem:[#allocation249_spill] sm:$0xff]  ;;  %v9505_v25 = vmul.f32 %v12479_v3, %v23669_v42  ;;  %v23670_v17 = vld [vmem:[#allocation238_spill] sm:$0xff]  ;;  %v12345_v13 = vld [vmem:[%s22399_s5 + $0x4c0] sm:$0xff] }
 0x93b   : > { %v9087_v48 = vadd.f32 %v9055_v20, %v8862_v14  ;;  %v9244_v50 = vpop.permute.xlu1 %9243  ;;  %v9495_v31 = vmul.f32 %v12469_v34, %v23668_v8  ;;  %v12343_v29 = vld [vmem:[%s22399_s5 + $0x4b0] sm:$0xff]  ;;  %v9721_v58 = vmul.f32 %v12502_v45, %v23670_v17  ;;  %v9723_v20 = vmul.f32 %v12504_v26, %v23671_v36  ;;  %v12533_v40 = vld [vmem:[%s22399_s5 + $0xaa0] sm:$0xff]  ;;  %v12536_v7 = vld [vmem:[%s22399_s5 + $0xab8] sm:$0xff] }
 0x93c   : > { %v9280_v28 = vmul.f32 %v12447_v12, %v9244_v50  ;;  %14741 = vset.pattern.permute.xlu1 %v23617_v22  ;;  %v12511_v0 = vld [vmem:[%s22399_s5 + $0x9f0] sm:$0xff]  ;;  %v8404_v14 = vadd.f32 %v8372_v59, %v8179_v46  ;;  %v12566_v12 = vld [vmem:[%s22399_s5 + $0xba8] sm:$0xff]  ;;  %v23672_v61 = vld [vmem:[#allocation67_spill] sm:$0xff]  ;;  %v8406_v34 = vadd.f32 %v8374_v21, %v8181_v24 }
 0x93d   : > { %9918 = vperm.xlu1 %14741, %v23604_v19   ;;  %v9527_v56 = vadd.f32 %v9495_v31, %v9302_v44  ;;  %v9720_v1 = vmul.f32 %v12501_v57, %v23672_v61  ;;  %v12375_v63 = vld [vmem:[%s22399_s5 + $0x5b0] sm:$0xff]  ;;  %v23673_v50 = vld [vmem:[#allocation267_spill] sm:$0xff]  ;;  %v9753_v26 = vadd.f32 %v9721_v58, %v9528_v9  ;;  %v9755_v42 = vadd.f32 %v9723_v20, %v9530_v4  ;;  %v23678_v36 = vld [vmem:[#allocation40_spill] sm:$0xff] }
 0x93e   : > { %v9312_v43 = vadd.f32 %v9280_v28, %v9087_v48  ;;  %v8597_v45 = vmul.f32 %v12343_v29, %v23673_v50  ;;  %v23674_v28 = vld [vmem:[#allocation103_spill] sm:$0xff]  ;;  %v23675_v57 = vld [vmem:[#allocation289_spill] sm:$0xff]  ;;  %v9948_v9 = vmul.f32 %v12536_v7, %v21178_v53  ;;  %v23677_v29 = vld [vmem:[#allocation22_spill] sm:$0xff] }
 0x93f   : > { %v9946_v8 = vmul.f32 %v12534_v39, %v23674_v28  ;;  %v12565_v46 = vld [vmem:[%s22399_s5 + $0xba0] sm:$0xff]  ;;  %v8599_v24 = vmul.f32 %v12345_v13, %v23675_v57  ;;  %v23676_v21 = vld [vmem:[#allocation65_spill] sm:$0xff]  ;;  %v12568_v58 = vld [vmem:[%s22399_s5 + $0xbb8] sm:$0xff]  ;;  %v9752_v4 = vadd.f32 %v9720_v1, %v9527_v56 }
 0x940   : > { %v9537_v3 = vadd.f32 %v9505_v25, %v9312_v43  ;;  %v9694_v48 = vpop.permute.xlu1 %9693  ;;  %v12377_v59 = vld [vmem:[%s22399_s5 + $0x5c0] sm:$0xff]  ;;  %v9945_v31 = vmul.f32 %v12533_v40, %v23676_v21  ;;  %v10171_v25 = vmul.f32 %v12566_v12, %v23677_v29  ;;  %v12598_v39 = vld [vmem:[%s22399_s5 + $0xca8] sm:$0xff]  ;;  %v8629_v43 = vadd.f32 %v8597_v45, %v8404_v14  ;;  %v12600_v7 = vld [vmem:[%s22399_s5 + $0xcb8] sm:$0xff] }
 0x941   : > { %v9730_v44 = vmul.f32 %v12511_v0, %v9694_v48  ;;  %14742 = vset.pattern.permute.xlu1 %v23609_v10  ;;  %v8822_v0 = vmul.f32 %v12375_v63, %v21282_v23  ;;  %v10170_v53 = vmul.f32 %v12565_v46, %v23678_v36  ;;  %v8631_v20 = vadd.f32 %v8599_v24, %v8406_v34  ;;  %v12407_v23 = vld [vmem:[%s22399_s5 + $0x6b0] sm:$0xff]  ;;  %v12250_v12 = vld [vmem:[%s22399_s5 + $0x1c8] sm:$0xff]  ;;  %v12597_v50 = vld [vmem:[%s22399_s5 + $0xca0] sm:$0xff] }
 0x942   : > { %10139 = vperm.xlu1 %14742, %v23596_v52   ;;  %v8824_v13 = vmul.f32 %v12377_v59, %v21378_v38  ;;  %v9978_v40 = vadd.f32 %v9946_v8, %v9753_v26  ;;  %v23679_v56 = vld [vmem:[#allocation58_spill] sm:$0xff]  ;;  %v9977_v1 = vadd.f32 %v9945_v31, %v9752_v4  ;;  %v9980_v63 = vadd.f32 %v9948_v9, %v9755_v42  ;;  %v7508_v38 = vld [vmem:[%s22399_s5 + $0xc8] sm:$0xff]  ;;  %v12629_v29 = vld [vmem:[%s22399_s5 + $0xda0] sm:$0xff] }
 0x943   : > { %v21751_v17 = vadd.f32 %v9730_v44, %v9537_v3  ;;  %v10396_v61 = vmul.f32 %v12598_v39, %v23679_v56  ;;  %v12409_v3 = vld [vmem:[%s22399_s5 + $0x6c0] sm:$0xff]  ;;  %v8854_v45 = vadd.f32 %v8822_v0, %v8629_v43  ;;  %v23680_v26 = vld [vmem:[#allocation6_spill] sm:$0xff]  ;;  %v12282_v59 = vld [vmem:[%s22399_s5 + $0x2c8] sm:$0xff] }
 0x944   : > { %v10203_v48 = vadd.f32 %v10171_v25, %v9978_v40  ;;  %v10398_v28 = vmul.f32 %v12600_v7, %v23680_v26  ;;  %v10202_v8 = vadd.f32 %v10170_v53, %v9977_v1  ;;  %v12439_v46 = vld [vmem:[%s22399_s5 + $0x7b0] sm:$0xff]  ;;  %v8856_v44 = vadd.f32 %v8824_v13, %v8631_v20  ;;  %v12630_v24 = vld [vmem:[%s22399_s5 + $0xda8] sm:$0xff]  ;;  %v12441_v39 = vld [vmem:[%s22399_s5 + $0x7c0] sm:$0xff] }
 0x945   : > { %v10116_v14 = vpop.permute.xlu1 %10115  ;;  %v23681_v21 = vld [vmem:[#allocation269_spill] sm:$0xff]  ;;  %v23682_v42 = vld [vmem:[#allocation274_spill] sm:$0xff]  ;;  %v7700_v25 = vmul.f32 %v21350_v30, %v7508_v38  ;;  %v23683_v43 = vld [vmem:[#allocation291_spill] sm:$0xff]  ;;  %v9272_v40 = vmul.f32 %v12439_v46, %v21305_v33  ;;  %v8150_v7 = vmul.f32 %v12282_v59, %v21354_v5  ;;  %v9274_v1 = vmul.f32 %v12441_v39, %v21382_v2 }
 0x946   : > { %v10173_v34 = vmul.f32 %v12568_v58, %v10116_v14  ;;  %14743 = vset.pattern.permute.xlu1 %v23611_v55  ;;  %v9047_v31 = vmul.f32 %v12407_v23, %v23681_v21  ;;  %v7925_v9 = vmul.f32 %v12250_v12, %v23682_v42  ;;  %v9049_v0 = vmul.f32 %v12409_v3, %v23683_v43  ;;  %v23684_v58 = vld [vmem:[#allocation107_spill] sm:$0xff]  ;;  %v23685_v23 = vld [vmem:[#allocation94_spill] sm:$0xff]  ;;  %v12314_v38 = vld [vmem:[%s22399_s5 + $0x3c8] sm:$0xff]  ;;  %v11004_v3 = vpop.permute.xlu0 %11003 }
 0x947   : > { %10581 = vperm.xlu1 %14743, %v23511_v18   ;;  %v10395_v4 = vmul.f32 %v12597_v50, %v23684_v58  ;;  %v10428_v36 = vadd.f32 %v10396_v61, %v10203_v48  ;;  %v10620_v12 = vmul.f32 %v12629_v29, %v23685_v23  ;;  %v12661_v33 = vld [vmem:[%s22399_s5 + $0xea0] sm:$0xff]  ;;  %v12471_v5 = vld [vmem:[%s22399_s5 + $0x8b0] sm:$0xff] }
 0x948   : > { %v10205_v57 = vadd.f32 %v10173_v34, %v9980_v63  ;;  %v9079_v13 = vadd.f32 %v9047_v31, %v8854_v45  ;;  %v9081_v56 = vadd.f32 %v9049_v0, %v8856_v44  ;;  %v7957_v61 = vadd.f32 %v7925_v9, %v7700_v25  ;;  %v12473_v2 = vld [vmem:[%s22399_s5 + $0x8c0] sm:$0xff]  ;;  %v12503_v26 = vld [vmem:[%s22399_s5 + $0x9b0] sm:$0xff] }
 0x949   : > { %v10427_v30 = vadd.f32 %v10395_v4, %v10202_v8  ;;  %v12693_v34 = vld [vmem:[%s22399_s5 + $0xfa0] sm:$0xff]  ;;  %v23688_v31 = vld [vmem:[#allocation293_spill] sm:$0xff] }
 0x94a   : > { %v10558_v53 = vpop.permute.xlu1 %10557  ;;  %v21800_v20 = vadd.f32 %v10398_v28, %v10205_v57  ;;  %v8182_v48 = vadd.f32 %v8150_v7, %v7957_v61  ;;  %v12346_v28 = vld [vmem:[%s22399_s5 + $0x4c8] sm:$0xff]  ;;  %v9306_v8 = vadd.f32 %v9274_v1, %v9081_v56  ;;  %v23686_v59 = vld [vmem:[#allocation271_spill] sm:$0xff]  ;;  %v9499_v42 = vmul.f32 %v12473_v2, %v23688_v31  ;;  %v12535_v9 = vld [vmem:[%s22399_s5 + $0xab0] sm:$0xff] }
 0x94b   : > { %v10621_v14 = vmul.f32 %v12630_v24, %v10558_v53  ;;  %14744 = vset.pattern.permute.xlu1 %v23614_v54  ;;  %v10652_v45 = vadd.f32 %v10620_v12, %v10427_v30  ;;  %v9497_v44 = vmul.f32 %v12471_v5, %v23686_v59  ;;  %v23687_v57 = vld [vmem:[#allocation276_spill] sm:$0xff]  ;;  %v11070_v29 = vmul.f32 %v12693_v34, %v11004_v3  ;;  %v12567_v4 = vld [vmem:[%s22399_s5 + $0xbb0] sm:$0xff] }
 0x94c   : > { %10802 = vperm.xlu1 %14744, %v23561_v15   ;;  %v9304_v15 = vadd.f32 %v9272_v40, %v9079_v13  ;;  %v8375_v24 = vmul.f32 %v12314_v38, %v23687_v57  ;;  %v12505_v21 = vld [vmem:[%s22399_s5 + $0x9c0] sm:$0xff]  ;;  %v8600_v0 = vmul.f32 %v12346_v28, %v21358_v6  ;;  %v9947_v7 = vmul.f32 %v12535_v9, %v21338_v60  ;;  %v12410_v56 = vld [vmem:[%s22399_s5 + $0x6c8] sm:$0xff]  ;;  %v23689_v1 = vld [vmem:[#allocation278_spill] sm:$0xff] }
 0x94d   : > { %v21808_v63 = vadd.f32 %v10621_v14, %v10428_v36  ;;  %v12537_v58 = vld [vmem:[%s22399_s5 + $0xac0] sm:$0xff]  ;;  %v9531_v36 = vadd.f32 %v9499_v42, %v9306_v8  ;;  %v9724_v53 = vmul.f32 %v12505_v21, %v21386_v35  ;;  %v10172_v35 = vmul.f32 %v12567_v4, %v21343_v49  ;;  %v12599_v38 = vld [vmem:[%s22399_s5 + $0xcb0] sm:$0xff]  ;;  %v12442_v57 = vld [vmem:[%s22399_s5 + $0x7c8] sm:$0xff] }
 0x94e   : > { %v9529_v39 = vadd.f32 %v9497_v44, %v9304_v15  ;;  %v8407_v43 = vadd.f32 %v8375_v24, %v8182_v48  ;;  %v9949_v6 = vmul.f32 %v12537_v58, %v21390_v16  ;;  %v12569_v60 = vld [vmem:[%s22399_s5 + $0xbc0] sm:$0xff]  ;;  %v7509_v34 = vld [vmem:[%s22399_s5 + $0xd0] sm:$0xff]  ;;  %v12662_v4 = vld [vmem:[%s22399_s5 + $0xea8] sm:$0xff] }
 0x94f   : > { %v10779_v50 = vpop.permute.xlu1 %10778  ;;  %v9756_v16 = vadd.f32 %v9724_v53, %v9531_v36  ;;  %v23691_v59 = vld [vmem:[#allocation109_spill] sm:$0xff]  ;;  %v23692_v24 = vld [vmem:[#allocation306_spill] sm:$0xff]  ;;  %v23694_v36 = vld [vmem:[#allocation308_spill] sm:$0xff] }
 0x950   : > { %v10845_v46 = vmul.f32 %v12661_v33, %v10779_v50  ;;  %14745 = vset.pattern.permute.xlu1 %v23617_v22  ;;  %v9722_v22 = vmul.f32 %v12503_v26, %v21321_v27  ;;  %v12378_v27 = vld [vmem:[%s22399_s5 + $0x5c8] sm:$0xff]  ;;  %v8632_v23 = vadd.f32 %v8600_v0, %v8407_v43  ;;  %v12601_v33 = vld [vmem:[%s22399_s5 + $0xcc0] sm:$0xff]  ;;  %v9050_v50 = vmul.f32 %v12410_v56, %v21362_v47  ;;  %v12315_v0 = vld [vmem:[%s22399_s5 + $0x3d0] sm:$0xff] }
 0x951   : > { %9922 = vperm.xlu1 %14745, %v23602_v62   ;;  %v8825_v61 = vmul.f32 %v12378_v27, %v23689_v1  ;;  %v9981_v2 = vadd.f32 %v9949_v6, %v9756_v16  ;;  %v10397_v44 = vmul.f32 %v12599_v38, %v23691_v59  ;;  %v7701_v21 = vmul.f32 %v23692_v24, %v7509_v34  ;;  %v23697_v38 = vld [vmem:[#allocation282_spill] sm:$0xff]  ;;  %v12602_v59 = vld [vmem:[%s22399_s5 + $0xcc8] sm:$0xff] }
 0x952   : > { %v10877_v25 = vadd.f32 %v10845_v46, %v10652_v45  ;;  %v9754_v30 = vadd.f32 %v9722_v22, %v9529_v39  ;;  %v23690_v45 = vld [vmem:[#allocation120_spill] sm:$0xff]  ;;  %v12631_v46 = vld [vmem:[%s22399_s5 + $0xdb0] sm:$0xff]  ;;  %v23695_v56 = vmov 0.0  }
 0x953   : > { %v8857_v48 = vadd.f32 %v8825_v61, %v8632_v23  ;;  %v10399_v26 = vmul.f32 %v12601_v33, %v23690_v45  ;;  %v23693_v22 = vld [vmem:[#allocation280_spill] sm:$0xff]  ;;  %v8376_v23 = vmul.f32 %v12315_v0, %v21418_v37  ;;  %v12347_v61 = vld [vmem:[%s22399_s5 + $0x4d0] sm:$0xff]  ;;  %14222 = vmatprep.mubr.msk.f32.mxu0 %vm14844_vm5, %v23695_v56  ;;  %14233 = vmatprep.mubr.msk.f32.mxu1 %vm14844_vm5, %v23695_v56 }
 0x954   : > { %v11102_v13 = vadd.f32 %v11070_v29, %v10877_v25  ;;  %v21851_v40 = vpop.permute.xlu1 %9898  ;;  %v9979_v49 = vadd.f32 %v9947_v7, %v9754_v30  ;;  %v12474_v25 = vld [vmem:[%s22399_s5 + $0x8c8] sm:$0xff]  ;;  %v9275_v43 = vmul.f32 %v12442_v57, %v23693_v22  ;;  %v11008_v7 = vpop.permute.xlu0 %11007  ;;  %v11190_v30 = vld [vmem:[%s22401_s7 + $0x18] sm:$0xff]  ;;  %v12411_v24 = vld [vmem:[%s22399_s5 + $0x6d0] sm:$0xff] }
 0x955   : > { %14746 = vset.pattern.permute.xlu1 %v23609_v10  ;;  %v9082_v42 = vadd.f32 %v9050_v50, %v8857_v48  ;;  %v9500_v6 = vmul.f32 %v12474_v25, %v21366_v51  ;;  %14215 = vmatpush3.msra.mxu0 %v11190_v30  ;;  %v12506_v51 = vld [vmem:[%s22399_s5 + $0x9c8] sm:$0xff]  ;;  %v12632_v25 = vld [vmem:[%s22399_s5 + $0xdb8] sm:$0xff] }
 0x956   : > { %v11154_v14 = vsel %vm11114_vm4, %v11102_v13, 0.0  ;;  %10143 = vperm.xlu1 %14746, %v23604_v19   ;;  %v10204_v3 = vadd.f32 %v10172_v35, %v9979_v49  ;;  %v12694_v13 = vld [vmem:[%s22399_s5 + $0xfa8] sm:$0xff]  ;;  %14216 = vmatprep.subr.mxu0 %v23695_v56 }
 0x957   : > { %v21863_v12 = vadd.f32 %v11154_v14, %v21347_v11  ;;  %v12251_v11 = vld [vmem:[%s22399_s5 + $0x1d0] sm:$0xff]  ;;  %v9307_v27 = vadd.f32 %v9275_v43, %v9082_v42  ;;  %v11071_v16 = vmul.f32 %v12694_v13, %v11008_v7  ;;  %v12570_v45 = vld [vmem:[%s22399_s5 + $0xbc8] sm:$0xff]  ;;  %v12284_v42 = vld [vmem:[%s22399_s5 + $0x2d8] sm:$0xff] }
 0x958   : > { %v7926_v28 = vmul.f32 %v12251_v11, %v21414_v41  ;;  %v12283_v41 = vld [vmem:[%s22399_s5 + $0x2d0] sm:$0xff]  ;;  %v10429_v9 = vadd.f32 %v10397_v44, %v10204_v3  ;;  %v7510_v44 = vld [vmem:[%s22399_s5 + $0xd8] sm:$0xff]  ;;  %v23702_v43 = vld [vmem:[#allocation312_spill] sm:$0xff] }
 0x959   : > { %v10120_v5 = vpop.permute.xlu1 %10119  ;;  %v8151_v53 = vmul.f32 %v12283_v41, %v23694_v36  ;;  %v9532_v37 = vadd.f32 %v9500_v6, %v9307_v27  ;;  %v9051_v0 = vmul.f32 %v12411_v24, %v23702_v43  ;;  %v23704_v7 = vld [vmem:[#allocation139_spill] sm:$0xff] }
 0x95a   : > { %v10174_v15 = vmul.f32 %v12569_v60, %v10120_v5  ;;  %14747 = vset.pattern.permute.xlu1 %v23611_v55  ;;  %v7958_v39 = vadd.f32 %v7926_v28, %v7701_v21  ;;  %v23696_v5 = vmov 12   ;;  %v23699_v28 = vld [vmem:[#allocation159_spill] sm:$0xff]  ;;  %v8152_v27 = vmul.f32 %v12284_v42, %v23704_v7  ;;  %v12571_v42 = vld [vmem:[%s22399_s5 + $0xbd0] sm:$0xff] }
 0x95b   : > { %10585 = vperm.xlu1 %14747, %v23601_v32   ;;  %v12252_v21 = vld [vmem:[%s22399_s5 + $0x1d8] sm:$0xff]  ;;  %v7511_v43 = vld [vmem:[%s22399_s5 + $0xe0] sm:$0xff] }
 0x95c   : > { %v10206_v8 = vadd.f32 %v10174_v15, %v9981_v2  ;;  %v8183_v35 = vadd.f32 %v8151_v53, %v7958_v39  ;;  %v9725_v2 = vmul.f32 %v12506_v51, %v23697_v38  ;;  %v23698_v15 = vld [vmem:[#allocation310_spill] sm:$0xff]  ;;  %v23703_v53 = vld [vmem:[#allocation296_spill] sm:$0xff] }
 0x95d   : > { %v8601_v34 = vmul.f32 %v12347_v61, %v23698_v15  ;;  %v23701_v39 = vld [vmem:[#allocation122_spill] sm:$0xff]  ;;  %v7927_v13 = vmul.f32 %v12252_v21, %v23703_v53 }
 0x95e   : > { %v10562_v47 = vpop.permute.xlu1 %10561  ;;  %v21897_v31 = vadd.f32 %v10399_v26, %v10206_v8  ;;  %v8408_v33 = vadd.f32 %v8376_v23, %v8183_v35  ;;  %v7702_v22 = vmul.f32 %v23701_v39, %v7510_v44  ;;  %v23706_v35 = vld [vmem:[#allocation75_spill] sm:$0xff]  ;;  %v12475_v61 = vld [vmem:[%s22399_s5 + $0x8d0] sm:$0xff] }
 0x95f   : > { %v10622_v29 = vmul.f32 %v12631_v46, %v10562_v47  ;;  %14748 = vset.pattern.permute.xlu1 %v23614_v54  ;;  %v9757_v46 = vadd.f32 %v9725_v2, %v9532_v37  ;;  %v23700_v47 = vld [vmem:[#allocation54_spill] sm:$0xff] }
 0x960   : > { %10806 = vperm.xlu1 %14748, %v23511_v18   ;;  %v8633_v26 = vadd.f32 %v8601_v34, %v8408_v33  ;;  %v10400_v41 = vmul.f32 %v12602_v59, %v23700_v47  ;;  %v12316_v51 = vld [vmem:[%s22399_s5 + $0x3d8] sm:$0xff]  ;;  %v11189_v33 = vld [vmem:[%s22401_s7 + $0x10] sm:$0xff] }
 0x961   : > { %v21911_v58 = vadd.f32 %v10622_v29, %v10429_v9  ;;  %14217 = vmatpush3.msra.mxu0 %v11189_v33  ;;  %v23707_v38 = vld [vmem:[#allocation298_spill] sm:$0xff] }
 0x962   : > { %v8377_v2 = vmul.f32 %v12316_v51, %v23707_v38  ;;  %v12507_v15 = vld [vmem:[%s22399_s5 + $0x9d0] sm:$0xff]  ;;  %14218 = vmatprep.subr.mxu0 %v23695_v56  ;;  %v12380_v24 = vld [vmem:[%s22399_s5 + $0x5d8] sm:$0xff]  ;;  %v23717_v38 = vld [vmem:[#allocation328_spill] sm:$0xff] }
 0x963   : > { %v10783_v14 = vpop.permute.xlu1 %10782  ;;  %v23708_v34 = vld [vmem:[#allocation314_spill] sm:$0xff] }
 0x964   : > { %v10846_v60 = vmul.f32 %v12662_v4, %v10783_v14  ;;  %14749 = vset.pattern.permute.xlu1 %v23609_v10  ;;  %v12538_v10 = vld [vmem:[%s22399_s5 + $0xac8] sm:$0xff]  ;;  %v23705_v14 = vmov 15   ;;  %v23716_v33 = vld [vmem:[#allocation302_spill] sm:$0xff] }
 0x965   : > { %10147 = vperm.xlu1 %14749, %v23602_v62   ;;  %v9950_v3 = vmul.f32 %v12538_v10, %v21851_v40  ;;  %v11012_v10 = vpop.permute.xlu0 %11011 }
 0x966   : > { %v10878_v1 = vadd.f32 %v10846_v60, %v21808_v63  ;;  %v12379_v63 = vld [vmem:[%s22399_s5 + $0x5d0] sm:$0xff]  ;;  %v7959_v60 = vadd.f32 %v7927_v13, %v7702_v22 }
 0x967   : > { %v8826_v8 = vmul.f32 %v12379_v63, %v23699_v28  ;;  %v9982_v57 = vadd.f32 %v9950_v3, %v9757_v46  ;;  %v9501_v3 = vmul.f32 %v12475_v61, %v23708_v34  ;;  %v23709_v28 = vld [vmem:[#allocation29_spill] sm:$0xff]  ;;  %v12285_v61 = vld [vmem:[%s22399_s5 + $0x2e0] sm:$0xff] }
 0x968   : > { %v11103_v49 = vadd.f32 %v11071_v16, %v10878_v1  ;;  %v21938_v11 = vpop.permute.xlu1 %9902  ;;  %v12663_v1 = vld [vmem:[%s22399_s5 + $0xeb0] sm:$0xff]  ;;  %v8184_v37 = vadd.f32 %v8152_v27, %v7959_v60  ;;  %v23714_v27 = vld [vmem:[#allocation79_spill] sm:$0xff] }
 0x969   : > { %14750 = vset.pattern.permute.xlu1 %v23696_v5  ;;  %v8858_v9 = vadd.f32 %v8826_v8, %v8633_v26  ;;  %v12539_v46 = vld [vmem:[%s22399_s5 + $0xad0] sm:$0xff]  ;;  %v11016_v34 = vpop.permute.xlu0 %11015 }
 0x96a   : > { %v11156_v48 = vsel %vm11114_vm4, %v11103_v49, 0.0  ;;  %10368 = vperm.xlu1 %14750, %v23604_v19   ;;  %v12348_v49 = vld [vmem:[%s22399_s5 + $0x4d8] sm:$0xff]  ;;  %v8409_v26 = vadd.f32 %v8377_v2, %v8184_v37  ;;  %v23713_v13 = vld [vmem:[#allocation69_spill] sm:$0xff]  ;;  %v8153_v2 = vmul.f32 %v12285_v61, %v23717_v38  ;;  %v12445_v61 = vld [vmem:[%s22399_s5 + $0x7e0] sm:$0xff] }
 0x96b   : > { %v21950_v50 = vadd.f32 %v11156_v48, %v21863_v12  ;;  %v9083_v30 = vadd.f32 %v9051_v0, %v8858_v9  ;;  %v8602_v8 = vmul.f32 %v12348_v49, %v23709_v28  ;;  %v12412_v9 = vld [vmem:[%s22399_s5 + $0x6d8] sm:$0xff] }
 0x96c   : > { %v12476_v37 = vld [vmem:[%s22399_s5 + $0x8d8] sm:$0xff] }
 0x96d   : > { %v10124_v40 = vpop.permute.xlu1 %10123  ;;  %v8634_v47 = vadd.f32 %v8602_v8, %v8409_v26  ;;  %v23719_v28 = vld [vmem:[#allocation15_spill] sm:$0xff] }
 0x96e   : > { %v10175_v12 = vmul.f32 %v12570_v45, %v10124_v40  ;;  %14753 = vset.pattern.permute.xlu1 %v23614_v54  ;;  %v23710_v40 = vld [vmem:[#allocation93_spill] sm:$0xff] }
 0x96f   : > { %10810 = vperm.xlu1 %14753, %v23601_v32   ;;  %v12443_v32 = vld [vmem:[%s22399_s5 + $0x7d0] sm:$0xff]  ;;  %v9726_v44 = vmul.f32 %v12507_v15, %v23710_v40  ;;  %v11188_v15 = vld [vmem:[%s22401_s7 + $0x8] sm:$0xff] }
 0x970   : > { %v10207_v29 = vadd.f32 %v10175_v12, %v9982_v57  ;;  %v9276_v23 = vmul.f32 %v12443_v32, %v23706_v35  ;;  %v12633_v35 = vld [vmem:[%s22399_s5 + $0xdc0] sm:$0xff]  ;;  %14219 = vmatpush3.msra.mxu0 %v11188_v15 }
 0x971   : > { %14220 = vmatprep.subr.mxu0 %v23695_v56  ;;  %v23728_v15 = vld [vmem:[#allocation83_spill] sm:$0xff] }
 0x972   : > { %v10566_v4 = vpop.permute.xlu1 %10565  ;;  %v21982_v36 = vadd.f32 %v10400_v41, %v10207_v29  ;;  %v9308_v63 = vadd.f32 %v9276_v23, %v9083_v30  ;;  %v23715_v23 = vld [vmem:[#allocation326_spill] sm:$0xff] }
 0x973   : > { %v10623_v6 = vmul.f32 %v12632_v25, %v10566_v4  ;;  %14754 = vset.pattern.permute.xlu1 %v23705_v14  ;;  %v23711_v25 = vld [vmem:[#allocation300_spill] sm:$0xff]  ;;  %v23712_v4 = vld [vmem:[#allocation102_spill] sm:$0xff]  ;;  %v7703_v60 = vmul.f32 %v23715_v23, %v7511_v43 }
 0x974   : > { %11031 = vperm.xlu1 %14754, %v23511_v18   ;;  %v12695_v18 = vld [vmem:[%s22399_s5 + $0xfb0] sm:$0xff]  ;;  %v9533_v59 = vadd.f32 %v9501_v3, %v9308_v63  ;;  %v8827_v39 = vmul.f32 %v12380_v24, %v23711_v25  ;;  %v9052_v53 = vmul.f32 %v12412_v9, %v23712_v4  ;;  %v12317_v63 = vld [vmem:[%s22399_s5 + $0x3e0] sm:$0xff]  ;;  %v12540_v24 = vld [vmem:[%s22399_s5 + $0xad8] sm:$0xff] }
 0x975   : > { %v21990_v16 = vadd.f32 %v10623_v6, %v21800_v20  ;;  %v11072_v48 = vmul.f32 %v12695_v18, %v11012_v10  ;;  %v8378_v8 = vmul.f32 %v12317_v63, %v23719_v28  ;;  %v23720_v9 = vld [vmem:[#allocation304_spill] sm:$0xff]  ;;  %v23721_v25 = vld [vmem:[#allocation330_spill] sm:$0xff]  ;;  %v23727_v63 = vld [vmem:[#allocation43_spill] sm:$0xff]  ;;  %v11020_v28 = vpop.permute.xlu0 %11019 }
 0x976   : > { %v9758_v29 = vadd.f32 %v9726_v44, %v9533_v59  ;;  %v8859_v0 = vadd.f32 %v8827_v39, %v8634_v47  ;;  %v12508_v44 = vld [vmem:[%s22399_s5 + $0x9d8] sm:$0xff]  ;;  %v12634_v23 = vld [vmem:[%s22399_s5 + $0xdc8] sm:$0xff] }
 0x977   : > { %v10787_v20 = vpop.permute.xlu1 %10786 }
 0x978   : > { %v10847_v5 = vmul.f32 %v12663_v1, %v10787_v20  ;;  %14756 = vset.pattern.permute.xlu1 %v23611_v55  ;;  %v9084_v18 = vadd.f32 %v9052_v53, %v8859_v0 }
 0x979   : > { %10593 = vperm.xlu1 %14756, %v23604_v19  }
 0x97a   : > { %v10879_v45 = vadd.f32 %v10847_v5, %v21911_v58  ;;  %v9951_v58 = vmul.f32 %v12539_v46, %v21938_v11  ;;  %v12603_v11 = vld [vmem:[%s22399_s5 + $0xcd0] sm:$0xff] }
 0x97b   : > { %v10401_v7 = vmul.f32 %v12603_v11, %v23713_v13  ;;  %v12413_v13 = vld [vmem:[%s22399_s5 + $0x6e0] sm:$0xff] }
 0x97c   : > { %v11104_v57 = vadd.f32 %v11072_v48, %v10879_v45  ;;  %v22024_v12 = vpop.permute.xlu1 %9906  ;;  %v9983_v22 = vadd.f32 %v9951_v58, %v9758_v29  ;;  %v23718_v48 = vld [vmem:[#allocation57_spill] sm:$0xff]  ;;  %v9727_v29 = vmul.f32 %v12508_v44, %v23720_v9  ;;  %v11187_v9 = vld [vmem:[%s22401_s7] sm:$0xff] }
 0x97d   : > { %14757 = vset.pattern.permute.xlu1 %v23614_v54  ;;  %v9502_v45 = vmul.f32 %v12476_v37, %v23718_v48  ;;  %v9952_v11 = vmul.f32 %v12540_v24, %v22024_v12  ;;  %v7512_v12 = vld [vmem:[%s22399_s5 + $0xe8] sm:$0xff]  ;;  %v12665_v48 = vld [vmem:[%s22399_s5 + $0xec0] sm:$0xff]  ;;  %14221 = vmatpush3.msra.mxu0 %v11187_v9 }
 0x97e   : > { %v11158_v21 = vsel %vm11114_vm4, %v11104_v57, 0.0  ;;  %10814 = vperm.xlu1 %14757, %v23596_v52   ;;  %v12253_v52 = vld [vmem:[%s22399_s5 + $0x1e0] sm:$0xff] }
 0x97f   : > { %v22034_v41 = vadd.f32 %v11158_v21, %v21950_v50  ;;  %v7928_v6 = vmul.f32 %v12253_v52, %v23714_v27  ;;  %v12349_v57 = vld [vmem:[%s22399_s5 + $0x4e0] sm:$0xff] }
 0x980   : > { %v8603_v39 = vmul.f32 %v12349_v57, %v23721_v25  ;;  %v23723_v27 = vld [vmem:[#allocation96_spill] sm:$0xff] }
 0x981   : > { %v10128_v50 = vpop.permute.xlu1 %10127  ;;  %v7960_v20 = vadd.f32 %v7928_v6, %v7703_v60  ;;  %v23724_v60 = vld [vmem:[#allocation63_spill] sm:$0xff]  ;;  %v12350_v57 = vld [vmem:[%s22399_s5 + $0x4e8] sm:$0xff] }
 0x982   : > { %v10176_v32 = vmul.f32 %v12571_v42, %v10128_v50  ;;  %14758 = vset.pattern.permute.xlu1 %v23611_v55  ;;  %v12444_v55 = vld [vmem:[%s22399_s5 + $0x7d8] sm:$0xff]  ;;  %v12509_v24 = vld [vmem:[%s22399_s5 + $0x9e0] sm:$0xff] }
 0x983   : > { %10597 = vperm.xlu1 %14758, %v23602_v62   ;;  %v9277_v49 = vmul.f32 %v12444_v55, %v23716_v33  ;;  %v8185_v26 = vadd.f32 %v8153_v2, %v7960_v20  ;;  %v23726_v33 = vld [vmem:[#allocation316_spill] sm:$0xff] }
 0x984   : > { %v10208_v30 = vadd.f32 %v10176_v32, %v9983_v22  ;;  %v23722_v32 = vld [vmem:[#allocation7_spill] sm:$0xff] }
 0x985   : > { %v9309_v3 = vadd.f32 %v9277_v49, %v9084_v18  ;;  %v8410_v21 = vadd.f32 %v8378_v8, %v8185_v26  ;;  %v23725_v18 = vld [vmem:[#allocation332_spill] sm:$0xff] }
 0x986   : > { %v10570_v1 = vpop.permute.xlu1 %10569  ;;  %v22064_v51 = vadd.f32 %v10401_v7, %v10208_v30  ;;  %v12254_v7 = vld [vmem:[%s22399_s5 + $0x1e8] sm:$0xff]  ;;  %v12697_v26 = vld [vmem:[%s22399_s5 + $0xfc0] sm:$0xff] }
 0x987   : > { %v10624_v10 = vmul.f32 %v12633_v35, %v10570_v1  ;;  %14759 = vset.pattern.permute.xlu1 %v23614_v54  ;;  %v12664_v54 = vld [vmem:[%s22399_s5 + $0xeb8] sm:$0xff]  ;;  %v9534_v58 = vadd.f32 %v9502_v45, %v9309_v3  ;;  %v8635_v22 = vadd.f32 %v8603_v39, %v8410_v21  ;;  %v12286_v30 = vld [vmem:[%s22399_s5 + $0x2e8] sm:$0xff]  ;;  %v7704_v1 = vmul.f32 %v23724_v60, %v7512_v12  ;;  %v12541_v25 = vld [vmem:[%s22399_s5 + $0xae0] sm:$0xff] }
 0x988   : > { %10818 = vperm.xlu1 %14759, %v23604_v19   ;;  %v12696_v19 = vld [vmem:[%s22399_s5 + $0xfb8] sm:$0xff]  ;;  %v7929_v49 = vmul.f32 %v12254_v7, %v23726_v33  ;;  %v12318_v45 = vld [vmem:[%s22399_s5 + $0x3e8] sm:$0xff] }
 0x989   : > { %v22079_v5 = vadd.f32 %v10624_v10, %v21897_v31  ;;  %v11073_v59 = vmul.f32 %v12696_v19, %v11016_v34  ;;  %v9759_v0 = vadd.f32 %v9727_v29, %v9534_v58  ;;  %v9053_v10 = vmul.f32 %v12413_v13, %v23725_v18  ;;  %v23730_v58 = vld [vmem:[#allocation334_spill] sm:$0xff]  ;;  %v11267_v12 = vld [vmem:[%s22403_s9 + $0x8] sm:$0xff]  ;;  %v12573_v13 = vld [vmem:[%s22399_s5 + $0xbe0] sm:$0xff] }
 0x98a   : > { %v9278_v19 = vmul.f32 %v12445_v61, %v23728_v15  ;;  %v7961_v34 = vadd.f32 %v7929_v49, %v7704_v1  ;;  %v23731_v39 = vld [vmem:[#allocation70_spill] sm:$0xff]  ;;  %v23734_v1 = vld [vmem:[#allocation111_spill] sm:$0xff] }
 0x98b   : > { %v10791_v31 = vpop.permute.xlu1 %10790  ;;  %v9984_v53 = vadd.f32 %v9952_v11, %v9759_v0  ;;  %v8604_v11 = vmul.f32 %v12350_v57, %v23731_v39  ;;  %v11268_v0 = vld [vmem:[%s22403_s9 + $0x10] sm:$0xff] }
 0x98c   : > { %v10848_v46 = vmul.f32 %v12664_v54, %v10791_v31  ;;  %10822 = vperm.xlu1 %14759, %v23602_v62   ;;  %v8154_v54 = vmul.f32 %v12286_v30, %v23727_v63  ;;  %v12477_v31 = vld [vmem:[%s22399_s5 + $0x8e0] sm:$0xff]  ;;  %v23736_v15 = vld [vmem:[#allocation322_spill] sm:$0xff] }
 0x98d   : > { %v9503_v21 = vmul.f32 %v12477_v31, %v23730_v58  ;;  %v23738_v58 = vld [vmem:[#allocation324_spill] sm:$0xff] }
 0x98e   : > { %v10880_v40 = vadd.f32 %v10848_v46, %v21990_v16  ;;  %v12381_v16 = vld [vmem:[%s22399_s5 + $0x5e0] sm:$0xff]  ;;  %v8186_v8 = vadd.f32 %v8154_v54, %v7961_v34  ;;  %v12446_v54 = vld [vmem:[%s22399_s5 + $0x7e8] sm:$0xff] }
 0x98f   : > { %v8828_v43 = vmul.f32 %v12381_v16, %v23722_v32  ;;  %v12698_v34 = vld [vmem:[%s22399_s5 + $0xfc8] sm:$0xff] }
 0x990   : > { %v11105_v47 = vadd.f32 %v11073_v59, %v10880_v40  ;;  %14760 = vset.pattern.permute.xlu1 %v23705_v14  ;;  %v22106_v42 = vpop.permute.xlu1 %9910  ;;  %v12572_v14 = vld [vmem:[%s22399_s5 + $0xbd8] sm:$0xff] }
 0x991   : > { %11047 = vperm.xlu1 %14760, %v23602_v62   ;;  %v12604_v62 = vld [vmem:[%s22399_s5 + $0xcd8] sm:$0xff]  ;;  %v8860_v35 = vadd.f32 %v8828_v43, %v8635_v22 }
 0x992   : > { %v11160_v52 = vsel %vm11114_vm4, %v11105_v47, 0.0  ;;  %v10402_v6 = vmul.f32 %v12604_v62, %v23723_v27  ;;  %v23729_v40 = vld [vmem:[#allocation318_spill] sm:$0xff]  ;;  %v11074_v47 = vmul.f32 %v12697_v26, %v11020_v28  ;;  %v9953_v62 = vmul.f32 %v12541_v25, %v22106_v42  ;;  %v11266_v27 = vld [vmem:[%s22403_s9] sm:$0xff]  ;;  %v12606_v25 = vld [vmem:[%s22399_s5 + $0xce8] sm:$0xff] }
 0x993   : > { %v22117_v50 = vadd.f32 %v11160_v52, %v22034_v41  ;;  %v9085_v2 = vadd.f32 %v9053_v10, %v8860_v35  ;;  %v8379_v44 = vmul.f32 %v12318_v45, %v23729_v40  ;;  %v11269_v43 = vld [vmem:[%s22403_s9 + $0x18] sm:$0xff]  ;;  %v23733_v35 = vld [vmem:[#allocation320_spill] sm:$0xff]  ;;  %v23735_v10 = vld [vmem:[#allocation113_spill] sm:$0xff] }
 0x994   : > { %14226 = vmatpush3.msra.mxu1 %v11269_v43  ;;  %v23737_v26 = vld [vmem:[#allocation72_spill] sm:$0xff]  ;;  %v12635_v43 = vld [vmem:[%s22399_s5 + $0xdd0] sm:$0xff] }
 0x995   : > { %v10132_v4 = vpop.permute.xlu1 %10131  ;;  %v9310_v46 = vadd.f32 %v9278_v19, %v9085_v2  ;;  %v8411_v29 = vadd.f32 %v8379_v44, %v8186_v8  ;;  %14227 = vmatprep.subr.mxu1 %v23695_v56  ;;  %v12478_v2 = vld [vmem:[%s22399_s5 + $0x8e8] sm:$0xff]  ;;  %v9279_v19 = vmul.f32 %v12446_v54, %v23736_v15  ;;  %v12608_v15 = vld [vmem:[%s22399_s5 + $0xcf8] sm:$0xff] }
 0x996   : > { %v10177_v41 = vmul.f32 %v12572_v14, %v10132_v4  ;;  %v23732_v14 = vld [vmem:[#allocation124_spill] sm:$0xff]  ;;  %14228 = vmatpush3.msra.mxu1 %v11268_v0  ;;  %v9504_v28 = vmul.f32 %v12478_v2, %v23737_v26  ;;  %v23740_v0 = vld [vmem:[#allocation77_spill] sm:$0xff] }
 0x997   : > { %v9535_v52 = vadd.f32 %v9503_v21, %v9310_v46  ;;  %v9728_v22 = vmul.f32 %v12509_v24, %v23732_v14  ;;  %v8636_v42 = vadd.f32 %v8604_v11, %v8411_v29  ;;  %14229 = vmatprep.subr.mxu1 %v23695_v56  ;;  %v12542_v40 = vld [vmem:[%s22399_s5 + $0xae8] sm:$0xff] }
 0x998   : > { %v10209_v55 = vadd.f32 %v10177_v41, %v9984_v53  ;;  %v12382_v53 = vld [vmem:[%s22399_s5 + $0x5e8] sm:$0xff]  ;;  %14230 = vmatpush3.msra.mxu1 %v11267_v12 }
 0x999   : > { %v9760_v7 = vadd.f32 %v9728_v22, %v9535_v52  ;;  %14231 = vmatprep.subr.mxu1 %v23695_v56  ;;  %v12666_v56 = vld [vmem:[%s22399_s5 + $0xec8] sm:$0xff] }
 0x99a   : > { %v10574_v37 = vpop.permute.xlu1 %10573  ;;  %v22147_v20 = vadd.f32 %v10402_v6, %v10209_v55  ;;  %v12605_v6 = vld [vmem:[%s22399_s5 + $0xce0] sm:$0xff]  ;;  %v8829_v55 = vmul.f32 %v12382_v53, %v23733_v35  ;;  %14232 = vmatpush3.msra.mxu1 %v11266_v27  ;;  %v12638_v14 = vld [vmem:[%s22399_s5 + $0xde8] sm:$0xff] }
 0x99b   : > { %v10625_v38 = vmul.f32 %v12634_v23, %v10574_v37  ;;  %v9985_v23 = vadd.f32 %v9953_v62, %v9760_v7  ;;  %v10403_v61 = vmul.f32 %v12605_v6, %v23734_v1  ;;  %v23739_v22 = vld [vmem:[#allocation68_spill] sm:$0xff]  ;;  %v10629_v62 = vmul.f32 %v12638_v14, %v23740_v0  ;;  %v23742_v2 = vld [vmem:[#allocation141_spill] sm:$0xff] }
 0x99c   : > { %v8861_v18 = vadd.f32 %v8829_v55, %v8636_v42  ;;  %v12699_v42 = vld [vmem:[%s22399_s5 + $0xfd0] sm:$0xff] }
 0x99d   : > { %v22153_v3 = vadd.f32 %v10625_v38, %v21982_v36 }
 0x99f   : > { %v10795_v36 = vpop.permute.xlu1 %10794 }
 0x9a0   : > { %v10849_v59 = vmul.f32 %v12665_v48, %v10795_v36  ;;  %v11024_v48 = vpop.permute.xlu0 %11023 }
 0x9a1   : > { %v11075_v36 = vmul.f32 %v12698_v34, %v11024_v48 }
 0x9a2   : > { %v10881_v16 = vadd.f32 %v10849_v59, %v22079_v5  ;;  %v12510_v59 = vld [vmem:[%s22399_s5 + $0x9e8] sm:$0xff] }
 0x9a3   : > { %v9729_v21 = vmul.f32 %v12510_v59, %v23738_v58 }
 0x9a4   : > { %v11106_v32 = vadd.f32 %v11074_v47, %v10881_v16  ;;  %v9915_v5 = vpop.permute.xlu1 %9914  ;;  %v11028_v7 = vpop.permute.xlu0 %11027 }
 0x9a5   : > { %v9954_v47 = vmul.f32 %v12542_v40, %v9915_v5  ;;  %v12669_v40 = vld [vmem:[%s22399_s5 + $0xee0] sm:$0xff] }
 0x9a6   : > { %v11162_v4 = vsel %vm11114_vm4, %v11106_v32, 0.0  ;;  %v10404_v32 = vmul.f32 %v12606_v25, %v23739_v22 }
 0x9a7   : > { %v11163_v41 = vadd.f32 %v11162_v4, %v22117_v50  ;;  %v12414_v50 = vld [vmem:[%s22399_s5 + $0x6e8] sm:$0xff] }
 0x9a8   : > { %v9054_v37 = vmul.f32 %v12414_v50, %v23735_v10  ;;  %v12512_v10 = vld [vmem:[%s22399_s5 + $0x9f8] sm:$0xff] }
 0x9a9   : > { %v10136_v30 = vpop.permute.xlu1 %10135 }
 0x9aa   : > { %v10178_v60 = vmul.f32 %v12573_v13, %v10136_v30  ;;  %v9086_v38 = vadd.f32 %v9054_v37, %v8861_v18  ;;  %v12667_v13 = vld [vmem:[%s22399_s5 + $0xed0] sm:$0xff]  ;;  %v11076_v30 = vmul.f32 %v12699_v42, %v11028_v7  ;;  %v12544_v37 = vld [vmem:[%s22399_s5 + $0xaf8] sm:$0xff] }
 0x9ab   : > { %v12575_v42 = vld [vmem:[%s22399_s5 + $0xbf0] sm:$0xff] }
 0x9ac   : > { %v10210_v33 = vadd.f32 %v10178_v60, %v9985_v23  ;;  %v9311_v31 = vadd.f32 %v9279_v19, %v9086_v38  ;;  %v12576_v38 = vld [vmem:[%s22399_s5 + $0xbf8] sm:$0xff] }
 0x9ae   : > { %v10578_v49 = vpop.permute.xlu1 %10577  ;;  %v22219_v63 = vadd.f32 %v10403_v61, %v10210_v33  ;;  %v9536_v44 = vadd.f32 %v9504_v28, %v9311_v31  ;;  %v12637_v28 = vld [vmem:[%s22399_s5 + $0xde0] sm:$0xff] }
 0x9af   : > { %v10626_v53 = vmul.f32 %v12635_v43, %v10578_v49 }
 0x9b0   : > { %v9761_v29 = vadd.f32 %v9729_v21, %v9536_v44  ;;  %v12668_v44 = vld [vmem:[%s22399_s5 + $0xed8] sm:$0xff] }
 0x9b1   : > { %v10658_v6 = vadd.f32 %v10626_v53, %v22064_v51  ;;  %v23741_v51 = vld [vmem:[#allocation49_spill] sm:$0xff] }
 0x9b2   : > { %v9986_v11 = vadd.f32 %v9954_v47, %v9761_v29  ;;  %v9731_v49 = vmul.f32 %v12512_v10, %v23741_v51  ;;  %v12700_v29 = vld [vmem:[%s22399_s5 + $0xfd8] sm:$0xff]  ;;  %v12702_v53 = vld [vmem:[%s22399_s5 + $0xfe8] sm:$0xff] }
 0x9b3   : > { %v10799_v45 = vpop.permute.xlu1 %10798 }
 0x9b4   : > { %v10850_v8 = vmul.f32 %v12666_v56, %v10799_v45  ;;  %v9763_v56 = vadd.f32 %v9731_v49, %v23742_v2  ;;  %v23743_v45 = vld [vmem:[#allocation81_spill] sm:$0xff]  ;;  %v12640_v2 = vld [vmem:[%s22399_s5 + $0xdf8] sm:$0xff] }
 0x9b5   : > { %v10406_v31 = vmul.f32 %v12608_v15, %v23743_v45 }
 0x9b6   : > { %v10882_v46 = vadd.f32 %v10850_v8, %v22153_v3  ;;  %v12574_v3 = vld [vmem:[%s22399_s5 + $0xbe8] sm:$0xff] }
 0x9b8   : > { %v11107_v57 = vadd.f32 %v11075_v36, %v10882_v46  ;;  %v22242_v24 = vpop.permute.xlu1 %9918  ;;  %v12636_v46 = vld [vmem:[%s22399_s5 + $0xdd8] sm:$0xff] }
 0x9ba   : > { %v11164_v16 = vsel %vm11114_vm4, %v11107_v57, 0.0 }
 0x9bb   : > { %v11165_v9 = vadd.f32 %v11164_v16, %v11163_v41 }
 0x9bd   : > { %v10140_v39 = vpop.permute.xlu1 %10139 }
 0x9be   : > { %v10179_v52 = vmul.f32 %v12574_v3, %v10140_v39  ;;  %v11036_v3 = vpop.permute.xlu0 %11035 }
 0x9c0   : > { %v10211_v5 = vadd.f32 %v10179_v52, %v9986_v11 }
 0x9c2   : > { %v10436_v4 = vadd.f32 %v10404_v32, %v10211_v5  ;;  %v10582_v12 = vpop.permute.xlu1 %10581 }
 0x9c3   : > { %v10627_v57 = vmul.f32 %v12636_v46, %v10582_v12 }
 0x9c4   : > { %v22260_v41 = vadd.f32 %v10629_v62, %v10436_v4  ;;  %v12543_v4 = vld [vmem:[%s22399_s5 + $0xaf0] sm:$0xff] }
 0x9c5   : > { %v10659_v25 = vadd.f32 %v10627_v57, %v22147_v20  ;;  %v12670_v20 = vld [vmem:[%s22399_s5 + $0xee8] sm:$0xff] }
 0x9c7   : > { %v10803_v27 = vpop.permute.xlu1 %10802 }
 0x9c8   : > { %v10851_v50 = vmul.f32 %v12667_v13, %v10803_v27  ;;  %v11040_v13 = vpop.permute.xlu0 %11039  ;;  %v9955_v27 = vmul.f32 %v12543_v4, %v22242_v24 }
 0x9ca   : > { %v10883_v35 = vadd.f32 %v10851_v50, %v10658_v6  ;;  %v12607_v50 = vld [vmem:[%s22399_s5 + $0xcf0] sm:$0xff] }
 0x9cc   : > { %v11108_v55 = vadd.f32 %v11076_v30, %v10883_v35  ;;  %v9923_v23 = vpop.permute.xlu1 %9922  ;;  %v11079_v30 = vmul.f32 %v12702_v53, %v11040_v13 }
 0x9cd   : > { %v9956_v54 = vmul.f32 %v12544_v37, %v9923_v23  ;;  %v12639_v23 = vld [vmem:[%s22399_s5 + $0xdf0] sm:$0xff] }
 0x9ce   : > { %v11166_v60 = vsel %vm11114_vm4, %v11108_v55, 0.0 }
 0x9cf   : > { %v11167_v1 = vadd.f32 %v11166_v60, %v11165_v9  ;;  %v9988_v34 = vadd.f32 %v9956_v54, %v9763_v56  ;;  %v12701_v9 = vld [vmem:[%s22399_s5 + $0xfe0] sm:$0xff]  ;;  %v9987_v60 = vadd.f32 %v9955_v27, %v21751_v17  ;;  %v11044_v54 = vpop.permute.xlu0 %11043 }
 0x9d0   : > { %v11078_v52 = vmul.f32 %v12701_v9, %v11036_v3 }
 0x9d1   : > { %v10144_v61 = vpop.permute.xlu1 %10143 }
 0x9d2   : > { %v10180_v35 = vmul.f32 %v12575_v42, %v10144_v61  ;;  %v12671_v61 = vld [vmem:[%s22399_s5 + $0xef0] sm:$0xff] }
 0x9d4   : > { %v10212_v37 = vadd.f32 %v10180_v35, %v9987_v60 }
 0x9d6   : > { %v10586_v18 = vpop.permute.xlu1 %10585 }
 0x9d7   : > { %v10628_v59 = vmul.f32 %v12637_v28, %v10586_v18 }
 0x9d9   : > { %v10660_v47 = vadd.f32 %v10628_v59, %v22219_v63 }
 0x9db   : > { %v10807_v33 = vpop.permute.xlu1 %10806 }
 0x9dc   : > { %v10852_v16 = vmul.f32 %v12668_v44, %v10807_v33 }
 0x9de   : > { %v10884_v14 = vadd.f32 %v10852_v16, %v10659_v25 }
 0x9e0   : > { %v10148_v19 = vpop.permute.xlu1 %10147 }
 0x9e1   : > { %v10181_v48 = vmul.f32 %v12576_v38, %v10148_v19 }
 0x9e3   : > { %v10213_v26 = vadd.f32 %v10181_v48, %v9988_v34  ;;  %v12672_v34 = vld [vmem:[%s22399_s5 + $0xef8] sm:$0xff] }
 0x9e5   : > { %v10369_v8 = vpop.permute.xlu1 %10368  ;;  %v22288_v36 = vadd.f32 %v10406_v31, %v10213_v26 }
 0x9ea   : > { %v10811_v58 = vpop.permute.xlu1 %10810 }
 0x9eb   : > { %v10853_v21 = vmul.f32 %v12669_v40, %v10811_v58 }
 0x9ed   : > { %v10885_v39 = vadd.f32 %v10853_v21, %v10660_v47 }
 0x9ef   : > { %v11032_v11 = vpop.permute.xlu1 %11031  ;;  %v11110_v32 = vadd.f32 %v11078_v52, %v10885_v39  ;;  %v11184_v39 = vld [vmem:[%s22400_s6] sm:$0x1] }
 0x9f0   : > { %v11077_v22 = vmul.f32 %v12700_v29, %v11032_v11 }
 0x9f1   : > { %v11170_v62 = vsel %vm11114_vm4, %v11110_v32, 0.0 }
 0x9f2   : > { %v11109_v5 = vadd.f32 %v11077_v22, %v10884_v14  ;;  %v11191_v14 = vld [vmem:[%s22402_s8] sm:$0x1] }
 0x9f4   : > { %v11168_v63 = vsel %vm11114_vm4, %v11109_v5, 0.0  ;;  %v10594_v43 = vpop.permute.xlu1 %10593 }
 0x9f5   : > { %v11169_v0 = vadd.f32 %v11168_v63, %v11167_v1  ;;  %v10405_v1 = vmul.f32 %v12607_v50, %v10369_v8  ;;  %v10630_v24 = vmul.f32 %v12639_v23, %v10594_v43  ;;  %v12704_v8 = vld [vmem:[%s22399_s5 + $0xff8] sm:$0xff]  ;;  %v11270_v43 = vld [vmem:[%s22404_s10] sm:$0x1] }
 0x9f7   : > { %v11171_v12 = vadd.f32 %v11170_v62, %v11169_v0  ;;  %v10437_v49 = vadd.f32 %v10405_v1, %v10212_v37 }
 0x9f9   : > { %v10815_v7 = vpop.permute.xlu1 %10814  ;;  %v10662_v17 = vadd.f32 %v10630_v24, %v10437_v49 }
 0x9fa   : > { %v10854_v6 = vmul.f32 %v12670_v20, %v10815_v7 }
 0x9fc   : > { %v10886_v55 = vadd.f32 %v10854_v6, %v22260_v41  ;;  %v12703_v41 = vld [vmem:[%s22399_s5 + $0xff0] sm:$0xff] }
 0x9fd   : > { %v11080_v15 = vmul.f32 %v12703_v41, %v11044_v54 }
 0x9fe   : > { %v11111_v18 = vadd.f32 %v11079_v30, %v10886_v55  ;;  %v10598_v10 = vpop.permute.xlu1 %10597 }
 0x9ff   : > { %v10631_v48 = vmul.f32 %v12640_v2, %v10598_v10 }
 0xa00   : > { %v11172_v33 = vsel %vm11114_vm4, %v11111_v18, 0.0 }
 0xa01   : > { %v11173_v51 = vadd.f32 %v11172_v33, %v11171_v12  ;;  %v10663_v46 = vadd.f32 %v10631_v48, %v22288_v36 }
 0xa03   : > { %v10819_v38 = vpop.permute.xlu1 %10818 }
 0xa04   : > { %v10855_v56 = vmul.f32 %v12671_v61, %v10819_v38 }
 0xa06   : > { %v10887_v19 = vadd.f32 %v10855_v56, %v10662_v17 }
 0xa07   : > { %v10823_v45 = vpop.permute.xlu1 %10822 }
 0xa08   : > { %v11112_v31 = vadd.f32 %v11080_v15, %v10887_v19  ;;  %v10856_v26 = vmul.f32 %v12672_v34, %v10823_v45 }
 0xa0a   : > { %v11174_v28 = vsel %vm11114_vm4, %v11112_v31, 0.0  ;;  %v10888_v44 = vadd.f32 %v10856_v26, %v10663_v46 }
 0xa0b   : > { %v11175_v59 = vadd.f32 %v11174_v28, %v11173_v51 }
 0xa0c   : > { %v11048_v40 = vpop.permute.xlu1 %11047 }
 0xa0d   : > { %v11081_v57 = vmul.f32 %v12704_v8, %v11048_v40 }
 0xa0f   : > { %v11113_v58 = vadd.f32 %v11081_v57, %v10888_v44 }
 0xa11   : > { %v11176_v21 = vsel %vm11114_vm4, %v11113_v58, 0.0 }
 0xa12   : > { %v11177_v47 = vadd.f32 %v11176_v21, %v11175_v59 }
 0xa14   : > { %v11178_v16 = vrot.slane %v11177_v47, 4 }
 0xa16   : > { %v11179_v9 = vadd.f32 %v11178_v16, %v11177_v47 }
 0xa18   : > { %v11180_v3 = vrot.slane %v11179_v9, 2 }
 0xa1a   : > { %v11181_v29 = vadd.f32 %v11180_v3, %v11179_v9 }
 0xa1c   : > { %v11182_v25 = vrot.slane %v11181_v29, 1 }
 0xa1e   : > { %v11183_v11 = vadd.f32 %v11182_v25, %v11181_v29 }
 0xa20   : > { %v11185_v52 = vadd.f32 %v11184_v39, %v11183_v11 }
 0xa22   : > { %v11186_v36 = vmax.f32 %v11185_v52, 0.0 }
 0xa24   : > { %14223 = vmatmul.mubr.msk.f32.vlgmr.msra.gmra.mxu0 %vm11114_vm4, %v11186_v36 }
 0xae4   : > { %v11261_v22 = vpop.f32.mrf.mxu0 }
 0xae5   : > { %v11262_v32 = vadd.f32 %v11261_v22, %v11191_v14 }
 0xae6   : > { %v14224_v5 = vpop.f32.mrf.mxu0 }
 0xae7   : > { %v11265_v63 = vmax.f32 %v11262_v32, 0.0 }
 0xae9   : > { %14234 = vmatmul.mubr.msk.f32.vlgmr.msra.gmra.mxu1 %vm11114_vm4, %v11265_v63 }
 0xba9   : > { %v11340_v0 = vpop.f32.mrf.mxu1 }
 0xbaa   : > { %v11341_v62 = vadd.f32 %v11340_v0, %v11270_v43 }
 0xbab   : > { %v14235_v4 = vpop.f32.mrf.mxu1 }
 0xbac   : > { %v11345_v12 = vsel %vm11344_vm6, %v11341_v62, -inf }
 0xbad   : > { %11346 = vmax.xlane.f32.xlu0 %v11345_v12 }
 0xc36   : > { %v11347_v20 = vpop.xlane.xlu0 %11346 }
 0xc37   : > { %v11348_v53 = vsub.f32 %v11341_v62, %v11347_v20 }
 0xc39   : > { %v11349_v13 = vmul.f32 1.442695, %v11348_v53 }
 0xc3b   : > { %14761 = vpow2.f32 %v11349_v13 }
 0xc48   : > { %v14762_v42 = vpop.eup %14761 }
 0xc49   : > { %v11351_v7 = vsel %vm11344_vm6, %v14762_v42, 0.0 }
 0xc4a   : > { %11352 = vadd.xlane.f32.xlu1 %v11351_v7 }
 0xcd3   : > { %v11353_v27 = vpop.xlane.xlu1 %11352 }
 0xcd4   : > { %14763 = vrcp.f32 %v11353_v27 }
 0xce1   : > { %v14764_v6 = vpop.eup %14763 }
 0xce2   : > { %v11355_v50 = vmul.f32 %v14764_v6, %v14762_v42 }
 0xce4   : > { %11356 = vst [vmem:[%s378_s14] sm:$0x1] %v11355_v50 }
 0xce5   : > { %14778 = shalt.err (!%p14775_p3)
}
 0xce6   : > { %s14779_s1 = scalar_lea.hbm %s11368_s22, 16  ;;  %s14783_s14 = scalar_lea.hbm %s22405_s11, 32 }
 0xce7   : > { %p14780_p4 = scmp.ne.s32.totalorder %s11368_s22, %s14779_s1  ;;  %p14784_p9 = scmp.lt.s32.totalorder %s11368_s22, %s22405_s11 }
 0xce8   : > { %p14785_p10 = scmp.lt.s32.totalorder %s14783_s14, %s14779_s1 }
 0xce9   : > { %p14781_p7 = pnand %p14780_p4, %p14944_p5 }
 0xcea   : > { %p14786_p11 = por %p14785_p10, %p14784_p9 }
 0xceb   : > { %p14782_p8 = pneg %p14781_p7 }
 0xced   : > { %p14787_p12 = pnand %p14786_p11, %p14782_p8 }
 0xcef   : > { %14790 = shalt.err (!%p14787_p12)
}
 0xcf0   : > { %14237 = dma.vmem_to_hbm [thread:$0]  (%p14944_p5), %s11371_s15, 16, %s11368_s22, %s11358_s24  }
 0xcf1 PF: > { %p14243_p13 = scmp.ge.s32.totalorder %s14825_s20, 2  ;;  %s11382_s0 = sand.u32 1, %s14813_s17  }
 0xcf2   : > { %s11383_s25 = scalar_lea.sflag [#allocation4], %s11382_s0 }
 0xcf3   : > { %p14240_p0 = pnand %p14243_p13, %p14948_p6 }
 0xcf5   : > { %p14241_p1 = pneg %p14240_p0 }
 0xcf7   : > { %14808 = dma.done.wait (%p14241_p1), %s11383_s25, 16  }
 0xcf8   : > { %14810 = vsyncadd (%p14241_p1), %s11383_s25, 4294967280  ;;  %p21_p2 = scmp.ge.s32.totalorder %s14931_s23, 4   ;;  %s23744_s17 = smov %s14817_s18 }
 0xcf9   : > { %s23745_s18 = smov %s14821_s19  ;;  %s23746_s19 = smov %s14942_s26 }
 0xcfa   : > { %s23747_s20 = smov %s14931_s23  ;;  %23 = sbr.rel (!%p21_p2) target bundleno = 6 (0x6), region = 134 }
 0xcff   :  { %11387 = vsyncpa [#allocation4], 1 }
 0xd00   :  { %11389 = vsyncpa [#allocation4 + $0x1], 1 }

</bundles_post_ra>
